<compile_context>
chip_gen: v6e
topology: v6e:2x2x1
jax: 0.10.0
libtpu: 0.0.40
codegen_flags: <defaults>
</compile_context>

<pallas_src>
import functools

import jax
import jax.numpy as jnp
from jax.experimental import pallas as pl
from jax.experimental.pallas import tpu as pltpu


_VMEM_LIMIT = 48 * 1024 * 1024     # scoped-VMEM budget (safe on v5e/v6e/v7x)
_TILE_M_TARGET = 1024              # rows per grid step for the 1x1 convs


def _pick_tile_m(M, target=_TILE_M_TARGET):
    """Largest multiple-of-8 divisor of M that is <= target (fallback: M)."""
    if M <= target:
        return M
    t = (target // 8) * 8
    while t >= 8:
        if M % t == 0:
            return t
        t -= 8
    return M  # no nice divisor: single full-M block (full-dim exemption)


# ----------------------------- Pallas kernels ------------------------------ #

def _pointwise_kernel(x_ref, w_ref, b_ref, o_ref):
    # x: (tm, Cin) bf16, w: (Cin, Cout) bf16, b: (1, Cout) f32 -> o: (tm, Cout)
    acc = jnp.dot(x_ref[...], w_ref[...], preferred_element_type=jnp.float32)
    o_ref[...] = (acc + b_ref[...]).astype(o_ref.dtype)


def _pointwise_add_kernel(x_ref, w_ref, b_ref, r_ref, o_ref):
    # Same as above with the FPN lateral/residual add fused in (f32 add).
    acc = jnp.dot(x_ref[...], w_ref[...], preferred_element_type=jnp.float32)
    acc = acc + b_ref[...] + r_ref[...].astype(jnp.float32)
    o_ref[...] = acc.astype(o_ref.dtype)


def _conv3x3_kernel(x_ref, w_ref, b_ref, o_ref, *, Wp, Lout):
    # x: (Hp*Wp, Cin) bf16 flat padded image (resident for all 9 taps)
    # w: (9, Cin, cout_t) bf16, b: (1, cout_t) f32, o: (Lout=H*Wp, cout_t)
    acc = jnp.zeros(o_ref.shape, jnp.float32)
    for t in range(9):
        dy, dx = divmod(t, 3)
        tap = x_ref[pl.ds(dy * Wp + dx, Lout), :]           # row-shifted view
        acc = acc + jnp.dot(tap, w_ref[t],
                            preferred_element_type=jnp.float32)
    o_ref[...] = (acc + b_ref[...]).astype(o_ref.dtype)


# ------------------------------ conv wrappers ------------------------------ #

def conv1x1(x, w, b, residual=None, out_dtype=jnp.bfloat16):
    """1x1 conv as a tiled matmul.  x: (N,H,W,Cin) bf16, w: (Cin,Cout) bf16,
    b: (1,Cout) f32.  `residual` (N,H,W,Cout), if given, is added in-kernel."""
    N, H, W, Cin = x.shape
    Cout = w.shape[1]
    M = N * H * W
    x2 = x.reshape(M, Cin)                      # free view (NHWC contiguous)
    tm = _pick_tile_m(M)

    in_specs = [
        pl.BlockSpec((tm, Cin), lambda i: (i, 0)),      # activations: tiled
        pl.BlockSpec((Cin, Cout), lambda i: (0, 0)),    # weights: resident
        pl.BlockSpec((1, Cout), lambda i: (0, 0)),      # bias: resident
    ]
    args = [x2, w, b]
    kernel = _pointwise_kernel
    if residual is not None:
        in_specs.append(pl.BlockSpec((tm, Cout), lambda i: (i, 0)))
        args.append(residual.reshape(M, Cout))
        kernel = _pointwise_add_kernel

    out = pl.pallas_call(
        kernel,
        out_shape=jax.ShapeDtypeStruct((M, Cout), out_dtype),
        grid=(M // tm,),
        in_specs=in_specs,
        out_specs=pl.BlockSpec((tm, Cout), lambda i: (i, 0)),
        compiler_params=pltpu.CompilerParams(
            dimension_semantics=("parallel",),
            vmem_limit_bytes=_VMEM_LIMIT),
    )(*args)
    return out.reshape(N, H, W, Cout)


def conv3x3_same(x, w, b, out_dtype=jnp.float32):
    """Stride-1 'same' 3x3 conv with in-kernel tap accumulation.

    x: (N,H,W,Cin) bf16, w: (3,3,Cin,Cout) bf16, b: (1,Cout) f32.
    Returns (N,H,W,Cout) in out_dtype.
    """
    N, H, W, Cin = x.shape
    Cout = w.shape[-1]
    Wp = W + 2
    # 1 zero row/col around the image plus 2 extra bottom rows so every flat
    # tap window (offset dy*Wp+dx, length H*Wp) stays inside the buffer.
    xp = jnp.pad(x, ((0, 0), (1, 2), (1, 1), (0, 0)))
    Lf = (H + 3) * Wp
    Lout = H * Wp
    xf = xp.reshape(N, Lf, Cin)                 # free view
    w9 = w.reshape(9, Cin, Cout)

    cout_t = 128 if Cout % 128 == 0 else Cout
    nj = Cout // cout_t
    kernel = functools.partial(_conv3x3_kernel, Wp=Wp, Lout=Lout)

    out = pl.pallas_call(
        kernel,
        out_shape=jax.ShapeDtypeStruct((N, Lout, Cout), out_dtype),
        grid=(N, nj),
        in_specs=[
            # Full padded image per step; index constant in j => fetched once
            # per image even when Cout is tiled.
            pl.BlockSpec((None, Lf, Cin), lambda n, j: (n, 0, 0)),
            pl.BlockSpec((9, Cin, cout_t), lambda n, j: (0, 0, j)),
            pl.BlockSpec((1, cout_t), lambda n, j: (0, j)),
        ],
        out_specs=pl.BlockSpec((None, Lout, cout_t), lambda n, j: (n, 0, j)),
        compiler_params=pltpu.CompilerParams(
            dimension_semantics=("parallel", "parallel"),
            vmem_limit_bytes=_VMEM_LIMIT),
    )(xf, w9, b)
    # (N, H, Wp, Cout): columns [W, Wp) are wrap-around scratch, drop them
    # (this slice fuses with the consumer / final NCHW transpose).
    return out.reshape(N, H, Wp, Cout)[:, :, :W, :]


def conv3x3_stride2(x, w, b, out_dtype=jnp.float32):
    """3x3 conv, stride 2, padding 1: stride-1 kernel + subsample.  Only used
    for the tiny P6/P7 levels where the 4x extra MXU work is negligible."""
    full = conv3x3_same(x, w, b, out_dtype)
    return full[:, ::2, ::2, :]


def upsample_nearest_2x(x):
    # nn.Upsample(scale_factor=2, mode='nearest') on NHWC.
    return jnp.repeat(jnp.repeat(x, 2, axis=1), 2, axis=2)


# ------------------------------ parameter init ----------------------------- #

def init_params(key, C3_size, C4_size, C5_size, feature_size):
    shapes = {
        "P5_1": (1, 1, C5_size, feature_size),
        "P5_2": (3, 3, feature_size, feature_size),
        "P4_1": (1, 1, C4_size, feature_size),
        "P4_2": (3, 3, feature_size, feature_size),
        "P3_1": (1, 1, C3_size, feature_size),
        "P3_2": (3, 3, feature_size, feature_size),
        "P6":   (3, 3, C5_size, feature_size),
        "P7_2": (3, 3, feature_size, feature_size),
    }
    params = {}
    for name, shp in shapes.items():
        key, kw_, kb_ = jax.random.split(key, 3)
        params[name + "_w"] = 0.05 * jax.random.normal(kw_, shp, jnp.float32)
        params[name + "_b"] = 0.05 * jax.random.normal(kb_, (shp[-1],),
                                                       jnp.float32)
    return params


# ------------------------------ forward pass ------------------------------- #

def pyramid_features(params, C3, C4, C5):
    """Inputs/outputs are NCHW (PyTorch convention); NHWC + bf16 internally."""
    bf16 = jnp.bfloat16
    c3 = jnp.transpose(C3, (0, 2, 3, 1)).astype(bf16)
    c4 = jnp.transpose(C4, (0, 2, 3, 1)).astype(bf16)
    c5 = jnp.transpose(C5, (0, 2, 3, 1)).astype(bf16)

    def w1(name):   # 1x1 weights -> (Cin, Cout) bf16
        w = params[name + "_w"]
        return w.reshape(w.shape[2], w.shape[3]).astype(bf16)

    def w3(name):   # 3x3 weights -> (3,3,Cin,Cout) bf16
        return params[name + "_w"].astype(bf16)

    def bias(name):
        return params[name + "_b"].reshape(1, -1).astype(jnp.float32)

    # P5 level
    P5_x = conv1x1(c5, w1("P5_1"), bias("P5_1"))                  # bf16
    P5_up = upsample_nearest_2x(P5_x)                             # bf16
    P5_out = conv3x3_same(P5_x, w3("P5_2"), bias("P5_2"))         # f32

    # P4 level: lateral merge fused into the 1x1 kernel.
    P4_x = conv1x1(c4, w1("P4_1"), bias("P4_1"), residual=P5_up)
    P4_up = upsample_nearest_2x(P4_x)
    P4_out = conv3x3_same(P4_x, w3("P4_2"), bias("P4_2"))

    # P3 level
    P3_x = conv1x1(c3, w1("P3_1"), bias("P3_1"), residual=P4_up)
    P3_out = conv3x3_same(P3_x, w3("P3_2"), bias("P3_2"))

    # P6 / P7
    P6_out = conv3x3_stride2(c5, w3("P6"), bias("P6"))
    p7_in = jnp.maximum(P6_out, 0.0).astype(bf16)   # single-pass ReLU + cast
    P7_out = conv3x3_stride2(p7_in, w3("P7_2"), bias("P7_2"))

    to_nchw = lambda t: jnp.transpose(t, (0, 3, 1, 2))
    return [to_nchw(P3_out), to_nchw(P4_out), to_nchw(P5_out),
            to_nchw(P6_out), to_nchw(P7_out)]


# ---------------------------- pure-JAX reference ---------------------------- #

def _ref_conv(x, w, b, stride, padding):
    out = jax.lax.conv_general_dilated(
        x, w, (stride, stride), [(padding, padding)] * 2,
        dimension_numbers=("NHWC", "HWIO", "NHWC"))
    return out + b


def pyramid_features_ref(params, C3, C4, C5):
    c3 = jnp.transpose(C3, (0, 2, 3, 1))
    c4 = jnp.transpose(C4, (0, 2, 3, 1))
    c5 = jnp.transpose(C5, (0, 2, 3, 1))
    P5_x = _ref_conv(c5, params["P5_1_w"], params["P5_1_b"], 1, 0)
    P5_up = upsample_nearest_2x(P5_x)
    P5_out = _ref_conv(P5_x, params["P5_2_w"], params["P5_2_b"], 1, 1)
    P4_x = _ref_conv(c4, params["P4_1_w"], params["P4_1_b"], 1, 0) + P5_up
    P4_up = upsample_nearest_2x(P4_x)
    P4_out = _ref_conv(P4_x, params["P4_2_w"], params["P4_2_b"], 1, 1)
    P3_x = _ref_conv(c3, params["P3_1_w"], params["P3_1_b"], 1, 0) + P4_up
    P3_out = _ref_conv(P3_x, params["P3_2_w"], params["P3_2_b"], 1, 1)
    P6_out = _ref_conv(c5, params["P6_w"], params["P6_b"], 2, 1)
    P7_out = _ref_conv(jnp.maximum(P6_out, 0.0),
                       params["P7_2_w"], params["P7_2_b"], 2, 1)
    to_nchw = lambda t: jnp.transpose(t, (0, 3, 1, 2))
    return [to_nchw(P3_out), to_nchw(P4_out), to_nchw(P5_out),
            to_nchw(P6_out), to_nchw(P7_out)]


# ---------------------------------- main ----------------------------------- #

if __name__ == "__main__":
    key = jax.random.PRNGKey(0)
    N = 2
    # Lane-dense feature size (multiple of 128), small backbone channels.
    C3_size, C4_size, C5_size, feature_size = 32, 64, 128, 128

    kp, k3, k4, k5 = jax.random.split(key, 4)
    params = init_params(kp, C3_size, C4_size, C5_size, feature_size)

    # FPN pyramid: C3 is the highest-resolution level, each next level halves.
    C3 = jax.random.normal(k3, (N, C3_size, 16, 16), jnp.float32)
    C4 = jax.random.normal(k4, (N, C4_size, 8, 8), jnp.float32)
    C5 = jax.random.normal(k5, (N, C5_size, 4, 4), jnp.float32)

    fwd = jax.jit(pyramid_features)
    outs = jax.block_until_ready(fwd(params, C3, C4, C5))

    refs = jax.block_until_ready(
        jax.jit(pyramid_features_ref)(params, C3, C4, C5))
    for o, r in zip(outs, refs):
        assert o.shape == r.shape and o.dtype == r.dtype
        # Tolerance sized for bf16 MXU inputs + bf16-stored intermediates.
        assert jnp.allclose(o, r, atol=3e-2, rtol=3e-2), \
            float(jnp.max(jnp.abs(o - r)))

    print("KERNEL_OK")
</pallas_src>

<mosaic_0001>
module attributes {stable_mosaic.version = 11 : i64} {
  func.func @_pointwise_kernel(%arg0: i32, %arg1: memref<32x128xbf16, #tpu.memory_space<vmem>>, %arg2: memref<128x128xbf16, #tpu.memory_space<vmem>>, %arg3: memref<1x128xf32, #tpu.memory_space<vmem>>, %arg4: memref<32x128xbf16, #tpu.memory_space<vmem>>) attributes {dimension_semantics = [#tpu.dimension_semantics<parallel>], iteration_bounds = array<i64: 1>, scalar_prefetch = 0 : i64, scratch_operands = 0 : i64, tpu.core_type = #tpu.core_type<tc>, window_params = [{transform_indices = @transform_0, window_bounds = array<i64: 32, 128>}, {pipeline_mode = #tpu.pipeline_mode<synchronous>, transform_indices = @transform_1, window_bounds = array<i64: 128, 128>}, {pipeline_mode = #tpu.pipeline_mode<synchronous>, transform_indices = @transform_2, window_bounds = array<i64: 1, 128>}, {transform_indices = @transform_3, window_bounds = array<i64: 32, 128>}]} {
    %c0 = arith.constant 0 : index
    %c0_0 = arith.constant 0 : index
    %0 = vector.load %arg1[%c0, %c0_0] : memref<32x128xbf16, #tpu.memory_space<vmem>>, vector<32x128xbf16>
    %c0_1 = arith.constant 0 : index
    %c0_2 = arith.constant 0 : index
    %1 = vector.load %arg2[%c0_1, %c0_2] : memref<128x128xbf16, #tpu.memory_space<vmem>>, vector<128x128xbf16>
    %cst = arith.constant dense<0.000000e+00> : vector<32x128xf32>
    %2 = tpu.matmul %0, %1, %cst {dimension_numbers = #tpu.dot_dimension_numbers<[1], [0], [0], [1], [0, 0, 1, 1], [], []>} : vector<32x128xbf16>, vector<128x128xbf16>, vector<32x128xf32> -> vector<32x128xf32>
    %c0_3 = arith.constant 0 : index
    %c0_4 = arith.constant 0 : index
    %3 = vector.load %arg3[%c0_3, %c0_4] : memref<1x128xf32, #tpu.memory_space<vmem>>, vector<1x128xf32>
    %4 = vector.broadcast %3 : vector<1x128xf32> to vector<32x128xf32>
    %5 = arith.addf %2, %4 : vector<32x128xf32>
    %6 = arith.truncf %5 : vector<32x128xf32> to vector<32x128xbf16>
    %c0_5 = arith.constant 0 : index
    %c0_6 = arith.constant 0 : index
    %7 = vector.load %arg4[%c0_5, %c0_6] : memref<32x128xbf16, #tpu.memory_space<vmem>>, vector<32x128xbf16>
    tpu.vector_store %arg4[%c0_5, %c0_6], %6 {strides = array<i32>} : memref<32x128xbf16, #tpu.memory_space<vmem>>, vector<32x128xbf16>,
    return
  }
  func.func @transform_0(%arg0: i32) -> (i32, i32) {
    %c0_i32 = arith.constant 0 : i32
    %c0_i32_0 = arith.constant 0 : i32
    return %arg0, %c0_i32 : i32, i32
  }
  func.func @transform_1(%arg0: i32) -> (i32, i32) {
    %c0_i32 = arith.constant 0 : i32
    %c0_i32_0 = arith.constant 0 : i32
    %c0_i32_1 = arith.constant 0 : i32
    return %c0_i32, %c0_i32_0 : i32, i32
  }
  func.func @transform_2(%arg0: i32) -> (i32, i32) {
    %c0_i32 = arith.constant 0 : i32
    %c0_i32_0 = arith.constant 0 : i32
    %c0_i32_1 = arith.constant 0 : i32
    return %c0_i32, %c0_i32_0 : i32, i32
  }
  func.func @transform_3(%arg0: i32) -> (i32, i32) {
    %c0_i32 = arith.constant 0 : i32
    %c0_i32_0 = arith.constant 0 : i32
    return %arg0, %c0_i32 : i32, i32
  }
}

module attributes {stable_mosaic.version = 11 : i64} {
  func.func @_pointwise_add_kernel(%arg0: i32, %arg1: memref<128x64xbf16, #tpu.memory_space<vmem>>, %arg2: memref<64x128xbf16, #tpu.memory_space<vmem>>, %arg3: memref<1x128xf32, #tpu.memory_space<vmem>>, %arg4: memref<128x128xbf16, #tpu.memory_space<vmem>>, %arg5: memref<128x128xbf16, #tpu.memory_space<vmem>>) attributes {dimension_semantics = [#tpu.dimension_semantics<parallel>], iteration_bounds = array<i64: 1>, scalar_prefetch = 0 : i64, scratch_operands = 0 : i64, tpu.core_type = #tpu.core_type<tc>, window_params = [{transform_indices = @transform_0, window_bounds = array<i64: 128, 64>}, {pipeline_mode = #tpu.pipeline_mode<synchronous>, transform_indices = @transform_1, window_bounds = array<i64: 64, 128>}, {pipeline_mode = #tpu.pipeline_mode<synchronous>, transform_indices = @transform_2, window_bounds = array<i64: 1, 128>}, {transform_indices = @transform_3, window_bounds = array<i64: 128, 128>}, {transform_indices = @transform_4, window_bounds = array<i64: 128, 128>}]} {
    %c0 = arith.constant 0 : index
    %c0_0 = arith.constant 0 : index
    %0 = vector.load %arg1[%c0, %c0_0] : memref<128x64xbf16, #tpu.memory_space<vmem>>, vector<128x64xbf16>
    %c0_1 = arith.constant 0 : index
    %c0_2 = arith.constant 0 : index
    %1 = vector.load %arg2[%c0_1, %c0_2] : memref<64x128xbf16, #tpu.memory_space<vmem>>, vector<64x128xbf16>
    %cst = arith.constant dense<0.000000e+00> : vector<128x128xf32>
    %2 = tpu.matmul %0, %1, %cst {dimension_numbers = #tpu.dot_dimension_numbers<[1], [0], [0], [1], [0, 0, 1, 1], [], []>} : vector<128x64xbf16>, vector<64x128xbf16>, vector<128x128xf32> -> vector<128x128xf32>
    %c0_3 = arith.constant 0 : index
    %c0_4 = arith.constant 0 : index
    %3 = vector.load %arg3[%c0_3, %c0_4] : memref<1x128xf32, #tpu.memory_space<vmem>>, vector<1x128xf32>
    %4 = vector.broadcast %3 : vector<1x128xf32> to vector<128x128xf32>
    %5 = arith.addf %2, %4 : vector<128x128xf32>
    %c0_5 = arith.constant 0 : index
    %c0_6 = arith.constant 0 : index
    %6 = vector.load %arg4[%c0_5, %c0_6] : memref<128x128xbf16, #tpu.memory_space<vmem>>, vector<128x128xbf16>
    %7 = arith.extf %6 : vector<128x128xbf16> to vector<128x128xf32>
    %8 = arith.addf %5, %7 : vector<128x128xf32>
    %9 = arith.truncf %8 : vector<128x128xf32> to vector<128x128xbf16>
    %c0_7 = arith.constant 0 : index
    %c0_8 = arith.constant 0 : index
    %10 = vector.load %arg5[%c0_7, %c0_8] : memref<128x128xbf16, #tpu.memory_space<vmem>>, vector<128x128xbf16>
    tpu.vector_store %arg5[%c0_7, %c0_8], %9 {strides = array<i32>} : memref<128x128xbf16, #tpu.memory_space<vmem>>, vector<128x128xbf16>,
    return
  }
  func.func @transform_0(%arg0: i32) -> (i32, i32) {
    %c0_i32 = arith.constant 0 : i32
    %c0_i32_0 = arith.constant 0 : i32
    return %arg0, %c0_i32 : i32, i32
  }
  func.func @transform_1(%arg0: i32) -> (i32, i32) {
    %c0_i32 = arith.constant 0 : i32
    %c0_i32_0 = arith.constant 0 : i32
    %c0_i32_1 = arith.constant 0 : i32
    return %c0_i32, %c0_i32_0 : i32, i32
  }
  func.func @transform_2(%arg0: i32) -> (i32, i32) {
    %c0_i32 = arith.constant 0 : i32
    %c0_i32_0 = arith.constant 0 : i32
    %c0_i32_1 = arith.constant 0 : i32
    return %c0_i32, %c0_i32_0 : i32, i32
  }
  func.func @transform_3(%arg0: i32) -> (i32, i32) {
    %c0_i32 = arith.constant 0 : i32
    %c0_i32_0 = arith.constant 0 : i32
    return %arg0, %c0_i32 : i32, i32
  }
  func.func @transform_4(%arg0: i32) -> (i32, i32) {
    %c0_i32 = arith.constant 0 : i32
    %c0_i32_0 = arith.constant 0 : i32
    return %arg0, %c0_i32 : i32, i32
  }
}

module attributes {stable_mosaic.version = 11 : i64} {
  func.func @_pointwise_add_kernel(%arg0: i32, %arg1: memref<512x32xbf16, #tpu.memory_space<vmem>>, %arg2: memref<32x128xbf16, #tpu.memory_space<vmem>>, %arg3: memref<1x128xf32, #tpu.memory_space<vmem>>, %arg4: memref<512x128xbf16, #tpu.memory_space<vmem>>, %arg5: memref<512x128xbf16, #tpu.memory_space<vmem>>) attributes {dimension_semantics = [#tpu.dimension_semantics<parallel>], iteration_bounds = array<i64: 1>, scalar_prefetch = 0 : i64, scratch_operands = 0 : i64, tpu.core_type = #tpu.core_type<tc>, window_params = [{transform_indices = @transform_0, window_bounds = array<i64: 512, 32>}, {pipeline_mode = #tpu.pipeline_mode<synchronous>, transform_indices = @transform_1, window_bounds = array<i64: 32, 128>}, {pipeline_mode = #tpu.pipeline_mode<synchronous>, transform_indices = @transform_2, window_bounds = array<i64: 1, 128>}, {transform_indices = @transform_3, window_bounds = array<i64: 512, 128>}, {transform_indices = @transform_4, window_bounds = array<i64: 512, 128>}]} {
    %c0 = arith.constant 0 : index
    %c0_0 = arith.constant 0 : index
    %0 = vector.load %arg1[%c0, %c0_0] : memref<512x32xbf16, #tpu.memory_space<vmem>>, vector<512x32xbf16>
    %c0_1 = arith.constant 0 : index
    %c0_2 = arith.constant 0 : index
    %1 = vector.load %arg2[%c0_1, %c0_2] : memref<32x128xbf16, #tpu.memory_space<vmem>>, vector<32x128xbf16>
    %cst = arith.constant dense<0.000000e+00> : vector<512x128xf32>
    %2 = tpu.matmul %0, %1, %cst {dimension_numbers = #tpu.dot_dimension_numbers<[1], [0], [0], [1], [0, 0, 1, 1], [], []>} : vector<512x32xbf16>, vector<32x128xbf16>, vector<512x128xf32> -> vector<512x128xf32>
    %c0_3 = arith.constant 0 : index
    %c0_4 = arith.constant 0 : index
    %3 = vector.load %arg3[%c0_3, %c0_4] : memref<1x128xf32, #tpu.memory_space<vmem>>, vector<1x128xf32>
    %4 = vector.broadcast %3 : vector<1x128xf32> to vector<512x128xf32>
    %5 = arith.addf %2, %4 : vector<512x128xf32>
    %c0_5 = arith.constant 0 : index
    %c0_6 = arith.constant 0 : index
    %6 = vector.load %arg4[%c0_5, %c0_6] : memref<512x128xbf16, #tpu.memory_space<vmem>>, vector<512x128xbf16>
    %7 = arith.extf %6 : vector<512x128xbf16> to vector<512x128xf32>
    %8 = arith.addf %5, %7 : vector<512x128xf32>
    %9 = arith.truncf %8 : vector<512x128xf32> to vector<512x128xbf16>
    %c0_7 = arith.constant 0 : index
    %c0_8 = arith.constant 0 : index
    %10 = vector.load %arg5[%c0_7, %c0_8] : memref<512x128xbf16, #tpu.memory_space<vmem>>, vector<512x128xbf16>
    tpu.vector_store %arg5[%c0_7, %c0_8], %9 {strides = array<i32>} : memref<512x128xbf16, #tpu.memory_space<vmem>>, vector<512x128xbf16>,
    return
  }
  func.func @transform_0(%arg0: i32) -> (i32, i32) {
    %c0_i32 = arith.constant 0 : i32
    %c0_i32_0 = arith.constant 0 : i32
    return %arg0, %c0_i32 : i32, i32
  }
  func.func @transform_1(%arg0: i32) -> (i32, i32) {
    %c0_i32 = arith.constant 0 : i32
    %c0_i32_0 = arith.constant 0 : i32
    %c0_i32_1 = arith.constant 0 : i32
    return %c0_i32, %c0_i32_0 : i32, i32
  }
  func.func @transform_2(%arg0: i32) -> (i32, i32) {
    %c0_i32 = arith.constant 0 : i32
    %c0_i32_0 = arith.constant 0 : i32
    %c0_i32_1 = arith.constant 0 : i32
    return %c0_i32, %c0_i32_0 : i32, i32
  }
  func.func @transform_3(%arg0: i32) -> (i32, i32) {
    %c0_i32 = arith.constant 0 : i32
    %c0_i32_0 = arith.constant 0 : i32
    return %arg0, %c0_i32 : i32, i32
  }
  func.func @transform_4(%arg0: i32) -> (i32, i32) {
    %c0_i32 = arith.constant 0 : i32
    %c0_i32_0 = arith.constant 0 : i32
    return %arg0, %c0_i32 : i32, i32
  }
}

module attributes {stable_mosaic.version = 11 : i64} {
  func.func @_conv3x3_kernel(%arg0: i32, %arg1: i32, %arg2: memref<1x342x128xbf16, #tpu.memory_space<vmem>>, %arg3: memref<9x128x128xbf16, #tpu.memory_space<vmem>>, %arg4: memref<1x128xf32, #tpu.memory_space<vmem>>, %arg5: memref<1x288x128xf32, #tpu.memory_space<vmem>>) attributes {dimension_semantics = [#tpu.dimension_semantics<parallel>, #tpu.dimension_semantics<parallel>], iteration_bounds = array<i64: 2, 1>, scalar_prefetch = 0 : i64, scratch_operands = 0 : i64, tpu.core_type = #tpu.core_type<tc>, window_params = [{transform_indices = @transform_0, window_bounds = array<i64: 1, 342, 128>}, {transform_indices = @transform_1, window_bounds = array<i64: 9, 128, 128>}, {transform_indices = @transform_2, window_bounds = array<i64: 1, 128>}, {transform_indices = @transform_3, window_bounds = array<i64: 1, 288, 128>}]} {
    %cst = arith.constant 0.000000e+00 : f32
    %0 = vector.broadcast %cst : f32 to vector<288x128xf32>
    %c0 = arith.constant 0 : index
    %c0_0 = arith.constant 0 : index
    %c0_1 = arith.constant 0 : index
    %1 = vector.load %arg2[%c0, %c0_0, %c0_1] : memref<1x342x128xbf16, #tpu.memory_space<vmem>>, vector<1x288x128xbf16>
    %2 = vector.shape_cast %1 : vector<1x288x128xbf16> to vector<288x128xbf16>
    %c0_2 = arith.constant 0 : index
    %c0_3 = arith.constant 0 : index
    %c0_4 = arith.constant 0 : index
    %3 = vector.load %arg3[%c0_2, %c0_3, %c0_4] : memref<9x128x128xbf16, #tpu.memory_space<vmem>>, vector<1x128x128xbf16>
    %4 = vector.shape_cast %3 : vector<1x128x128xbf16> to vector<128x128xbf16>
    %cst_5 = arith.constant dense<0.000000e+00> : vector<288x128xf32>
    %5 = tpu.matmul %2, %4, %cst_5 {dimension_numbers = #tpu.dot_dimension_numbers<[1], [0], [0], [1], [0, 0, 1, 1], [], []>} : vector<288x128xbf16>, vector<128x128xbf16>, vector<288x128xf32> -> vector<288x128xf32>
    %6 = arith.addf %0, %5 : vector<288x128xf32>
    %c0_6 = arith.constant 0 : index
    %c1 = arith.constant 1 : index
    %c0_7 = arith.constant 0 : index
    %7 = vector.load %arg2[%c0_6, %c1, %c0_7] : memref<1x342x128xbf16, #tpu.memory_space<vmem>>, vector<1x288x128xbf16>
    %8 = vector.shape_cast %7 : vector<1x288x128xbf16> to vector<288x128xbf16>
    %c1_8 = arith.constant 1 : index
    %c0_9 = arith.constant 0 : index
    %c0_10 = arith.constant 0 : index
    %9 = vector.load %arg3[%c1_8, %c0_9, %c0_10] : memref<9x128x128xbf16, #tpu.memory_space<vmem>>, vector<1x128x128xbf16>
    %10 = vector.shape_cast %9 : vector<1x128x128xbf16> to vector<128x128xbf16>
    %cst_11 = arith.constant dense<0.000000e+00> : vector<288x128xf32>
    %11 = tpu.matmul %8, %10, %cst_11 {dimension_numbers = #tpu.dot_dimension_numbers<[1], [0], [0], [1], [0, 0, 1, 1], [], []>} : vector<288x128xbf16>, vector<128x128xbf16>, vector<288x128xf32> -> vector<288x128xf32>
    %12 = arith.addf %6, %11 : vector<288x128xf32>
    %c0_12 = arith.constant 0 : index
    %c2 = arith.constant 2 : index
    %c0_13 = arith.constant 0 : index
    %13 = vector.load %arg2[%c0_12, %c2, %c0_13] : memref<1x342x128xbf16, #tpu.memory_space<vmem>>, vector<1x288x128xbf16>
    %14 = vector.shape_cast %13 : vector<1x288x128xbf16> to vector<288x128xbf16>
    %c2_14 = arith.constant 2 : index
    %c0_15 = arith.constant 0 : index
    %c0_16 = arith.constant 0 : index
    %15 = vector.load %arg3[%c2_14, %c0_15, %c0_16] : memref<9x128x128xbf16, #tpu.memory_space<vmem>>, vector<1x128x128xbf16>
    %16 = vector.shape_cast %15 : vector<1x128x128xbf16> to vector<128x128xbf16>
    %cst_17 = arith.constant dense<0.000000e+00> : vector<288x128xf32>
    %17 = tpu.matmul %14, %16, %cst_17 {dimension_numbers = #tpu.dot_dimension_numbers<[1], [0], [0], [1], [0, 0, 1, 1], [], []>} : vector<288x128xbf16>, vector<128x128xbf16>, vector<288x128xf32> -> vector<288x128xf32>
    %18 = arith.addf %12, %17 : vector<288x128xf32>
    %c0_18 = arith.constant 0 : index
    %c18 = arith.constant 18 : index
    %c0_19 = arith.constant 0 : index
    %19 = vector.load %arg2[%c0_18, %c18, %c0_19] : memref<1x342x128xbf16, #tpu.memory_space<vmem>>, vector<1x288x128xbf16>
    %20 = vector.shape_cast %19 : vector<1x288x128xbf16> to vector<288x128xbf16>
    %c3 = arith.constant 3 : index
    %c0_20 = arith.constant 0 : index
    %c0_21 = arith.constant 0 : index
    %21 = vector.load %arg3[%c3, %c0_20, %c0_21] : memref<9x128x128xbf16, #tpu.memory_space<vmem>>, vector<1x128x128xbf16>
    %22 = vector.shape_cast %21 : vector<1x128x128xbf16> to vector<128x128xbf16>
    %cst_22 = arith.constant dense<0.000000e+00> : vector<288x128xf32>
    %23 = tpu.matmul %20, %22, %cst_22 {dimension_numbers = #tpu.dot_dimension_numbers<[1], [0], [0], [1], [0, 0, 1, 1], [], []>} : vector<288x128xbf16>, vector<128x128xbf16>, vector<288x128xf32> -> vector<288x128xf32>
    %24 = arith.addf %18, %23 : vector<288x128xf32>
    %c0_23 = arith.constant 0 : index
    %c19 = arith.constant 19 : index
    %c0_24 = arith.constant 0 : index
    %25 = vector.load %arg2[%c0_23, %c19, %c0_24] : memref<1x342x128xbf16, #tpu.memory_space<vmem>>, vector<1x288x128xbf16>
    %26 = vector.shape_cast %25 : vector<1x288x128xbf16> to vector<288x128xbf16>
    %c4 = arith.constant 4 : index
    %c0_25 = arith.constant 0 : index
    %c0_26 = arith.constant 0 : index
    %27 = vector.load %arg3[%c4, %c0_25, %c0_26] : memref<9x128x128xbf16, #tpu.memory_space<vmem>>, vector<1x128x128xbf16>
    %28 = vector.shape_cast %27 : vector<1x128x128xbf16> to vector<128x128xbf16>
    %cst_27 = arith.constant dense<0.000000e+00> : vector<288x128xf32>
    %29 = tpu.matmul %26, %28, %cst_27 {dimension_numbers = #tpu.dot_dimension_numbers<[1], [0], [0], [1], [0, 0, 1, 1], [], []>} : vector<288x128xbf16>, vector<128x128xbf16>, vector<288x128xf32> -> vector<288x128xf32>
    %30 = arith.addf %24, %29 : vector<288x128xf32>
    %c0_28 = arith.constant 0 : index
    %c20 = arith.constant 20 : index
    %c0_29 = arith.constant 0 : index
    %31 = vector.load %arg2[%c0_28, %c20, %c0_29] : memref<1x342x128xbf16, #tpu.memory_space<vmem>>, vector<1x288x128xbf16>
    %32 = vector.shape_cast %31 : vector<1x288x128xbf16> to vector<288x128xbf16>
    %c5 = arith.constant 5 : index
    %c0_30 = arith.constant 0 : index
    %c0_31 = arith.constant 0 : index
    %33 = vector.load %arg3[%c5, %c0_30, %c0_31] : memref<9x128x128xbf16, #tpu.memory_space<vmem>>, vector<1x128x128xbf16>
    %34 = vector.shape_cast %33 : vector<1x128x128xbf16> to vector<128x128xbf16>
    %cst_32 = arith.constant dense<0.000000e+00> : vector<288x128xf32>
    %35 = tpu.matmul %32, %34, %cst_32 {dimension_numbers = #tpu.dot_dimension_numbers<[1], [0], [0], [1], [0, 0, 1, 1], [], []>} : vector<288x128xbf16>, vector<128x128xbf16>, vector<288x128xf32> -> vector<288x128xf32>
    %36 = arith.addf %30, %35 : vector<288x128xf32>
    %c0_33 = arith.constant 0 : index
    %c36 = arith.constant 36 : index
    %c0_34 = arith.constant 0 : index
    %37 = vector.load %arg2[%c0_33, %c36, %c0_34] : memref<1x342x128xbf16, #tpu.memory_space<vmem>>, vector<1x288x128xbf16>
    %38 = vector.shape_cast %37 : vector<1x288x128xbf16> to vector<288x128xbf16>
    %c6 = arith.constant 6 : index
    %c0_35 = arith.constant 0 : index
    %c0_36 = arith.constant 0 : index
    %39 = vector.load %arg3[%c6, %c0_35, %c0_36] : memref<9x128x128xbf16, #tpu.memory_space<vmem>>, vector<1x128x128xbf16>
    %40 = vector.shape_cast %39 : vector<1x128x128xbf16> to vector<128x128xbf16>
    %cst_37 = arith.constant dense<0.000000e+00> : vector<288x128xf32>
    %41 = tpu.matmul %38, %40, %cst_37 {dimension_numbers = #tpu.dot_dimension_numbers<[1], [0], [0], [1], [0, 0, 1, 1], [], []>} : vector<288x128xbf16>, vector<128x128xbf16>, vector<288x128xf32> -> vector<288x128xf32>
    %42 = arith.addf %36, %41 : vector<288x128xf32>
    %c0_38 = arith.constant 0 : index
    %c37 = arith.constant 37 : index
    %c0_39 = arith.constant 0 : index
    %43 = vector.load %arg2[%c0_38, %c37, %c0_39] : memref<1x342x128xbf16, #tpu.memory_space<vmem>>, vector<1x288x128xbf16>
    %44 = vector.shape_cast %43 : vector<1x288x128xbf16> to vector<288x128xbf16>
    %c7 = arith.constant 7 : index
    %c0_40 = arith.constant 0 : index
    %c0_41 = arith.constant 0 : index
    %45 = vector.load %arg3[%c7, %c0_40, %c0_41] : memref<9x128x128xbf16, #tpu.memory_space<vmem>>, vector<1x128x128xbf16>
    %46 = vector.shape_cast %45 : vector<1x128x128xbf16> to vector<128x128xbf16>
    %cst_42 = arith.constant dense<0.000000e+00> : vector<288x128xf32>
    %47 = tpu.matmul %44, %46, %cst_42 {dimension_numbers = #tpu.dot_dimension_numbers<[1], [0], [0], [1], [0, 0, 1, 1], [], []>} : vector<288x128xbf16>, vector<128x128xbf16>, vector<288x128xf32> -> vector<288x128xf32>
    %48 = arith.addf %42, %47 : vector<288x128xf32>
    %c0_43 = arith.constant 0 : index
    %c38 = arith.constant 38 : index
    %c0_44 = arith.constant 0 : index
    %49 = vector.load %arg2[%c0_43, %c38, %c0_44] : memref<1x342x128xbf16, #tpu.memory_space<vmem>>, vector<1x288x128xbf16>
    %50 = vector.shape_cast %49 : vector<1x288x128xbf16> to vector<288x128xbf16>
    %c8 = arith.constant 8 : index
    %c0_45 = arith.constant 0 : index
    %c0_46 = arith.constant 0 : index
    %51 = vector.load %arg3[%c8, %c0_45, %c0_46] : memref<9x128x128xbf16, #tpu.memory_space<vmem>>, vector<1x128x128xbf16>
    %52 = vector.shape_cast %51 : vector<1x128x128xbf16> to vector<128x128xbf16>
    %cst_47 = arith.constant dense<0.000000e+00> : vector<288x128xf32>
    %53 = tpu.matmul %50, %52, %cst_47 {dimension_numbers = #tpu.dot_dimension_numbers<[1], [0], [0], [1], [0, 0, 1, 1], [], []>} : vector<288x128xbf16>, vector<128x128xbf16>, vector<288x128xf32> -> vector<288x128xf32>
    %54 = arith.addf %48, %53 : vector<288x128xf32>
    %c0_48 = arith.constant 0 : index
    %c0_49 = arith.constant 0 : index
    %55 = vector.load %arg4[%c0_48, %c0_49] : memref<1x128xf32, #tpu.memory_space<vmem>>, vector<1x128xf32>
    %56 = vector.broadcast %55 : vector<1x128xf32> to vector<288x128xf32>
    %57 = arith.addf %54, %56 : vector<288x128xf32>
    %c0_50 = arith.constant 0 : index
    %c0_51 = arith.constant 0 : index
    %c0_52 = arith.constant 0 : index
    %58 = vector.load %arg5[%c0_50, %c0_51, %c0_52] : memref<1x288x128xf32, #tpu.memory_space<vmem>>, vector<1x288x128xf32>
    %59 = vector.shape_cast %58 : vector<1x288x128xf32> to vector<288x128xf32>
    %60 = vector.shape_cast %57 : vector<288x128xf32> to vector<1x288x128xf32>
    tpu.vector_store %arg5[%c0_50, %c0_51, %c0_52], %60 {strides = array<i32>} : memref<1x288x128xf32, #tpu.memory_space<vmem>>, vector<1x288x128xf32>,
    return
  }
  func.func @transform_0(%arg0: i32, %arg1: i32) -> (i32, i32, i32) {
    %c0_i32 = arith.constant 0 : i32
    %c0_i32_0 = arith.constant 0 : i32
    %c0_i32_1 = arith.constant 0 : i32
    return %arg0, %c0_i32, %c0_i32_0 : i32, i32, i32
  }
  func.func @transform_1(%arg0: i32, %arg1: i32) -> (i32, i32, i32) {
    %c0_i32 = arith.constant 0 : i32
    %c0_i32_0 = arith.constant 0 : i32
    %c0_i32_1 = arith.constant 0 : i32
    return %c0_i32, %c0_i32_0, %arg1 : i32, i32, i32
  }
  func.func @transform_2(%arg0: i32, %arg1: i32) -> (i32, i32) {
    %c0_i32 = arith.constant 0 : i32
    %c0_i32_0 = arith.constant 0 : i32
    return %c0_i32, %arg1 : i32, i32
  }
  func.func @transform_3(%arg0: i32, %arg1: i32) -> (i32, i32, i32) {
    %c0_i32 = arith.constant 0 : i32
    %c0_i32_0 = arith.constant 0 : i32
    return %arg0, %c0_i32, %arg1 : i32, i32, i32
  }
}

module attributes {stable_mosaic.version = 11 : i64} {
  func.func @_conv3x3_kernel(%arg0: i32, %arg1: i32, %arg2: memref<1x42x128xbf16, #tpu.memory_space<vmem>>, %arg3: memref<9x128x128xbf16, #tpu.memory_space<vmem>>, %arg4: memref<1x128xf32, #tpu.memory_space<vmem>>, %arg5: memref<1x24x128xf32, #tpu.memory_space<vmem>>) attributes {dimension_semantics = [#tpu.dimension_semantics<parallel>, #tpu.dimension_semantics<parallel>], iteration_bounds = array<i64: 2, 1>, scalar_prefetch = 0 : i64, scratch_operands = 0 : i64, tpu.core_type = #tpu.core_type<tc>, window_params = [{transform_indices = @transform_0, window_bounds = array<i64: 1, 42, 128>}, {transform_indices = @transform_1, window_bounds = array<i64: 9, 128, 128>}, {transform_indices = @transform_2, window_bounds = array<i64: 1, 128>}, {transform_indices = @transform_3, window_bounds = array<i64: 1, 24, 128>}]} {
    %cst = arith.constant 0.000000e+00 : f32
    %0 = vector.broadcast %cst : f32 to vector<24x128xf32>
    %c0 = arith.constant 0 : index
    %c0_0 = arith.constant 0 : index
    %c0_1 = arith.constant 0 : index
    %1 = vector.load %arg2[%c0, %c0_0, %c0_1] : memref<1x42x128xbf16, #tpu.memory_space<vmem>>, vector<1x24x128xbf16>
    %2 = vector.shape_cast %1 : vector<1x24x128xbf16> to vector<24x128xbf16>
    %c0_2 = arith.constant 0 : index
    %c0_3 = arith.constant 0 : index
    %c0_4 = arith.constant 0 : index
    %3 = vector.load %arg3[%c0_2, %c0_3, %c0_4] : memref<9x128x128xbf16, #tpu.memory_space<vmem>>, vector<1x128x128xbf16>
    %4 = vector.shape_cast %3 : vector<1x128x128xbf16> to vector<128x128xbf16>
    %cst_5 = arith.constant dense<0.000000e+00> : vector<24x128xf32>
    %5 = tpu.matmul %2, %4, %cst_5 {dimension_numbers = #tpu.dot_dimension_numbers<[1], [0], [0], [1], [0, 0, 1, 1], [], []>} : vector<24x128xbf16>, vector<128x128xbf16>, vector<24x128xf32> -> vector<24x128xf32>
    %6 = arith.addf %0, %5 : vector<24x128xf32>
    %c0_6 = arith.constant 0 : index
    %c1 = arith.constant 1 : index
    %c0_7 = arith.constant 0 : index
    %7 = vector.load %arg2[%c0_6, %c1, %c0_7] : memref<1x42x128xbf16, #tpu.memory_space<vmem>>, vector<1x24x128xbf16>
    %8 = vector.shape_cast %7 : vector<1x24x128xbf16> to vector<24x128xbf16>
    %c1_8 = arith.constant 1 : index
    %c0_9 = arith.constant 0 : index
    %c0_10 = arith.constant 0 : index
    %9 = vector.load %arg3[%c1_8, %c0_9, %c0_10] : memref<9x128x128xbf16, #tpu.memory_space<vmem>>, vector<1x128x128xbf16>
    %10 = vector.shape_cast %9 : vector<1x128x128xbf16> to vector<128x128xbf16>
    %cst_11 = arith.constant dense<0.000000e+00> : vector<24x128xf32>
    %11 = tpu.matmul %8, %10, %cst_11 {dimension_numbers = #tpu.dot_dimension_numbers<[1], [0], [0], [1], [0, 0, 1, 1], [], []>} : vector<24x128xbf16>, vector<128x128xbf16>, vector<24x128xf32> -> vector<24x128xf32>
    %12 = arith.addf %6, %11 : vector<24x128xf32>
    %c0_12 = arith.constant 0 : index
    %c2 = arith.constant 2 : index
    %c0_13 = arith.constant 0 : index
    %13 = vector.load %arg2[%c0_12, %c2, %c0_13] : memref<1x42x128xbf16, #tpu.memory_space<vmem>>, vector<1x24x128xbf16>
    %14 = vector.shape_cast %13 : vector<1x24x128xbf16> to vector<24x128xbf16>
    %c2_14 = arith.constant 2 : index
    %c0_15 = arith.constant 0 : index
    %c0_16 = arith.constant 0 : index
    %15 = vector.load %arg3[%c2_14, %c0_15, %c0_16] : memref<9x128x128xbf16, #tpu.memory_space<vmem>>, vector<1x128x128xbf16>
    %16 = vector.shape_cast %15 : vector<1x128x128xbf16> to vector<128x128xbf16>
    %cst_17 = arith.constant dense<0.000000e+00> : vector<24x128xf32>
    %17 = tpu.matmul %14, %16, %cst_17 {dimension_numbers = #tpu.dot_dimension_numbers<[1], [0], [0], [1], [0, 0, 1, 1], [], []>} : vector<24x128xbf16>, vector<128x128xbf16>, vector<24x128xf32> -> vector<24x128xf32>
    %18 = arith.addf %12, %17 : vector<24x128xf32>
    %c0_18 = arith.constant 0 : index
    %c6 = arith.constant 6 : index
    %c0_19 = arith.constant 0 : index
    %19 = vector.load %arg2[%c0_18, %c6, %c0_19] : memref<1x42x128xbf16, #tpu.memory_space<vmem>>, vector<1x24x128xbf16>
    %20 = vector.shape_cast %19 : vector<1x24x128xbf16> to vector<24x128xbf16>
    %c3 = arith.constant 3 : index
    %c0_20 = arith.constant 0 : index
    %c0_21 = arith.constant 0 : index
    %21 = vector.load %arg3[%c3, %c0_20, %c0_21] : memref<9x128x128xbf16, #tpu.memory_space<vmem>>, vector<1x128x128xbf16>
    %22 = vector.shape_cast %21 : vector<1x128x128xbf16> to vector<128x128xbf16>
    %cst_22 = arith.constant dense<0.000000e+00> : vector<24x128xf32>
    %23 = tpu.matmul %20, %22, %cst_22 {dimension_numbers = #tpu.dot_dimension_numbers<[1], [0], [0], [1], [0, 0, 1, 1], [], []>} : vector<24x128xbf16>, vector<128x128xbf16>, vector<24x128xf32> -> vector<24x128xf32>
    %24 = arith.addf %18, %23 : vector<24x128xf32>
    %c0_23 = arith.constant 0 : index
    %c7 = arith.constant 7 : index
    %c0_24 = arith.constant 0 : index
    %25 = vector.load %arg2[%c0_23, %c7, %c0_24] : memref<1x42x128xbf16, #tpu.memory_space<vmem>>, vector<1x24x128xbf16>
    %26 = vector.shape_cast %25 : vector<1x24x128xbf16> to vector<24x128xbf16>
    %c4 = arith.constant 4 : index
    %c0_25 = arith.constant 0 : index
    %c0_26 = arith.constant 0 : index
    %27 = vector.load %arg3[%c4, %c0_25, %c0_26] : memref<9x128x128xbf16, #tpu.memory_space<vmem>>, vector<1x128x128xbf16>
    %28 = vector.shape_cast %27 : vector<1x128x128xbf16> to vector<128x128xbf16>
    %cst_27 = arith.constant dense<0.000000e+00> : vector<24x128xf32>
    %29 = tpu.matmul %26, %28, %cst_27 {dimension_numbers = #tpu.dot_dimension_numbers<[1], [0], [0], [1], [0, 0, 1, 1], [], []>} : vector<24x128xbf16>, vector<128x128xbf16>, vector<24x128xf32> -> vector<24x128xf32>
    %30 = arith.addf %24, %29 : vector<24x128xf32>
    %c0_28 = arith.constant 0 : index
    %c8 = arith.constant 8 : index
    %c0_29 = arith.constant 0 : index
    %31 = vector.load %arg2[%c0_28, %c8, %c0_29] : memref<1x42x128xbf16, #tpu.memory_space<vmem>>, vector<1x24x128xbf16>
    %32 = vector.shape_cast %31 : vector<1x24x128xbf16> to vector<24x128xbf16>
    %c5 = arith.constant 5 : index
    %c0_30 = arith.constant 0 : index
    %c0_31 = arith.constant 0 : index
    %33 = vector.load %arg3[%c5, %c0_30, %c0_31] : memref<9x128x128xbf16, #tpu.memory_space<vmem>>, vector<1x128x128xbf16>
    %34 = vector.shape_cast %33 : vector<1x128x128xbf16> to vector<128x128xbf16>
    %cst_32 = arith.constant dense<0.000000e+00> : vector<24x128xf32>
    %35 = tpu.matmul %32, %34, %cst_32 {dimension_numbers = #tpu.dot_dimension_numbers<[1], [0], [0], [1], [0, 0, 1, 1], [], []>} : vector<24x128xbf16>, vector<128x128xbf16>, vector<24x128xf32> -> vector<24x128xf32>
    %36 = arith.addf %30, %35 : vector<24x128xf32>
    %c0_33 = arith.constant 0 : index
    %c12 = arith.constant 12 : index
    %c0_34 = arith.constant 0 : index
    %37 = vector.load %arg2[%c0_33, %c12, %c0_34] : memref<1x42x128xbf16, #tpu.memory_space<vmem>>, vector<1x24x128xbf16>
    %38 = vector.shape_cast %37 : vector<1x24x128xbf16> to vector<24x128xbf16>
    %c6_35 = arith.constant 6 : index
    %c0_36 = arith.constant 0 : index
    %c0_37 = arith.constant 0 : index
    %39 = vector.load %arg3[%c6_35, %c0_36, %c0_37] : memref<9x128x128xbf16, #tpu.memory_space<vmem>>, vector<1x128x128xbf16>
    %40 = vector.shape_cast %39 : vector<1x128x128xbf16> to vector<128x128xbf16>
    %cst_38 = arith.constant dense<0.000000e+00> : vector<24x128xf32>
    %41 = tpu.matmul %38, %40, %cst_38 {dimension_numbers = #tpu.dot_dimension_numbers<[1], [0], [0], [1], [0, 0, 1, 1], [], []>} : vector<24x128xbf16>, vector<128x128xbf16>, vector<24x128xf32> -> vector<24x128xf32>
    %42 = arith.addf %36, %41 : vector<24x128xf32>
    %c0_39 = arith.constant 0 : index
    %c13 = arith.constant 13 : index
    %c0_40 = arith.constant 0 : index
    %43 = vector.load %arg2[%c0_39, %c13, %c0_40] : memref<1x42x128xbf16, #tpu.memory_space<vmem>>, vector<1x24x128xbf16>
    %44 = vector.shape_cast %43 : vector<1x24x128xbf16> to vector<24x128xbf16>
    %c7_41 = arith.constant 7 : index
    %c0_42 = arith.constant 0 : index
    %c0_43 = arith.constant 0 : index
    %45 = vector.load %arg3[%c7_41, %c0_42, %c0_43] : memref<9x128x128xbf16, #tpu.memory_space<vmem>>, vector<1x128x128xbf16>
    %46 = vector.shape_cast %45 : vector<1x128x128xbf16> to vector<128x128xbf16>
    %cst_44 = arith.constant dense<0.000000e+00> : vector<24x128xf32>
    %47 = tpu.matmul %44, %46, %cst_44 {dimension_numbers = #tpu.dot_dimension_numbers<[1], [0], [0], [1], [0, 0, 1, 1], [], []>} : vector<24x128xbf16>, vector<128x128xbf16>, vector<24x128xf32> -> vector<24x128xf32>
    %48 = arith.addf %42, %47 : vector<24x128xf32>
    %c0_45 = arith.constant 0 : index
    %c14 = arith.constant 14 : index
    %c0_46 = arith.constant 0 : index
    %49 = vector.load %arg2[%c0_45, %c14, %c0_46] : memref<1x42x128xbf16, #tpu.memory_space<vmem>>, vector<1x24x128xbf16>
    %50 = vector.shape_cast %49 : vector<1x24x128xbf16> to vector<24x128xbf16>
    %c8_47 = arith.constant 8 : index
    %c0_48 = arith.constant 0 : index
    %c0_49 = arith.constant 0 : index
    %51 = vector.load %arg3[%c8_47, %c0_48, %c0_49] : memref<9x128x128xbf16, #tpu.memory_space<vmem>>, vector<1x128x128xbf16>
    %52 = vector.shape_cast %51 : vector<1x128x128xbf16> to vector<128x128xbf16>
    %cst_50 = arith.constant dense<0.000000e+00> : vector<24x128xf32>
    %53 = tpu.matmul %50, %52, %cst_50 {dimension_numbers = #tpu.dot_dimension_numbers<[1], [0], [0], [1], [0, 0, 1, 1], [], []>} : vector<24x128xbf16>, vector<128x128xbf16>, vector<24x128xf32> -> vector<24x128xf32>
    %54 = arith.addf %48, %53 : vector<24x128xf32>
    %c0_51 = arith.constant 0 : index
    %c0_52 = arith.constant 0 : index
    %55 = vector.load %arg4[%c0_51, %c0_52] : memref<1x128xf32, #tpu.memory_space<vmem>>, vector<1x128xf32>
    %56 = vector.broadcast %55 : vector<1x128xf32> to vector<24x128xf32>
    %57 = arith.addf %54, %56 : vector<24x128xf32>
    %c0_53 = arith.constant 0 : index
    %c0_54 = arith.constant 0 : index
    %c0_55 = arith.constant 0 : index
    %58 = vector.load %arg5[%c0_53, %c0_54, %c0_55] : memref<1x24x128xf32, #tpu.memory_space<vmem>>, vector<1x24x128xf32>
    %59 = vector.shape_cast %58 : vector<1x24x128xf32> to vector<24x128xf32>
    %60 = vector.shape_cast %57 : vector<24x128xf32> to vector<1x24x128xf32>
    tpu.vector_store %arg5[%c0_53, %c0_54, %c0_55], %60 {strides = array<i32>} : memref<1x24x128xf32, #tpu.memory_space<vmem>>, vector<1x24x128xf32>,
    return
  }
  func.func @transform_0(%arg0: i32, %arg1: i32) -> (i32, i32, i32) {
    %c0_i32 = arith.constant 0 : i32
    %c0_i32_0 = arith.constant 0 : i32
    %c0_i32_1 = arith.constant 0 : i32
    return %arg0, %c0_i32, %c0_i32_0 : i32, i32, i32
  }
  func.func @transform_1(%arg0: i32, %arg1: i32) -> (i32, i32, i32) {
    %c0_i32 = arith.constant 0 : i32
    %c0_i32_0 = arith.constant 0 : i32
    %c0_i32_1 = arith.constant 0 : i32
    return %c0_i32, %c0_i32_0, %arg1 : i32, i32, i32
  }
  func.func @transform_2(%arg0: i32, %arg1: i32) -> (i32, i32) {
    %c0_i32 = arith.constant 0 : i32
    %c0_i32_0 = arith.constant 0 : i32
    return %c0_i32, %arg1 : i32, i32
  }
  func.func @transform_3(%arg0: i32, %arg1: i32) -> (i32, i32, i32) {
    %c0_i32 = arith.constant 0 : i32
    %c0_i32_0 = arith.constant 0 : i32
    return %arg0, %c0_i32, %arg1 : i32, i32, i32
  }
}

module attributes {stable_mosaic.version = 11 : i64} {
  func.func @_conv3x3_kernel(%arg0: i32, %arg1: i32, %arg2: memref<1x110x128xbf16, #tpu.memory_space<vmem>>, %arg3: memref<9x128x128xbf16, #tpu.memory_space<vmem>>, %arg4: memref<1x128xf32, #tpu.memory_space<vmem>>, %arg5: memref<1x80x128xf32, #tpu.memory_space<vmem>>) attributes {dimension_semantics = [#tpu.dimension_semantics<parallel>, #tpu.dimension_semantics<parallel>], iteration_bounds = array<i64: 2, 1>, scalar_prefetch = 0 : i64, scratch_operands = 0 : i64, tpu.core_type = #tpu.core_type<tc>, window_params = [{transform_indices = @transform_0, window_bounds = array<i64: 1, 110, 128>}, {transform_indices = @transform_1, window_bounds = array<i64: 9, 128, 128>}, {transform_indices = @transform_2, window_bounds = array<i64: 1, 128>}, {transform_indices = @transform_3, window_bounds = array<i64: 1, 80, 128>}]} {
    %cst = arith.constant 0.000000e+00 : f32
    %0 = vector.broadcast %cst : f32 to vector<80x128xf32>
    %c0 = arith.constant 0 : index
    %c0_0 = arith.constant 0 : index
    %c0_1 = arith.constant 0 : index
    %1 = vector.load %arg2[%c0, %c0_0, %c0_1] : memref<1x110x128xbf16, #tpu.memory_space<vmem>>, vector<1x80x128xbf16>
    %2 = vector.shape_cast %1 : vector<1x80x128xbf16> to vector<80x128xbf16>
    %c0_2 = arith.constant 0 : index
    %c0_3 = arith.constant 0 : index
    %c0_4 = arith.constant 0 : index
    %3 = vector.load %arg3[%c0_2, %c0_3, %c0_4] : memref<9x128x128xbf16, #tpu.memory_space<vmem>>, vector<1x128x128xbf16>
    %4 = vector.shape_cast %3 : vector<1x128x128xbf16> to vector<128x128xbf16>
    %cst_5 = arith.constant dense<0.000000e+00> : vector<80x128xf32>
    %5 = tpu.matmul %2, %4, %cst_5 {dimension_numbers = #tpu.dot_dimension_numbers<[1], [0], [0], [1], [0, 0, 1, 1], [], []>} : vector<80x128xbf16>, vector<128x128xbf16>, vector<80x128xf32> -> vector<80x128xf32>
    %6 = arith.addf %0, %5 : vector<80x128xf32>
    %c0_6 = arith.constant 0 : index
    %c1 = arith.constant 1 : index
    %c0_7 = arith.constant 0 : index
    %7 = vector.load %arg2[%c0_6, %c1, %c0_7] : memref<1x110x128xbf16, #tpu.memory_space<vmem>>, vector<1x80x128xbf16>
    %8 = vector.shape_cast %7 : vector<1x80x128xbf16> to vector<80x128xbf16>
    %c1_8 = arith.constant 1 : index
    %c0_9 = arith.constant 0 : index
    %c0_10 = arith.constant 0 : index
    %9 = vector.load %arg3[%c1_8, %c0_9, %c0_10] : memref<9x128x128xbf16, #tpu.memory_space<vmem>>, vector<1x128x128xbf16>
    %10 = vector.shape_cast %9 : vector<1x128x128xbf16> to vector<128x128xbf16>
    %cst_11 = arith.constant dense<0.000000e+00> : vector<80x128xf32>
    %11 = tpu.matmul %8, %10, %cst_11 {dimension_numbers = #tpu.dot_dimension_numbers<[1], [0], [0], [1], [0, 0, 1, 1], [], []>} : vector<80x128xbf16>, vector<128x128xbf16>, vector<80x128xf32> -> vector<80x128xf32>
    %12 = arith.addf %6, %11 : vector<80x128xf32>
    %c0_12 = arith.constant 0 : index
    %c2 = arith.constant 2 : index
    %c0_13 = arith.constant 0 : index
    %13 = vector.load %arg2[%c0_12, %c2, %c0_13] : memref<1x110x128xbf16, #tpu.memory_space<vmem>>, vector<1x80x128xbf16>
    %14 = vector.shape_cast %13 : vector<1x80x128xbf16> to vector<80x128xbf16>
    %c2_14 = arith.constant 2 : index
    %c0_15 = arith.constant 0 : index
    %c0_16 = arith.constant 0 : index
    %15 = vector.load %arg3[%c2_14, %c0_15, %c0_16] : memref<9x128x128xbf16, #tpu.memory_space<vmem>>, vector<1x128x128xbf16>
    %16 = vector.shape_cast %15 : vector<1x128x128xbf16> to vector<128x128xbf16>
    %cst_17 = arith.constant dense<0.000000e+00> : vector<80x128xf32>
    %17 = tpu.matmul %14, %16, %cst_17 {dimension_numbers = #tpu.dot_dimension_numbers<[1], [0], [0], [1], [0, 0, 1, 1], [], []>} : vector<80x128xbf16>, vector<128x128xbf16>, vector<80x128xf32> -> vector<80x128xf32>
    %18 = arith.addf %12, %17 : vector<80x128xf32>
    %c0_18 = arith.constant 0 : index
    %c10 = arith.constant 10 : index
    %c0_19 = arith.constant 0 : index
    %19 = vector.load %arg2[%c0_18, %c10, %c0_19] : memref<1x110x128xbf16, #tpu.memory_space<vmem>>, vector<1x80x128xbf16>
    %20 = vector.shape_cast %19 : vector<1x80x128xbf16> to vector<80x128xbf16>
    %c3 = arith.constant 3 : index
    %c0_20 = arith.constant 0 : index
    %c0_21 = arith.constant 0 : index
    %21 = vector.load %arg3[%c3, %c0_20, %c0_21] : memref<9x128x128xbf16, #tpu.memory_space<vmem>>, vector<1x128x128xbf16>
    %22 = vector.shape_cast %21 : vector<1x128x128xbf16> to vector<128x128xbf16>
    %cst_22 = arith.constant dense<0.000000e+00> : vector<80x128xf32>
    %23 = tpu.matmul %20, %22, %cst_22 {dimension_numbers = #tpu.dot_dimension_numbers<[1], [0], [0], [1], [0, 0, 1, 1], [], []>} : vector<80x128xbf16>, vector<128x128xbf16>, vector<80x128xf32> -> vector<80x128xf32>
    %24 = arith.addf %18, %23 : vector<80x128xf32>
    %c0_23 = arith.constant 0 : index
    %c11 = arith.constant 11 : index
    %c0_24 = arith.constant 0 : index
    %25 = vector.load %arg2[%c0_23, %c11, %c0_24] : memref<1x110x128xbf16, #tpu.memory_space<vmem>>, vector<1x80x128xbf16>
    %26 = vector.shape_cast %25 : vector<1x80x128xbf16> to vector<80x128xbf16>
    %c4 = arith.constant 4 : index
    %c0_25 = arith.constant 0 : index
    %c0_26 = arith.constant 0 : index
    %27 = vector.load %arg3[%c4, %c0_25, %c0_26] : memref<9x128x128xbf16, #tpu.memory_space<vmem>>, vector<1x128x128xbf16>
    %28 = vector.shape_cast %27 : vector<1x128x128xbf16> to vector<128x128xbf16>
    %cst_27 = arith.constant dense<0.000000e+00> : vector<80x128xf32>
    %29 = tpu.matmul %26, %28, %cst_27 {dimension_numbers = #tpu.dot_dimension_numbers<[1], [0], [0], [1], [0, 0, 1, 1], [], []>} : vector<80x128xbf16>, vector<128x128xbf16>, vector<80x128xf32> -> vector<80x128xf32>
    %30 = arith.addf %24, %29 : vector<80x128xf32>
    %c0_28 = arith.constant 0 : index
    %c12 = arith.constant 12 : index
    %c0_29 = arith.constant 0 : index
    %31 = vector.load %arg2[%c0_28, %c12, %c0_29] : memref<1x110x128xbf16, #tpu.memory_space<vmem>>, vector<1x80x128xbf16>
    %32 = vector.shape_cast %31 : vector<1x80x128xbf16> to vector<80x128xbf16>
    %c5 = arith.constant 5 : index
    %c0_30 = arith.constant 0 : index
    %c0_31 = arith.constant 0 : index
    %33 = vector.load %arg3[%c5, %c0_30, %c0_31] : memref<9x128x128xbf16, #tpu.memory_space<vmem>>, vector<1x128x128xbf16>
    %34 = vector.shape_cast %33 : vector<1x128x128xbf16> to vector<128x128xbf16>
    %cst_32 = arith.constant dense<0.000000e+00> : vector<80x128xf32>
    %35 = tpu.matmul %32, %34, %cst_32 {dimension_numbers = #tpu.dot_dimension_numbers<[1], [0], [0], [1], [0, 0, 1, 1], [], []>} : vector<80x128xbf16>, vector<128x128xbf16>, vector<80x128xf32> -> vector<80x128xf32>
    %36 = arith.addf %30, %35 : vector<80x128xf32>
    %c0_33 = arith.constant 0 : index
    %c20 = arith.constant 20 : index
    %c0_34 = arith.constant 0 : index
    %37 = vector.load %arg2[%c0_33, %c20, %c0_34] : memref<1x110x128xbf16, #tpu.memory_space<vmem>>, vector<1x80x128xbf16>
    %38 = vector.shape_cast %37 : vector<1x80x128xbf16> to vector<80x128xbf16>
    %c6 = arith.constant 6 : index
    %c0_35 = arith.constant 0 : index
    %c0_36 = arith.constant 0 : index
    %39 = vector.load %arg3[%c6, %c0_35, %c0_36] : memref<9x128x128xbf16, #tpu.memory_space<vmem>>, vector<1x128x128xbf16>
    %40 = vector.shape_cast %39 : vector<1x128x128xbf16> to vector<128x128xbf16>
    %cst_37 = arith.constant dense<0.000000e+00> : vector<80x128xf32>
    %41 = tpu.matmul %38, %40, %cst_37 {dimension_numbers = #tpu.dot_dimension_numbers<[1], [0], [0], [1], [0, 0, 1, 1], [], []>} : vector<80x128xbf16>, vector<128x128xbf16>, vector<80x128xf32> -> vector<80x128xf32>
    %42 = arith.addf %36, %41 : vector<80x128xf32>
    %c0_38 = arith.constant 0 : index
    %c21 = arith.constant 21 : index
    %c0_39 = arith.constant 0 : index
    %43 = vector.load %arg2[%c0_38, %c21, %c0_39] : memref<1x110x128xbf16, #tpu.memory_space<vmem>>, vector<1x80x128xbf16>
    %44 = vector.shape_cast %43 : vector<1x80x128xbf16> to vector<80x128xbf16>
    %c7 = arith.constant 7 : index
    %c0_40 = arith.constant 0 : index
    %c0_41 = arith.constant 0 : index
    %45 = vector.load %arg3[%c7, %c0_40, %c0_41] : memref<9x128x128xbf16, #tpu.memory_space<vmem>>, vector<1x128x128xbf16>
    %46 = vector.shape_cast %45 : vector<1x128x128xbf16> to vector<128x128xbf16>
    %cst_42 = arith.constant dense<0.000000e+00> : vector<80x128xf32>
    %47 = tpu.matmul %44, %46, %cst_42 {dimension_numbers = #tpu.dot_dimension_numbers<[1], [0], [0], [1], [0, 0, 1, 1], [], []>} : vector<80x128xbf16>, vector<128x128xbf16>, vector<80x128xf32> -> vector<80x128xf32>
    %48 = arith.addf %42, %47 : vector<80x128xf32>
    %c0_43 = arith.constant 0 : index
    %c22 = arith.constant 22 : index
    %c0_44 = arith.constant 0 : index
    %49 = vector.load %arg2[%c0_43, %c22, %c0_44] : memref<1x110x128xbf16, #tpu.memory_space<vmem>>, vector<1x80x128xbf16>
    %50 = vector.shape_cast %49 : vector<1x80x128xbf16> to vector<80x128xbf16>
    %c8 = arith.constant 8 : index
    %c0_45 = arith.constant 0 : index
    %c0_46 = arith.constant 0 : index
    %51 = vector.load %arg3[%c8, %c0_45, %c0_46] : memref<9x128x128xbf16, #tpu.memory_space<vmem>>, vector<1x128x128xbf16>
    %52 = vector.shape_cast %51 : vector<1x128x128xbf16> to vector<128x128xbf16>
    %cst_47 = arith.constant dense<0.000000e+00> : vector<80x128xf32>
    %53 = tpu.matmul %50, %52, %cst_47 {dimension_numbers = #tpu.dot_dimension_numbers<[1], [0], [0], [1], [0, 0, 1, 1], [], []>} : vector<80x128xbf16>, vector<128x128xbf16>, vector<80x128xf32> -> vector<80x128xf32>
    %54 = arith.addf %48, %53 : vector<80x128xf32>
    %c0_48 = arith.constant 0 : index
    %c0_49 = arith.constant 0 : index
    %55 = vector.load %arg4[%c0_48, %c0_49] : memref<1x128xf32, #tpu.memory_space<vmem>>, vector<1x128xf32>
    %56 = vector.broadcast %55 : vector<1x128xf32> to vector<80x128xf32>
    %57 = arith.addf %54, %56 : vector<80x128xf32>
    %c0_50 = arith.constant 0 : index
    %c0_51 = arith.constant 0 : index
    %c0_52 = arith.constant 0 : index
    %58 = vector.load %arg5[%c0_50, %c0_51, %c0_52] : memref<1x80x128xf32, #tpu.memory_space<vmem>>, vector<1x80x128xf32>
    %59 = vector.shape_cast %58 : vector<1x80x128xf32> to vector<80x128xf32>
    %60 = vector.shape_cast %57 : vector<80x128xf32> to vector<1x80x128xf32>
    tpu.vector_store %arg5[%c0_50, %c0_51, %c0_52], %60 {strides = array<i32>} : memref<1x80x128xf32, #tpu.memory_space<vmem>>, vector<1x80x128xf32>,
    return
  }
  func.func @transform_0(%arg0: i32, %arg1: i32) -> (i32, i32, i32) {
    %c0_i32 = arith.constant 0 : i32
    %c0_i32_0 = arith.constant 0 : i32
    %c0_i32_1 = arith.constant 0 : i32
    return %arg0, %c0_i32, %c0_i32_0 : i32, i32, i32
  }
  func.func @transform_1(%arg0: i32, %arg1: i32) -> (i32, i32, i32) {
    %c0_i32 = arith.constant 0 : i32
    %c0_i32_0 = arith.constant 0 : i32
    %c0_i32_1 = arith.constant 0 : i32
    return %c0_i32, %c0_i32_0, %arg1 : i32, i32, i32
  }
  func.func @transform_2(%arg0: i32, %arg1: i32) -> (i32, i32) {
    %c0_i32 = arith.constant 0 : i32
    %c0_i32_0 = arith.constant 0 : i32
    return %c0_i32, %arg1 : i32, i32
  }
  func.func @transform_3(%arg0: i32, %arg1: i32) -> (i32, i32, i32) {
    %c0_i32 = arith.constant 0 : i32
    %c0_i32_0 = arith.constant 0 : i32
    return %arg0, %c0_i32, %arg1 : i32, i32, i32
  }
}

module attributes {stable_mosaic.version = 11 : i64} {
  func.func @_conv3x3_kernel(%arg0: i32, %arg1: i32, %arg2: memref<1x20x128xbf16, #tpu.memory_space<vmem>>, %arg3: memref<9x128x128xbf16, #tpu.memory_space<vmem>>, %arg4: memref<1x128xf32, #tpu.memory_space<vmem>>, %arg5: memref<1x8x128xf32, #tpu.memory_space<vmem>>) attributes {dimension_semantics = [#tpu.dimension_semantics<parallel>, #tpu.dimension_semantics<parallel>], iteration_bounds = array<i64: 2, 1>, scalar_prefetch = 0 : i64, scratch_operands = 0 : i64, tpu.core_type = #tpu.core_type<tc>, window_params = [{transform_indices = @transform_0, window_bounds = array<i64: 1, 20, 128>}, {transform_indices = @transform_1, window_bounds = array<i64: 9, 128, 128>}, {transform_indices = @transform_2, window_bounds = array<i64: 1, 128>}, {transform_indices = @transform_3, window_bounds = array<i64: 1, 8, 128>}]} {
    %cst = arith.constant 0.000000e+00 : f32
    %0 = vector.broadcast %cst : f32 to vector<8x128xf32>
    %c0 = arith.constant 0 : index
    %c0_0 = arith.constant 0 : index
    %c0_1 = arith.constant 0 : index
    %1 = vector.load %arg2[%c0, %c0_0, %c0_1] : memref<1x20x128xbf16, #tpu.memory_space<vmem>>, vector<1x8x128xbf16>
    %2 = vector.shape_cast %1 : vector<1x8x128xbf16> to vector<8x128xbf16>
    %c0_2 = arith.constant 0 : index
    %c0_3 = arith.constant 0 : index
    %c0_4 = arith.constant 0 : index
    %3 = vector.load %arg3[%c0_2, %c0_3, %c0_4] : memref<9x128x128xbf16, #tpu.memory_space<vmem>>, vector<1x128x128xbf16>
    %4 = vector.shape_cast %3 : vector<1x128x128xbf16> to vector<128x128xbf16>
    %cst_5 = arith.constant dense<0.000000e+00> : vector<8x128xf32>
    %5 = tpu.matmul %2, %4, %cst_5 {dimension_numbers = #tpu.dot_dimension_numbers<[1], [0], [0], [1], [0, 0, 1, 1], [], []>} : vector<8x128xbf16>, vector<128x128xbf16>, vector<8x128xf32> -> vector<8x128xf32>
    %6 = arith.addf %0, %5 : vector<8x128xf32>
    %c0_6 = arith.constant 0 : index
    %c1 = arith.constant 1 : index
    %c0_7 = arith.constant 0 : index
    %7 = vector.load %arg2[%c0_6, %c1, %c0_7] : memref<1x20x128xbf16, #tpu.memory_space<vmem>>, vector<1x8x128xbf16>
    %8 = vector.shape_cast %7 : vector<1x8x128xbf16> to vector<8x128xbf16>
    %c1_8 = arith.constant 1 : index
    %c0_9 = arith.constant 0 : index
    %c0_10 = arith.constant 0 : index
    %9 = vector.load %arg3[%c1_8, %c0_9, %c0_10] : memref<9x128x128xbf16, #tpu.memory_space<vmem>>, vector<1x128x128xbf16>
    %10 = vector.shape_cast %9 : vector<1x128x128xbf16> to vector<128x128xbf16>
    %cst_11 = arith.constant dense<0.000000e+00> : vector<8x128xf32>
    %11 = tpu.matmul %8, %10, %cst_11 {dimension_numbers = #tpu.dot_dimension_numbers<[1], [0], [0], [1], [0, 0, 1, 1], [], []>} : vector<8x128xbf16>, vector<128x128xbf16>, vector<8x128xf32> -> vector<8x128xf32>
    %12 = arith.addf %6, %11 : vector<8x128xf32>
    %c0_12 = arith.constant 0 : index
    %c2 = arith.constant 2 : index
    %c0_13 = arith.constant 0 : index
    %13 = vector.load %arg2[%c0_12, %c2, %c0_13] : memref<1x20x128xbf16, #tpu.memory_space<vmem>>, vector<1x8x128xbf16>
    %14 = vector.shape_cast %13 : vector<1x8x128xbf16> to vector<8x128xbf16>
    %c2_14 = arith.constant 2 : index
    %c0_15 = arith.constant 0 : index
    %c0_16 = arith.constant 0 : index
    %15 = vector.load %arg3[%c2_14, %c0_15, %c0_16] : memref<9x128x128xbf16, #tpu.memory_space<vmem>>, vector<1x128x128xbf16>
    %16 = vector.shape_cast %15 : vector<1x128x128xbf16> to vector<128x128xbf16>
    %cst_17 = arith.constant dense<0.000000e+00> : vector<8x128xf32>
    %17 = tpu.matmul %14, %16, %cst_17 {dimension_numbers = #tpu.dot_dimension_numbers<[1], [0], [0], [1], [0, 0, 1, 1], [], []>} : vector<8x128xbf16>, vector<128x128xbf16>, vector<8x128xf32> -> vector<8x128xf32>
    %18 = arith.addf %12, %17 : vector<8x128xf32>
    %c0_18 = arith.constant 0 : index
    %c4 = arith.constant 4 : index
    %c0_19 = arith.constant 0 : index
    %19 = vector.load %arg2[%c0_18, %c4, %c0_19] : memref<1x20x128xbf16, #tpu.memory_space<vmem>>, vector<1x8x128xbf16>
    %20 = vector.shape_cast %19 : vector<1x8x128xbf16> to vector<8x128xbf16>
    %c3 = arith.constant 3 : index
    %c0_20 = arith.constant 0 : index
    %c0_21 = arith.constant 0 : index
    %21 = vector.load %arg3[%c3, %c0_20, %c0_21] : memref<9x128x128xbf16, #tpu.memory_space<vmem>>, vector<1x128x128xbf16>
    %22 = vector.shape_cast %21 : vector<1x128x128xbf16> to vector<128x128xbf16>
    %cst_22 = arith.constant dense<0.000000e+00> : vector<8x128xf32>
    %23 = tpu.matmul %20, %22, %cst_22 {dimension_numbers = #tpu.dot_dimension_numbers<[1], [0], [0], [1], [0, 0, 1, 1], [], []>} : vector<8x128xbf16>, vector<128x128xbf16>, vector<8x128xf32> -> vector<8x128xf32>
    %24 = arith.addf %18, %23 : vector<8x128xf32>
    %c0_23 = arith.constant 0 : index
    %c5 = arith.constant 5 : index
    %c0_24 = arith.constant 0 : index
    %25 = vector.load %arg2[%c0_23, %c5, %c0_24] : memref<1x20x128xbf16, #tpu.memory_space<vmem>>, vector<1x8x128xbf16>
    %26 = vector.shape_cast %25 : vector<1x8x128xbf16> to vector<8x128xbf16>
    %c4_25 = arith.constant 4 : index
    %c0_26 = arith.constant 0 : index
    %c0_27 = arith.constant 0 : index
    %27 = vector.load %arg3[%c4_25, %c0_26, %c0_27] : memref<9x128x128xbf16, #tpu.memory_space<vmem>>, vector<1x128x128xbf16>
    %28 = vector.shape_cast %27 : vector<1x128x128xbf16> to vector<128x128xbf16>
    %cst_28 = arith.constant dense<0.000000e+00> : vector<8x128xf32>
    %29 = tpu.matmul %26, %28, %cst_28 {dimension_numbers = #tpu.dot_dimension_numbers<[1], [0], [0], [1], [0, 0, 1, 1], [], []>} : vector<8x128xbf16>, vector<128x128xbf16>, vector<8x128xf32> -> vector<8x128xf32>
    %30 = arith.addf %24, %29 : vector<8x128xf32>
    %c0_29 = arith.constant 0 : index
    %c6 = arith.constant 6 : index
    %c0_30 = arith.constant 0 : index
    %31 = vector.load %arg2[%c0_29, %c6, %c0_30] : memref<1x20x128xbf16, #tpu.memory_space<vmem>>, vector<1x8x128xbf16>
    %32 = vector.shape_cast %31 : vector<1x8x128xbf16> to vector<8x128xbf16>
    %c5_31 = arith.constant 5 : index
    %c0_32 = arith.constant 0 : index
    %c0_33 = arith.constant 0 : index
    %33 = vector.load %arg3[%c5_31, %c0_32, %c0_33] : memref<9x128x128xbf16, #tpu.memory_space<vmem>>, vector<1x128x128xbf16>
    %34 = vector.shape_cast %33 : vector<1x128x128xbf16> to vector<128x128xbf16>
    %cst_34 = arith.constant dense<0.000000e+00> : vector<8x128xf32>
    %35 = tpu.matmul %32, %34, %cst_34 {dimension_numbers = #tpu.dot_dimension_numbers<[1], [0], [0], [1], [0, 0, 1, 1], [], []>} : vector<8x128xbf16>, vector<128x128xbf16>, vector<8x128xf32> -> vector<8x128xf32>
    %36 = arith.addf %30, %35 : vector<8x128xf32>
    %c0_35 = arith.constant 0 : index
    %c8 = arith.constant 8 : index
    %c0_36 = arith.constant 0 : index
    %37 = vector.load %arg2[%c0_35, %c8, %c0_36] : memref<1x20x128xbf16, #tpu.memory_space<vmem>>, vector<1x8x128xbf16>
    %38 = vector.shape_cast %37 : vector<1x8x128xbf16> to vector<8x128xbf16>
    %c6_37 = arith.constant 6 : index
    %c0_38 = arith.constant 0 : index
    %c0_39 = arith.constant 0 : index
    %39 = vector.load %arg3[%c6_37, %c0_38, %c0_39] : memref<9x128x128xbf16, #tpu.memory_space<vmem>>, vector<1x128x128xbf16>
    %40 = vector.shape_cast %39 : vector<1x128x128xbf16> to vector<128x128xbf16>
    %cst_40 = arith.constant dense<0.000000e+00> : vector<8x128xf32>
    %41 = tpu.matmul %38, %40, %cst_40 {dimension_numbers = #tpu.dot_dimension_numbers<[1], [0], [0], [1], [0, 0, 1, 1], [], []>} : vector<8x128xbf16>, vector<128x128xbf16>, vector<8x128xf32> -> vector<8x128xf32>
    %42 = arith.addf %36, %41 : vector<8x128xf32>
    %c0_41 = arith.constant 0 : index
    %c9 = arith.constant 9 : index
    %c0_42 = arith.constant 0 : index
    %43 = vector.load %arg2[%c0_41, %c9, %c0_42] : memref<1x20x128xbf16, #tpu.memory_space<vmem>>, vector<1x8x128xbf16>
    %44 = vector.shape_cast %43 : vector<1x8x128xbf16> to vector<8x128xbf16>
    %c7 = arith.constant 7 : index
    %c0_43 = arith.constant 0 : index
    %c0_44 = arith.constant 0 : index
    %45 = vector.load %arg3[%c7, %c0_43, %c0_44] : memref<9x128x128xbf16, #tpu.memory_space<vmem>>, vector<1x128x128xbf16>
    %46 = vector.shape_cast %45 : vector<1x128x128xbf16> to vector<128x128xbf16>
    %cst_45 = arith.constant dense<0.000000e+00> : vector<8x128xf32>
    %47 = tpu.matmul %44, %46, %cst_45 {dimension_numbers = #tpu.dot_dimension_numbers<[1], [0], [0], [1], [0, 0, 1, 1], [], []>} : vector<8x128xbf16>, vector<128x128xbf16>, vector<8x128xf32> -> vector<8x128xf32>
    %48 = arith.addf %42, %47 : vector<8x128xf32>
    %c0_46 = arith.constant 0 : index
    %c10 = arith.constant 10 : index
    %c0_47 = arith.constant 0 : index
    %49 = vector.load %arg2[%c0_46, %c10, %c0_47] : memref<1x20x128xbf16, #tpu.memory_space<vmem>>, vector<1x8x128xbf16>
    %50 = vector.shape_cast %49 : vector<1x8x128xbf16> to vector<8x128xbf16>
    %c8_48 = arith.constant 8 : index
    %c0_49 = arith.constant 0 : index
    %c0_50 = arith.constant 0 : index
    %51 = vector.load %arg3[%c8_48, %c0_49, %c0_50] : memref<9x128x128xbf16, #tpu.memory_space<vmem>>, vector<1x128x128xbf16>
    %52 = vector.shape_cast %51 : vector<1x128x128xbf16> to vector<128x128xbf16>
    %cst_51 = arith.constant dense<0.000000e+00> : vector<8x128xf32>
    %53 = tpu.matmul %50, %52, %cst_51 {dimension_numbers = #tpu.dot_dimension_numbers<[1], [0], [0], [1], [0, 0, 1, 1], [], []>} : vector<8x128xbf16>, vector<128x128xbf16>, vector<8x128xf32> -> vector<8x128xf32>
    %54 = arith.addf %48, %53 : vector<8x128xf32>
    %c0_52 = arith.constant 0 : index
    %c0_53 = arith.constant 0 : index
    %55 = vector.load %arg4[%c0_52, %c0_53] : memref<1x128xf32, #tpu.memory_space<vmem>>, vector<1x128xf32>
    %56 = vector.broadcast %55 : vector<1x128xf32> to vector<8x128xf32>
    %57 = arith.addf %54, %56 : vector<8x128xf32>
    %c0_54 = arith.constant 0 : index
    %c0_55 = arith.constant 0 : index
    %c0_56 = arith.constant 0 : index
    %58 = vector.load %arg5[%c0_54, %c0_55, %c0_56] : memref<1x8x128xf32, #tpu.memory_space<vmem>>, vector<1x8x128xf32>
    %59 = vector.shape_cast %58 : vector<1x8x128xf32> to vector<8x128xf32>
    %60 = vector.shape_cast %57 : vector<8x128xf32> to vector<1x8x128xf32>
    tpu.vector_store %arg5[%c0_54, %c0_55, %c0_56], %60 {strides = array<i32>} : memref<1x8x128xf32, #tpu.memory_space<vmem>>, vector<1x8x128xf32>,
    return
  }
  func.func @transform_0(%arg0: i32, %arg1: i32) -> (i32, i32, i32) {
    %c0_i32 = arith.constant 0 : i32
    %c0_i32_0 = arith.constant 0 : i32
    %c0_i32_1 = arith.constant 0 : i32
    return %arg0, %c0_i32, %c0_i32_0 : i32, i32, i32
  }
  func.func @transform_1(%arg0: i32, %arg1: i32) -> (i32, i32, i32) {
    %c0_i32 = arith.constant 0 : i32
    %c0_i32_0 = arith.constant 0 : i32
    %c0_i32_1 = arith.constant 0 : i32
    return %c0_i32, %c0_i32_0, %arg1 : i32, i32, i32
  }
  func.func @transform_2(%arg0: i32, %arg1: i32) -> (i32, i32) {
    %c0_i32 = arith.constant 0 : i32
    %c0_i32_0 = arith.constant 0 : i32
    return %c0_i32, %arg1 : i32, i32
  }
  func.func @transform_3(%arg0: i32, %arg1: i32) -> (i32, i32, i32) {
    %c0_i32 = arith.constant 0 : i32
    %c0_i32_0 = arith.constant 0 : i32
    return %arg0, %c0_i32, %arg1 : i32, i32, i32
  }
}

</mosaic_0001>

<bundles_post_ra>
// kernel: pyramid_features.8
= control target key start
LH: loop header
LB: loop body
LE: loop exit
PB: predicated region body
PF: predicated region fallthrough
CT: control target
= control target key end

     0   :  { %s304_s1 = inlined_call_operand.vmem [shape: bf16[128,128], index: 1, kind: input, shape index: {}]   ;;  %s305_s0 = inlined_call_operand.vmem [shape: bf16[32,128], index: 0, kind: input, shape index: {}]   ;;  %s306_s2 = inlined_call_operand.vmem [shape: f32[1,128], index: 2, kind: input, shape index: {}]   ;;  %s307_s3 = inlined_call_operand.vmem [shape: bf16[32,128], index: 3, kind: output, shape index: {}]  }
   0x1   :  { %v235_v0 = vld [vmem:[%s304_s1 + $0x38] sm:$0xff]   ;;  %v236_v1 = vld [vmem:[%s304_s1 + $0x30] sm:$0xff]   ;;  %v237_v2 = vld [vmem:[%s304_s1 + $0x28] sm:$0xff]  }
   0x2   :  { %215 = vmatprep.subr.bf16.mxu0 %v235_v0  ;;  %v238_v3 = vld [vmem:[%s304_s1 + $0x20] sm:$0xff]   ;;  %v239_v5 = vld [vmem:[%s304_s1 + $0x18] sm:$0xff]   ;;  %v240_v6 = vld [vmem:[%s304_s1 + $0x10] sm:$0xff]  }
   0x3   :  { %216 = vmatpush3.bf16.msra.mxu0 %v235_v0  ;;  %v243_v4 = vld [vmem:[%s305_s0] sm:$0xff]   ;;  %v241_v7 = vld [vmem:[%s304_s1 + $0x8] sm:$0xff]  }
   0x4   :  { %217 = vmatprep.subr.bf16.mxu0 %v236_v1  ;;  %231 = vmatprep.mubr.bf16.mxu0 %v243_v4  ;;  %v242_v8 = vld [vmem:[%s304_s1] sm:$0xff]   ;;  %v244_v9 = vld [vmem:[%s305_s0 + $0x8] sm:$0xff]  }
   0x5   :  { %v175_v11 = vld [vmem:[%s306_s2] ss:$0 sm:$0xff] }
   0x7   :  { %218 = vmatpush3.bf16.msra.mxu0 %v236_v1 }
   0x8   :  { %219 = vmatprep.subr.bf16.mxu0 %v237_v2 }
   0xb   :  { %220 = vmatpush3.bf16.msra.mxu0 %v237_v2 }
   0xc   :  { %221 = vmatprep.subr.bf16.mxu0 %v238_v3 }
   0xf   :  { %222 = vmatpush3.bf16.msra.mxu0 %v238_v3 }
  0x10   :  { %223 = vmatprep.subr.bf16.mxu0 %v239_v5 }
  0x13   :  { %224 = vmatpush3.bf16.msra.mxu0 %v239_v5 }
  0x14   :  { %225 = vmatprep.subr.bf16.mxu0 %v240_v6 }
  0x17   :  { %226 = vmatpush3.bf16.msra.mxu0 %v240_v6 }
  0x18   :  { %227 = vmatprep.subr.bf16.mxu0 %v241_v7 }
  0x1b   :  { %228 = vmatpush3.bf16.msra.mxu0 %v241_v7 }
  0x1c   :  { %229 = vmatprep.subr.bf16.mxu0 %v242_v8 }
  0x1f   :  { %230 = vmatpush3.bf16.msra.mxu0 %v242_v8 }
  0x22   :  { %232 = vmatmul.mubr.bf16.vlgmr.msra.gmra.mxu0 %v244_v9 }
  0xe2   :  { %v233_v10 = vpop.f32.mrf.mxu0 }
  0xe3   :  { %v145_v14 = vadd.f32 %v233_v10, %v175_v11 }
  0xe4   :  { %v136_v12 = vpop.f32.mrf.mxu0 }
  0xe5   :  { %v137_v17 = vadd.f32 %v175_v11, %v136_v12 }
  0xe6   :  { %v234_v13 = vpop.f32.mrf.mxu0 }
  0xe7   :  { %v148_v15 = vadd.f32 %v234_v13, %v175_v11 }
  0xe8   :  { %v139_v16 = vpop.f32.mrf.mxu0 }
  0xe9   :  { %v202_v18 = vpack.c.bf16 %v148_v15, %v145_v14  ;;  %v140_v19 = vadd.f32 %v175_v11, %v139_v16 }
  0xeb   :  { %204 = vst [vmem:[%s307_s3 + $0x8] sm:$0xff] %v202_v18   ;;  %v197_v20 = vpack.c.bf16 %v140_v19, %v137_v17 }
  0xed   :  { %198 = vst [vmem:[%s307_s3] sm:$0xff] %v197_v20  }

// kernel: pyramid_features.10
= control target key start
LH: loop header
LB: loop body
LE: loop exit
PB: predicated region body
PF: predicated region fallthrough
CT: control target
= control target key end

     0   :  { %vm113_vm0 = vcmask 523264   ;;  %s700_s1 = inlined_call_operand.vmem [shape: bf16[64,128], index: 1, kind: input, shape index: {}]   ;;  %s701_s0 = inlined_call_operand.vmem [shape: bf16[128,64], index: 0, kind: input, shape index: {}]   ;;  %s702_s2 = inlined_call_operand.vmem [shape: f32[1,128], index: 2, kind: input, shape index: {}]   ;;  %s703_s3 = inlined_call_operand.vmem [shape: bf16[128,128], index: 3, kind: input, shape index: {}]   ;;  %s704_s4 = inlined_call_operand.vmem [shape: bf16[128,128], index: 4, kind: output, shape index: {}]  }
   0x1   :  { %v550_v0 = vld [vmem:[%s700_s1 + $0x18] sm:$0xff]   ;;  %v551_v1 = vld [vmem:[%s700_s1 + $0x10] sm:$0xff]   ;;  %v552_v2 = vld [vmem:[%s700_s1 + $0x8] sm:$0xff]  }
   0x2   :  { %518 = vmatprep.subr.bf16.mxu0 %v550_v0  ;;  %542 = vmatprep.subr.bf16.mxu1 %v550_v0  ;;  %v554_v3 = vld [vmem:[%s701_s0] sm:$0xff]   ;;  %v556_v6 = vld [vmem:[%s701_s0 + $0x8] sm:$0xff]   ;;  %v558_v8 = vld [vmem:[%s701_s0 + $0x10] sm:$0xff]  }
   0x3   :  { %519 = vmatpush3.bf16.msra.mxu0 %v550_v0  ;;  %546 = vmatpush3.bf16.msra.mxu1 %v550_v0  ;;  %v555_v4 = vld [vmem:[%s701_s0 + $0x20] sm:$0xff]   ;;  %v557_v7 = vld [vmem:[%s701_s0 + $0x28] sm:$0xff]   ;;  %v559_v9 = vld [vmem:[%s701_s0 + $0x30] sm:$0xff]  }
   0x4   :  { %520 = vmatprep.subr.bf16.mxu0 %v551_v1  ;;  %543 = vmatprep.subr.bf16.mxu1 %v551_v1  ;;  %v553_v5 = vld [vmem:[%s700_s1] sm:$0xff]   ;;  %v560_v10 = vld [vmem:[%s701_s0 + $0x18] sm:$0xff]   ;;  %v492_v13 = vld [vmem:[%s703_s3 + $0x8] sm:$0xff]  }
   0x5   :  { %526 = vmatprep.mubr.msk.bf16.mxu0 %vm113_vm0, %v554_v3  ;;  %534 = vmatprep.mubr.msk.bf16.mxu1 %vm113_vm0, %v555_v4  ;;  %v561_v11 = vld [vmem:[%s701_s0 + $0x38] sm:$0xff]   ;;  %v634_v12 = vld [vmem:[%s702_s2] ss:$0 sm:$0xff]  ;;  %v496_v14 = vld [vmem:[%s703_s3 + $0x28] sm:$0xff]   ;;  %v426_v20 = vunpack.c.l.bf16 %v492_v13  ;;  %v427_v25 = vunpack.c.h.bf16 %v492_v13 }
   0x6   :  { %v421_v17 = vld [vmem:[%s703_s3] sm:$0xff]   ;;  %v442_v22 = vunpack.c.l.bf16 %v496_v14  ;;  %v443_v26 = vunpack.c.h.bf16 %v496_v14  ;;  %v494_v45 = vld [vmem:[%s703_s3 + $0x18] sm:$0xff]   ;;  %v493_v55 = vld [vmem:[%s703_s3 + $0x10] sm:$0xff]  }
   0x7   :  { %521 = vmatpush3.bf16.msra.mxu0 %v551_v1  ;;  %547 = vmatpush3.bf16.msra.mxu1 %v551_v1  ;;  %v495_v18 = vld [vmem:[%s703_s3 + $0x20] sm:$0xff]   ;;  %v422_v28 = vunpack.c.l.bf16 %v421_v17  ;;  %v423_v35 = vunpack.c.h.bf16 %v421_v17  ;;  %v498_v46 = vld [vmem:[%s703_s3 + $0x38] sm:$0xff]   ;;  %v497_v56 = vld [vmem:[%s703_s3 + $0x30] sm:$0xff]   ;;  %v434_v58 = vunpack.c.l.bf16 %v494_v45  ;;  %v435_v1 = vunpack.c.h.bf16 %v494_v45 }
   0x8   :  { %522 = vmatprep.subr.bf16.mxu0 %v552_v2  ;;  %544 = vmatprep.subr.bf16.mxu1 %v552_v2  ;;  %v438_v30 = vunpack.c.l.bf16 %v495_v18  ;;  %v439_v36 = vunpack.c.h.bf16 %v495_v18  ;;  %v450_v60 = vunpack.c.l.bf16 %v498_v46  ;;  %v430_v4 = vunpack.c.l.bf16 %v493_v55 }
   0x9   :  { %v447_v13 = vunpack.c.h.bf16 %v497_v56 }
   0xb   :  { %523 = vmatpush3.bf16.msra.mxu0 %v552_v2  ;;  %548 = vmatpush3.bf16.msra.mxu1 %v552_v2  ;;  %v451_v2 = vunpack.c.h.bf16 %v498_v46 }
   0xc   :  { %524 = vmatprep.subr.bf16.mxu0 %v553_v5  ;;  %545 = vmatprep.subr.bf16.mxu1 %v553_v5 }
   0xf   :  { %525 = vmatpush3.bf16.msra.mxu0 %v553_v5  ;;  %549 = vmatpush3.bf16.msra.mxu1 %v553_v5 }
  0x12   :  { %527 = vmatmul.mubr.msk.bf16.vlgmr.msra.gmra.mxu0 %vm113_vm0, %v556_v6  ;;  %535 = vmatmul.mubr.msk.bf16.vlgmr.msra.gmra.mxu1 %vm113_vm0, %v557_v7  ;;  %v446_v6 = vunpack.c.l.bf16 %v497_v56 }
  0x13   :  { %530 = vmatprep.mubr.msk.bf16.mxu0 %vm113_vm0, %v558_v8  ;;  %538 = vmatprep.mubr.msk.bf16.mxu1 %vm113_vm0, %v559_v9 }
  0x1a   :  { %531 = vmatmul.mubr.msk.bf16.gmra.mxu0 %vm113_vm0, %v560_v10  ;;  %539 = vmatmul.mubr.msk.bf16.gmra.mxu1 %vm113_vm0, %v561_v11  ;;  %v431_v11 = vunpack.c.h.bf16 %v493_v55 }
  0xd2   :  { %v528_v15 = vpop.f32.mrf.mxu0  ;;  %v536_v16 = vpop.f32.mrf.mxu1 }
  0xd3   :  { %v181_v19 = vadd.f32 %v528_v15, %v634_v12  ;;  %v213_v21 = vadd.f32 %v536_v16, %v634_v12 }
  0xd4   :  { %v172_v23 = vpop.f32.mrf.mxu0  ;;  %v204_v24 = vpop.f32.mrf.mxu1 }
  0xd5   :  { %v173_v27 = vadd.f32 %v634_v12, %v172_v23  ;;  %v205_v29 = vadd.f32 %v634_v12, %v204_v24  ;;  %v269_v37 = vadd.f32 %v426_v20, %v181_v19  ;;  %v277_v38 = vadd.f32 %v442_v22, %v213_v21 }
  0xd6   :  { %v529_v31 = vpop.f32.mrf.mxu0  ;;  %v537_v32 = vpop.f32.mrf.mxu1 }
  0xd7   :  { %v184_v33 = vadd.f32 %v529_v31, %v634_v12  ;;  %v216_v34 = vadd.f32 %v537_v32, %v634_v12  ;;  %v267_v47 = vadd.f32 %v422_v28, %v173_v27  ;;  %v275_v48 = vadd.f32 %v438_v30, %v205_v29 }
  0xd8   :  { %v175_v39 = vpop.f32.mrf.mxu0  ;;  %v207_v40 = vpop.f32.mrf.mxu1 }
  0xd9   :  { %v270_v41 = vadd.f32 %v427_v25, %v184_v33  ;;  %v278_v42 = vadd.f32 %v443_v26, %v216_v34  ;;  %v176_v43 = vadd.f32 %v634_v12, %v175_v39  ;;  %v208_v44 = vadd.f32 %v634_v12, %v207_v40 }
  0xda   :  { %v532_v49 = vpop.f32.mrf.mxu0  ;;  %v540_v50 = vpop.f32.mrf.mxu1 }
  0xdb   :  { %v460_v51 = vpack.c.bf16 %v270_v41, %v269_v37  ;;  %v480_v52 = vpack.c.bf16 %v278_v42, %v277_v38  ;;  %v268_v53 = vadd.f32 %v423_v35, %v176_v43  ;;  %v276_v54 = vadd.f32 %v439_v36, %v208_v44 }
  0xdc   :  { %v197_v57 = vadd.f32 %v532_v49, %v634_v12  ;;  %v229_v59 = vadd.f32 %v540_v50, %v634_v12  ;;  %v188_v61 = vpop.f32.mrf.mxu0  ;;  %v220_v62 = vpop.f32.mrf.mxu1 }
  0xdd   :  { %499 = vst [vmem:[%s704_s4 + $0x8] sm:$0xff] %v460_v51   ;;  %503 = vst [vmem:[%s704_s4 + $0x28] sm:$0xff] %v480_v52   ;;  %v455_v63 = vpack.c.bf16 %v268_v53, %v267_v47  ;;  %v475_v0 = vpack.c.bf16 %v276_v54, %v275_v48  ;;  %v189_v3 = vadd.f32 %v634_v12, %v188_v61 }
  0xde   :  { %v221_v5 = vadd.f32 %v634_v12, %v220_v62  ;;  %v533_v7 = vpop.f32.mrf.mxu0  ;;  %v541_v8 = vpop.f32.mrf.mxu1  ;;  %v273_v14 = vadd.f32 %v434_v58, %v197_v57  ;;  %v281_v15 = vadd.f32 %v450_v60, %v229_v59 }
  0xdf   :  { %456 = vst [vmem:[%s704_s4] sm:$0xff] %v455_v63   ;;  %502 = vst [vmem:[%s704_s4 + $0x20] sm:$0xff] %v475_v0   ;;  %v200_v9 = vadd.f32 %v533_v7, %v634_v12  ;;  %v232_v10 = vadd.f32 %v541_v8, %v634_v12  ;;  %v271_v22 = vadd.f32 %v430_v4, %v189_v3 }
  0xe0   :  { %v191_v16 = vpop.f32.mrf.mxu0  ;;  %v223_v17 = vpop.f32.mrf.mxu1  ;;  %v279_v23 = vadd.f32 %v446_v6, %v221_v5 }
  0xe1   :  { %v274_v18 = vadd.f32 %v435_v1, %v200_v9  ;;  %v282_v19 = vadd.f32 %v451_v2, %v232_v10  ;;  %v192_v20 = vadd.f32 %v634_v12, %v191_v16  ;;  %v224_v21 = vadd.f32 %v634_v12, %v223_v17 }
  0xe3   :  { %v470_v24 = vpack.c.bf16 %v274_v18, %v273_v14  ;;  %v490_v25 = vpack.c.bf16 %v282_v19, %v281_v15  ;;  %v272_v26 = vadd.f32 %v431_v11, %v192_v20  ;;  %v280_v27 = vadd.f32 %v447_v13, %v224_v21 }
  0xe5   :  { %501 = vst [vmem:[%s704_s4 + $0x18] sm:$0xff] %v470_v24   ;;  %505 = vst [vmem:[%s704_s4 + $0x38] sm:$0xff] %v490_v25   ;;  %v465_v28 = vpack.c.bf16 %v272_v26, %v271_v22  ;;  %v485_v29 = vpack.c.bf16 %v280_v27, %v279_v23 }
  0xe7   :  { %500 = vst [vmem:[%s704_s4 + $0x10] sm:$0xff] %v465_v28   ;;  %504 = vst [vmem:[%s704_s4 + $0x30] sm:$0xff] %v485_v29  }

// kernel: pyramid_features.12
= control target key start
LH: loop header
LB: loop body
LE: loop exit
PB: predicated region body
PF: predicated region fallthrough
CT: control target
= control target key end

     0   :  { %vm265_vm0 = vcmask 261120   ;;  %s2272_s1 = inlined_call_operand.vmem [shape: bf16[32,128], index: 1, kind: input, shape index: {}]   ;;  %s2273_s0 = inlined_call_operand.vmem [shape: bf16[512,32], index: 0, kind: input, shape index: {}]   ;;  %s2274_s2 = inlined_call_operand.vmem [shape: f32[1,128], index: 2, kind: input, shape index: {}]   ;;  %s2275_s3 = inlined_call_operand.vmem [shape: bf16[512,128], index: 3, kind: input, shape index: {}]   ;;  %s2276_s4 = inlined_call_operand.vmem [shape: bf16[512,128], index: 4, kind: output, shape index: {}]  }
   0x1   :  { %v1818_v0 = vld [vmem:[%s2272_s1 + $0x8] sm:$0xff]   ;;  %v1819_v1 = vld [vmem:[%s2272_s1] sm:$0xff]   ;;  %v1824_v6 = vld [vmem:[%s2273_s0 + $0x10] sm:$0xff]  }
   0x2   :  { %1746 = vmatprep.subr.bf16.mxu0 %v1818_v0  ;;  %1814 = vmatprep.subr.bf16.mxu1 %v1818_v0  ;;  %v1820_v2 = vld [vmem:[%s2273_s0] sm:$0xff]   ;;  %v1822_v4 = vld [vmem:[%s2273_s0 + $0x8] sm:$0xff]   ;;  %v1825_v7 = vld [vmem:[%s2273_s0 + $0x90] sm:$0xff]  }
   0x3   :  { %1747 = vmatpush3.bf16.msra.mxu0 %v1818_v0  ;;  %1816 = vmatpush3.bf16.msra.mxu1 %v1818_v0  ;;  %v1821_v3 = vld [vmem:[%s2273_s0 + $0x80] sm:$0xff]   ;;  %v1823_v5 = vld [vmem:[%s2273_s0 + $0x88] sm:$0xff]   ;;  %v1826_v8 = vld [vmem:[%s2273_s0 + $0x18] sm:$0xff]  }
   0x4   :  { %1748 = vmatprep.subr.bf16.mxu0 %v1819_v1  ;;  %1815 = vmatprep.subr.bf16.mxu1 %v1819_v1  ;;  %v1827_v9 = vld [vmem:[%s2273_s0 + $0x98] sm:$0xff]   ;;  %v1828_v10 = vld [vmem:[%s2273_s0 + $0x20] sm:$0xff]   ;;  %v1830_v12 = vld [vmem:[%s2273_s0 + $0x28] sm:$0xff]  }
   0x5   :  { %1750 = vmatprep.mubr.msk.bf16.mxu0 %vm265_vm0, %v1820_v2  ;;  %1782 = vmatprep.mubr.msk.bf16.mxu1 %vm265_vm0, %v1821_v3  ;;  %v1829_v11 = vld [vmem:[%s2273_s0 + $0xa0] sm:$0xff]   ;;  %v1831_v13 = vld [vmem:[%s2273_s0 + $0xa8] sm:$0xff]   ;;  %v1832_v14 = vld [vmem:[%s2273_s0 + $0x30] sm:$0xff]  }
   0x6   :  { %v1833_v15 = vld [vmem:[%s2273_s0 + $0xb0] sm:$0xff]   ;;  %v1834_v16 = vld [vmem:[%s2273_s0 + $0x38] sm:$0xff]   ;;  %v1836_v18 = vld [vmem:[%s2273_s0 + $0x40] sm:$0xff]  }
   0x7   :  { %1749 = vmatpush3.bf16.msra.mxu0 %v1819_v1  ;;  %1817 = vmatpush3.bf16.msra.mxu1 %v1819_v1  ;;  %v1835_v17 = vld [vmem:[%s2273_s0 + $0xb8] sm:$0xff]   ;;  %v1837_v19 = vld [vmem:[%s2273_s0 + $0xc0] sm:$0xff]   ;;  %v1838_v20 = vld [vmem:[%s2273_s0 + $0x48] sm:$0xff]  }
   0x8   :  { %v1839_v21 = vld [vmem:[%s2273_s0 + $0xc8] sm:$0xff]   ;;  %v1840_v22 = vld [vmem:[%s2273_s0 + $0x50] sm:$0xff]   ;;  %v1842_v24 = vld [vmem:[%s2273_s0 + $0x58] sm:$0xff]  }
   0x9   :  { %v1841_v23 = vld [vmem:[%s2273_s0 + $0xd0] sm:$0xff]   ;;  %v1843_v25 = vld [vmem:[%s2273_s0 + $0xd8] sm:$0xff]   ;;  %v1844_v26 = vld [vmem:[%s2273_s0 + $0x60] sm:$0xff]  }
   0xa   :  { %1751 = vmatmul.mubr.msk.bf16.vlgmr.msra.gmra.mxu0 %vm265_vm0, %v1822_v4  ;;  %1783 = vmatmul.mubr.msk.bf16.vlgmr.msra.gmra.mxu1 %vm265_vm0, %v1823_v5  ;;  %v1845_v27 = vld [vmem:[%s2273_s0 + $0xe0] sm:$0xff]   ;;  %v1846_v28 = vld [vmem:[%s2273_s0 + $0x68] sm:$0xff]   ;;  %v1848_v30 = vld [vmem:[%s2273_s0 + $0x70] sm:$0xff]  }
   0xb   :  { %1754 = vmatprep.mubr.msk.bf16.mxu0 %vm265_vm0, %v1824_v6  ;;  %1786 = vmatprep.mubr.msk.bf16.mxu1 %vm265_vm0, %v1825_v7  ;;  %v1847_v29 = vld [vmem:[%s2273_s0 + $0xe8] sm:$0xff]   ;;  %v1849_v31 = vld [vmem:[%s2273_s0 + $0xf0] sm:$0xff]   ;;  %v1850_v32 = vld [vmem:[%s2273_s0 + $0x78] sm:$0xff]  }
   0xc   :  { %v1851_v33 = vld [vmem:[%s2273_s0 + $0xf8] sm:$0xff]   ;;  %v2014_v34 = vld [vmem:[%s2274_s2] ss:$0 sm:$0xff]  ;;  %v1650_v35 = vld [vmem:[%s2275_s3 + $0x8] sm:$0xff]  }
   0xd   :  { %v1666_v36 = vld [vmem:[%s2275_s3 + $0x88] sm:$0xff]   ;;  %v1363_v39 = vld [vmem:[%s2275_s3] sm:$0xff]   ;;  %v1368_v42 = vunpack.c.l.bf16 %v1650_v35  ;;  %v1369_v47 = vunpack.c.h.bf16 %v1650_v35  ;;  %v1652_v3 = vld [vmem:[%s2275_s3 + $0x18] sm:$0xff]  }
   0xe   :  { %v1665_v40 = vld [vmem:[%s2275_s3 + $0x80] sm:$0xff]   ;;  %v1432_v44 = vunpack.c.l.bf16 %v1666_v36  ;;  %v1433_v48 = vunpack.c.h.bf16 %v1666_v36  ;;  %v1364_v50 = vunpack.c.l.bf16 %v1363_v39  ;;  %v1365_v57 = vunpack.c.h.bf16 %v1363_v39  ;;  %v1668_v4 = vld [vmem:[%s2275_s3 + $0x98] sm:$0xff]  }
   0xf   :  { %v1428_v52 = vunpack.c.l.bf16 %v1665_v40  ;;  %v1429_v58 = vunpack.c.h.bf16 %v1665_v40 }
  0x12   :  { %1755 = vmatmul.mubr.msk.bf16.gmra.mxu0 %vm265_vm0, %v1826_v8  ;;  %1787 = vmatmul.mubr.msk.bf16.gmra.mxu1 %vm265_vm0, %v1827_v9 }
  0x13   :  { %1758 = vmatprep.mubr.msk.bf16.mxu0 %vm265_vm0, %v1828_v10  ;;  %1790 = vmatprep.mubr.msk.bf16.mxu1 %vm265_vm0, %v1829_v11 }
  0x1a   :  { %1759 = vmatmul.mubr.msk.bf16.gmra.mxu0 %vm265_vm0, %v1830_v12  ;;  %1791 = vmatmul.mubr.msk.bf16.gmra.mxu1 %vm265_vm0, %v1831_v13  ;;  %v1651_v13 = vld [vmem:[%s2275_s3 + $0x10] sm:$0xff]  }
  0x1b   :  { %1762 = vmatprep.mubr.msk.bf16.mxu0 %vm265_vm0, %v1832_v14  ;;  %1794 = vmatprep.mubr.msk.bf16.mxu1 %vm265_vm0, %v1833_v15  ;;  %v1667_v14 = vld [vmem:[%s2275_s3 + $0x90] sm:$0xff]  }
  0x1c   :  { %v1437_v35 = vunpack.c.h.bf16 %v1667_v14 }
  0x22   :  { %1763 = vmatmul.mubr.msk.bf16.gmra.mxu0 %vm265_vm0, %v1834_v16  ;;  %1795 = vmatmul.mubr.msk.bf16.gmra.mxu1 %vm265_vm0, %v1835_v17  ;;  %v1376_v16 = vunpack.c.l.bf16 %v1652_v3 }
  0x23   :  { %1766 = vmatprep.mubr.msk.bf16.mxu0 %vm265_vm0, %v1836_v18  ;;  %1798 = vmatprep.mubr.msk.bf16.mxu1 %vm265_vm0, %v1837_v19  ;;  %v1440_v18 = vunpack.c.l.bf16 %v1668_v4 }
  0x2a   :  { %1767 = vmatmul.mubr.msk.bf16.gmra.mxu0 %vm265_vm0, %v1838_v20  ;;  %1799 = vmatmul.mubr.msk.bf16.gmra.mxu1 %vm265_vm0, %v1839_v21 }
  0x2b   :  { %1770 = vmatprep.mubr.msk.bf16.mxu0 %vm265_vm0, %v1840_v22  ;;  %1802 = vmatprep.mubr.msk.bf16.mxu1 %vm265_vm0, %v1841_v23  ;;  %v1377_v23 = vunpack.c.h.bf16 %v1652_v3 }
  0x32   :  { %1771 = vmatmul.mubr.msk.bf16.gmra.mxu0 %vm265_vm0, %v1842_v24  ;;  %1803 = vmatmul.mubr.msk.bf16.gmra.mxu1 %vm265_vm0, %v1843_v25  ;;  %v1441_v24 = vunpack.c.h.bf16 %v1668_v4 }
  0x33   :  { %1774 = vmatprep.mubr.msk.bf16.mxu0 %vm265_vm0, %v1844_v26  ;;  %1806 = vmatprep.mubr.msk.bf16.mxu1 %vm265_vm0, %v1845_v27  ;;  %v1372_v26 = vunpack.c.l.bf16 %v1651_v13 }
  0x3a   :  { %1775 = vmatmul.mubr.msk.bf16.gmra.mxu0 %vm265_vm0, %v1846_v28  ;;  %1807 = vmatmul.mubr.msk.bf16.gmra.mxu1 %vm265_vm0, %v1847_v29  ;;  %v1436_v28 = vunpack.c.l.bf16 %v1667_v14 }
  0x3b   :  { %1778 = vmatprep.mubr.msk.bf16.mxu0 %vm265_vm0, %v1848_v30  ;;  %1810 = vmatprep.mubr.msk.bf16.mxu1 %vm265_vm0, %v1849_v31 }
  0x42   :  { %1779 = vmatmul.mubr.msk.bf16.gmra.mxu0 %vm265_vm0, %v1850_v32  ;;  %1811 = vmatmul.mubr.msk.bf16.gmra.mxu1 %vm265_vm0, %v1851_v33  ;;  %v1373_v33 = vunpack.c.h.bf16 %v1651_v13 }
  0xca   :  { %v1752_v37 = vpop.f32.mrf.mxu0  ;;  %v1784_v38 = vpop.f32.mrf.mxu1 }
  0xcb   :  { %v405_v41 = vadd.f32 %v1752_v37, %v2014_v34  ;;  %v533_v43 = vadd.f32 %v1784_v38, %v2014_v34 }
  0xcc   :  { %v396_v45 = vpop.f32.mrf.mxu0  ;;  %v524_v46 = vpop.f32.mrf.mxu1 }
  0xcd   :  { %v397_v49 = vadd.f32 %v2014_v34, %v396_v45  ;;  %v525_v51 = vadd.f32 %v2014_v34, %v524_v46  ;;  %v781_v59 = vadd.f32 %v1368_v42, %v405_v41  ;;  %v813_v60 = vadd.f32 %v1432_v44, %v533_v43  ;;  %v1654_v44 = vld [vmem:[%s2275_s3 + $0x28] sm:$0xff]  }
  0xce   :  { %v1753_v53 = vpop.f32.mrf.mxu0  ;;  %v1785_v54 = vpop.f32.mrf.mxu1  ;;  %v1670_v45 = vld [vmem:[%s2275_s3 + $0xa8] sm:$0xff]  }
  0xcf   :  { %v408_v55 = vadd.f32 %v1753_v53, %v2014_v34  ;;  %v536_v56 = vadd.f32 %v1785_v54, %v2014_v34  ;;  %v779_v5 = vadd.f32 %v1364_v50, %v397_v49  ;;  %v811_v6 = vadd.f32 %v1428_v52, %v525_v51  ;;  %v1653_v54 = vld [vmem:[%s2275_s3 + $0x20] sm:$0xff]  }
  0xd0   :  { %v399_v61 = vpop.f32.mrf.mxu0  ;;  %v527_v62 = vpop.f32.mrf.mxu1  ;;  %v1380_v3 = vunpack.c.l.bf16 %v1653_v54 }
  0xd1   :  { %v782_v63 = vadd.f32 %v1369_v47, %v408_v55  ;;  %v814_v0 = vadd.f32 %v1433_v48, %v536_v56  ;;  %v400_v1 = vadd.f32 %v2014_v34, %v399_v61  ;;  %v528_v2 = vadd.f32 %v2014_v34, %v527_v62  ;;  %v1669_v55 = vld [vmem:[%s2275_s3 + $0xa0] sm:$0xff]  }
  0xd2   :  { %v1756_v7 = vpop.f32.mrf.mxu0  ;;  %v1788_v8 = vpop.f32.mrf.mxu1 }
  0xd3   :  { %v1498_v9 = vpack.c.bf16 %v782_v63, %v781_v59  ;;  %v1578_v10 = vpack.c.bf16 %v814_v0, %v813_v60  ;;  %v780_v11 = vadd.f32 %v1365_v57, %v400_v1  ;;  %v812_v12 = vadd.f32 %v1429_v58, %v528_v2 }
  0xd4   :  { %v421_v15 = vadd.f32 %v1756_v7, %v2014_v34  ;;  %v549_v17 = vadd.f32 %v1788_v8, %v2014_v34  ;;  %v412_v19 = vpop.f32.mrf.mxu0  ;;  %v540_v20 = vpop.f32.mrf.mxu1  ;;  %v1384_v57 = vunpack.c.l.bf16 %v1654_v44  ;;  %v1448_v59 = vunpack.c.l.bf16 %v1670_v45 }
  0xd5   :  { %1681 = vst [vmem:[%s2276_s4 + $0x8] sm:$0xff] %v1498_v9   ;;  %1697 = vst [vmem:[%s2276_s4 + $0x88] sm:$0xff] %v1578_v10   ;;  %v1493_v21 = vpack.c.bf16 %v780_v11, %v779_v5  ;;  %v1573_v22 = vpack.c.bf16 %v812_v12, %v811_v6  ;;  %v413_v25 = vadd.f32 %v2014_v34, %v412_v19  ;;  %v1385_v0 = vunpack.c.h.bf16 %v1654_v44 }
  0xd6   :  { %v541_v27 = vadd.f32 %v2014_v34, %v540_v20  ;;  %v1757_v29 = vpop.f32.mrf.mxu0  ;;  %v1789_v30 = vpop.f32.mrf.mxu1  ;;  %v785_v36 = vadd.f32 %v1376_v16, %v421_v15  ;;  %v817_v37 = vadd.f32 %v1440_v18, %v549_v17  ;;  %v1449_v1 = vunpack.c.h.bf16 %v1670_v45  ;;  %v1656_v20 = vld [vmem:[%s2275_s3 + $0x38] sm:$0xff]  }
  0xd7   :  { %1494 = vst [vmem:[%s2276_s4] sm:$0xff] %v1493_v21   ;;  %1696 = vst [vmem:[%s2276_s4 + $0x80] sm:$0xff] %v1573_v22   ;;  %v424_v31 = vadd.f32 %v1757_v29, %v2014_v34  ;;  %v552_v32 = vadd.f32 %v1789_v30, %v2014_v34  ;;  %v783_v46 = vadd.f32 %v1372_v26, %v413_v25  ;;  %v1444_v5 = vunpack.c.l.bf16 %v1669_v55  ;;  %v1672_v21 = vld [vmem:[%s2275_s3 + $0xb8] sm:$0xff]   ;;  %v1655_v30 = vld [vmem:[%s2275_s3 + $0x30] sm:$0xff]  }
  0xd8   :  { %v415_v38 = vpop.f32.mrf.mxu0  ;;  %v543_v39 = vpop.f32.mrf.mxu1  ;;  %v815_v47 = vadd.f32 %v1436_v28, %v541_v27  ;;  %v1381_v10 = vunpack.c.h.bf16 %v1653_v54  ;;  %v1445_v11 = vunpack.c.h.bf16 %v1669_v55  ;;  %v1388_v44 = vunpack.c.l.bf16 %v1655_v30 }
  0xd9   :  { %v786_v40 = vadd.f32 %v1377_v23, %v424_v31  ;;  %v818_v41 = vadd.f32 %v1441_v24, %v552_v32  ;;  %v416_v42 = vadd.f32 %v2014_v34, %v415_v38  ;;  %v544_v43 = vadd.f32 %v2014_v34, %v543_v39  ;;  %v1671_v31 = vld [vmem:[%s2275_s3 + $0xb0] sm:$0xff]  }
  0xda   :  { %v1760_v48 = vpop.f32.mrf.mxu0  ;;  %v1792_v49 = vpop.f32.mrf.mxu1 }
  0xdb   :  { %v1508_v50 = vpack.c.bf16 %v786_v40, %v785_v36  ;;  %v1588_v51 = vpack.c.bf16 %v818_v41, %v817_v37  ;;  %v784_v52 = vadd.f32 %v1373_v33, %v416_v42  ;;  %v816_v53 = vadd.f32 %v1437_v35, %v544_v43 }
  0xdc   :  { %v437_v56 = vadd.f32 %v1760_v48, %v2014_v34  ;;  %v565_v58 = vadd.f32 %v1792_v49, %v2014_v34  ;;  %v428_v60 = vpop.f32.mrf.mxu0  ;;  %v556_v61 = vpop.f32.mrf.mxu1  ;;  %v1392_v33 = vunpack.c.l.bf16 %v1656_v20  ;;  %v1456_v36 = vunpack.c.l.bf16 %v1672_v21 }
  0xdd   :  { %1683 = vst [vmem:[%s2276_s4 + $0x18] sm:$0xff] %v1508_v50   ;;  %1699 = vst [vmem:[%s2276_s4 + $0x98] sm:$0xff] %v1588_v51   ;;  %v1503_v62 = vpack.c.bf16 %v784_v52, %v783_v46  ;;  %v1583_v63 = vpack.c.bf16 %v816_v53, %v815_v47  ;;  %v429_v2 = vadd.f32 %v2014_v34, %v428_v60  ;;  %v1393_v41 = vunpack.c.h.bf16 %v1656_v20 }
  0xde   :  { %v557_v4 = vadd.f32 %v2014_v34, %v556_v61  ;;  %v1761_v6 = vpop.f32.mrf.mxu0  ;;  %v1793_v7 = vpop.f32.mrf.mxu1  ;;  %v789_v12 = vadd.f32 %v1384_v57, %v437_v56  ;;  %v821_v13 = vadd.f32 %v1448_v59, %v565_v58  ;;  %v1457_v42 = vunpack.c.h.bf16 %v1672_v21  ;;  %v1658_v61 = vld [vmem:[%s2275_s3 + $0x48] sm:$0xff]  }
  0xdf   :  { %1682 = vst [vmem:[%s2276_s4 + $0x10] sm:$0xff] %v1503_v62   ;;  %1698 = vst [vmem:[%s2276_s4 + $0x90] sm:$0xff] %v1583_v63   ;;  %v440_v8 = vadd.f32 %v1761_v6, %v2014_v34  ;;  %v568_v9 = vadd.f32 %v1793_v7, %v2014_v34  ;;  %v787_v22 = vadd.f32 %v1380_v3, %v429_v2  ;;  %v1452_v46 = vunpack.c.l.bf16 %v1671_v31  ;;  %v1674_v62 = vld [vmem:[%s2275_s3 + $0xc8] sm:$0xff]   ;;  %v1657_v7 = vld [vmem:[%s2275_s3 + $0x40] sm:$0xff]  }
  0xe0   :  { %v431_v14 = vpop.f32.mrf.mxu0  ;;  %v559_v15 = vpop.f32.mrf.mxu1  ;;  %v819_v23 = vadd.f32 %v1444_v5, %v557_v4  ;;  %v1389_v51 = vunpack.c.h.bf16 %v1655_v30  ;;  %v1453_v52 = vunpack.c.h.bf16 %v1671_v31  ;;  %v1396_v20 = vunpack.c.l.bf16 %v1657_v7 }
  0xe1   :  { %v790_v16 = vadd.f32 %v1385_v0, %v440_v8  ;;  %v822_v17 = vadd.f32 %v1449_v1, %v568_v9  ;;  %v432_v18 = vadd.f32 %v2014_v34, %v431_v14  ;;  %v560_v19 = vadd.f32 %v2014_v34, %v559_v15  ;;  %v1673_v8 = vld [vmem:[%s2275_s3 + $0xc0] sm:$0xff]  }
  0xe2   :  { %v1764_v24 = vpop.f32.mrf.mxu0  ;;  %v1796_v25 = vpop.f32.mrf.mxu1 }
  0xe3   :  { %v1518_v26 = vpack.c.bf16 %v790_v16, %v789_v12  ;;  %v1598_v27 = vpack.c.bf16 %v822_v17, %v821_v13  ;;  %v788_v28 = vadd.f32 %v1381_v10, %v432_v18  ;;  %v820_v29 = vadd.f32 %v1445_v11, %v560_v19 }
  0xe4   :  { %v453_v32 = vadd.f32 %v1764_v24, %v2014_v34  ;;  %v581_v35 = vadd.f32 %v1796_v25, %v2014_v34  ;;  %v444_v37 = vpop.f32.mrf.mxu0  ;;  %v572_v38 = vpop.f32.mrf.mxu1  ;;  %v1400_v10 = vunpack.c.l.bf16 %v1658_v61  ;;  %v1464_v12 = vunpack.c.l.bf16 %v1674_v62 }
  0xe5   :  { %1685 = vst [vmem:[%s2276_s4 + $0x28] sm:$0xff] %v1518_v26   ;;  %1701 = vst [vmem:[%s2276_s4 + $0xa8] sm:$0xff] %v1598_v27   ;;  %v1513_v39 = vpack.c.bf16 %v788_v28, %v787_v22  ;;  %v1593_v40 = vpack.c.bf16 %v820_v29, %v819_v23  ;;  %v445_v43 = vadd.f32 %v2014_v34, %v444_v37  ;;  %v1401_v17 = vunpack.c.h.bf16 %v1658_v61 }
  0xe6   :  { %v573_v45 = vadd.f32 %v2014_v34, %v572_v38  ;;  %v1765_v47 = vpop.f32.mrf.mxu0  ;;  %v1797_v48 = vpop.f32.mrf.mxu1  ;;  %v793_v53 = vadd.f32 %v1392_v33, %v453_v32  ;;  %v825_v54 = vadd.f32 %v1456_v36, %v581_v35  ;;  %v1465_v18 = vunpack.c.h.bf16 %v1674_v62  ;;  %v1660_v38 = vld [vmem:[%s2275_s3 + $0x58] sm:$0xff]  }
  0xe7   :  { %1684 = vst [vmem:[%s2276_s4 + $0x20] sm:$0xff] %v1513_v39   ;;  %1700 = vst [vmem:[%s2276_s4 + $0xa0] sm:$0xff] %v1593_v40   ;;  %v456_v49 = vadd.f32 %v1765_v47, %v2014_v34  ;;  %v584_v50 = vadd.f32 %v1797_v48, %v2014_v34  ;;  %v791_v63 = vadd.f32 %v1388_v44, %v445_v43  ;;  %v1460_v22 = vunpack.c.l.bf16 %v1673_v8  ;;  %v1676_v39 = vld [vmem:[%s2275_s3 + $0xd8] sm:$0xff]   ;;  %v1659_v48 = vld [vmem:[%s2275_s3 + $0x50] sm:$0xff]  }
  0xe8   :  { %v447_v55 = vpop.f32.mrf.mxu0  ;;  %v575_v56 = vpop.f32.mrf.mxu1  ;;  %v823_v0 = vadd.f32 %v1452_v46, %v573_v45  ;;  %v1397_v27 = vunpack.c.h.bf16 %v1657_v7  ;;  %v1461_v28 = vunpack.c.h.bf16 %v1673_v8  ;;  %v1404_v61 = vunpack.c.l.bf16 %v1659_v48 }
  0xe9   :  { %v794_v57 = vadd.f32 %v1393_v41, %v456_v49  ;;  %v826_v58 = vadd.f32 %v1457_v42, %v584_v50  ;;  %v448_v59 = vadd.f32 %v2014_v34, %v447_v55  ;;  %v576_v60 = vadd.f32 %v2014_v34, %v575_v56  ;;  %v1675_v49 = vld [vmem:[%s2275_s3 + $0xd0] sm:$0xff]  }
  0xea   :  { %v1768_v1 = vpop.f32.mrf.mxu0  ;;  %v1800_v2 = vpop.f32.mrf.mxu1 }
  0xeb   :  { %v1528_v3 = vpack.c.bf16 %v794_v57, %v793_v53  ;;  %v1608_v4 = vpack.c.bf16 %v826_v58, %v825_v54  ;;  %v792_v5 = vadd.f32 %v1389_v51, %v448_v59  ;;  %v824_v6 = vadd.f32 %v1453_v52, %v576_v60 }
  0xec   :  { %v469_v9 = vadd.f32 %v1768_v1, %v2014_v34  ;;  %v597_v11 = vadd.f32 %v1800_v2, %v2014_v34  ;;  %v460_v13 = vpop.f32.mrf.mxu0  ;;  %v588_v14 = vpop.f32.mrf.mxu1  ;;  %v1408_v51 = vunpack.c.l.bf16 %v1660_v38  ;;  %v1472_v53 = vunpack.c.l.bf16 %v1676_v39 }
  0xed   :  { %1687 = vst [vmem:[%s2276_s4 + $0x38] sm:$0xff] %v1528_v3   ;;  %1703 = vst [vmem:[%s2276_s4 + $0xb8] sm:$0xff] %v1608_v4   ;;  %v1523_v15 = vpack.c.bf16 %v792_v5, %v791_v63  ;;  %v1603_v16 = vpack.c.bf16 %v824_v6, %v823_v0  ;;  %v461_v19 = vadd.f32 %v2014_v34, %v460_v13  ;;  %v1409_v58 = vunpack.c.h.bf16 %v1660_v38 }
  0xee   :  { %v589_v21 = vadd.f32 %v2014_v34, %v588_v14  ;;  %v1769_v23 = vpop.f32.mrf.mxu0  ;;  %v1801_v24 = vpop.f32.mrf.mxu1  ;;  %v797_v29 = vadd.f32 %v1400_v10, %v469_v9  ;;  %v829_v30 = vadd.f32 %v1464_v12, %v597_v11  ;;  %v1473_v59 = vunpack.c.h.bf16 %v1676_v39  ;;  %v1662_v14 = vld [vmem:[%s2275_s3 + $0x68] sm:$0xff]  }
  0xef   :  { %1686 = vst [vmem:[%s2276_s4 + $0x30] sm:$0xff] %v1523_v15   ;;  %1702 = vst [vmem:[%s2276_s4 + $0xb0] sm:$0xff] %v1603_v16   ;;  %v472_v25 = vadd.f32 %v1769_v23, %v2014_v34  ;;  %v600_v26 = vadd.f32 %v1801_v24, %v2014_v34  ;;  %v795_v40 = vadd.f32 %v1396_v20, %v461_v19  ;;  %v1468_v63 = vunpack.c.l.bf16 %v1675_v49  ;;  %v1678_v15 = vld [vmem:[%s2275_s3 + $0xe8] sm:$0xff]   ;;  %v1661_v24 = vld [vmem:[%s2275_s3 + $0x60] sm:$0xff]  }
  0xf0   :  { %v463_v31 = vpop.f32.mrf.mxu0  ;;  %v591_v32 = vpop.f32.mrf.mxu1  ;;  %v827_v41 = vadd.f32 %v1460_v22, %v589_v21  ;;  %v1405_v4 = vunpack.c.h.bf16 %v1659_v48  ;;  %v1469_v5 = vunpack.c.h.bf16 %v1675_v49  ;;  %v1412_v38 = vunpack.c.l.bf16 %v1661_v24 }
  0xf1   :  { %v798_v33 = vadd.f32 %v1401_v17, %v472_v25  ;;  %v830_v35 = vadd.f32 %v1465_v18, %v600_v26  ;;  %v464_v36 = vadd.f32 %v2014_v34, %v463_v31  ;;  %v592_v37 = vadd.f32 %v2014_v34, %v591_v32  ;;  %v1677_v25 = vld [vmem:[%s2275_s3 + $0xe0] sm:$0xff]  }
  0xf2   :  { %v1772_v42 = vpop.f32.mrf.mxu0  ;;  %v1804_v43 = vpop.f32.mrf.mxu1 }
  0xf3   :  { %v1538_v44 = vpack.c.bf16 %v798_v33, %v797_v29  ;;  %v1618_v45 = vpack.c.bf16 %v830_v35, %v829_v30  ;;  %v796_v46 = vadd.f32 %v1397_v27, %v464_v36  ;;  %v828_v47 = vadd.f32 %v1461_v28, %v592_v37 }
  0xf4   :  { %v485_v50 = vadd.f32 %v1772_v42, %v2014_v34  ;;  %v613_v52 = vadd.f32 %v1804_v43, %v2014_v34  ;;  %v476_v54 = vpop.f32.mrf.mxu0  ;;  %v604_v55 = vpop.f32.mrf.mxu1  ;;  %v1416_v27 = vunpack.c.l.bf16 %v1662_v14  ;;  %v1480_v29 = vunpack.c.l.bf16 %v1678_v15 }
  0xf5   :  { %1689 = vst [vmem:[%s2276_s4 + $0x48] sm:$0xff] %v1538_v44   ;;  %1705 = vst [vmem:[%s2276_s4 + $0xc8] sm:$0xff] %v1618_v45   ;;  %v1533_v56 = vpack.c.bf16 %v796_v46, %v795_v40  ;;  %v1613_v57 = vpack.c.bf16 %v828_v47, %v827_v41  ;;  %v477_v60 = vadd.f32 %v2014_v34, %v476_v54  ;;  %v1417_v35 = vunpack.c.h.bf16 %v1662_v14 }
  0xf6   :  { %v605_v62 = vadd.f32 %v2014_v34, %v604_v55  ;;  %v1773_v0 = vpop.f32.mrf.mxu0  ;;  %v1805_v1 = vpop.f32.mrf.mxu1  ;;  %v801_v6 = vadd.f32 %v1408_v51, %v485_v50  ;;  %v833_v7 = vadd.f32 %v1472_v53, %v613_v52  ;;  %v1481_v36 = vunpack.c.h.bf16 %v1678_v15  ;;  %v1664_v55 = vld [vmem:[%s2275_s3 + $0x78] sm:$0xff]  }
  0xf7   :  { %1688 = vst [vmem:[%s2276_s4 + $0x40] sm:$0xff] %v1533_v56   ;;  %1704 = vst [vmem:[%s2276_s4 + $0xc0] sm:$0xff] %v1613_v57   ;;  %v488_v2 = vadd.f32 %v1773_v0, %v2014_v34  ;;  %v616_v3 = vadd.f32 %v1805_v1, %v2014_v34  ;;  %v799_v16 = vadd.f32 %v1404_v61, %v477_v60  ;;  %v1476_v40 = vunpack.c.l.bf16 %v1677_v25  ;;  %v1680_v56 = vld [vmem:[%s2275_s3 + $0xf8] sm:$0xff]   ;;  %v1663_v1 = vld [vmem:[%s2275_s3 + $0x70] sm:$0xff]  }
  0xf8   :  { %v479_v8 = vpop.f32.mrf.mxu0  ;;  %v607_v9 = vpop.f32.mrf.mxu1  ;;  %v831_v17 = vadd.f32 %v1468_v63, %v605_v62  ;;  %v1413_v45 = vunpack.c.h.bf16 %v1661_v24  ;;  %v1477_v46 = vunpack.c.h.bf16 %v1677_v25  ;;  %v1420_v14 = vunpack.c.l.bf16 %v1663_v1 }
  0xf9   :  { %v802_v10 = vadd.f32 %v1409_v58, %v488_v2  ;;  %v834_v11 = vadd.f32 %v1473_v59, %v616_v3  ;;  %v480_v12 = vadd.f32 %v2014_v34, %v479_v8  ;;  %v608_v13 = vadd.f32 %v2014_v34, %v607_v9  ;;  %v1679_v2 = vld [vmem:[%s2275_s3 + $0xf0] sm:$0xff]  }
  0xfa   :  { %v1776_v18 = vpop.f32.mrf.mxu0  ;;  %v1808_v19 = vpop.f32.mrf.mxu1 }
  0xfb   :  { %v1548_v20 = vpack.c.bf16 %v802_v10, %v801_v6  ;;  %v1628_v21 = vpack.c.bf16 %v834_v11, %v833_v7  ;;  %v800_v22 = vadd.f32 %v1405_v4, %v480_v12  ;;  %v832_v23 = vadd.f32 %v1469_v5, %v608_v13 }
  0xfc   :  { %v501_v26 = vadd.f32 %v1776_v18, %v2014_v34  ;;  %v629_v28 = vadd.f32 %v1808_v19, %v2014_v34  ;;  %v492_v30 = vpop.f32.mrf.mxu0  ;;  %v620_v31 = vpop.f32.mrf.mxu1  ;;  %v1424_v4 = vunpack.c.l.bf16 %v1664_v55  ;;  %v1488_v6 = vunpack.c.l.bf16 %v1680_v56 }
  0xfd   :  { %1691 = vst [vmem:[%s2276_s4 + $0x58] sm:$0xff] %v1548_v20   ;;  %1707 = vst [vmem:[%s2276_s4 + $0xd8] sm:$0xff] %v1628_v21   ;;  %v1543_v32 = vpack.c.bf16 %v800_v22, %v799_v16  ;;  %v1623_v33 = vpack.c.bf16 %v832_v23, %v831_v17  ;;  %v493_v37 = vadd.f32 %v2014_v34, %v492_v30  ;;  %v1425_v11 = vunpack.c.h.bf16 %v1664_v55 }
  0xfe   :  { %v621_v39 = vadd.f32 %v2014_v34, %v620_v31  ;;  %v1777_v41 = vpop.f32.mrf.mxu0  ;;  %v1809_v42 = vpop.f32.mrf.mxu1  ;;  %v805_v47 = vadd.f32 %v1416_v27, %v501_v26  ;;  %v837_v48 = vadd.f32 %v1480_v29, %v629_v28  ;;  %v1489_v12 = vunpack.c.h.bf16 %v1680_v56 }
  0xff   :  { %1690 = vst [vmem:[%s2276_s4 + $0x50] sm:$0xff] %v1543_v32   ;;  %1706 = vst [vmem:[%s2276_s4 + $0xd0] sm:$0xff] %v1623_v33   ;;  %v504_v43 = vadd.f32 %v1777_v41, %v2014_v34  ;;  %v632_v44 = vadd.f32 %v1809_v42, %v2014_v34  ;;  %v803_v57 = vadd.f32 %v1412_v38, %v493_v37  ;;  %v1484_v16 = vunpack.c.l.bf16 %v1679_v2 }
 0x100   :  { %v495_v49 = vpop.f32.mrf.mxu0  ;;  %v623_v50 = vpop.f32.mrf.mxu1  ;;  %v835_v58 = vadd.f32 %v1476_v40, %v621_v39  ;;  %v1421_v21 = vunpack.c.h.bf16 %v1663_v1  ;;  %v1485_v22 = vunpack.c.h.bf16 %v1679_v2 }
 0x101   :  { %v806_v51 = vadd.f32 %v1417_v35, %v504_v43  ;;  %v838_v52 = vadd.f32 %v1481_v36, %v632_v44  ;;  %v496_v53 = vadd.f32 %v2014_v34, %v495_v49  ;;  %v624_v54 = vadd.f32 %v2014_v34, %v623_v50 }
 0x102   :  { %v1780_v59 = vpop.f32.mrf.mxu0  ;;  %v1812_v60 = vpop.f32.mrf.mxu1 }
 0x103   :  { %v1558_v61 = vpack.c.bf16 %v806_v51, %v805_v47  ;;  %v1638_v62 = vpack.c.bf16 %v838_v52, %v837_v48  ;;  %v804_v63 = vadd.f32 %v1413_v45, %v496_v53  ;;  %v836_v0 = vadd.f32 %v1477_v46, %v624_v54 }
 0x104   :  { %v517_v3 = vadd.f32 %v1780_v59, %v2014_v34  ;;  %v645_v5 = vadd.f32 %v1812_v60, %v2014_v34  ;;  %v508_v7 = vpop.f32.mrf.mxu0  ;;  %v636_v8 = vpop.f32.mrf.mxu1 }
 0x105   :  { %1693 = vst [vmem:[%s2276_s4 + $0x68] sm:$0xff] %v1558_v61   ;;  %1709 = vst [vmem:[%s2276_s4 + $0xe8] sm:$0xff] %v1638_v62   ;;  %v1553_v9 = vpack.c.bf16 %v804_v63, %v803_v57  ;;  %v1633_v10 = vpack.c.bf16 %v836_v0, %v835_v58  ;;  %v509_v13 = vadd.f32 %v2014_v34, %v508_v7 }
 0x106   :  { %v637_v15 = vadd.f32 %v2014_v34, %v636_v8  ;;  %v1781_v17 = vpop.f32.mrf.mxu0  ;;  %v1813_v18 = vpop.f32.mrf.mxu1  ;;  %v809_v23 = vadd.f32 %v1424_v4, %v517_v3  ;;  %v841_v24 = vadd.f32 %v1488_v6, %v645_v5 }
 0x107   :  { %1692 = vst [vmem:[%s2276_s4 + $0x60] sm:$0xff] %v1553_v9   ;;  %1708 = vst [vmem:[%s2276_s4 + $0xe0] sm:$0xff] %v1633_v10   ;;  %v520_v19 = vadd.f32 %v1781_v17, %v2014_v34  ;;  %v648_v20 = vadd.f32 %v1813_v18, %v2014_v34  ;;  %v807_v31 = vadd.f32 %v1420_v14, %v509_v13 }
 0x108   :  { %v511_v25 = vpop.f32.mrf.mxu0  ;;  %v639_v26 = vpop.f32.mrf.mxu1  ;;  %v839_v32 = vadd.f32 %v1484_v16, %v637_v15 }
 0x109   :  { %v810_v27 = vadd.f32 %v1425_v11, %v520_v19  ;;  %v842_v28 = vadd.f32 %v1489_v12, %v648_v20  ;;  %v512_v29 = vadd.f32 %v2014_v34, %v511_v25  ;;  %v640_v30 = vadd.f32 %v2014_v34, %v639_v26 }
 0x10b   :  { %v1568_v33 = vpack.c.bf16 %v810_v27, %v809_v23  ;;  %v1648_v35 = vpack.c.bf16 %v842_v28, %v841_v24  ;;  %v808_v36 = vadd.f32 %v1421_v21, %v512_v29  ;;  %v840_v37 = vadd.f32 %v1485_v22, %v640_v30 }
 0x10d   :  { %1695 = vst [vmem:[%s2276_s4 + $0x78] sm:$0xff] %v1568_v33   ;;  %1711 = vst [vmem:[%s2276_s4 + $0xf8] sm:$0xff] %v1648_v35   ;;  %v1563_v38 = vpack.c.bf16 %v808_v36, %v807_v31  ;;  %v1643_v39 = vpack.c.bf16 %v840_v37, %v839_v32 }
 0x10f   :  { %1694 = vst [vmem:[%s2276_s4 + $0x70] sm:$0xff] %v1563_v38   ;;  %1710 = vst [vmem:[%s2276_s4 + $0xf0] sm:$0xff] %v1643_v39  }

// kernel: pyramid_features.14
= control target key start
LH: loop header
LB: loop body
LE: loop exit
PB: predicated region body
PF: predicated region fallthrough
CT: control target
= control target key end

     0   :  { %s2167_s12 = smov 0   ;;  %s2169_s13 = smov 0   ;;  %s2494_s0 = inlined_call_operand.vmem [shape: bf16[2,42,128], index: 0, kind: input, shape index: {}]   ;;  %s2495_s1 = inlined_call_operand.vmem [shape: bf16[9,128,128], index: 1, kind: input, shape index: {}]   ;;  %s2496_s2 = inlined_call_operand.vmem [shape: f32[1,128], index: 2, kind: input, shape index: {}]   ;;  %s2497_s3 = inlined_call_operand.vmem [shape: f32[2,24,128], index: 3, kind: output, shape index: {}]  }
   0x1   :  { %s2171_s14 = smov 0  }
   0x2 LB: > { %s25_s15 = sadd.s32 1, %s2141_s13  ;;  %p1524_p0 = scmp.ge.s32.totalorder %s2145_s14, 1  ;;  %s2145_s14 = sphi %s2171_s14, %s13_s14   ;;  %s2141_s13 = sphi %s2169_s13, %s2499_s13   ;;  %s2137_s12 = sphi %s2167_s12, %s2498_s12  }
   0x3   : > { %p27_p1 = scmp.ge.s32.totalorder %s25_s15, 2  ;;  %p168_p2 = scmp.lt.s32.totalorder %s2145_s14, 3 }
   0x5   : > { %s2501_s15 = smov (%p27_p1, %s25_s15), 0  ;;  %p169_p3 = pnand %p1524_p0, %p168_p2 }
   0x6   : > { %p202_p4 = scmp.lt.s32.totalorder (!%p169_p3), %s2137_s12, 1 }
   0x7   : > { %172 = sbr.rel (%p169_p3) target bundleno = 377 (0x179), region = 32 }
   0xc   : > { %v2038_v0 = vld [vmem:[%s2495_s1 + $0x78] sm:$0xff]   ;;  %v2040_v2 = vld [vmem:[%s2495_s1 + $0x70] sm:$0xff]   ;;  %v2042_v4 = vld [vmem:[%s2495_s1 + $0x68] sm:$0xff]   ;;  %s2503_s12 = smov (!%p202_p4, %s2137_s12), 1  ;;  %vm270_vm0 = vsmask.f32 7424 }
   0xd   : > { %v2039_v1 = vld [vmem:[%s2495_s1 + $0x38] sm:$0xff]   ;;  %1833 = vmatprep.subr.bf16.mxu0 %v2038_v0  ;;  %v2041_v3 = vld [vmem:[%s2495_s1 + $0x30] sm:$0xff]   ;;  %v2043_v5 = vld [vmem:[%s2495_s1 + $0x28] sm:$0xff]   ;;  %s2013_s5 = smul.u32 24, %s2503_s12  ;;  %vm504_vm1 = vcmask 1046528   ;;  %vm634_vm2 = vcmask 1044480  }
   0xe   : > { %1853 = vmatprep.subr.bf16.mxu1 %v2039_v1  ;;  %1834 = vmatpush3.bf16.msra.mxu0 %v2038_v0  ;;  %v2044_v6 = vld [vmem:[%s2495_s1 + $0x60] sm:$0xff]   ;;  %v2046_v8 = vld [vmem:[%s2495_s1 + $0x58] sm:$0xff]   ;;  %v2048_v10 = vld [vmem:[%s2495_s1 + $0x50] sm:$0xff]   ;;  %vm760_vm3 = vsmask.f32 4352  ;;  %vm1030_vm4 = vcmask 1045504  }
   0xf   : > { %1854 = vmatpush3.bf16.msra.mxu1 %v2039_v1  ;;  %1835 = vmatprep.subr.bf16.mxu0 %v2040_v2  ;;  %v2045_v7 = vld [vmem:[%s2495_s1 + $0x20] sm:$0xff]   ;;  %v2047_v9 = vld [vmem:[%s2495_s1 + $0x18] sm:$0xff]   ;;  %s2223_s16 = scalar_lea.vmem %s2494_s0, %s2013_s5  ;;  %v2049_v14 = vld [vmem:[%s2495_s1 + $0x10] sm:$0xff]   ;;  %vm1156_vm5 = vsmask.f32 5376  ;;  %s221_s11 = scalar_lea.vmem %s2497_s3, %s2013_s5 }
  0x10   : > { %1855 = vmatprep.subr.bf16.mxu1 %v2041_v3  ;;  %v223_v11 = vld [vmem:[%s2223_s16] sm:$0xf]  ;;  %v2230_v12 = vld [vmem:[%s2223_s16 + $0x4] sm:$0xf]  ;;  %v2233_v13 = vld [vmem:[%s2223_s16 + $0x8] sm:$0xf] }
  0x11   : > { %v242_v15 = vld [vmem:[%s2223_s16 + $0xc] sm:$0x1]  ;;  %v1543_v16 = vcombine.low %v223_v11, %v2230_v12  ;;  %v2052_v26 = vld [vmem:[%s2495_s1 + $0x40] sm:$0xff]   ;;  %v2057_v30 = vld [vmem:[%s2495_s1 + $0xb8] sm:$0xff]   ;;  %v1553_v33 = vcombine.low %v2233_v13, %v2233_v13 }
  0x12   : > { %1836 = vmatpush3.bf16.msra.mxu0 %v2040_v2  ;;  %v2241_v17 = vcombine.low %v2233_v13, %v242_v15  ;;  %v2050_v20 = vld [vmem:[%s2495_s1 + $0x48] sm:$0xff]   ;;  %v2053_v27 = vld [vmem:[%s2495_s1] sm:$0xff]   ;;  %v2058_v31 = vld [vmem:[%s2495_s1 + $0xf8] sm:$0xff]   ;;  %v1654_v15 = vcombine.low %v2230_v12, %v2233_v13 }
  0x13   : > { %1856 = vmatpush3.bf16.msra.mxu1 %v2041_v3  ;;  %1837 = vmatprep.subr.bf16.mxu0 %v2042_v4  ;;  %v272_v18 = vshrl.u32 %v1543_v16, 16  ;;  %v274_v19 = vshll.u32 %v1543_v16, 16  ;;  %v2051_v22 = vld [vmem:[%s2495_s1 + $0x8] sm:$0xff]   ;;  %v2059_v34 = vld [vmem:[%s2495_s1 + $0xb0] sm:$0xff]   ;;  %v483_v36 = vld [vmem:[%s2223_s16] sm:$0xe] }
  0x14   : > { %1857 = vmatprep.subr.bf16.mxu1 %v2043_v5  ;;  %1869 = vmatprep.mubr.bf16.mxu1 %v1543_v16  ;;  %v279_v21 = vshll.u32 %v2241_v17, 16  ;;  %v283_v29 = vshrl.u32 %v2241_v17, 16  ;;  %v2060_v35 = vld [vmem:[%s2495_s1 + $0xf0] sm:$0xff]   ;;  %v1578_v37 = vcombine.low %v483_v36, %v2230_v12  ;;  %v506_v38 = vrot.slane %v2241_v17, 1  ;;  %v609_v39 = vld [vmem:[%s2223_s16] sm:$0x8] }
  0x15   : > { %v276_v23 = vrot.slane %v274_v19, 1  ;;  %v610_v40 = vld [vmem:[%s2223_s16 + $0xc] sm:$0x7]  ;;  %v1603_v42 = vcombine.low %v609_v39, %v2230_v12  ;;  %v2063_v49 = vld [vmem:[%s2495_s1 + $0xa0] sm:$0xff]   ;;  %v2065_v52 = vld [vmem:[%s2495_s1 + $0x98] sm:$0xff]  }
  0x16   : > { %1838 = vmatpush3.bf16.msra.mxu0 %v2042_v4  ;;  %v281_v24 = vrot.slane %v279_v21, 1  ;;  %v2061_v41 = vld [vmem:[%s2495_s1 + $0xa8] sm:$0xff]   ;;  %v1604_v43 = vcombine.low %v2233_v13, %v610_v40  ;;  %v505_v45 = vrot.slane %v1578_v37, 1  ;;  %v2064_v51 = vld [vmem:[%s2495_s1 + $0xe0] sm:$0xff]   ;;  %v2066_v53 = vld [vmem:[%s2495_s1 + $0xd8] sm:$0xff]  }
  0x17   : > { %1858 = vmatpush3.bf16.msra.mxu1 %v2043_v5  ;;  %1839 = vmatprep.subr.bf16.mxu0 %v2044_v6  ;;  %v277_v25 = vor.u32 %v276_v23, %v272_v18  ;;  %v2062_v44 = vld [vmem:[%s2495_s1 + $0xe8] sm:$0xff]   ;;  %v635_v46 = vrot.slane %v1603_v42, 3  ;;  %v2067_v54 = vld [vmem:[%s2495_s1 + $0x90] sm:$0xff]   ;;  %v762_v58 = vshrl.u32 %v1603_v42, 16  ;;  %v765_v59 = vshll.u32 %v1603_v42, 16  ;;  %v2071_v0 = vld [vmem:[%s2495_s1 + $0x80] sm:$0xff]  }
  0x18   : > { %1859 = vmatprep.subr.bf16.mxu1 %v2045_v7  ;;  %v285_v32 = vor.u32 %v283_v29, %v281_v24  ;;  %v2285_v47 = vrot.slane %v1604_v43, 3  ;;  %v507_v48 = vsel %vm504_vm1, %v505_v45, %v506_v38  ;;  %v2068_v55 = vld [vmem:[%s2495_s1 + $0xd0] sm:$0xff]   ;;  %v2069_v56 = vld [vmem:[%s2495_s1 + $0x88] sm:$0xff]   ;;  %v2072_v1 = vld [vmem:[%s2495_s1 + $0xc0] sm:$0xff]  }
  0x19   : > { %v282_v28 = vsel %vm270_vm0, %v277_v25, %v281_v24  ;;  %v2314_v57 = vld [vmem:[%s2223_s16 + $0xc] sm:$0xf]  ;;  %v764_v2 = vrot.slane %v762_v58, 3  ;;  %v767_v3 = vrot.slane %v765_v59, 4  ;;  %v2079_v11 = vld [vmem:[%s2495_s1 + $0x170] sm:$0xff]   ;;  %v2082_v12 = vld [vmem:[%s2495_s1 + $0x120] sm:$0xff]  }
  0x1a   : > { %1840 = vmatpush3.bf16.msra.mxu0 %v2044_v6  ;;  %1849 = vmatprep.mubr.bf16.mxu0 %v282_v28  ;;  %v637_v50 = vsel %vm634_vm2, %v635_v46, %v2285_v47  ;;  %v1629_v60 = vcombine.low %v2233_v13, %v2314_v57  ;;  %v2070_v61 = vld [vmem:[%s2495_s1 + $0xc8] sm:$0xff]   ;;  %v2074_v6 = vld [vmem:[%s2495_s1 + $0x138] sm:$0xff]   ;;  %v2083_v13 = vld [vmem:[%s2495_s1 + $0x160] sm:$0xff]  }
  0x1b   : > { %1860 = vmatpush3.bf16.msra.mxu1 %v2045_v7  ;;  %1841 = vmatprep.subr.bf16.mxu0 %v2046_v8  ;;  %v2077_v7 = vld [vmem:[%s2495_s1 + $0x178] sm:$0xff]   ;;  %v2080_v16 = vld [vmem:[%s2495_s1 + $0x128] sm:$0xff]   ;;  %v1135_v19 = vld [vmem:[%s2223_s16 + $0x10] sm:$0x7] }
  0x1c   : > { %1861 = vmatprep.subr.bf16.mxu1 %v2047_v9  ;;  %v770_v62 = vshrl.u32 %v1629_v60, 16  ;;  %v773_v63 = vshll.u32 %v1629_v60, 16  ;;  %v2081_v17 = vld [vmem:[%s2495_s1 + $0x168] sm:$0xff]   ;;  %v2085_v21 = vld [vmem:[%s2495_s1 + $0x158] sm:$0xff]   ;;  %v1275_v24 = vld [vmem:[%s2223_s16 + $0x4] sm:$0x8] }
  0x1d   : > { %v1001_v18 = vld [vmem:[%s2223_s16 + $0xc] sm:$0xf]  ;;  %v1000_v23 = vld [vmem:[%s2223_s16 + $0x8] sm:$0xf]  ;;  %v999_v28 = vld [vmem:[%s2223_s16 + $0x4] sm:$0xc] }
  0x1e   : > { %1842 = vmatpush3.bf16.msra.mxu0 %v2046_v8  ;;  %v772_v4 = vrot.slane %v770_v62, 3  ;;  %v775_v5 = vrot.slane %v773_v63, 4  ;;  %v768_v8 = vor.u32 %v767_v3, %v764_v2  ;;  %v1731_v25 = vcombine.low %v1275_v24, %v1000_v23  ;;  %v2087_v29 = vld [vmem:[%s2495_s1 + $0x150] sm:$0xff]   ;;  %v2090_v40 = vld [vmem:[%s2495_s1 + $0x100] sm:$0xff]   ;;  %v2099_v58 = vld [vmem:[%s2495_s1 + $0x1a8] sm:$0xff]  }
  0x1f   : > { %1862 = vmatpush3.bf16.msra.mxu1 %v2047_v9  ;;  %1843 = vmatprep.subr.bf16.mxu0 %v2048_v10  ;;  %v2100_v59 = vld [vmem:[%s2495_s1 + $0x1e8] sm:$0xff]   ;;  %v2101_v60 = vld [vmem:[%s2495_s1 + $0x1a0] sm:$0xff]   ;;  %v2103_v62 = vld [vmem:[%s2495_s1 + $0x198] sm:$0xff]  }
  0x20   : > { %1863 = vmatprep.subr.bf16.mxu1 %v2049_v14  ;;  %v2333_v9 = vor.u32 %v775_v5, %v772_v4  ;;  %v2104_v63 = vld [vmem:[%s2495_s1 + $0x1d8] sm:$0xff]   ;;  %v2107_v2 = vld [vmem:[%s2495_s1 + $0x188] sm:$0xff]   ;;  %v2109_v4 = vld [vmem:[%s2495_s1 + $0x180] sm:$0xff]  }
  0x21   : > { %v2108_v3 = vld [vmem:[%s2495_s1 + $0x1c8] sm:$0xff]   ;;  %v2110_v5 = vld [vmem:[%s2495_s1 + $0x1c0] sm:$0xff]  }
  0x22   : > { %1844 = vmatpush3.bf16.msra.mxu0 %v2048_v10  ;;  %v2078_v10 = vld [vmem:[%s2495_s1 + $0x130] sm:$0xff]  }
  0x23   : > { %1864 = vmatpush3.bf16.msra.mxu1 %v2049_v14  ;;  %1845 = vmatprep.subr.bf16.mxu0 %v2050_v20  ;;  %v777_v14 = vsel %vm760_vm3, %v768_v8, %v2333_v9  ;;  %v2116_v8 = vld [vmem:[%s2495_s1 + $0x228] sm:$0xff]  }
  0x24   : > { %1865 = vmatprep.subr.bf16.mxu1 %v2051_v22 }
  0x26   : > { %1846 = vmatpush3.bf16.msra.mxu0 %v2050_v20  ;;  %v2084_v20 = vld [vmem:[%s2495_s1 + $0x118] sm:$0xff]  }
  0x27   : > { %1866 = vmatpush3.bf16.msra.mxu1 %v2051_v22  ;;  %1847 = vmatprep.subr.bf16.mxu0 %v2052_v26  ;;  %v2367_v22 = vcombine.low %v1001_v18, %v1135_v19 }
  0x28   : > { %1867 = vmatprep.subr.bf16.mxu1 %v2053_v27 }
  0x29   : > { %v1169_v39 = vshll.u32 %v2367_v22, 16 }
  0x2a   : > { %1848 = vmatpush3.bf16.msra.mxu0 %v2052_v26  ;;  %v1297_v26 = vrot.slane %v2367_v22, 3 }
  0x2b   : > { %1868 = vmatpush3.bf16.msra.mxu1 %v2053_v27  ;;  %1873 = vmatprep.subr.bf16.mxu0 %v2057_v30  ;;  %v2086_v27 = vld [vmem:[%s2495_s1 + $0x110] sm:$0xff]   ;;  %v1171_v46 = vrot.slane %v1169_v39, 3 }
  0x2c   : > { %1893 = vmatprep.subr.bf16.mxu1 %v2058_v31 }
  0x2d   : > { %1850 = vmatmul.mubr.bf16.vlgmr.msra.gmra.mxu0 %v285_v32 }
  0x2e   : > { %1870 = vmatmul.mubr.bf16.vlgmr.msra.gmra.mxu1 %v1553_v33  ;;  %1874 = vmatpush3.bf16.msra.mxu0 %v2057_v30  ;;  %v1296_v30 = vrot.slane %v1731_v25, 3  ;;  %v2088_v33 = vld [vmem:[%s2495_s1 + $0x108] sm:$0xff]  }
  0x2f   : > { %1894 = vmatpush3.bf16.msra.mxu1 %v2058_v31  ;;  %1875 = vmatprep.subr.bf16.mxu0 %v2059_v34  ;;  %v1680_v31 = vcombine.low %v999_v28, %v1000_v23 }
  0x30   : > { %1895 = vmatprep.subr.bf16.mxu1 %v2060_v35  ;;  %1889 = vmatprep.mubr.bf16.mxu0 %v507_v48  ;;  %v2382_v32 = vsel %vm634_vm2, %v1296_v30, %v1297_v26  ;;  %v2096_v48 = vld [vmem:[%s2495_s1 + $0x1f8] sm:$0xff]  }
  0x31   : > { %1909 = vmatprep.mubr.bf16.mxu1 %v637_v50  ;;  %v1158_v36 = vshrl.u32 %v1680_v31, 16  ;;  %v1161_v37 = vshll.u32 %v1680_v31, 16 }
  0x32   : > { %1876 = vmatpush3.bf16.msra.mxu0 %v2059_v34  ;;  %v2089_v34 = vld [vmem:[%s2495_s1 + $0x148] sm:$0xff]  }
  0x33   : > { %1896 = vmatpush3.bf16.msra.mxu1 %v2060_v35  ;;  %1877 = vmatprep.subr.bf16.mxu0 %v2061_v41  ;;  %v1002_v35 = vld [vmem:[%s2223_s16 + $0x10] sm:$0x3]  ;;  %v1160_v43 = vrot.slane %v1158_v36, 2 }
  0x34   : > { %1897 = vmatprep.subr.bf16.mxu1 %v2062_v44  ;;  %v1681_v42 = vcombine.low %v1001_v18, %v1002_v35 }
  0x36   : > { %1878 = vmatpush3.bf16.msra.mxu0 %v2061_v41  ;;  %v2091_v41 = vld [vmem:[%s2495_s1 + $0x140] sm:$0xff]   ;;  %v1032_v50 = vrot.slane %v1681_v42, 2 }
  0x37   : > { %1898 = vmatpush3.bf16.msra.mxu1 %v2062_v44  ;;  %1879 = vmatprep.subr.bf16.mxu0 %v2063_v49  ;;  %v1163_v44 = vrot.slane %v1161_v37, 3 }
  0x38   : > { %1899 = vmatprep.subr.bf16.mxu1 %v2064_v51 }
  0x3a   : > { %1880 = vmatpush3.bf16.msra.mxu0 %v2063_v49  ;;  %v1031_v49 = vrot.slane %v1680_v31, 2 }
  0x3b   : > { %1900 = vmatpush3.bf16.msra.mxu1 %v2064_v51  ;;  %1881 = vmatprep.subr.bf16.mxu0 %v2065_v52  ;;  %v1655_v51 = vcombine.low %v2314_v57, %v2314_v57 }
  0x3c   : > { %1901 = vmatprep.subr.bf16.mxu1 %v2066_v53 }
  0x3e   : > { %1882 = vmatpush3.bf16.msra.mxu0 %v2065_v52  ;;  %v1164_v52 = vor.u32 %v1163_v44, %v1160_v43 }
  0x3f   : > { %1902 = vmatpush3.bf16.msra.mxu1 %v2066_v53  ;;  %1883 = vmatprep.subr.bf16.mxu0 %v2067_v54 }
  0x40   : > { %1903 = vmatprep.subr.bf16.mxu1 %v2068_v55 }
  0x42   : > { %1884 = vmatpush3.bf16.msra.mxu0 %v2067_v54  ;;  %v2097_v54 = vld [vmem:[%s2495_s1 + $0x1b0] sm:$0xff]  }
  0x43   : > { %1904 = vmatpush3.bf16.msra.mxu1 %v2068_v55  ;;  %1885 = vmatprep.subr.bf16.mxu0 %v2069_v56  ;;  %v2098_v55 = vld [vmem:[%s2495_s1 + $0x1f0] sm:$0xff]  }
  0x44   : > { %1905 = vmatprep.subr.bf16.mxu1 %v2070_v61 }
  0x46   : > { %1886 = vmatpush3.bf16.msra.mxu0 %v2069_v56  ;;  %v1033_v56 = vsel %vm1030_vm4, %v1031_v49, %v1032_v50 }
  0x47   : > { %1906 = vmatpush3.bf16.msra.mxu1 %v2070_v61  ;;  %1887 = vmatprep.subr.bf16.mxu0 %v2071_v0  ;;  %v2102_v61 = vld [vmem:[%s2495_s1 + $0x1e0] sm:$0xff]  }
  0x48   : > { %1907 = vmatprep.subr.bf16.mxu1 %v2072_v1 }
  0x4a   : > { %1888 = vmatpush3.bf16.msra.mxu0 %v2071_v0  ;;  %v2105_v0 = vld [vmem:[%s2495_s1 + $0x190] sm:$0xff]  }
  0x4b   : > { %1908 = vmatpush3.bf16.msra.mxu1 %v2072_v1  ;;  %1913 = vmatprep.subr.bf16.mxu0 %v2074_v6  ;;  %v2106_v1 = vld [vmem:[%s2495_s1 + $0x1d0] sm:$0xff]  }
  0x4c   : > { %1933 = vmatprep.subr.bf16.mxu1 %v2077_v7 }
  0x4d   : > { %1890 = vmatmul.mubr.bf16.vlgmr.msra.gmra.mxu0 %v506_v38  ;;  %v1166_v38 = vshrl.u32 %v2367_v22, 16 }
  0x4e   : > { %1914 = vmatpush3.bf16.msra.mxu0 %v2074_v6  ;;  %1910 = vmatmul.mubr.bf16.vlgmr.msra.gmra.mxu1 %v2285_v47  ;;  %v2093_v47 = vld [vmem:[%s2495_s1 + $0x1b8] sm:$0xff]  }
  0x4f   : > { %1934 = vmatpush3.bf16.msra.mxu1 %v2077_v7  ;;  %1915 = vmatprep.subr.bf16.mxu0 %v2078_v10  ;;  %v1168_v45 = vrot.slane %v1166_v38, 2  ;;  %v2114_v6 = vld [vmem:[%s2495_s1 + $0x238] sm:$0xff]   ;;  %v2115_v7 = vld [vmem:[%s2495_s1 + $0x230] sm:$0xff]  }
  0x50   : > { %1935 = vmatprep.subr.bf16.mxu1 %v2079_v11  ;;  %1929 = vmatprep.mubr.bf16.mxu0 %v777_v14  ;;  %v2120_v14 = vld [vmem:[%s2495_s1 + $0x208] sm:$0xff]  }
  0x51   : > { %1949 = vmatprep.mubr.bf16.mxu1 %v1654_v15  ;;  %v1172_v53 = vor.u32 %v1171_v46, %v1168_v45  ;;  %v2121_v15 = vld [vmem:[%s2495_s1 + $0x200] sm:$0xff]  }
  0x52   : > { %1916 = vmatpush3.bf16.msra.mxu0 %v2078_v10  ;;  %v2118_v10 = vld [vmem:[%s2495_s1 + $0x218] sm:$0xff]  }
  0x53   : > { %1936 = vmatpush3.bf16.msra.mxu1 %v2079_v11  ;;  %1917 = vmatprep.subr.bf16.mxu0 %v2080_v16  ;;  %v1173_v57 = vsel %vm1156_vm5, %v1164_v52, %v1172_v53  ;;  %v2119_v11 = vld [vmem:[%s2495_s1 + $0x210] sm:$0xff]  }
  0x54   : > { %1937 = vmatprep.subr.bf16.mxu1 %v2081_v17 }
  0x56   : > { %1918 = vmatpush3.bf16.msra.mxu0 %v2080_v16 }
  0x57   : > { %1938 = vmatpush3.bf16.msra.mxu1 %v2081_v17  ;;  %1919 = vmatprep.subr.bf16.mxu0 %v2082_v12 }
  0x58   : > { %1939 = vmatprep.subr.bf16.mxu1 %v2083_v13 }
  0x5a   : > { %1920 = vmatpush3.bf16.msra.mxu0 %v2082_v12 }
  0x5b   : > { %1940 = vmatpush3.bf16.msra.mxu1 %v2083_v13  ;;  %1921 = vmatprep.subr.bf16.mxu0 %v2084_v20 }
  0x5c   : > { %1941 = vmatprep.subr.bf16.mxu1 %v2085_v21 }
  0x5e   : > { %1922 = vmatpush3.bf16.msra.mxu0 %v2084_v20 }
  0x5f   : > { %1942 = vmatpush3.bf16.msra.mxu1 %v2085_v21  ;;  %1923 = vmatprep.subr.bf16.mxu0 %v2086_v27 }
  0x60   : > { %1943 = vmatprep.subr.bf16.mxu1 %v2087_v29 }
  0x62   : > { %1924 = vmatpush3.bf16.msra.mxu0 %v2086_v27 }
  0x63   : > { %1944 = vmatpush3.bf16.msra.mxu1 %v2087_v29  ;;  %1925 = vmatprep.subr.bf16.mxu0 %v2088_v33 }
  0x64   : > { %1945 = vmatprep.subr.bf16.mxu1 %v2089_v34 }
  0x66   : > { %1926 = vmatpush3.bf16.msra.mxu0 %v2088_v33 }
  0x67   : > { %1946 = vmatpush3.bf16.msra.mxu1 %v2089_v34  ;;  %1927 = vmatprep.subr.bf16.mxu0 %v2090_v40 }
  0x68   : > { %1947 = vmatprep.subr.bf16.mxu1 %v2091_v41 }
  0x6a   : > { %1928 = vmatpush3.bf16.msra.mxu0 %v2090_v40 }
  0x6b   : > { %1948 = vmatpush3.bf16.msra.mxu1 %v2091_v41  ;;  %1953 = vmatprep.subr.bf16.mxu0 %v2093_v47 }
  0x6c   : > { %1973 = vmatprep.subr.bf16.mxu1 %v2096_v48 }
  0x6d   : > { %1930 = vmatmul.mubr.bf16.vlgmr.msra.gmra.mxu0 %v2333_v9  ;;  %v2117_v9 = vld [vmem:[%s2495_s1 + $0x220] sm:$0xff]  }
  0x6e   : > { %1954 = vmatpush3.bf16.msra.mxu0 %v2093_v47  ;;  %1950 = vmatmul.mubr.bf16.vlgmr.msra.gmra.mxu1 %v1655_v51 }
  0x6f   : > { %1974 = vmatpush3.bf16.msra.mxu1 %v2096_v48  ;;  %1955 = vmatprep.subr.bf16.mxu0 %v2097_v54 }
  0x70   : > { %1975 = vmatprep.subr.bf16.mxu1 %v2098_v55  ;;  %1969 = vmatprep.mubr.bf16.mxu0 %v1033_v56 }
  0x71   : > { %1989 = vmatprep.mubr.bf16.mxu1 %v1173_v57 }
  0x72   : > { %1956 = vmatpush3.bf16.msra.mxu0 %v2097_v54 }
  0x73   : > { %1976 = vmatpush3.bf16.msra.mxu1 %v2098_v55  ;;  %1957 = vmatprep.subr.bf16.mxu0 %v2099_v58 }
  0x74   : > { %1977 = vmatprep.subr.bf16.mxu1 %v2100_v59 }
  0x76   : > { %1958 = vmatpush3.bf16.msra.mxu0 %v2099_v58 }
  0x77   : > { %1978 = vmatpush3.bf16.msra.mxu1 %v2100_v59  ;;  %1959 = vmatprep.subr.bf16.mxu0 %v2101_v60 }
  0x78   : > { %1979 = vmatprep.subr.bf16.mxu1 %v2102_v61 }
  0x7a   : > { %1960 = vmatpush3.bf16.msra.mxu0 %v2101_v60 }
  0x7b   : > { %1980 = vmatpush3.bf16.msra.mxu1 %v2102_v61  ;;  %1961 = vmatprep.subr.bf16.mxu0 %v2103_v62 }
  0x7c   : > { %1981 = vmatprep.subr.bf16.mxu1 %v2104_v63 }
  0x7e   : > { %1962 = vmatpush3.bf16.msra.mxu0 %v2103_v62 }
  0x7f   : > { %1982 = vmatpush3.bf16.msra.mxu1 %v2104_v63  ;;  %1963 = vmatprep.subr.bf16.mxu0 %v2105_v0 }
  0x80   : > { %1983 = vmatprep.subr.bf16.mxu1 %v2106_v1 }
  0x82   : > { %1964 = vmatpush3.bf16.msra.mxu0 %v2105_v0  ;;  %v1740_v0 = vld [vmem:[%s2496_s2] ss:$0 sm:$0xff] }
  0x83   : > { %1984 = vmatpush3.bf16.msra.mxu1 %v2106_v1  ;;  %1965 = vmatprep.subr.bf16.mxu0 %v2107_v2 }
  0x84   : > { %1985 = vmatprep.subr.bf16.mxu1 %v2108_v3 }
  0x86   : > { %1966 = vmatpush3.bf16.msra.mxu0 %v2107_v2 }
  0x87   : > { %1986 = vmatpush3.bf16.msra.mxu1 %v2108_v3  ;;  %1967 = vmatprep.subr.bf16.mxu0 %v2109_v4 }
  0x88   : > { %1987 = vmatprep.subr.bf16.mxu1 %v2110_v5 }
  0x8a   : > { %1968 = vmatpush3.bf16.msra.mxu0 %v2109_v4 }
  0x8b   : > { %1988 = vmatpush3.bf16.msra.mxu1 %v2110_v5  ;;  %1993 = vmatprep.subr.bf16.mxu0 %v2114_v6 }
  0x8d   : > { %1970 = vmatmul.mubr.bf16.vlgmr.msra.gmra.mxu0 %v1032_v50 }
  0x8e   : > { %1994 = vmatpush3.bf16.msra.mxu0 %v2114_v6  ;;  %1990 = vmatmul.mubr.bf16.vlgmr.msra.gmra.mxu1 %v1172_v53 }
  0x8f   : > { %1995 = vmatprep.subr.bf16.mxu0 %v2115_v7  ;;  %2009 = vmatprep.mubr.bf16.mxu0 %v2382_v32 }
  0x92   : > { %1996 = vmatpush3.bf16.msra.mxu0 %v2115_v7 }
  0x93   : > { %1997 = vmatprep.subr.bf16.mxu0 %v2116_v8 }
  0x96   : > { %1998 = vmatpush3.bf16.msra.mxu0 %v2116_v8 }
  0x97   : > { %1999 = vmatprep.subr.bf16.mxu0 %v2117_v9 }
  0x9a   : > { %2000 = vmatpush3.bf16.msra.mxu0 %v2117_v9 }
  0x9b   : > { %2001 = vmatprep.subr.bf16.mxu0 %v2118_v10 }
  0x9e   : > { %2002 = vmatpush3.bf16.msra.mxu0 %v2118_v10 }
  0x9f   : > { %2003 = vmatprep.subr.bf16.mxu0 %v2119_v11 }
  0xa2   : > { %2004 = vmatpush3.bf16.msra.mxu0 %v2119_v11 }
  0xa3   : > { %2005 = vmatprep.subr.bf16.mxu0 %v2120_v14 }
  0xa6   : > { %2006 = vmatpush3.bf16.msra.mxu0 %v2120_v14 }
  0xa7   : > { %2007 = vmatprep.subr.bf16.mxu0 %v2121_v15 }
  0xaa   : > { %2008 = vmatpush3.bf16.msra.mxu0 %v2121_v15 }
  0xad   : > { %2010 = vmatmul.mubr.bf16.vlgmr.msra.gmra.mxu0 %v1297_v26 }
  0xed   : > { %v1851_v16 = vpop.f32.mrf.mxu0 }
  0xee   : > { %v1871_v17 = vpop.f32.mrf.mxu1 }
  0xef   : > { %v478_v12 = vadd.f32 %v1871_v17, %v1851_v16  ;;  %v370_v13 = vpop.f32.mrf.mxu0 }
  0xf0   : > { %v469_v18 = vpop.f32.mrf.mxu1 }
  0xf1   : > { %v470_v19 = vadd.f32 %v469_v18, %v370_v13  ;;  %v1852_v20 = vpop.f32.mrf.mxu0 }
  0xf2   : > { %v1872_v21 = vpop.f32.mrf.mxu1 }
  0xf3   : > { %v373_v23 = vpop.f32.mrf.mxu0 }
  0xf4   : > { %v472_v24 = vpop.f32.mrf.mxu1 }
  0xf5   : > { %v473_v25 = vadd.f32 %v472_v24, %v373_v23 }
 0x10d   : > { %v1891_v27 = vpop.f32.mrf.mxu0 }
 0x10e   : > { %v608_v28 = vadd.f32 %v1891_v27, %v478_v12  ;;  %v1911_v29 = vpop.f32.mrf.mxu1 }
 0x10f   : > { %v592_v30 = vpop.f32.mrf.mxu0 }
 0x110   : > { %v606_v31 = vadd.f32 %v592_v30, %v470_v19  ;;  %v738_v32 = vadd.f32 %v1911_v29, %v608_v28  ;;  %v722_v33 = vpop.f32.mrf.mxu1 }
 0x111   : > { %v1892_v22 = vpop.f32.mrf.mxu0 }
 0x112   : > { %v736_v26 = vadd.f32 %v722_v33, %v606_v31  ;;  %v1912_v34 = vpop.f32.mrf.mxu1 }
 0x113   : > { %v595_v35 = vpop.f32.mrf.mxu0 }
 0x114   : > { %v725_v36 = vpop.f32.mrf.mxu1  ;;  %v607_v51 = vadd.f32 %v595_v35, %v473_v25 }
 0x116   : > { %v737_v54 = vadd.f32 %v725_v36, %v607_v51 }
 0x12d   : > { %v1931_v37 = vpop.f32.mrf.mxu0 }
 0x12e   : > { %v1951_v38 = vpop.f32.mrf.mxu1  ;;  %v878_v52 = vadd.f32 %v1931_v37, %v738_v32 }
 0x12f   : > { %v862_v39 = vpop.f32.mrf.mxu0 }
 0x130   : > { %v982_v40 = vpop.f32.mrf.mxu1  ;;  %v876_v53 = vadd.f32 %v862_v39, %v736_v26  ;;  %v998_v55 = vadd.f32 %v1951_v38, %v878_v52 }
 0x131   : > { %v1932_v41 = vpop.f32.mrf.mxu0 }
 0x132   : > { %v1952_v42 = vpop.f32.mrf.mxu1  ;;  %v996_v56 = vadd.f32 %v982_v40, %v876_v53 }
 0x133   : > { %v865_v43 = vpop.f32.mrf.mxu0 }
 0x134   : > { %v985_v44 = vpop.f32.mrf.mxu1  ;;  %v877_v57 = vadd.f32 %v865_v43, %v737_v54 }
 0x136   : > { %v997_v61 = vadd.f32 %v985_v44, %v877_v57 }
 0x14d   : > { %v1971_v45 = vpop.f32.mrf.mxu0 }
 0x14e   : > { %v1991_v46 = vpop.f32.mrf.mxu1  ;;  %v1134_v58 = vadd.f32 %v1971_v45, %v998_v55 }
 0x14f   : > { %v1118_v47 = vpop.f32.mrf.mxu0 }
 0x150   : > { %v1258_v48 = vpop.f32.mrf.mxu1  ;;  %v1132_v59 = vadd.f32 %v1118_v47, %v996_v56  ;;  %v1274_v62 = vadd.f32 %v1991_v46, %v1134_v58 }
 0x151   : > { %v1972_v49 = vpop.f32.mrf.mxu0 }
 0x152   : > { %v1992_v50 = vpop.f32.mrf.mxu1  ;;  %v1272_v1 = vadd.f32 %v1258_v48, %v1132_v59 }
 0x153   : > { %v1121_v60 = vpop.f32.mrf.mxu0 }
 0x154   : > { %v1133_v2 = vadd.f32 %v1121_v60, %v997_v61  ;;  %v1261_v4 = vpop.f32.mrf.mxu1 }
 0x156   : > { %v1273_v9 = vadd.f32 %v1261_v4, %v1133_v2 }
 0x16d   : > { %v2011_v63 = vpop.f32.mrf.mxu0 }
 0x16e   : > { %v1399_v3 = vadd.f32 %v2011_v63, %v1274_v62 }
 0x16f   : > { %v1383_v5 = vpop.f32.mrf.mxu0 }
 0x170   : > { %v1409_v6 = vadd.f32 %v1740_v0, %v1399_v3  ;;  %v1397_v7 = vadd.f32 %v1383_v5, %v1272_v1 }
 0x171   : > { %v2012_v8 = vpop.f32.mrf.mxu0 }
 0x172   : > { %1412 = vst [vmem:[%s221_s11 + $0x10] sm:$0xff] %v1409_v6  ;;  %v1407_v10 = vadd.f32 %v1740_v0, %v1397_v7 }
 0x173   : > { %v1386_v11 = vpop.f32.mrf.mxu0 }
 0x174   : > { %1410 = vst [vmem:[%s221_s11] sm:$0xff] %v1407_v10  ;;  %v1398_v14 = vadd.f32 %v1386_v11, %v1273_v9 }
 0x176   : > { %v1408_v15 = vadd.f32 %v1740_v0, %v1398_v14 }
 0x178   : > { %1411 = vst [vmem:[%s221_s11 + $0x8] sm:$0xff] %v1408_v15 }
 0x179 PF: > { %s13_s14 = sadd.s32 1, %s2145_s14   ;;  %s2498_s12 = smov %s2141_s13 }
 0x17a   : > { %p10_p5 = scmp.ge.s32.totalorder %s13_s14, 4   ;;  %s2499_s13 = smov %s2501_s15 }
 0x17c   :  { %12 = sbr.rel (!%p10_p5) target bundleno = 2 (0x2), region = 76 }

// kernel: pyramid_features.15
= control target key start
LH: loop header
LB: loop body
LE: loop exit
PB: predicated region body
PF: predicated region fallthrough
CT: control target
= control target key end

     0   :  { %s1983_s12 = smov 0   ;;  %s1985_s13 = smov 0   ;;  %s2346_s0 = inlined_call_operand.vmem [shape: bf16[2,20,128], index: 0, kind: input, shape index: {}]   ;;  %s2347_s1 = inlined_call_operand.vmem [shape: bf16[9,128,128], index: 1, kind: input, shape index: {}]   ;;  %s2348_s2 = inlined_call_operand.vmem [shape: f32[1,128], index: 2, kind: input, shape index: {}]   ;;  %s2349_s3 = inlined_call_operand.vmem [shape: f32[2,8,128], index: 3, kind: output, shape index: {}]  }
   0x1   :  { %s1987_s14 = smov 0  }
   0x2 LB: > { %s25_s15 = sadd.s32 1, %s1955_s13  ;;  %p1357_p0 = scmp.ge.s32.totalorder %s1959_s14, 1  ;;  %s1959_s14 = sphi %s1987_s14, %s13_s14   ;;  %s1955_s13 = sphi %s1985_s13, %s2351_s13   ;;  %s1951_s12 = sphi %s1983_s12, %s2350_s12  }
   0x3   : > { %p27_p1 = scmp.ge.s32.totalorder %s25_s15, 2  ;;  %p168_p2 = scmp.lt.s32.totalorder %s1959_s14, 3 }
   0x5   : > { %s2353_s15 = smov (%p27_p1, %s25_s15), 0  ;;  %p169_p3 = pnand %p1357_p0, %p168_p2 }
   0x6   : > { %p201_p4 = scmp.lt.s32.totalorder (!%p169_p3), %s1951_s12, 1 }
   0x7   : > { %172 = sbr.rel (%p169_p3) target bundleno = 372 (0x174), region = 32 }
   0xc   : > { %v1858_v0 = vld [vmem:[%s2347_s1 + $0x78] sm:$0xff]   ;;  %v1961_v1 = vmov 0.0   ;;  %v1860_v3 = vld [vmem:[%s2347_s1 + $0x70] sm:$0xff]   ;;  %vm1962_vm0 = vmmov 0   ;;  %s2355_s12 = smov (!%p201_p4, %s1951_s12), 1  ;;  %v1862_v5 = vld [vmem:[%s2347_s1 + $0x68] sm:$0xff]  }
   0xd   : > { %1651 = vmatprep.subr.bf16.mxu0 %v1961_v1  ;;  %1671 = vmatprep.subr.bf16.mxu1 %v1961_v1  ;;  %v1859_v2 = vld [vmem:[%s2347_s1 + $0x38] sm:$0xff]   ;;  %v1861_v4 = vld [vmem:[%s2347_s1 + $0x30] sm:$0xff]   ;;  %v1863_v6 = vld [vmem:[%s2347_s1 + $0x28] sm:$0xff]   ;;  %s1831_s28 = smul.u32 12, %s2355_s12 }
   0xe   : > { %1652 = vmatpush3.bf16.msra.mxu0 %v1858_v0  ;;  %1667 = vmatprep.mubr.msk.bf16.mxu0 %vm1962_vm0, %v1961_v1  ;;  %v1864_v7 = vld [vmem:[%s2347_s1 + $0x60] sm:$0xff]   ;;  %v1866_v9 = vld [vmem:[%s2347_s1 + $0x58] sm:$0xff]   ;;  %v1868_v14 = vld [vmem:[%s2347_s1 + $0x50] sm:$0xff]  }
   0xf   : > { %1672 = vmatpush3.bf16.msra.mxu1 %v1859_v2  ;;  %1653 = vmatprep.subr.bf16.mxu0 %v1961_v1  ;;  %v1865_v8 = vld [vmem:[%s2347_s1 + $0x20] sm:$0xff]   ;;  %s2043_s8 = scalar_lea.vmem %s2346_s0, %s1831_s28  ;;  %v1867_v10 = vld [vmem:[%s2347_s1 + $0x18] sm:$0xff]   ;;  %v1869_v15 = vld [vmem:[%s2347_s1 + $0x10] sm:$0xff]  }
  0x10   : > { %1673 = vmatprep.subr.bf16.mxu1 %v1961_v1  ;;  %1687 = vmatprep.mubr.msk.bf16.mxu1 %vm1962_vm0, %v1961_v1  ;;  %v221_v11 = vld [vmem:[%s2043_s8] sm:$0xf]  ;;  %v2055_v12 = vld [vmem:[%s2043_s8 + $0x4] sm:$0x1]  ;;  %v1870_v17 = vld [vmem:[%s2347_s1 + $0x48] sm:$0xff]  }
  0x11   : > { %v1376_v13 = vcombine.low %v221_v11, %v2055_v12  ;;  %v1871_v18 = vld [vmem:[%s2347_s1 + $0x8] sm:$0xff]   ;;  %v1872_v21 = vld [vmem:[%s2347_s1 + $0x40] sm:$0xff]   ;;  %v1875_v24 = vld [vmem:[%s2347_s1 + $0xb8] sm:$0xff]  }
  0x12   : > { %1654 = vmatpush3.bf16.msra.mxu0 %v1860_v3  ;;  %v1873_v22 = vld [vmem:[%s2347_s1] sm:$0xff]   ;;  %v1876_v25 = vld [vmem:[%s2347_s1 + $0xf8] sm:$0xff]   ;;  %v1877_v26 = vld [vmem:[%s2347_s1 + $0xb0] sm:$0xff]  }
  0x13   : > { %1674 = vmatpush3.bf16.msra.mxu1 %v1861_v4  ;;  %1655 = vmatprep.subr.bf16.mxu0 %v1961_v1  ;;  %v264_v16 = vshll.u32 %v1376_v13, 16  ;;  %v262_v19 = vshrl.u32 %v1376_v13, 16  ;;  %v1878_v27 = vld [vmem:[%s2347_s1 + $0xf0] sm:$0xff]   ;;  %v1879_v28 = vld [vmem:[%s2347_s1 + $0xa8] sm:$0xff]   ;;  %v1881_v30 = vld [vmem:[%s2347_s1 + $0xa0] sm:$0xff]  }
  0x14   : > { %1675 = vmatprep.subr.bf16.mxu1 %v1961_v1  ;;  %v1880_v29 = vld [vmem:[%s2347_s1 + $0xe8] sm:$0xff]   ;;  %v1882_v31 = vld [vmem:[%s2347_s1 + $0xe0] sm:$0xff]   ;;  %v1883_v32 = vld [vmem:[%s2347_s1 + $0x98] sm:$0xff]  }
  0x15   : > { %v266_v20 = vrot.slane %v264_v16, 1  ;;  %v1884_v33 = vld [vmem:[%s2347_s1 + $0xd8] sm:$0xff]   ;;  %v1885_v34 = vld [vmem:[%s2347_s1 + $0x90] sm:$0xff]   ;;  %v1887_v36 = vld [vmem:[%s2347_s1 + $0x88] sm:$0xff]  }
  0x16   : > { %1656 = vmatpush3.bf16.msra.mxu0 %v1862_v5  ;;  %v1886_v35 = vld [vmem:[%s2347_s1 + $0xd0] sm:$0xff]   ;;  %v1888_v37 = vld [vmem:[%s2347_s1 + $0xc8] sm:$0xff]   ;;  %v445_v38 = vld [vmem:[%s2043_s8] sm:$0xe] }
  0x17   : > { %1676 = vmatpush3.bf16.msra.mxu1 %v1863_v6  ;;  %1657 = vmatprep.subr.bf16.mxu0 %v1961_v1  ;;  %v267_v23 = vor.u32 %v266_v20, %v262_v19  ;;  %v557_v39 = vld [vmem:[%s2043_s8] sm:$0xc]  ;;  %v558_v40 = vld [vmem:[%s2043_s8 + $0x4] sm:$0x3]  ;;  %v1409_v41 = vcombine.low %v445_v38, %v2055_v12  ;;  %v1892_v46 = vld [vmem:[%s2347_s1 + $0x138] sm:$0xff]  }
  0x18   : > { %1677 = vmatprep.subr.bf16.mxu1 %v1961_v1  ;;  %v1889_v42 = vld [vmem:[%s2347_s1 + $0x80] sm:$0xff]   ;;  %v1434_v43 = vcombine.low %v557_v39, %v558_v40  ;;  %v1895_v48 = vld [vmem:[%s2347_s1 + $0x178] sm:$0xff]   ;;  %v1896_v49 = vld [vmem:[%s2347_s1 + $0x130] sm:$0xff]  }
  0x19   : > { %v1890_v44 = vld [vmem:[%s2347_s1 + $0xc0] sm:$0xff]   ;;  %v466_v45 = vrot.slane %v1409_v41, 1  ;;  %v1897_v50 = vld [vmem:[%s2347_s1 + $0x170] sm:$0xff]   ;;  %v1898_v51 = vld [vmem:[%s2347_s1 + $0x128] sm:$0xff]  }
  0x1a   : > { %1658 = vmatpush3.bf16.msra.mxu0 %v1864_v7  ;;  %v581_v47 = vrot.slane %v1434_v43, 2  ;;  %v1899_v52 = vld [vmem:[%s2347_s1 + $0x168] sm:$0xff]   ;;  %v1900_v53 = vld [vmem:[%s2347_s1 + $0x120] sm:$0xff]   ;;  %v1902_v56 = vld [vmem:[%s2347_s1 + $0x118] sm:$0xff]  }
  0x1b   : > { %1678 = vmatpush3.bf16.msra.mxu1 %v1865_v8  ;;  %1659 = vmatprep.subr.bf16.mxu0 %v1961_v1  ;;  %v1901_v54 = vld [vmem:[%s2347_s1 + $0x160] sm:$0xff]   ;;  %v1903_v57 = vld [vmem:[%s2347_s1 + $0x158] sm:$0xff]   ;;  %v1904_v59 = vld [vmem:[%s2347_s1 + $0x110] sm:$0xff]  }
  0x1c   : > { %1679 = vmatprep.subr.bf16.mxu1 %v1961_v1  ;;  %v672_v55 = vld [vmem:[%s2043_s8 + $0x4] sm:$0x7]  ;;  %v1905_v60 = vld [vmem:[%s2347_s1 + $0x150] sm:$0xff]   ;;  %v1906_v63 = vld [vmem:[%s2347_s1 + $0x108] sm:$0xff]  }
  0x1d   : > { %v1459_v58 = vcombine.low %v557_v39, %v672_v55  ;;  %v1907_v0 = vld [vmem:[%s2347_s1 + $0x148] sm:$0xff]   ;;  %v791_v2 = vld [vmem:[%s2043_s8] sm:$0x8]  ;;  %v1913_v12 = vld [vmem:[%s2347_s1 + $0x1b0] sm:$0xff]  }
  0x1e   : > { %1660 = vmatpush3.bf16.msra.mxu0 %v1866_v9  ;;  %v1908_v5 = vld [vmem:[%s2347_s1 + $0x100] sm:$0xff]   ;;  %v1484_v6 = vcombine.low %v791_v2, %v672_v55  ;;  %v1910_v9 = vld [vmem:[%s2347_s1 + $0x1b8] sm:$0xff]   ;;  %v1914_v13 = vld [vmem:[%s2347_s1 + $0x1f0] sm:$0xff]  }
  0x1f   : > { %1680 = vmatpush3.bf16.msra.mxu1 %v1867_v10  ;;  %1661 = vmatprep.subr.bf16.mxu0 %v1961_v1  ;;  %v694_v61 = vshrl.u32 %v1459_v58, 16  ;;  %v697_v62 = vshll.u32 %v1459_v58, 16  ;;  %v1909_v7 = vld [vmem:[%s2347_s1 + $0x140] sm:$0xff]   ;;  %v1920_v19 = vld [vmem:[%s2347_s1 + $0x1d8] sm:$0xff]   ;;  %v1933_v39 = vld [vmem:[%s2347_s1 + $0x210] sm:$0xff]  }
  0x20   : > { %1681 = vmatprep.subr.bf16.mxu1 %v1961_v1  ;;  %v812_v10 = vrot.slane %v1484_v6, 3  ;;  %v1917_v16 = vld [vmem:[%s2347_s1 + $0x1a0] sm:$0xff]   ;;  %v1932_v38 = vld [vmem:[%s2347_s1 + $0x218] sm:$0xff]   ;;  %v1934_v40 = vld [vmem:[%s2347_s1 + $0x208] sm:$0xff]  }
  0x21   : > { %v696_v3 = vrot.slane %v694_v61, 2  ;;  %v699_v4 = vrot.slane %v697_v62, 3  ;;  %v1010_v20 = vld [vmem:[%s2043_s8 + $0x4] sm:$0xf] }
  0x22   : > { %1662 = vmatpush3.bf16.msra.mxu0 %v1868_v14  ;;  %v1915_v14 = vld [vmem:[%s2347_s1 + $0x1a8] sm:$0xff]   ;;  %v1131_v41 = vld [vmem:[%s2043_s8 + $0x4] sm:$0xe] }
  0x23   : > { %1682 = vmatpush3.bf16.msra.mxu1 %v1869_v15  ;;  %1663 = vmatprep.subr.bf16.mxu0 %v1961_v1  ;;  %v700_v8 = vor.u32 %v699_v4, %v696_v3  ;;  %v1916_v15 = vld [vmem:[%s2347_s1 + $0x1e8] sm:$0xff]   ;;  %v1935_v43 = vld [vmem:[%s2347_s1 + $0x200] sm:$0xff]  }
  0x24   : > { %1683 = vmatprep.subr.bf16.mxu1 %v1961_v1 }
  0x26   : > { %1664 = vmatpush3.bf16.msra.mxu0 %v1870_v17  ;;  %v1918_v17 = vld [vmem:[%s2347_s1 + $0x1e0] sm:$0xff]  }
  0x27   : > { %1684 = vmatpush3.bf16.msra.mxu1 %v1871_v18  ;;  %1665 = vmatprep.subr.bf16.mxu0 %v1961_v1  ;;  %v1919_v18 = vld [vmem:[%s2347_s1 + $0x198] sm:$0xff]  }
  0x28   : > { %1685 = vmatprep.subr.bf16.mxu1 %v1961_v1 }
  0x2a   : > { %1666 = vmatpush3.bf16.msra.mxu0 %v1872_v21  ;;  %v1011_v21 = vld [vmem:[%s2043_s8 + $0x8] sm:$0x1] }
  0x2b   : > { %1686 = vmatpush3.bf16.msra.mxu1 %v1873_v22  ;;  %1691 = vmatprep.subr.bf16.mxu0 %v1961_v1  ;;  %v1921_v22 = vld [vmem:[%s2347_s1 + $0x190] sm:$0xff]  }
  0x2c   : > { %1711 = vmatprep.subr.bf16.mxu1 %v1961_v1 }
  0x2d   : > { %1668 = vmatmul.mubr.bf16.vlgmr.msra.gmra.mxu0 %v267_v23  ;;  %v1533_v23 = vcombine.low %v1010_v20, %v1011_v21 }
  0x2e   : > { %1688 = vmatmul.mubr.bf16.vlgmr.msra.gmra.mxu1 %v221_v11  ;;  %1692 = vmatpush3.bf16.msra.mxu0 %v1875_v24  ;;  %v1912_v11 = vld [vmem:[%s2347_s1 + $0x1f8] sm:$0xff]   ;;  %v1922_v24 = vld [vmem:[%s2347_s1 + $0x1d0] sm:$0xff]  }
  0x2f   : > { %1712 = vmatpush3.bf16.msra.mxu1 %v1876_v25  ;;  %1693 = vmatprep.subr.bf16.mxu0 %v1961_v1  ;;  %v1923_v25 = vld [vmem:[%s2347_s1 + $0x188] sm:$0xff]  }
  0x30   : > { %1713 = vmatprep.subr.bf16.mxu1 %v1961_v1  ;;  %1707 = vmatprep.mubr.msk.bf16.mxu0 %vm1962_vm0, %v1961_v1 }
  0x31   : > { %1727 = vmatprep.mubr.msk.bf16.mxu1 %vm1962_vm0, %v1961_v1 }
  0x32   : > { %1694 = vmatpush3.bf16.msra.mxu0 %v1877_v26  ;;  %v1037_v26 = vshll.u32 %v1533_v23, 16 }
  0x33   : > { %1714 = vmatpush3.bf16.msra.mxu1 %v1878_v27  ;;  %1695 = vmatprep.subr.bf16.mxu0 %v1961_v1  ;;  %v1924_v27 = vld [vmem:[%s2347_s1 + $0x1c8] sm:$0xff]  }
  0x34   : > { %1715 = vmatprep.subr.bf16.mxu1 %v1961_v1 }
  0x36   : > { %1696 = vmatpush3.bf16.msra.mxu0 %v1879_v28  ;;  %v1925_v28 = vld [vmem:[%s2347_s1 + $0x180] sm:$0xff]  }
  0x37   : > { %1716 = vmatpush3.bf16.msra.mxu1 %v1880_v29  ;;  %1697 = vmatprep.subr.bf16.mxu0 %v1961_v1  ;;  %v1035_v29 = vshrl.u32 %v1533_v23, 16 }
  0x38   : > { %1717 = vmatprep.subr.bf16.mxu1 %v1961_v1 }
  0x3a   : > { %1698 = vmatpush3.bf16.msra.mxu0 %v1881_v30  ;;  %v1039_v30 = vrot.slane %v1037_v26, 1 }
  0x3b   : > { %1718 = vmatpush3.bf16.msra.mxu1 %v1882_v31  ;;  %1699 = vmatprep.subr.bf16.mxu0 %v1961_v1  ;;  %v1926_v31 = vld [vmem:[%s2347_s1 + $0x1c0] sm:$0xff]  }
  0x3c   : > { %1719 = vmatprep.subr.bf16.mxu1 %v1961_v1 }
  0x3e   : > { %1700 = vmatpush3.bf16.msra.mxu0 %v1883_v32  ;;  %v903_v32 = vld [vmem:[%s2043_s8 + $0x4] sm:$0xf]  ;;  %s1359_s8 = sshll.u32 %s2355_s12, 3 }
  0x3f   : > { %1720 = vmatpush3.bf16.msra.mxu1 %v1884_v33  ;;  %1701 = vmatprep.subr.bf16.mxu0 %v1961_v1  ;;  %v1927_v33 = vld [vmem:[%s2347_s1 + $0x238] sm:$0xff]   ;;  %s219_s9 = scalar_lea.vmem %s2349_s3, %s1359_s8 }
  0x40   : > { %1721 = vmatprep.subr.bf16.mxu1 %v1961_v1 }
  0x42   : > { %1702 = vmatpush3.bf16.msra.mxu0 %v1885_v34  ;;  %v1040_v34 = vor.u32 %v1039_v30, %v1035_v29 }
  0x43   : > { %1722 = vmatpush3.bf16.msra.mxu1 %v1886_v35  ;;  %1703 = vmatprep.subr.bf16.mxu0 %v1961_v1  ;;  %v1929_v35 = vld [vmem:[%s2347_s1 + $0x230] sm:$0xff]  }
  0x44   : > { %1723 = vmatprep.subr.bf16.mxu1 %v1961_v1 }
  0x46   : > { %1704 = vmatpush3.bf16.msra.mxu0 %v1887_v36  ;;  %v1930_v36 = vld [vmem:[%s2347_s1 + $0x228] sm:$0xff]  }
  0x47   : > { %1724 = vmatpush3.bf16.msra.mxu1 %v1888_v37  ;;  %1705 = vmatprep.subr.bf16.mxu0 %v1961_v1  ;;  %v1931_v37 = vld [vmem:[%s2347_s1 + $0x220] sm:$0xff]  }
  0x48   : > { %1725 = vmatprep.subr.bf16.mxu1 %v1961_v1 }
  0x4a   : > { %1706 = vmatpush3.bf16.msra.mxu0 %v1889_v42  ;;  %v1558_v42 = vcombine.low %v1131_v41, %v1011_v21  ;;  %v1567_v21 = vld [vmem:[%s2348_s2] ss:$0 sm:$0xff] }
  0x4b   : > { %1726 = vmatpush3.bf16.msra.mxu1 %v1890_v44  ;;  %1731 = vmatprep.subr.bf16.mxu0 %v1961_v1 }
  0x4c   : > { %1751 = vmatprep.subr.bf16.mxu1 %v1961_v1  ;;  %v1152_v44 = vrot.slane %v1558_v42, 1 }
  0x4d   : > { %1708 = vmatmul.mubr.bf16.vlgmr.msra.gmra.mxu0 %v466_v45 }
  0x4e   : > { %1732 = vmatpush3.bf16.msra.mxu0 %v1892_v46  ;;  %1728 = vmatmul.mubr.bf16.vlgmr.msra.gmra.mxu1 %v581_v47 }
  0x4f   : > { %1752 = vmatpush3.bf16.msra.mxu1 %v1895_v48  ;;  %1733 = vmatprep.subr.bf16.mxu0 %v1961_v1 }
  0x50   : > { %1753 = vmatprep.subr.bf16.mxu1 %v1961_v1  ;;  %1747 = vmatprep.mubr.msk.bf16.mxu0 %vm1962_vm0, %v1961_v1 }
  0x51   : > { %1767 = vmatprep.mubr.msk.bf16.mxu1 %vm1962_vm0, %v1961_v1 }
  0x52   : > { %1734 = vmatpush3.bf16.msra.mxu0 %v1896_v49 }
  0x53   : > { %1754 = vmatpush3.bf16.msra.mxu1 %v1897_v50  ;;  %1735 = vmatprep.subr.bf16.mxu0 %v1961_v1 }
  0x54   : > { %1755 = vmatprep.subr.bf16.mxu1 %v1961_v1 }
  0x56   : > { %1736 = vmatpush3.bf16.msra.mxu0 %v1898_v51 }
  0x57   : > { %1756 = vmatpush3.bf16.msra.mxu1 %v1899_v52  ;;  %1737 = vmatprep.subr.bf16.mxu0 %v1961_v1 }
  0x58   : > { %1757 = vmatprep.subr.bf16.mxu1 %v1961_v1 }
  0x5a   : > { %1738 = vmatpush3.bf16.msra.mxu0 %v1900_v53 }
  0x5b   : > { %1758 = vmatpush3.bf16.msra.mxu1 %v1901_v54  ;;  %1739 = vmatprep.subr.bf16.mxu0 %v1961_v1 }
  0x5c   : > { %1759 = vmatprep.subr.bf16.mxu1 %v1961_v1 }
  0x5e   : > { %1740 = vmatpush3.bf16.msra.mxu0 %v1902_v56 }
  0x5f   : > { %1760 = vmatpush3.bf16.msra.mxu1 %v1903_v57  ;;  %1741 = vmatprep.subr.bf16.mxu0 %v1961_v1 }
  0x60   : > { %1761 = vmatprep.subr.bf16.mxu1 %v1961_v1 }
  0x62   : > { %1742 = vmatpush3.bf16.msra.mxu0 %v1904_v59 }
  0x63   : > { %1762 = vmatpush3.bf16.msra.mxu1 %v1905_v60  ;;  %1743 = vmatprep.subr.bf16.mxu0 %v1961_v1 }
  0x64   : > { %1763 = vmatprep.subr.bf16.mxu1 %v1961_v1 }
  0x66   : > { %1744 = vmatpush3.bf16.msra.mxu0 %v1906_v63 }
  0x67   : > { %1764 = vmatpush3.bf16.msra.mxu1 %v1907_v0  ;;  %1745 = vmatprep.subr.bf16.mxu0 %v1961_v1 }
  0x68   : > { %1765 = vmatprep.subr.bf16.mxu1 %v1961_v1 }
  0x6a   : > { %1746 = vmatpush3.bf16.msra.mxu0 %v1908_v5 }
  0x6b   : > { %1766 = vmatpush3.bf16.msra.mxu1 %v1909_v7  ;;  %1771 = vmatprep.subr.bf16.mxu0 %v1961_v1 }
  0x6c   : > { %1791 = vmatprep.subr.bf16.mxu1 %v1961_v1 }
  0x6d   : > { %1748 = vmatmul.mubr.bf16.vlgmr.msra.gmra.mxu0 %v700_v8 }
  0x6e   : > { %1772 = vmatpush3.bf16.msra.mxu0 %v1910_v9  ;;  %1768 = vmatmul.mubr.bf16.vlgmr.msra.gmra.mxu1 %v812_v10 }
  0x6f   : > { %1792 = vmatpush3.bf16.msra.mxu1 %v1912_v11  ;;  %1773 = vmatprep.subr.bf16.mxu0 %v1961_v1 }
  0x70   : > { %1793 = vmatprep.subr.bf16.mxu1 %v1961_v1  ;;  %1787 = vmatprep.mubr.msk.bf16.mxu0 %vm1962_vm0, %v1961_v1 }
  0x71   : > { %1807 = vmatprep.mubr.msk.bf16.mxu1 %vm1962_vm0, %v1961_v1 }
  0x72   : > { %1774 = vmatpush3.bf16.msra.mxu0 %v1913_v12 }
  0x73   : > { %1794 = vmatpush3.bf16.msra.mxu1 %v1914_v13  ;;  %1775 = vmatprep.subr.bf16.mxu0 %v1961_v1 }
  0x74   : > { %1795 = vmatprep.subr.bf16.mxu1 %v1961_v1 }
  0x76   : > { %1776 = vmatpush3.bf16.msra.mxu0 %v1915_v14 }
  0x77   : > { %1796 = vmatpush3.bf16.msra.mxu1 %v1916_v15  ;;  %1777 = vmatprep.subr.bf16.mxu0 %v1961_v1 }
  0x78   : > { %1797 = vmatprep.subr.bf16.mxu1 %v1961_v1 }
  0x7a   : > { %1778 = vmatpush3.bf16.msra.mxu0 %v1917_v16 }
  0x7b   : > { %1798 = vmatpush3.bf16.msra.mxu1 %v1918_v17  ;;  %1779 = vmatprep.subr.bf16.mxu0 %v1961_v1 }
  0x7c   : > { %1799 = vmatprep.subr.bf16.mxu1 %v1961_v1 }
  0x7e   : > { %1780 = vmatpush3.bf16.msra.mxu0 %v1919_v18 }
  0x7f   : > { %1800 = vmatpush3.bf16.msra.mxu1 %v1920_v19  ;;  %1781 = vmatprep.subr.bf16.mxu0 %v1961_v1 }
  0x80   : > { %1801 = vmatprep.subr.bf16.mxu1 %v1961_v1 }
  0x82   : > { %1782 = vmatpush3.bf16.msra.mxu0 %v1921_v22 }
  0x83   : > { %1802 = vmatpush3.bf16.msra.mxu1 %v1922_v24  ;;  %1783 = vmatprep.subr.bf16.mxu0 %v1961_v1 }
  0x84   : > { %1803 = vmatprep.subr.bf16.mxu1 %v1961_v1 }
  0x86   : > { %1784 = vmatpush3.bf16.msra.mxu0 %v1923_v25 }
  0x87   : > { %1804 = vmatpush3.bf16.msra.mxu1 %v1924_v27  ;;  %1785 = vmatprep.subr.bf16.mxu0 %v1961_v1 }
  0x88   : > { %1805 = vmatprep.subr.bf16.mxu1 %v1961_v1 }
  0x8a   : > { %1786 = vmatpush3.bf16.msra.mxu0 %v1925_v28 }
  0x8b   : > { %1806 = vmatpush3.bf16.msra.mxu1 %v1926_v31  ;;  %1811 = vmatprep.subr.bf16.mxu0 %v1961_v1 }
  0x8d   : > { %1788 = vmatmul.mubr.bf16.vlgmr.msra.gmra.mxu0 %v903_v32 }
  0x8e   : > { %1812 = vmatpush3.bf16.msra.mxu0 %v1927_v33  ;;  %1808 = vmatmul.mubr.bf16.vlgmr.msra.gmra.mxu1 %v1040_v34 }
  0x8f   : > { %1813 = vmatprep.subr.bf16.mxu0 %v1961_v1  ;;  %1827 = vmatprep.mubr.msk.bf16.mxu0 %vm1962_vm0, %v1961_v1 }
  0x92   : > { %1814 = vmatpush3.bf16.msra.mxu0 %v1929_v35 }
  0x93   : > { %1815 = vmatprep.subr.bf16.mxu0 %v1961_v1 }
  0x96   : > { %1816 = vmatpush3.bf16.msra.mxu0 %v1930_v36 }
  0x97   : > { %1817 = vmatprep.subr.bf16.mxu0 %v1961_v1 }
  0x9a   : > { %1818 = vmatpush3.bf16.msra.mxu0 %v1931_v37 }
  0x9b   : > { %1819 = vmatprep.subr.bf16.mxu0 %v1961_v1 }
  0x9e   : > { %1820 = vmatpush3.bf16.msra.mxu0 %v1932_v38 }
  0x9f   : > { %1821 = vmatprep.subr.bf16.mxu0 %v1961_v1 }
  0xa2   : > { %1822 = vmatpush3.bf16.msra.mxu0 %v1933_v39 }
  0xa3   : > { %1823 = vmatprep.subr.bf16.mxu0 %v1961_v1 }
  0xa6   : > { %1824 = vmatpush3.bf16.msra.mxu0 %v1934_v40 }
  0xa7   : > { %1825 = vmatprep.subr.bf16.mxu0 %v1961_v1 }
  0xaa   : > { %1826 = vmatpush3.bf16.msra.mxu0 %v1935_v43 }
  0xad   : > { %1828 = vmatmul.mubr.bf16.vlgmr.msra.gmra.mxu0 %v1152_v44 }
  0xed   : > { %v351_v45 = vpop.f32.mrf.mxu0 }
  0xee   : > { %v439_v46 = vpop.f32.mrf.mxu1 }
  0xef   : > { %v440_v47 = vadd.f32 %v439_v46, %v351_v45  ;;  %v1669_v48 = vpop.f32.mrf.mxu0 }
  0xf0   : > { %v1689_v49 = vpop.f32.mrf.mxu1 }
  0xf1   : > { %v354_v50 = vpop.f32.mrf.mxu0 }
  0xf2   : > { %v442_v51 = vpop.f32.mrf.mxu1 }
  0xf3   : > { %v1670_v52 = vpop.f32.mrf.mxu0 }
  0xf4   : > { %v1690_v53 = vpop.f32.mrf.mxu1 }
 0x10d   : > { %v550_v54 = vpop.f32.mrf.mxu0 }
 0x10e   : > { %v556_v55 = vadd.f32 %v550_v54, %v440_v47  ;;  %v665_v56 = vpop.f32.mrf.mxu1 }
 0x10f   : > { %v1709_v57 = vpop.f32.mrf.mxu0 }
 0x110   : > { %v671_v58 = vadd.f32 %v665_v56, %v556_v55  ;;  %v1729_v59 = vpop.f32.mrf.mxu1 }
 0x111   : > { %v553_v60 = vpop.f32.mrf.mxu0 }
 0x112   : > { %v668_v1 = vpop.f32.mrf.mxu1 }
 0x113   : > { %v1710_v61 = vpop.f32.mrf.mxu0 }
 0x114   : > { %v1730_v62 = vpop.f32.mrf.mxu1 }
 0x12d   : > { %v784_v63 = vpop.f32.mrf.mxu0 }
 0x12e   : > { %v896_v0 = vpop.f32.mrf.mxu1  ;;  %v790_v16 = vadd.f32 %v784_v63, %v671_v58 }
 0x12f   : > { %v1749_v2 = vpop.f32.mrf.mxu0 }
 0x130   : > { %v1769_v3 = vpop.f32.mrf.mxu1  ;;  %v902_v17 = vadd.f32 %v896_v0, %v790_v16 }
 0x131   : > { %v787_v4 = vpop.f32.mrf.mxu0 }
 0x132   : > { %v899_v5 = vpop.f32.mrf.mxu1 }
 0x133   : > { %v1750_v6 = vpop.f32.mrf.mxu0 }
 0x134   : > { %v1770_v7 = vpop.f32.mrf.mxu1 }
 0x14d   : > { %v1003_v8 = vpop.f32.mrf.mxu0 }
 0x14e   : > { %v1124_v9 = vpop.f32.mrf.mxu1  ;;  %v1009_v18 = vadd.f32 %v1003_v8, %v902_v17 }
 0x14f   : > { %v1789_v10 = vpop.f32.mrf.mxu0 }
 0x150   : > { %v1809_v11 = vpop.f32.mrf.mxu1  ;;  %v1130_v19 = vadd.f32 %v1124_v9, %v1009_v18 }
 0x151   : > { %v1006_v12 = vpop.f32.mrf.mxu0 }
 0x152   : > { %v1127_v13 = vpop.f32.mrf.mxu1 }
 0x153   : > { %v1790_v14 = vpop.f32.mrf.mxu0 }
 0x154   : > { %v1810_v15 = vpop.f32.mrf.mxu1 }
 0x16d   : > { %v1236_v20 = vpop.f32.mrf.mxu0 }
 0x16e   : > { %v1242_v22 = vadd.f32 %v1236_v20, %v1130_v19 }
 0x16f   : > { %v1829_v23 = vpop.f32.mrf.mxu0 }
 0x170   : > { %v1250_v24 = vadd.f32 %v1567_v21, %v1242_v22 }
 0x171   : > { %v1239_v25 = vpop.f32.mrf.mxu0 }
 0x172   : > { %1251 = vst [vmem:[%s219_s9] sm:$0xff] %v1250_v24 }
 0x173   : > { %v1830_v26 = vpop.f32.mrf.mxu0 }
 0x174 PF: > { %s13_s14 = sadd.s32 1, %s1959_s14   ;;  %s2350_s12 = smov %s1955_s13 }
 0x175   : > { %p10_p5 = scmp.ge.s32.totalorder %s13_s14, 4   ;;  %s2351_s13 = smov %s2353_s15 }
 0x177   :  { %12 = sbr.rel (!%p10_p5) target bundleno = 2 (0x2), region = 76 }

// kernel: pyramid_features.11
= control target key start
LH: loop header
LB: loop body
LE: loop exit
PB: predicated region body
PF: predicated region fallthrough
CT: control target
= control target key end

     0   :  { %s2920_s12 = smov 0   ;;  %s2922_s13 = smov 0   ;;  %s3593_s0 = inlined_call_operand.vmem [shape: bf16[2,110,128], index: 0, kind: input, shape index: {}]   ;;  %s3594_s1 = inlined_call_operand.vmem [shape: bf16[9,128,128], index: 1, kind: input, shape index: {}]   ;;  %s3595_s2 = inlined_call_operand.vmem [shape: f32[1,128], index: 2, kind: input, shape index: {}]   ;;  %s3596_s3 = inlined_call_operand.vmem [shape: f32[2,80,128], index: 3, kind: output, shape index: {}]  }
   0x1   :  { %s2924_s14 = smov 0  }
   0x2 LB: > { %s25_s15 = sadd.s32 1, %s2892_s13  ;;  %p2065_p0 = scmp.ge.s32.totalorder %s2896_s14, 1  ;;  %s2896_s14 = sphi %s2924_s14, %s13_s14   ;;  %s2892_s13 = sphi %s2922_s13, %s3598_s13   ;;  %s2888_s12 = sphi %s2920_s12, %s3597_s12  }
   0x3   : > { %p27_p1 = scmp.ge.s32.totalorder %s25_s15, 2  ;;  %p168_p2 = scmp.lt.s32.totalorder %s2896_s14, 3 }
   0x5   : > { %s3600_s15 = smov (%p27_p1, %s25_s15), 0  ;;  %p169_p3 = pnand %p2065_p0, %p168_p2 }
   0x6   : > { %p202_p4 = scmp.lt.s32.totalorder (!%p169_p3), %s2888_s12, 1 }
   0x7   : > { %172 = sbr.rel (%p169_p3) target bundleno = 423 (0x1a7), region = 32 }
   0xc   : > { %v2779_v0 = vld [vmem:[%s3594_s1 + $0x78] sm:$0xff]   ;;  %v2898_v1 = vmov 0.0   ;;  %v2781_v3 = vld [vmem:[%s3594_s1 + $0x70] sm:$0xff]   ;;  %vm2899_vm0 = vmmov 0   ;;  %s3602_s12 = smov (!%p202_p4, %s2888_s12), 1  ;;  %v2783_v5 = vld [vmem:[%s3594_s1 + $0x68] sm:$0xff]  }
   0xd   : > { %2411 = vmatprep.subr.bf16.mxu0 %v2898_v1  ;;  %2447 = vmatprep.subr.bf16.mxu1 %v2898_v1  ;;  %v2780_v2 = vld [vmem:[%s3594_s1 + $0x38] sm:$0xff]   ;;  %v2782_v4 = vld [vmem:[%s3594_s1 + $0x30] sm:$0xff]   ;;  %v2784_v6 = vld [vmem:[%s3594_s1 + $0x28] sm:$0xff]   ;;  %s2751_s28 = smul.u32 56, %s3602_s12  ;;  %vm295_vm1 = vsmask.f32 7424 }
   0xe   : > { %2412 = vmatpush3.bf16.msra.mxu0 %v2779_v0  ;;  %2427 = vmatprep.mubr.msk.bf16.mxu0 %vm2899_vm0, %v2898_v1  ;;  %v2785_v7 = vld [vmem:[%s3594_s1 + $0x60] sm:$0xff]   ;;  %v2787_v9 = vld [vmem:[%s3594_s1 + $0x58] sm:$0xff]   ;;  %v2789_v13 = vld [vmem:[%s3594_s1 + $0x50] sm:$0xff]   ;;  %vm613_vm2 = vcmask 1046528   ;;  %vm985_vm3 = vsmask.f32 6400 }
   0xf   : > { %2448 = vmatpush3.bf16.msra.mxu1 %v2780_v2  ;;  %2413 = vmatprep.subr.bf16.mxu0 %v2898_v1  ;;  %v2786_v8 = vld [vmem:[%s3594_s1 + $0x20] sm:$0xff]   ;;  %s2980_s8 = scalar_lea.vmem %s3593_s0, %s2751_s28  ;;  %v2788_v10 = vld [vmem:[%s3594_s1 + $0x18] sm:$0xff]   ;;  %v2790_v16 = vld [vmem:[%s3594_s1 + $0x10] sm:$0xff]   ;;  %vm1196_vm4 = vcmask 1045504   ;;  %vm1568_vm5 = vsmask.f32 5376 }
  0x10   : > { %2449 = vmatprep.subr.bf16.mxu1 %v2898_v1  ;;  %2463 = vmatprep.mubr.msk.bf16.mxu1 %vm2899_vm0, %v2898_v1  ;;  %v223_v11 = vld [vmem:[%s2980_s8] sm:$0xf]  ;;  %v2992_v12 = vld [vmem:[%s2980_s8 + $0x4] sm:$0xf]  ;;  %v2999_v15 = vld [vmem:[%s2980_s8 + $0x8] sm:$0xff]   ;;  %vm1779_vm6 = vcmask 1044480  }
  0x11   : > { %v2084_v14 = vcombine.low %v223_v11, %v2992_v12  ;;  %v2791_v18 = vld [vmem:[%s3594_s1 + $0x48] sm:$0xff]   ;;  %v304_v21 = vshll.u32 %v2999_v15, 16  ;;  %v2793_v23 = vld [vmem:[%s3594_s1 + $0x40] sm:$0xff]   ;;  %v3022_v27 = vld [vmem:[%s2980_s8 + $0x10] sm:$0xff]   ;;  %v308_v30 = vshrl.u32 %v2999_v15, 16 }
  0x12   : > { %2414 = vmatpush3.bf16.msra.mxu0 %v2781_v3  ;;  %v2792_v22 = vld [vmem:[%s3594_s1 + $0x8] sm:$0xff]   ;;  %v2794_v24 = vld [vmem:[%s3594_s1] sm:$0xff]   ;;  %v2797_v28 = vld [vmem:[%s3594_s1 + $0xb8] sm:$0xff]   ;;  %v312_v31 = vshll.u32 %v3022_v27, 16  ;;  %v316_v41 = vshrl.u32 %v3022_v27, 16 }
  0x13   : > { %2450 = vmatpush3.bf16.msra.mxu1 %v2782_v4  ;;  %2415 = vmatprep.subr.bf16.mxu0 %v2898_v1  ;;  %v299_v17 = vshll.u32 %v2084_v14, 16  ;;  %v297_v19 = vshrl.u32 %v2084_v14, 16  ;;  %v306_v26 = vrot.slane %v304_v21, 1  ;;  %v2800_v32 = vld [vmem:[%s3594_s1 + $0xf8] sm:$0xff]   ;;  %v2798_v34 = vld [vmem:[%s3594_s1 + $0xb0] sm:$0xff]   ;;  %v2801_v40 = vld [vmem:[%s3594_s1 + $0xa8] sm:$0xff]  }
  0x14   : > { %2451 = vmatprep.subr.bf16.mxu1 %v2898_v1  ;;  %v3038_v33 = vld [vmem:[%s2980_s8 + $0x18] sm:$0xff]   ;;  %v314_v36 = vrot.slane %v312_v31, 1  ;;  %v2802_v37 = vld [vmem:[%s3594_s1 + $0xf0] sm:$0xff]   ;;  %v2805_v42 = vld [vmem:[%s3594_s1 + $0xe8] sm:$0xff]   ;;  %v617_v21 = vrot.slane %v3022_v27, 1 }
  0x15   : > { %v301_v20 = vrot.slane %v299_v17, 1  ;;  %v310_v35 = vor.u32 %v308_v30, %v306_v26  ;;  %v320_v38 = vshll.u32 %v3038_v33, 16  ;;  %v2804_v44 = vld [vmem:[%s3594_s1 + $0xa0] sm:$0xff]   ;;  %v2806_v48 = vld [vmem:[%s3594_s1 + $0x98] sm:$0xff]   ;;  %v324_v50 = vshrl.u32 %v3038_v33, 16  ;;  %v2810_v56 = vld [vmem:[%s3594_s1 + $0x90] sm:$0xff]  }
  0x16   : > { %2416 = vmatpush3.bf16.msra.mxu0 %v2783_v5  ;;  %v3067_v45 = vld [vmem:[%s2980_s8 + $0x20] sm:$0xff]   ;;  %v318_v46 = vor.u32 %v316_v41, %v314_v36  ;;  %v2809_v52 = vld [vmem:[%s3594_s1 + $0xd8] sm:$0xff]   ;;  %v3090_v53 = vld [vmem:[%s2980_s8 + $0x28] ss:$0 sps:$4 sm:$0x11]  }
  0x17   : > { %2452 = vmatpush3.bf16.msra.mxu1 %v2784_v6  ;;  %2417 = vmatprep.subr.bf16.mxu0 %v2898_v1  ;;  %v302_v25 = vor.u32 %v301_v20, %v297_v19  ;;  %v315_v39 = vsel %vm295_vm1, %v310_v35, %v314_v36  ;;  %v322_v43 = vrot.slane %v320_v38, 1  ;;  %v2807_v47 = vld [vmem:[%s3594_s1 + $0xe0] sm:$0xff]   ;;  %v328_v51 = vshll.u32 %v3067_v45, 16  ;;  %v2811_v57 = vld [vmem:[%s3594_s1 + $0xd0] sm:$0xff]   ;;  %v2812_v61 = vld [vmem:[%s3594_s1 + $0x88] sm:$0xff]  }
  0x18   : > { %2453 = vmatprep.subr.bf16.mxu1 %v2898_v1  ;;  %v332_v59 = vshrl.u32 %v3067_v45, 16  ;;  %v336_v60 = vshll.u32 %v3090_v53, 16  ;;  %v2814_v62 = vld [vmem:[%s3594_s1 + $0xc8] sm:$0xff]   ;;  %v2815_v63 = vld [vmem:[%s3594_s1 + $0x80] sm:$0xff]   ;;  %v2820_v17 = vld [vmem:[%s3594_s1 + $0x138] sm:$0xff]   ;;  %v621_v38 = vrot.slane %v3067_v45, 1 }
  0x19   : > { %v307_v29 = vsel %vm295_vm1, %v302_v25, %v306_v26  ;;  %v323_v49 = vsel %vm295_vm1, %v318_v46, %v322_v43  ;;  %v326_v54 = vor.u32 %v324_v50, %v322_v43  ;;  %v330_v55 = vrot.slane %v328_v51, 1  ;;  %v2816_v3 = vld [vmem:[%s3594_s1 + $0xc0] sm:$0xff]   ;;  %v3132_v6 = vld [vmem:[%s2980_s8 + $0x8] sm:$0xf]  ;;  %v3159_v19 = vld [vmem:[%s2980_s8 + $0x14] sm:$0xff]  }
  0x1a   : > { %2418 = vmatpush3.bf16.msra.mxu0 %v2785_v7  ;;  %v338_v2 = vrot.slane %v336_v60, 1  ;;  %v592_v4 = vld [vmem:[%s2980_s8] sm:$0xe]  ;;  %v761_v5 = vld [vmem:[%s2980_s8 + $0x4] sm:$0xe]  ;;  %v2821_v20 = vld [vmem:[%s3594_s1 + $0x130] sm:$0xff]  }
  0x1b   : > { %2454 = vmatpush3.bf16.msra.mxu1 %v2786_v8  ;;  %2419 = vmatprep.subr.bf16.mxu0 %v2898_v1  ;;  %v331_v58 = vsel %vm295_vm1, %v326_v54, %v330_v55  ;;  %v334_v0 = vor.u32 %v332_v59, %v330_v55  ;;  %v2122_v8 = vcombine.low %v592_v4, %v2992_v12  ;;  %v615_v12 = vrot.slane %v2999_v15, 1  ;;  %v2824_v25 = vld [vmem:[%s3594_s1 + $0x128] sm:$0xff]   ;;  %v2827_v30 = vld [vmem:[%s3594_s1 + $0x120] sm:$0xff]   ;;  %v2834_v41 = vld [vmem:[%s3594_s1 + $0x150] sm:$0xff]  }
  0x1c   : > { %2455 = vmatprep.subr.bf16.mxu1 %v2898_v1  ;;  %v3212_v36 = vld [vmem:[%s2980_s8 + $0x24] sm:$0xff]   ;;  %v2836_v43 = vld [vmem:[%s2980_s8 + $0x2c] ss:$0 sps:$4 sm:$0x11]  }
  0x1d   : > { %v339_v7 = vsel %vm295_vm1, %v334_v0, %v338_v2  ;;  %v614_v11 = vrot.slane %v2122_v8, 1  ;;  %v2837_v46 = vld [vmem:[%s3594_s1 + $0x148] sm:$0xff]   ;;  %v2839_v54 = vld [vmem:[%s3594_s1 + $0x140] sm:$0xff]   ;;  %v1004_v2 = vshrl.u32 %v3159_v19, 16 }
  0x1e   : > { %2420 = vmatpush3.bf16.msra.mxu0 %v2787_v9  ;;  %v3138_v9 = vcombine.low %v761_v5, %v3132_v6  ;;  %v1175_v55 = vld [vmem:[%s2980_s8 + $0x4] sm:$0xc] }
  0x1f   : > { %2456 = vmatpush3.bf16.msra.mxu1 %v2788_v10  ;;  %2421 = vmatprep.subr.bf16.mxu0 %v2898_v1  ;;  %v3141_v10 = vld [vmem:[%s2980_s8 + $0xc] sm:$0xff]   ;;  %v1006_v8 = vrot.slane %v1004_v2, 1 }
  0x20   : > { %2457 = vmatprep.subr.bf16.mxu1 %v2898_v1  ;;  %v995_v50 = vshrl.u32 %v3141_v10, 16  ;;  %v998_v51 = vshll.u32 %v3141_v10, 16  ;;  %v1198_v5 = vrot.slane %v3141_v10, 2 }
  0x22   : > { %2422 = vmatpush3.bf16.msra.mxu0 %v2789_v13  ;;  %v817_v13 = vrot.slane %v3138_v9, 1  ;;  %v997_v59 = vrot.slane %v995_v50, 1  ;;  %v1000_v60 = vrot.slane %v998_v51, 2  ;;  %v3357_v51 = vld [vmem:[%s2980_s8 + $0x10] sm:$0xff]  }
  0x23   : > { %2458 = vmatpush3.bf16.msra.mxu1 %v2790_v16  ;;  %2423 = vmatprep.subr.bf16.mxu0 %v2898_v1  ;;  %v616_v16 = vsel %vm613_vm2, %v614_v11, %v615_v12 }
  0x24   : > { %2459 = vmatprep.subr.bf16.mxu1 %v2898_v1  ;;  %v1001_v0 = vor.u32 %v1000_v60, %v997_v59  ;;  %v1581_v59 = vshll.u32 %v3357_v51, 16  ;;  %v2857_v60 = vld [vmem:[%s3594_s1 + $0x1c0] sm:$0xff]  }
  0x26   : > { %2424 = vmatpush3.bf16.msra.mxu0 %v2791_v18 }
  0x27   : > { %2460 = vmatpush3.bf16.msra.mxu1 %v2792_v22  ;;  %2425 = vmatprep.subr.bf16.mxu0 %v2898_v1  ;;  %v820_v22 = vrot.slane %v3159_v19, 1 }
  0x28   : > { %2461 = vmatprep.subr.bf16.mxu1 %v2898_v1 }
  0x2a   : > { %2426 = vmatpush3.bf16.msra.mxu0 %v2793_v23  ;;  %v2825_v23 = vld [vmem:[%s3594_s1 + $0x170] sm:$0xff]  }
  0x2b   : > { %2462 = vmatpush3.bf16.msra.mxu1 %v2794_v24  ;;  %2483 = vmatprep.subr.bf16.mxu0 %v2898_v1  ;;  %v618_v24 = vsel %vm613_vm2, %v615_v12, %v617_v21  ;;  %v2843_v12 = vld [vmem:[%s3594_s1 + $0x1f8] sm:$0xff]  }
  0x2c   : > { %2519 = vmatprep.subr.bf16.mxu1 %v2898_v1 }
  0x2d   : > { %2428 = vmatmul.mubr.bf16.vlgmr.msra.gmra.mxu0 %v307_v29  ;;  %v619_v29 = vrot.slane %v3038_v33, 1 }
  0x2e   : > { %2464 = vmatmul.mubr.bf16.vlgmr.msra.gmra.mxu1 %v2084_v14  ;;  %2484 = vmatpush3.bf16.msra.mxu0 %v2797_v28  ;;  %v818_v14 = vrot.slane %v3141_v10, 1  ;;  %v2828_v28 = vld [vmem:[%s3594_s1 + $0x168] sm:$0xff]   ;;  %v2842_v10 = vld [vmem:[%s3594_s1 + $0x1b0] sm:$0xff]  }
  0x2f   : > { %2485 = vmatprep.subr.bf16.mxu0 %v2898_v1  ;;  %2431 = vmatprep.mubr.msk.bf16.mxu0 %vm2899_vm0, %v2898_v1 }
  0x30   : > { %2467 = vmatprep.mubr.msk.bf16.mxu1 %vm2899_vm0, %v2898_v1  ;;  %2520 = vmatpush3.bf16.msra.mxu1 %v2800_v32  ;;  %v819_v18 = vsel %vm613_vm2, %v817_v13, %v818_v14  ;;  %v821_v26 = vsel %vm613_vm2, %v818_v14, %v820_v22  ;;  %v2830_v32 = vld [vmem:[%s3594_s1 + $0x160] sm:$0xff]  }
  0x31   : > { %2521 = vmatprep.subr.bf16.mxu1 %v2898_v1 }
  0x32   : > { %2486 = vmatpush3.bf16.msra.mxu0 %v2798_v34  ;;  %v2829_v34 = vld [vmem:[%s3594_s1 + $0x118] sm:$0xff]  }
  0x33   : > { %2487 = vmatprep.subr.bf16.mxu0 %v2898_v1 }
  0x34   : > { %2522 = vmatpush3.bf16.msra.mxu1 %v2802_v37  ;;  %v2832_v37 = vld [vmem:[%s3594_s1 + $0x158] sm:$0xff]  }
  0x35   : > { %2432 = vmatmul.mubr.bf16.gmra.mxu0 %v315_v39  ;;  %2523 = vmatprep.subr.bf16.mxu1 %v2898_v1  ;;  %v2833_v39 = vld [vmem:[%s3594_s1 + $0x110] sm:$0xff]  }
  0x36   : > { %2468 = vmatmul.mubr.bf16.gmra.mxu1 %v2999_v15  ;;  %2488 = vmatpush3.bf16.msra.mxu0 %v2801_v40  ;;  %v2823_v15 = vld [vmem:[%s3594_s1 + $0x178] sm:$0xff]   ;;  %v824_v40 = vrot.slane %v3212_v36, 1 }
  0x37   : > { %2435 = vmatprep.mubr.msk.bf16.mxu0 %vm2899_vm0, %v2898_v1  ;;  %2471 = vmatprep.mubr.msk.bf16.mxu1 %vm2899_vm0, %v2898_v1 }
  0x38   : > { %2489 = vmatprep.subr.bf16.mxu0 %v2898_v1  ;;  %2524 = vmatpush3.bf16.msra.mxu1 %v2805_v42  ;;  %v622_v42 = vsel %vm613_vm2, %v619_v29, %v621_v38 }
  0x39   : > { %2525 = vmatprep.subr.bf16.mxu1 %v2898_v1 }
  0x3a   : > { %2490 = vmatpush3.bf16.msra.mxu0 %v2804_v44 }
  0x3b   : > { %2491 = vmatprep.subr.bf16.mxu0 %v2898_v1 }
  0x3c   : > { %2526 = vmatpush3.bf16.msra.mxu1 %v2807_v47  ;;  %v623_v47 = vrot.slane %v3090_v53, 1  ;;  %v2838_v53 = vld [vmem:[%s3594_s1 + $0x100] sm:$0xff]  }
  0x3d   : > { %2436 = vmatmul.mubr.bf16.gmra.mxu0 %v323_v49  ;;  %2527 = vmatprep.subr.bf16.mxu1 %v2898_v1  ;;  %v990_v49 = vshll.u32 %v3138_v9, 16 }
  0x3e   : > { %2472 = vmatmul.mubr.bf16.gmra.mxu1 %v3022_v27  ;;  %2492 = vmatpush3.bf16.msra.mxu0 %v2806_v48  ;;  %v3185_v27 = vld [vmem:[%s2980_s8 + $0x1c] sm:$0xff]   ;;  %v987_v48 = vshrl.u32 %v3138_v9, 16 }
  0x3f   : > { %2439 = vmatprep.mubr.msk.bf16.mxu0 %vm2899_vm0, %v2898_v1  ;;  %2475 = vmatprep.mubr.msk.bf16.mxu1 %vm2899_vm0, %v2898_v1  ;;  %v822_v31 = vrot.slane %v3185_v27, 1  ;;  %v1013_v14 = vshrl.u32 %v3185_v27, 16 }
  0x40   : > { %2493 = vmatprep.subr.bf16.mxu0 %v2898_v1  ;;  %2528 = vmatpush3.bf16.msra.mxu1 %v2809_v52  ;;  %v826_v52 = vrot.slane %v2836_v43, 1  ;;  %v2852_v43 = vld [vmem:[%s3594_s1 + $0x1d0] sm:$0xff]  }
  0x41   : > { %2529 = vmatprep.subr.bf16.mxu1 %v2898_v1  ;;  %v823_v35 = vsel %vm613_vm2, %v820_v22, %v822_v31  ;;  %v825_v44 = vsel %vm613_vm2, %v822_v31, %v824_v40 }
  0x42   : > { %2494 = vmatpush3.bf16.msra.mxu0 %v2810_v56  ;;  %v624_v56 = vsel %vm613_vm2, %v621_v38, %v623_v47 }
  0x43   : > { %2495 = vmatprep.subr.bf16.mxu0 %v2898_v1 }
  0x44   : > { %2530 = vmatpush3.bf16.msra.mxu1 %v2811_v57  ;;  %v989_v57 = vrot.slane %v987_v48, 1 }
  0x45   : > { %2440 = vmatmul.mubr.bf16.gmra.mxu0 %v331_v58  ;;  %2531 = vmatprep.subr.bf16.mxu1 %v2898_v1  ;;  %v992_v58 = vrot.slane %v990_v49, 2 }
  0x46   : > { %2476 = vmatmul.mubr.bf16.gmra.mxu1 %v3038_v33  ;;  %2443 = vmatprep.mubr.msk.bf16.mxu0 %vm2899_vm0, %v2898_v1  ;;  %v620_v33 = vsel %vm613_vm2, %v617_v21, %v619_v29  ;;  %v1015_v21 = vrot.slane %v1013_v14, 1  ;;  %v1202_v29 = vrot.slane %v3185_v27, 2 }
  0x47   : > { %2479 = vmatprep.mubr.msk.bf16.mxu1 %vm2899_vm0, %v2898_v1  ;;  %2496 = vmatpush3.bf16.msra.mxu0 %v2812_v61  ;;  %v827_v61 = vsel %vm613_vm2, %v824_v40, %v826_v52  ;;  %v2855_v52 = vld [vmem:[%s3594_s1 + $0x1c8] sm:$0xff]  }
  0x48   : > { %2532 = vmatpush3.bf16.msra.mxu1 %v2814_v62  ;;  %2497 = vmatprep.subr.bf16.mxu0 %v2898_v1  ;;  %v2202_v62 = vcombine.low %v1175_v55, %v3132_v6  ;;  %v2856_v55 = vld [vmem:[%s3594_s1 + $0x180] sm:$0xff]  }
  0x49   : > { %2533 = vmatprep.subr.bf16.mxu1 %v2898_v1 }
  0x4a   : > { %v1197_v4 = vrot.slane %v2202_v62, 2 }
  0x4b   : > { %2498 = vmatpush3.bf16.msra.mxu0 %v2815_v63  ;;  %v993_v63 = vor.u32 %v992_v58, %v989_v57  ;;  %v1578_v58 = vshrl.u32 %v3357_v51, 16 }
  0x4c   : > { %2534 = vmatpush3.bf16.msra.mxu1 %v2816_v3  ;;  %2555 = vmatprep.subr.bf16.mxu0 %v2898_v1  ;;  %v1007_v3 = vshll.u32 %v3159_v19, 16  ;;  %v1199_v11 = vsel %vm1196_vm4, %v1197_v4, %v1198_v5  ;;  %v3380_v4 = vld [vmem:[%s2980_s8 + $0x18] sm:$0xff]  }
  0x4d   : > { %2444 = vmatmul.mubr.bf16.gmra.mxu0 %v339_v7  ;;  %2591 = vmatprep.subr.bf16.mxu1 %v2898_v1  ;;  %v1002_v6 = vsel %vm985_vm3, %v993_v63, %v1001_v0  ;;  %v2841_v7 = vld [vmem:[%s3594_s1 + $0x1b8] sm:$0xff]   ;;  %v1580_v2 = vrot.slane %v1578_v58, 2 }
  0x4e   : > { %2480 = vmatmul.mubr.bf16.gmra.mxu1 %v3067_v45  ;;  %2499 = vmatprep.mubr.msk.bf16.mxu0 %vm2899_vm0, %v2898_v1  ;;  %v2835_v45 = vld [vmem:[%s3594_s1 + $0x108] sm:$0xff]   ;;  %v1009_v9 = vrot.slane %v1007_v3, 2  ;;  %v1583_v3 = vrot.slane %v1581_v59, 3 }
  0x4f   : > { %2535 = vmatprep.mubr.msk.bf16.mxu1 %vm2899_vm0, %v2898_v1 }
  0x50   : > { %v1010_v13 = vor.u32 %v1009_v9, %v1006_v8  ;;  %v1584_v8 = vor.u32 %v1583_v3, %v1580_v2  ;;  %v1587_v9 = vshrl.u32 %v3380_v4, 16 }
  0x52   : > { %v1589_v14 = vrot.slane %v1587_v9, 2 }
  0x55   : > { %2500 = vmatmul.mubr.bf16.vlgmr.msra.gmra.mxu0 %v616_v16  ;;  %v1016_v16 = vshll.u32 %v3185_v27, 16 }
  0x56   : > { %2536 = vmatmul.mubr.bf16.vlgmr.msra.gmra.mxu1 %v819_v18  ;;  %2556 = vmatpush3.bf16.msra.mxu0 %v2820_v17  ;;  %v1200_v17 = vrot.slane %v3159_v19, 2  ;;  %v2845_v18 = vld [vmem:[%s3594_s1 + $0x1f0] sm:$0xff]  }
  0x57   : > { %2557 = vmatprep.subr.bf16.mxu0 %v2898_v1  ;;  %2503 = vmatprep.mubr.msk.bf16.mxu0 %vm2899_vm0, %v2898_v1  ;;  %v1018_v22 = vrot.slane %v1016_v16, 2 }
  0x58   : > { %2539 = vmatprep.mubr.msk.bf16.mxu1 %vm2899_vm0, %v2898_v1  ;;  %2592 = vmatpush3.bf16.msra.mxu1 %v2823_v15  ;;  %v1011_v15 = vsel %vm985_vm3, %v1001_v0, %v1010_v13  ;;  %v1201_v19 = vsel %vm1196_vm4, %v1198_v5, %v1200_v17  ;;  %v1203_v27 = vsel %vm1196_vm4, %v1200_v17, %v1202_v29  ;;  %v3397_v17 = vld [vmem:[%s2980_s8 + $0x20] sm:$0xff]  }
  0x59   : > { %2593 = vmatprep.subr.bf16.mxu1 %v2898_v1 }
  0x5a   : > { %2558 = vmatpush3.bf16.msra.mxu0 %v2821_v20  ;;  %v2844_v20 = vld [vmem:[%s3594_s1 + $0x1a8] sm:$0xff]  }
  0x5b   : > { %2559 = vmatprep.subr.bf16.mxu0 %v2898_v1 }
  0x5c   : > { %2594 = vmatpush3.bf16.msra.mxu1 %v2825_v23  ;;  %v2847_v23 = vld [vmem:[%s3594_s1 + $0x1e8] sm:$0xff]  }
  0x5d   : > { %2504 = vmatmul.mubr.bf16.gmra.mxu0 %v618_v24  ;;  %2595 = vmatprep.subr.bf16.mxu1 %v2898_v1  ;;  %v1019_v24 = vor.u32 %v1018_v22, %v1015_v21  ;;  %v1596_v21 = vshrl.u32 %v3397_v17, 16  ;;  %v1599_v22 = vshll.u32 %v3397_v17, 16 }
  0x5e   : > { %2540 = vmatmul.mubr.bf16.gmra.mxu1 %v821_v26  ;;  %2560 = vmatpush3.bf16.msra.mxu0 %v2824_v25  ;;  %v2846_v25 = vld [vmem:[%s3594_s1 + $0x1a0] sm:$0xff]   ;;  %v1022_v26 = vshrl.u32 %v3212_v36, 16 }
  0x5f   : > { %2507 = vmatprep.mubr.msk.bf16.mxu0 %vm2899_vm0, %v2898_v1  ;;  %2543 = vmatprep.mubr.msk.bf16.mxu1 %vm2899_vm0, %v2898_v1  ;;  %v1020_v31 = vsel %vm985_vm3, %v1010_v13, %v1019_v24 }
  0x60   : > { %2561 = vmatprep.subr.bf16.mxu0 %v2898_v1  ;;  %2596 = vmatpush3.bf16.msra.mxu1 %v2828_v28  ;;  %v1025_v28 = vshll.u32 %v3212_v36, 16 }
  0x61   : > { %2597 = vmatprep.subr.bf16.mxu1 %v2898_v1 }
  0x62   : > { %2562 = vmatpush3.bf16.msra.mxu0 %v2827_v30  ;;  %v2849_v30 = vld [vmem:[%s3594_s1 + $0x1e0] sm:$0xff]  }
  0x63   : > { %2563 = vmatprep.subr.bf16.mxu0 %v2898_v1 }
  0x64   : > { %2598 = vmatpush3.bf16.msra.mxu1 %v2830_v32  ;;  %v2848_v32 = vld [vmem:[%s3594_s1 + $0x198] sm:$0xff]  }
  0x65   : > { %2508 = vmatmul.mubr.bf16.gmra.mxu0 %v620_v33  ;;  %2599 = vmatprep.subr.bf16.mxu1 %v2898_v1  ;;  %v1024_v33 = vrot.slane %v1022_v26, 1  ;;  %v1601_v26 = vrot.slane %v1599_v22, 3 }
  0x66   : > { %2544 = vmatmul.mubr.bf16.gmra.mxu1 %v823_v35  ;;  %2564 = vmatpush3.bf16.msra.mxu0 %v2829_v34  ;;  %v1027_v34 = vrot.slane %v1025_v28, 2  ;;  %v2854_v35 = vld [vmem:[%s2980_s8 + $0x2c] ss:$0 sps:$4 sm:$0x33]  }
  0x67   : > { %2511 = vmatprep.mubr.msk.bf16.mxu0 %vm2899_vm0, %v2898_v1  ;;  %2547 = vmatprep.mubr.msk.bf16.mxu1 %vm2899_vm0, %v2898_v1  ;;  %v1031_v40 = vshrl.u32 %v2854_v35, 16  ;;  %v3418_v28 = vld [vmem:[%s2980_s8 + $0x28] sm:$0xff]  }
  0x68   : > { %2565 = vmatprep.subr.bf16.mxu0 %v2898_v1  ;;  %2600 = vmatpush3.bf16.msra.mxu1 %v2832_v37  ;;  %v2850_v37 = vld [vmem:[%s3594_s1 + $0x1d8] sm:$0xff]   ;;  %v1028_v38 = vor.u32 %v1027_v34, %v1024_v33  ;;  %v1608_v33 = vshll.u32 %v3418_v28, 16 }
  0x69   : > { %2601 = vmatprep.subr.bf16.mxu1 %v2898_v1  ;;  %v1033_v47 = vrot.slane %v1031_v40, 1  ;;  %v1407_v40 = vrot.slane %v3418_v28, 2 }
  0x6a   : > { %2566 = vmatpush3.bf16.msra.mxu0 %v2833_v39  ;;  %v2851_v39 = vld [vmem:[%s3594_s1 + $0x190] sm:$0xff]  }
  0x6b   : > { %2567 = vmatprep.subr.bf16.mxu0 %v2898_v1 }
  0x6c   : > { %2602 = vmatpush3.bf16.msra.mxu1 %v2834_v41  ;;  %v1034_v41 = vshll.u32 %v2854_v35, 16 }
  0x6d   : > { %2512 = vmatmul.mubr.bf16.gmra.mxu0 %v622_v42  ;;  %2603 = vmatprep.subr.bf16.mxu1 %v2898_v1  ;;  %v1204_v42 = vrot.slane %v3212_v36, 2  ;;  %v2853_v36 = vld [vmem:[%s3594_s1 + $0x188] sm:$0xff]  }
  0x6e   : > { %2548 = vmatmul.mubr.bf16.gmra.mxu1 %v825_v44  ;;  %2515 = vmatprep.mubr.msk.bf16.mxu0 %vm2899_vm0, %v2898_v1  ;;  %v1344_v44 = vld [vmem:[%s2980_s8 + $0x8] sm:$0xc]  ;;  %v1036_v48 = vrot.slane %v1034_v41, 2  ;;  %v2868_v41 = vld [vmem:[%s3594_s1 + $0x210] sm:$0xff]  }
  0x6f   : > { %2551 = vmatprep.mubr.msk.bf16.mxu1 %vm2899_vm0, %v2898_v1  ;;  %2568 = vmatpush3.bf16.msra.mxu0 %v2835_v45  ;;  %v3346_v45 = vld [vmem:[%s2980_s8 + $0xc] sm:$0xf]  ;;  %v1205_v49 = vsel %vm1196_vm4, %v1202_v29, %v1204_v42  ;;  %v1405_v29 = vrot.slane %v3397_v17, 2 }
  0x70   : > { %2604 = vmatpush3.bf16.msra.mxu1 %v2837_v46  ;;  %2569 = vmatprep.subr.bf16.mxu0 %v2898_v1  ;;  %v1029_v46 = vsel %vm985_vm3, %v1019_v24, %v1028_v38  ;;  %v2227_v50 = vcombine.low %v1344_v44, %v3346_v45 }
  0x71   : > { %2605 = vmatprep.subr.bf16.mxu1 %v2898_v1 }
  0x72   : > { %v1573_v57 = vshll.u32 %v2227_v50, 16  ;;  %v1400_v5 = vrot.slane %v2227_v50, 2 }
  0x73   : > { %2570 = vmatpush3.bf16.msra.mxu0 %v2838_v53  ;;  %v1037_v53 = vor.u32 %v1036_v48, %v1033_v47  ;;  %v2870_v47 = vld [vmem:[%s2980_s8 + $0x30] ss:$0 sps:$4 sm:$0x33]  }
  0x74   : > { %2606 = vmatpush3.bf16.msra.mxu1 %v2839_v54  ;;  %2627 = vmatprep.subr.bf16.mxu0 %v2898_v1  ;;  %v1206_v54 = vrot.slane %v2854_v35, 2  ;;  %v1575_v0 = vrot.slane %v1573_v57, 3  ;;  %v2866_v35 = vld [vmem:[%s3594_s1 + $0x218] sm:$0xff]  }
  0x75   : > { %2516 = vmatmul.mubr.bf16.gmra.mxu0 %v624_v56  ;;  %2663 = vmatprep.subr.bf16.mxu1 %v2898_v1  ;;  %v1570_v56 = vshrl.u32 %v2227_v50, 16 }
  0x76   : > { %2552 = vmatmul.mubr.bf16.gmra.mxu1 %v827_v61  ;;  %2571 = vmatprep.mubr.msk.bf16.mxu0 %vm2899_vm0, %v2898_v1  ;;  %v1038_v61 = vsel %vm985_vm3, %v1028_v38, %v1037_v53  ;;  %v1207_v62 = vsel %vm1196_vm4, %v1204_v42, %v1206_v54  ;;  %v1610_v38 = vrot.slane %v1608_v33, 3  ;;  %v2872_v54 = vld [vmem:[%s3594_s1 + $0x200] sm:$0xff]  }
  0x77   : > { %2607 = vmatprep.mubr.msk.bf16.mxu1 %vm2899_vm0, %v2898_v1  ;;  %v1572_v63 = vrot.slane %v1570_v56, 2 }
  0x7d   : > { %2572 = vmatmul.mubr.bf16.vlgmr.msra.gmra.mxu0 %v1002_v6  ;;  %v1401_v6 = vrot.slane %v3357_v51, 2 }
  0x7e   : > { %2608 = vmatmul.mubr.bf16.vlgmr.msra.gmra.mxu1 %v1199_v11  ;;  %2628 = vmatpush3.bf16.msra.mxu0 %v2841_v7  ;;  %v1576_v7 = vor.u32 %v1575_v0, %v1572_v63  ;;  %v1590_v11 = vshll.u32 %v3380_v4, 16  ;;  %v1783_v0 = vrot.slane %v3380_v4, 3 }
  0x7f   : > { %2629 = vmatprep.subr.bf16.mxu0 %v2898_v1  ;;  %2575 = vmatprep.mubr.msk.bf16.mxu0 %vm2899_vm0, %v2898_v1 }
  0x80   : > { %2611 = vmatprep.mubr.msk.bf16.mxu1 %vm2899_vm0, %v2898_v1  ;;  %2664 = vmatpush3.bf16.msra.mxu1 %v2843_v12  ;;  %v1402_v12 = vsel %vm1196_vm4, %v1400_v5, %v1401_v6  ;;  %v1585_v13 = vsel %vm1568_vm5, %v1576_v7, %v1584_v8  ;;  %v1592_v16 = vrot.slane %v1590_v11, 3 }
  0x81   : > { %2665 = vmatprep.subr.bf16.mxu1 %v2898_v1 }
  0x82   : > { %2630 = vmatpush3.bf16.msra.mxu0 %v2842_v10  ;;  %v2860_v10 = vld [vmem:[%s3594_s1 + $0x238] sm:$0xff]  }
  0x83   : > { %2631 = vmatprep.subr.bf16.mxu0 %v2898_v1 }
  0x84   : > { %2666 = vmatpush3.bf16.msra.mxu1 %v2845_v18  ;;  %v2861_v18 = vld [vmem:[%s3594_s1 + $0x230] sm:$0xff]  }
  0x85   : > { %2576 = vmatmul.mubr.bf16.gmra.mxu0 %v1011_v15  ;;  %2667 = vmatprep.subr.bf16.mxu1 %v2898_v1  ;;  %v1403_v15 = vrot.slane %v3380_v4, 2 }
  0x86   : > { %2612 = vmatmul.mubr.bf16.gmra.mxu1 %v1201_v19  ;;  %2632 = vmatpush3.bf16.msra.mxu0 %v2844_v20  ;;  %v1593_v20 = vor.u32 %v1592_v16, %v1589_v14 }
  0x87   : > { %2579 = vmatprep.mubr.msk.bf16.mxu0 %vm2899_vm0, %v2898_v1  ;;  %2615 = vmatprep.mubr.msk.bf16.mxu1 %vm2899_vm0, %v2898_v1  ;;  %v1404_v19 = vsel %vm1196_vm4, %v1401_v6, %v1403_v15  ;;  %v1406_v34 = vsel %vm1196_vm4, %v1403_v15, %v1405_v29 }
  0x88   : > { %2633 = vmatprep.subr.bf16.mxu0 %v2898_v1  ;;  %2668 = vmatpush3.bf16.msra.mxu1 %v2847_v23  ;;  %v2863_v23 = vld [vmem:[%s3594_s1 + $0x228] sm:$0xff]   ;;  %v1594_v24 = vsel %vm1568_vm5, %v1584_v8, %v1593_v20 }
  0x89   : > { %2669 = vmatprep.subr.bf16.mxu1 %v2898_v1 }
  0x8a   : > { %2634 = vmatpush3.bf16.msra.mxu0 %v2846_v25  ;;  %v1598_v25 = vrot.slane %v1596_v21, 2 }
  0x8b   : > { %2635 = vmatprep.subr.bf16.mxu0 %v2898_v1 }
  0x8c   : > { %2670 = vmatpush3.bf16.msra.mxu1 %v2849_v30  ;;  %v2865_v30 = vld [vmem:[%s3594_s1 + $0x220] sm:$0xff]  }
  0x8d   : > { %2580 = vmatmul.mubr.bf16.gmra.mxu0 %v1020_v31  ;;  %2671 = vmatprep.subr.bf16.mxu1 %v2898_v1  ;;  %v1602_v31 = vor.u32 %v1601_v26, %v1598_v25 }
  0x8e   : > { %2616 = vmatmul.mubr.bf16.gmra.mxu1 %v1203_v27  ;;  %2636 = vmatpush3.bf16.msra.mxu0 %v2848_v32  ;;  %v1605_v32 = vshrl.u32 %v3418_v28, 16 }
  0x8f   : > { %2583 = vmatprep.mubr.msk.bf16.mxu0 %vm2899_vm0, %v2898_v1  ;;  %2619 = vmatprep.mubr.msk.bf16.mxu1 %vm2899_vm0, %v2898_v1  ;;  %v1603_v27 = vsel %vm1568_vm5, %v1593_v20, %v1602_v31 }
  0x90   : > { %2637 = vmatprep.subr.bf16.mxu0 %v2898_v1  ;;  %2672 = vmatpush3.bf16.msra.mxu1 %v2850_v37  ;;  %v1607_v37 = vrot.slane %v1605_v32, 2 }
  0x91   : > { %2673 = vmatprep.subr.bf16.mxu1 %v2898_v1 }
  0x92   : > { %2638 = vmatpush3.bf16.msra.mxu0 %v2851_v39  ;;  %v3440_v39 = vld [vmem:[%s2980_s8 + $0x30] ss:$0 sps:$4 sm:$0x77]   ;;  %v1611_v42 = vor.u32 %v1610_v38, %v1607_v37 }
  0x93   : > { %2639 = vmatprep.subr.bf16.mxu0 %v2898_v1  ;;  %v1617_v44 = vshll.u32 %v3440_v39, 16 }
  0x94   : > { %2674 = vmatpush3.bf16.msra.mxu1 %v2852_v43  ;;  %v1614_v43 = vshrl.u32 %v3440_v39, 16  ;;  %v1612_v48 = vsel %vm1568_vm5, %v1602_v31, %v1611_v42 }
  0x95   : > { %2584 = vmatmul.mubr.bf16.gmra.mxu0 %v1029_v46  ;;  %2675 = vmatprep.subr.bf16.mxu1 %v2898_v1  ;;  %v1408_v46 = vsel %vm1196_vm4, %v1405_v29, %v1407_v40  ;;  %v1619_v50 = vrot.slane %v1617_v44, 3 }
  0x96   : > { %2620 = vmatmul.mubr.bf16.gmra.mxu1 %v1205_v49  ;;  %2587 = vmatprep.mubr.msk.bf16.mxu0 %vm2899_vm0, %v2898_v1  ;;  %v2869_v49 = vld [vmem:[%s3594_s1 + $0x208] sm:$0xff]  }
  0x97   : > { %2623 = vmatprep.mubr.msk.bf16.mxu1 %vm2899_vm0, %v2898_v1  ;;  %2640 = vmatpush3.bf16.msra.mxu0 %v2853_v36  ;;  %v1616_v36 = vrot.slane %v1614_v43, 2 }
  0x98   : > { %2676 = vmatpush3.bf16.msra.mxu1 %v2855_v52  ;;  %2641 = vmatprep.subr.bf16.mxu0 %v2898_v1  ;;  %v1409_v52 = vrot.slane %v2870_v47, 2 }
  0x99   : > { %2677 = vmatprep.subr.bf16.mxu1 %v2898_v1  ;;  %v1620_v53 = vor.u32 %v1619_v50, %v1616_v36 }
  0x9a   : > { %v1410_v56 = vsel %vm1196_vm4, %v1407_v40, %v1409_v52 }
  0x9b   : > { %2642 = vmatpush3.bf16.msra.mxu0 %v2856_v55  ;;  %v1758_v55 = vld [vmem:[%s2980_s8 + $0x8] sm:$0x8]  ;;  %v1621_v58 = vsel %vm1568_vm5, %v1611_v42, %v1620_v53  ;;  %s2752_s8 = smul.u32 80, %s3602_s12 }
  0x9c   : > { %2678 = vmatpush3.bf16.msra.mxu1 %v2857_v60  ;;  %2699 = vmatprep.subr.bf16.mxu0 %v2898_v1  ;;  %v2282_v57 = vcombine.low %v1758_v55, %v3346_v45  ;;  %v1781_v60 = vrot.slane %v3357_v51, 3  ;;  %v1787_v45 = vrot.slane %v3418_v28, 3  ;;  %v1789_v51 = vrot.slane %v3440_v39, 3 }
  0x9d   : > { %2588 = vmatmul.mubr.bf16.gmra.mxu0 %v1038_v61  ;;  %2735 = vmatprep.subr.bf16.mxu1 %v2898_v1  ;;  %v1785_v61 = vrot.slane %v3397_v17, 3  ;;  %s3550_s7 = scalar_lea.vmem %s3596_s3, %s2752_s8 }
  0x9e   : > { %2624 = vmatmul.mubr.bf16.gmra.mxu1 %v1207_v62  ;;  %2643 = vmatprep.mubr.msk.bf16.mxu0 %vm2899_vm0, %v2898_v1  ;;  %v1780_v59 = vrot.slane %v2282_v57, 3  ;;  %v1784_v2 = vsel %vm1779_vm6, %v1781_v60, %v1783_v0  ;;  %v1790_v3 = vsel %vm1779_vm6, %v1787_v45, %v1789_v51 }
  0x9f   : > { %2679 = vmatprep.mubr.msk.bf16.mxu1 %vm2899_vm0, %v2898_v1  ;;  %v1788_v63 = vsel %vm1779_vm6, %v1785_v61, %v1787_v45  ;;  %v1786_v5 = vsel %vm1779_vm6, %v1783_v0, %v1785_v61 }
  0xa0   : > { %v1782_v62 = vsel %vm1779_vm6, %v1780_v59, %v1781_v60 }
  0xa5   : > { %2644 = vmatmul.mubr.bf16.vlgmr.msra.gmra.mxu0 %v1402_v12 }
  0xa6   : > { %2680 = vmatmul.mubr.bf16.vlgmr.msra.gmra.mxu1 %v1585_v13  ;;  %2700 = vmatpush3.bf16.msra.mxu0 %v2860_v10 }
  0xa7   : > { %2701 = vmatprep.subr.bf16.mxu0 %v2898_v1  ;;  %2647 = vmatprep.mubr.msk.bf16.mxu0 %vm2899_vm0, %v2898_v1 }
  0xa8   : > { %2683 = vmatprep.mubr.msk.bf16.mxu1 %vm2899_vm0, %v2898_v1  ;;  %2743 = vmatpush3.bf16.msra.mxu1 %v2860_v10 }
  0xa9   : > { %2736 = vmatprep.subr.bf16.mxu1 %v2898_v1 }
  0xaa   : > { %2702 = vmatpush3.bf16.msra.mxu0 %v2861_v18 }
  0xab   : > { %2703 = vmatprep.subr.bf16.mxu0 %v2898_v1 }
  0xac   : > { %2744 = vmatpush3.bf16.msra.mxu1 %v2861_v18 }
  0xad   : > { %2648 = vmatmul.mubr.bf16.gmra.mxu0 %v1404_v19  ;;  %2737 = vmatprep.subr.bf16.mxu1 %v2898_v1 }
  0xae   : > { %2684 = vmatmul.mubr.bf16.gmra.mxu1 %v1594_v24  ;;  %2704 = vmatpush3.bf16.msra.mxu0 %v2863_v23 }
  0xaf   : > { %2651 = vmatprep.mubr.msk.bf16.mxu0 %vm2899_vm0, %v2898_v1  ;;  %2687 = vmatprep.mubr.msk.bf16.mxu1 %vm2899_vm0, %v2898_v1 }
  0xb0   : > { %2705 = vmatprep.subr.bf16.mxu0 %v2898_v1  ;;  %2745 = vmatpush3.bf16.msra.mxu1 %v2863_v23 }
  0xb1   : > { %2738 = vmatprep.subr.bf16.mxu1 %v2898_v1 }
  0xb2   : > { %2706 = vmatpush3.bf16.msra.mxu0 %v2865_v30 }
  0xb3   : > { %2707 = vmatprep.subr.bf16.mxu0 %v2898_v1 }
  0xb4   : > { %2746 = vmatpush3.bf16.msra.mxu1 %v2865_v30 }
  0xb5   : > { %2652 = vmatmul.mubr.bf16.gmra.mxu0 %v1406_v34  ;;  %2739 = vmatprep.subr.bf16.mxu1 %v2898_v1 }
  0xb6   : > { %2688 = vmatmul.mubr.bf16.gmra.mxu1 %v1603_v27  ;;  %2708 = vmatpush3.bf16.msra.mxu0 %v2866_v35 }
  0xb7   : > { %2655 = vmatprep.mubr.msk.bf16.mxu0 %vm2899_vm0, %v2898_v1  ;;  %2691 = vmatprep.mubr.msk.bf16.mxu1 %vm2899_vm0, %v2898_v1 }
  0xb8   : > { %2747 = vmatpush3.bf16.msra.mxu1 %v2866_v35  ;;  %2709 = vmatprep.subr.bf16.mxu0 %v2898_v1 }
  0xb9   : > { %2740 = vmatprep.subr.bf16.mxu1 %v2898_v1 }
  0xba   : > { %2710 = vmatpush3.bf16.msra.mxu0 %v2868_v41 }
  0xbb   : > { %2711 = vmatprep.subr.bf16.mxu0 %v2898_v1 }
  0xbc   : > { %2748 = vmatpush3.bf16.msra.mxu1 %v2868_v41 }
  0xbd   : > { %2656 = vmatmul.mubr.bf16.gmra.mxu0 %v1408_v46  ;;  %2741 = vmatprep.subr.bf16.mxu1 %v2898_v1 }
  0xbe   : > { %2692 = vmatmul.mubr.bf16.gmra.mxu1 %v1612_v48  ;;  %2659 = vmatprep.mubr.msk.bf16.mxu0 %vm2899_vm0, %v2898_v1 }
  0xbf   : > { %2695 = vmatprep.mubr.msk.bf16.mxu1 %vm2899_vm0, %v2898_v1  ;;  %2712 = vmatpush3.bf16.msra.mxu0 %v2869_v49 }
  0xc0   : > { %2749 = vmatpush3.bf16.msra.mxu1 %v2869_v49  ;;  %2713 = vmatprep.subr.bf16.mxu0 %v2898_v1 }
  0xc1   : > { %2742 = vmatprep.subr.bf16.mxu1 %v2898_v1 }
  0xc3   : > { %2714 = vmatpush3.bf16.msra.mxu0 %v2872_v54 }
  0xc4   : > { %2750 = vmatpush3.bf16.msra.mxu1 %v2872_v54 }
  0xc5   : > { %2660 = vmatmul.mubr.bf16.gmra.mxu0 %v1410_v56 }
  0xc6   : > { %2696 = vmatmul.mubr.bf16.gmra.mxu1 %v1621_v58  ;;  %2715 = vmatprep.mubr.msk.bf16.mxu0 %vm2899_vm0, %v2898_v1 }
  0xc7   : > { %2727 = vmatprep.mubr.msk.bf16.mxu1 %vm2899_vm0, %v2898_v1 }
  0xcd   : > { %2716 = vmatmul.mubr.bf16.vlgmr.msra.gmra.mxu0 %v1782_v62 }
  0xce   : > { %2728 = vmatmul.mubr.bf16.vlgmr.msra.gmra.mxu1 %v1788_v63  ;;  %2719 = vmatprep.mubr.msk.bf16.mxu0 %vm2899_vm0, %v2898_v1 }
  0xcf   : > { %2731 = vmatprep.mubr.msk.bf16.mxu1 %vm2899_vm0, %v2898_v1 }
  0xd5   : > { %2720 = vmatmul.mubr.bf16.gmra.mxu0 %v1784_v2 }
  0xd6   : > { %2732 = vmatmul.mubr.bf16.gmra.mxu1 %v1790_v3  ;;  %2723 = vmatprep.mubr.msk.bf16.mxu0 %vm2899_vm0, %v2898_v1 }
  0xdd   : > { %2724 = vmatmul.mubr.bf16.gmra.mxu0 %v1786_v5 }
  0xed   : > { %v427_v6 = vpop.f32.mrf.mxu0 }
  0xee   : > { %v553_v7 = vpop.f32.mrf.mxu1 }
  0xef   : > { %v554_v4 = vadd.f32 %v553_v7, %v427_v6  ;;  %v2429_v8 = vpop.f32.mrf.mxu0 }
  0xf0   : > { %v2465_v9 = vpop.f32.mrf.mxu1 }
  0xf1   : > { %v430_v11 = vpop.f32.mrf.mxu0 }
  0xf2   : > { %v556_v12 = vpop.f32.mrf.mxu1 }
  0xf3   : > { %v557_v10 = vadd.f32 %v556_v12, %v430_v11  ;;  %v2430_v13 = vpop.f32.mrf.mxu0 }
  0xf4   : > { %v2466_v14 = vpop.f32.mrf.mxu1 }
  0xf5   : > { %v435_v16 = vpop.f32.mrf.mxu0 }
  0xf6   : > { %v561_v17 = vpop.f32.mrf.mxu1 }
  0xf7   : > { %v562_v18 = vadd.f32 %v561_v17, %v435_v16  ;;  %v2433_v15 = vpop.f32.mrf.mxu0 }
  0xf8   : > { %v2469_v20 = vpop.f32.mrf.mxu1 }
  0xf9   : > { %v438_v21 = vpop.f32.mrf.mxu0 }
  0xfa   : > { %v564_v1 = vpop.f32.mrf.mxu1 }
  0xfb   : > { %v565_v22 = vadd.f32 %v564_v1, %v438_v21  ;;  %v2434_v19 = vpop.f32.mrf.mxu0 }
  0xfc   : > { %v2470_v23 = vpop.f32.mrf.mxu1 }
  0xfd   : > { %v443_v24 = vpop.f32.mrf.mxu0 }
  0xfe   : > { %v569_v25 = vpop.f32.mrf.mxu1 }
  0xff   : > { %v570_v26 = vadd.f32 %v569_v25, %v443_v24  ;;  %v2437_v28 = vpop.f32.mrf.mxu0 }
 0x100   : > { %v2473_v29 = vpop.f32.mrf.mxu1 }
 0x101   : > { %v446_v30 = vpop.f32.mrf.mxu0 }
 0x102   : > { %v572_v31 = vpop.f32.mrf.mxu1 }
 0x103   : > { %v573_v32 = vadd.f32 %v572_v31, %v446_v30  ;;  %v2438_v33 = vpop.f32.mrf.mxu0 }
 0x104   : > { %v2474_v34 = vpop.f32.mrf.mxu1 }
 0x105   : > { %v451_v35 = vpop.f32.mrf.mxu0 }
 0x106   : > { %v577_v27 = vpop.f32.mrf.mxu1 }
 0x107   : > { %v578_v37 = vadd.f32 %v577_v27, %v451_v35  ;;  %v2441_v38 = vpop.f32.mrf.mxu0 }
 0x108   : > { %v2477_v39 = vpop.f32.mrf.mxu1 }
 0x109   : > { %v454_v40 = vpop.f32.mrf.mxu0 }
 0x10a   : > { %v580_v41 = vpop.f32.mrf.mxu1 }
 0x10b   : > { %v581_v42 = vadd.f32 %v580_v41, %v454_v40  ;;  %v2442_v43 = vpop.f32.mrf.mxu0 }
 0x10c   : > { %v2478_v44 = vpop.f32.mrf.mxu1 }
 0x10d   : > { %v459_v46 = vpop.f32.mrf.mxu0 }
 0x10e   : > { %v585_v47 = vpop.f32.mrf.mxu1 }
 0x10f   : > { %v586_v48 = vadd.f32 %v585_v47, %v459_v46  ;;  %v2445_v49 = vpop.f32.mrf.mxu0 }
 0x110   : > { %v2481_v36 = vpop.f32.mrf.mxu1 }
 0x111   : > { %v462_v50 = vpop.f32.mrf.mxu0 }
 0x112   : > { %v588_v52 = vpop.f32.mrf.mxu1 }
 0x113   : > { %v589_v53 = vadd.f32 %v588_v52, %v462_v50  ;;  %v2446_v54 = vpop.f32.mrf.mxu0 }
 0x114   : > { %v2482_v55 = vpop.f32.mrf.mxu1 }
 0x115   : > { %v712_v56 = vpop.f32.mrf.mxu0 }
 0x116   : > { %v751_v57 = vadd.f32 %v712_v56, %v554_v4  ;;  %v915_v58 = vpop.f32.mrf.mxu1 }
 0x117   : > { %v2501_v59 = vpop.f32.mrf.mxu0 }
 0x118   : > { %v954_v60 = vadd.f32 %v915_v58, %v751_v57  ;;  %v2537_v61 = vpop.f32.mrf.mxu1 }
 0x119   : > { %v715_v45 = vpop.f32.mrf.mxu0 }
 0x11a   : > { %v752_v62 = vadd.f32 %v715_v45, %v557_v10  ;;  %v918_v63 = vpop.f32.mrf.mxu1 }
 0x11b   : > { %v2502_v0 = vpop.f32.mrf.mxu0 }
 0x11c   : > { %v955_v51 = vadd.f32 %v918_v63, %v752_v62  ;;  %v2538_v2 = vpop.f32.mrf.mxu1 }
 0x11d   : > { %v720_v3 = vpop.f32.mrf.mxu0 }
 0x11e   : > { %v753_v5 = vadd.f32 %v720_v3, %v562_v18  ;;  %v923_v6 = vpop.f32.mrf.mxu1 }
 0x11f   : > { %v2505_v7 = vpop.f32.mrf.mxu0 }
 0x120   : > { %v956_v8 = vadd.f32 %v923_v6, %v753_v5  ;;  %v2541_v9 = vpop.f32.mrf.mxu1 }
 0x121   : > { %v723_v11 = vpop.f32.mrf.mxu0 }
 0x122   : > { %v754_v12 = vadd.f32 %v723_v11, %v565_v22  ;;  %v926_v13 = vpop.f32.mrf.mxu1 }
 0x123   : > { %v2506_v4 = vpop.f32.mrf.mxu0 }
 0x124   : > { %v957_v14 = vadd.f32 %v926_v13, %v754_v12  ;;  %v2542_v16 = vpop.f32.mrf.mxu1 }
 0x125   : > { %v728_v17 = vpop.f32.mrf.mxu0 }
 0x126   : > { %v755_v15 = vadd.f32 %v728_v17, %v570_v26  ;;  %v931_v20 = vpop.f32.mrf.mxu1 }
 0x127   : > { %v2509_v10 = vpop.f32.mrf.mxu0 }
 0x128   : > { %v958_v21 = vadd.f32 %v931_v20, %v755_v15  ;;  %v2545_v1 = vpop.f32.mrf.mxu1 }
 0x129   : > { %v731_v19 = vpop.f32.mrf.mxu0 }
 0x12a   : > { %v756_v23 = vadd.f32 %v731_v19, %v573_v32  ;;  %v934_v24 = vpop.f32.mrf.mxu1 }
 0x12b   : > { %v2510_v18 = vpop.f32.mrf.mxu0 }
 0x12c   : > { %v959_v25 = vadd.f32 %v934_v24, %v756_v23  ;;  %v2546_v28 = vpop.f32.mrf.mxu1 }
 0x12d   : > { %v736_v29 = vpop.f32.mrf.mxu0 }
 0x12e   : > { %v757_v30 = vadd.f32 %v736_v29, %v578_v37  ;;  %v939_v31 = vpop.f32.mrf.mxu1 }
 0x12f   : > { %v2513_v22 = vpop.f32.mrf.mxu0 }
 0x130   : > { %v3496_v33 = vadd.f32 %v939_v31, %v757_v30  ;;  %v2549_v34 = vpop.f32.mrf.mxu1 }
 0x131   : > { %v739_v35 = vpop.f32.mrf.mxu0 }
 0x132   : > { %v758_v27 = vadd.f32 %v739_v35, %v581_v42  ;;  %v942_v26 = vpop.f32.mrf.mxu1 }
 0x133   : > { %v2514_v38 = vpop.f32.mrf.mxu0 }
 0x134   : > { %v3498_v39 = vadd.f32 %v942_v26, %v758_v27  ;;  %v2550_v40 = vpop.f32.mrf.mxu1 }
 0x135   : > { %v744_v41 = vpop.f32.mrf.mxu0 }
 0x136   : > { %v759_v32 = vadd.f32 %v744_v41, %v586_v48  ;;  %v947_v43 = vpop.f32.mrf.mxu1 }
 0x137   : > { %v2517_v44 = vpop.f32.mrf.mxu0 }
 0x138   : > { %v3500_v46 = vadd.f32 %v947_v43, %v759_v32  ;;  %v2553_v47 = vpop.f32.mrf.mxu1 }
 0x139   : > { %v747_v37 = vpop.f32.mrf.mxu0 }
 0x13a   : > { %v760_v49 = vadd.f32 %v747_v37, %v589_v53  ;;  %v950_v36 = vpop.f32.mrf.mxu1 }
 0x13b   : > { %v2518_v50 = vpop.f32.mrf.mxu0 }
 0x13c   : > { %v3502_v52 = vadd.f32 %v950_v36, %v760_v49  ;;  %v2554_v54 = vpop.f32.mrf.mxu1 }
 0x13d   : > { %v1126_v42 = vpop.f32.mrf.mxu0 }
 0x13e   : > { %v1165_v55 = vadd.f32 %v1126_v42, %v954_v60  ;;  %v1295_v56 = vpop.f32.mrf.mxu1 }
 0x13f   : > { %v2573_v57 = vpop.f32.mrf.mxu0 }
 0x140   : > { %v3504_v58 = vadd.f32 %v1295_v56, %v1165_v55  ;;  %v2609_v59 = vpop.f32.mrf.mxu1 }
 0x141   : > { %v1129_v48 = vpop.f32.mrf.mxu0 }
 0x142   : > { %v1166_v61 = vadd.f32 %v1129_v48, %v955_v51  ;;  %v1298_v45 = vpop.f32.mrf.mxu1 }
 0x143   : > { %v2574_v62 = vpop.f32.mrf.mxu0 }
 0x144   : > { %v3506_v63 = vadd.f32 %v1298_v45, %v1166_v61  ;;  %v2610_v0 = vpop.f32.mrf.mxu1 }
 0x145   : > { %v1134_v53 = vpop.f32.mrf.mxu0 }
 0x146   : > { %v1167_v2 = vadd.f32 %v1134_v53, %v956_v8  ;;  %v1303_v3 = vpop.f32.mrf.mxu1 }
 0x147   : > { %v2577_v5 = vpop.f32.mrf.mxu0 }
 0x148   : > { %v3508_v6 = vadd.f32 %v1303_v3, %v1167_v2  ;;  %v2613_v7 = vpop.f32.mrf.mxu1 }
 0x149   : > { %v1137_v60 = vpop.f32.mrf.mxu0 }
 0x14a   : > { %v1168_v9 = vadd.f32 %v1137_v60, %v957_v14  ;;  %v1306_v11 = vpop.f32.mrf.mxu1 }
 0x14b   : > { %v2578_v12 = vpop.f32.mrf.mxu0 }
 0x14c   : > { %v3510_v13 = vadd.f32 %v1306_v11, %v1168_v9  ;;  %v2614_v4 = vpop.f32.mrf.mxu1 }
 0x14d   : > { %v1142_v51 = vpop.f32.mrf.mxu0 }
 0x14e   : > { %v1169_v16 = vadd.f32 %v1142_v51, %v958_v21  ;;  %v1311_v17 = vpop.f32.mrf.mxu1 }
 0x14f   : > { %v2581_v15 = vpop.f32.mrf.mxu0 }
 0x150   : > { %v3512_v20 = vadd.f32 %v1311_v17, %v1169_v16  ;;  %v2617_v10 = vpop.f32.mrf.mxu1 }
 0x151   : > { %v1145_v8 = vpop.f32.mrf.mxu0 }
 0x152   : > { %v1170_v1 = vadd.f32 %v1145_v8, %v959_v25  ;;  %v1314_v19 = vpop.f32.mrf.mxu1 }
 0x153   : > { %v2582_v23 = vpop.f32.mrf.mxu0 }
 0x154   : > { %v3514_v24 = vadd.f32 %v1314_v19, %v1170_v1  ;;  %v2618_v18 = vpop.f32.mrf.mxu1 }
 0x155   : > { %v1150_v14 = vpop.f32.mrf.mxu0 }
 0x156   : > { %v1319_v28 = vpop.f32.mrf.mxu1  ;;  %v1171_v17 = vadd.f32 %v1150_v14, %v3496_v33 }
 0x157   : > { %v2585_v29 = vpop.f32.mrf.mxu0 }
 0x158   : > { %v2621_v30 = vpop.f32.mrf.mxu1  ;;  %v1340_v19 = vadd.f32 %v1319_v28, %v1171_v17 }
 0x159   : > { %v1153_v31 = vpop.f32.mrf.mxu0 }
 0x15a   : > { %v1322_v22 = vpop.f32.mrf.mxu1  ;;  %v1172_v23 = vadd.f32 %v1153_v31, %v3498_v39  ;;  %v3543_v39 = vld [vmem:[%s3595_s2] ss:$0 sm:$0xff] }
 0x15b   : > { %v2586_v34 = vpop.f32.mrf.mxu0 }
 0x15c   : > { %v2622_v21 = vpop.f32.mrf.mxu1 }
 0x15d   : > { %v1158_v35 = vpop.f32.mrf.mxu0 }
 0x15e   : > { %v3516_v27 = vpop.f32.mrf.mxu1 }
 0x15f   : > { %v2589_v26 = vpop.f32.mrf.mxu0 }
 0x160   : > { %v2625_v38 = vpop.f32.mrf.mxu1 }
 0x161   : > { %v1161_v40 = vpop.f32.mrf.mxu0  ;;  %v1341_v38 = vadd.f32 %v1322_v22, %v1172_v23 }
 0x162   : > { %v3518_v25 = vpop.f32.mrf.mxu1 }
 0x163   : > { %v2590_v41 = vpop.f32.mrf.mxu0 }
 0x164   : > { %v2626_v32 = vpop.f32.mrf.mxu1  ;;  %v1173_v41 = vadd.f32 %v1158_v35, %v3500_v46  ;;  %v1174_v46 = vadd.f32 %v1161_v40, %v3502_v52 }
 0x165   : > { %v1498_v43 = vpop.f32.mrf.mxu0 }
 0x166   : > { %v1709_v44 = vpop.f32.mrf.mxu1  ;;  %v1537_v29 = vadd.f32 %v1498_v43, %v3504_v58  ;;  %v1342_v22 = vadd.f32 %v3516_v27, %v1173_v41 }
 0x167   : > { %v2645_v47 = vpop.f32.mrf.mxu0 }
 0x168   : > { %v2681_v37 = vpop.f32.mrf.mxu1  ;;  %v1748_v33 = vadd.f32 %v1709_v44, %v1537_v29 }
 0x169   : > { %v1501_v49 = vpop.f32.mrf.mxu0 }
 0x16a   : > { %v1712_v36 = vpop.f32.mrf.mxu1  ;;  %v1538_v14 = vadd.f32 %v1501_v49, %v3506_v63 }
 0x16b   : > { %v2646_v50 = vpop.f32.mrf.mxu0 }
 0x16c   : > { %v2682_v54 = vpop.f32.mrf.mxu1  ;;  %v1749_v43 = vadd.f32 %v1712_v36, %v1538_v14 }
 0x16d   : > { %v1506_v42 = vpop.f32.mrf.mxu0 }
 0x16e   : > { %v3520_v55 = vpop.f32.mrf.mxu1  ;;  %v1539_v44 = vadd.f32 %v1506_v42, %v3508_v6 }
 0x16f   : > { %v2649_v56 = vpop.f32.mrf.mxu0 }
 0x170   : > { %v2685_v57 = vpop.f32.mrf.mxu1  ;;  %v1750_v6 = vadd.f32 %v3520_v55, %v1539_v44 }
 0x171   : > { %v3522_v59 = vpop.f32.mrf.mxu0 }
 0x172   : > { %v3524_v48 = vpop.f32.mrf.mxu1  ;;  %v1540_v42 = vadd.f32 %v3522_v59, %v3510_v13 }
 0x173   : > { %v2650_v61 = vpop.f32.mrf.mxu0 }
 0x174   : > { %v2686_v45 = vpop.f32.mrf.mxu1  ;;  %v1751_v55 = vadd.f32 %v3524_v48, %v1540_v42 }
 0x175   : > { %v3526_v62 = vpop.f32.mrf.mxu0  ;;  %v1343_v45 = vadd.f32 %v3518_v25, %v1174_v46 }
 0x176   : > { %v3528_v0 = vpop.f32.mrf.mxu1  ;;  %v1541_v13 = vadd.f32 %v3526_v62, %v3512_v20 }
 0x177   : > { %v2653_v53 = vpop.f32.mrf.mxu0 }
 0x178   : > { %v2689_v2 = vpop.f32.mrf.mxu1  ;;  %v1752_v48 = vadd.f32 %v3528_v0, %v1541_v13 }
 0x179   : > { %v3530_v3 = vpop.f32.mrf.mxu0 }
 0x17a   : > { %v3532_v5 = vpop.f32.mrf.mxu1  ;;  %v1542_v20 = vadd.f32 %v3530_v3, %v3514_v24 }
 0x17b   : > { %v2654_v7 = vpop.f32.mrf.mxu0 }
 0x17c   : > { %v2690_v60 = vpop.f32.mrf.mxu1 }
 0x17d   : > { %v1522_v9 = vpop.f32.mrf.mxu0 }
 0x17e   : > { %v1733_v11 = vpop.f32.mrf.mxu1  ;;  %v1543_v34 = vadd.f32 %v1522_v9, %v1340_v19 }
 0x17f   : > { %v2657_v12 = vpop.f32.mrf.mxu0 }
 0x180   : > { %v2693_v4 = vpop.f32.mrf.mxu1  ;;  %v1754_v37 = vadd.f32 %v1733_v11, %v1543_v34 }
 0x181   : > { %v1525_v51 = vpop.f32.mrf.mxu0 }
 0x182   : > { %v1736_v16 = vpop.f32.mrf.mxu1  ;;  %v1544_v28 = vadd.f32 %v1525_v51, %v1341_v38  ;;  %v1753_v38 = vadd.f32 %v3532_v5, %v1542_v20 }
 0x183   : > { %v2658_v15 = vpop.f32.mrf.mxu0 }
 0x184   : > { %v2694_v10 = vpop.f32.mrf.mxu1  ;;  %v1755_v56 = vadd.f32 %v1736_v16, %v1544_v28 }
 0x185   : > { %v1530_v8 = vpop.f32.mrf.mxu0 }
 0x186   : > { %v1741_v1 = vpop.f32.mrf.mxu1  ;;  %v1545_v57 = vadd.f32 %v1530_v8, %v1342_v22 }
 0x187   : > { %v2661_v18 = vpop.f32.mrf.mxu0 }
 0x188   : > { %v2697_v30 = vpop.f32.mrf.mxu1  ;;  %v1756_v60 = vadd.f32 %v1741_v1, %v1545_v57 }
 0x189   : > { %v1533_v21 = vpop.f32.mrf.mxu0 }
 0x18a   : > { %v1744_v26 = vpop.f32.mrf.mxu1  ;;  %v1546_v9 = vadd.f32 %v1533_v21, %v1343_v45 }
 0x18b   : > { %v2662_v32 = vpop.f32.mrf.mxu0 }
 0x18c   : > { %v2698_v47 = vpop.f32.mrf.mxu1  ;;  %v1757_v15 = vadd.f32 %v1744_v26, %v1546_v9 }
 0x18d   : > { %v1878_v50 = vpop.f32.mrf.mxu0 }
 0x18e   : > { %v1917_v58 = vadd.f32 %v1878_v50, %v1748_v33  ;;  %v1902_v31 = vpop.f32.mrf.mxu1 }
 0x18f   : > { %v1923_v63 = vadd.f32 %v1902_v31, %v1754_v37  ;;  %v2717_v35 = vpop.f32.mrf.mxu0 }
 0x190   : > { %v1934_v49 = vadd.f32 %v3543_v39, %v1917_v58  ;;  %v2729_v54 = vpop.f32.mrf.mxu1 }
 0x191   : > { %v1940_v27 = vadd.f32 %v3543_v39, %v1923_v63  ;;  %v1881_v52 = vpop.f32.mrf.mxu0 }
 0x192   : > { %1944 = vst [vmem:[%s3550_s7] sm:$0xff] %v1934_v49  ;;  %v1918_v40 = vadd.f32 %v1881_v52, %v1749_v43  ;;  %v1905_v61 = vpop.f32.mrf.mxu1 }
 0x193   : > { %1950 = vst [vmem:[%s3550_s7 + $0x30] sm:$0xff] %v1940_v27  ;;  %v1924_v53 = vadd.f32 %v1905_v61, %v1755_v56  ;;  %v2718_v36 = vpop.f32.mrf.mxu0 }
 0x194   : > { %v1935_v2 = vadd.f32 %v3543_v39, %v1918_v40  ;;  %v2730_v7 = vpop.f32.mrf.mxu1 }
 0x195   : > { %v1941_v11 = vadd.f32 %v3543_v39, %v1924_v53  ;;  %v1886_v12 = vpop.f32.mrf.mxu0 }
 0x196   : > { %1945 = vst [vmem:[%s3550_s7 + $0x8] sm:$0xff] %v1935_v2  ;;  %v1919_v25 = vadd.f32 %v1886_v12, %v1750_v6  ;;  %v1910_v4 = vpop.f32.mrf.mxu1 }
 0x197   : > { %1951 = vst [vmem:[%s3550_s7 + $0x38] sm:$0xff] %v1941_v11  ;;  %v1925_v51 = vadd.f32 %v1910_v4, %v1756_v60  ;;  %v2721_v16 = vpop.f32.mrf.mxu0 }
 0x198   : > { %v1936_v59 = vadd.f32 %v3543_v39, %v1919_v25  ;;  %v2733_v17 = vpop.f32.mrf.mxu1 }
 0x199   : > { %v1942_v10 = vadd.f32 %v3543_v39, %v1925_v51  ;;  %v1889_v8 = vpop.f32.mrf.mxu0 }
 0x19a   : > { %1946 = vst [vmem:[%s3550_s7 + $0x10] sm:$0xff] %v1936_v59  ;;  %v1920_v1 = vadd.f32 %v1889_v8, %v1751_v55  ;;  %v1913_v19 = vpop.f32.mrf.mxu1 }
 0x19b   : > { %1952 = vst [vmem:[%s3550_s7 + $0x40] sm:$0xff] %v1942_v10  ;;  %v1926_v23 = vadd.f32 %v1913_v19, %v1757_v15  ;;  %v2722_v18 = vpop.f32.mrf.mxu0 }
 0x19c   : > { %v1937_v62 = vadd.f32 %v3543_v39, %v1920_v1  ;;  %v2734_v29 = vpop.f32.mrf.mxu1 }
 0x19d   : > { %v1943_v30 = vadd.f32 %v3543_v39, %v1926_v23  ;;  %v1894_v34 = vpop.f32.mrf.mxu0 }
 0x19e   : > { %1947 = vst [vmem:[%s3550_s7 + $0x18] sm:$0xff] %v1937_v62  ;;  %v1921_v21 = vadd.f32 %v1894_v34, %v1752_v48 }
 0x19f   : > { %1953 = vst [vmem:[%s3550_s7 + $0x48] sm:$0xff] %v1943_v30  ;;  %v2725_v26 = vpop.f32.mrf.mxu0 }
 0x1a0   : > { %v1938_v41 = vadd.f32 %v3543_v39, %v1921_v21 }
 0x1a1   : > { %v1897_v32 = vpop.f32.mrf.mxu0 }
 0x1a2   : > { %1948 = vst [vmem:[%s3550_s7 + $0x20] sm:$0xff] %v1938_v41  ;;  %v1922_v0 = vadd.f32 %v1897_v32, %v1753_v38 }
 0x1a3   : > { %v2726_v33 = vpop.f32.mrf.mxu0 }
 0x1a4   : > { %v1939_v24 = vadd.f32 %v3543_v39, %v1922_v0 }
 0x1a6   : > { %1949 = vst [vmem:[%s3550_s7 + $0x28] sm:$0xff] %v1939_v24 }
 0x1a7 PF: > { %s13_s14 = sadd.s32 1, %s2896_s14   ;;  %s3597_s12 = smov %s2892_s13 }
 0x1a8   : > { %p10_p5 = scmp.ge.s32.totalorder %s13_s14, 4   ;;  %s3598_s13 = smov %s3600_s15 }
 0x1aa   :  { %12 = sbr.rel (!%p10_p5) target bundleno = 2 (0x2), region = 76 }

// kernel: pyramid_features.13
= control target key start
LH: loop header
LB: loop body
LE: loop exit
PB: predicated region body
PF: predicated region fallthrough
CT: control target
= control target key end

     0   :  { %s5283_s12 = smov 0   ;;  %s5285_s13 = smov 0   ;;  %s6805_s0 = inlined_call_operand.vmem [shape: bf16[2,342,128], index: 0, kind: input, shape index: {}]   ;;  %s6806_s1 = inlined_call_operand.vmem [shape: bf16[9,128,128], index: 1, kind: input, shape index: {}]   ;;  %s6807_s2 = inlined_call_operand.vmem [shape: f32[1,128], index: 2, kind: input, shape index: {}]   ;;  %s6808_s3 = inlined_call_operand.vmem [shape: f32[2,288,128], index: 3, kind: output, shape index: {}]  }
   0x1   :  { %s5287_s14 = smov 0  }
   0x2 LB: > { %s25_s15 = sadd.s32 1, %s5257_s13  ;;  %p4093_p0 = scmp.ge.s32.totalorder %s5261_s14, 1  ;;  %s5261_s14 = sphi %s5287_s14, %s13_s14   ;;  %s5257_s13 = sphi %s5285_s13, %s6891_s13   ;;  %s5253_s12 = sphi %s5283_s12, %s6890_s12  }
   0x3   : > { %p27_p1 = scmp.ge.s32.totalorder %s25_s15, 2  ;;  %p168_p2 = scmp.lt.s32.totalorder %s5261_s14, 3 }
   0x5   : > { %s6893_s15 = smov (%p27_p1, %s25_s15), 0  ;;  %p169_p3 = pnand %p4093_p0, %p168_p2 }
   0x7   : > { %172 = sbr.rel (%p169_p3) target bundleno = 571 (0x23b), region = 32 }
   0xc   : > { %v5105_v0 = vld [vmem:[%s6806_s1 + $0x78] sm:$0xff]   ;;  %p202_p4 = scmp.lt.s32.totalorder %s5253_s12, 1  ;;  %v5106_v1 = vld [vmem:[%s6806_s1 + $0x70] sm:$0xff]   ;;  %v5107_v2 = vld [vmem:[%s6806_s1 + $0x68] sm:$0xff]   ;;  %vm386_vm0 = vsmask.f32 7424 }
   0xd   : > { %5063 = vmatprep.subr.bf16.mxu1 %v5105_v0  ;;  %4595 = vmatprep.subr.bf16.mxu0 %v5105_v0  ;;  %v5108_v3 = vld [vmem:[%s6806_s1 + $0x60] sm:$0xff]   ;;  %v5109_v6 = vld [vmem:[%s6806_s1 + $0x58] sm:$0xff]   ;;  %v5110_v17 = vld [vmem:[%s6806_s1 + $0x50] sm:$0xff]   ;;  %vm1042_vm1 = vcmask 1046528   ;;  %vm2314_vm2 = vcmask 1045504   ;;  %vm3586_vm4 = vcmask 1044480  }
   0xe   : > { %s6895_s12 = smov (!%p202_p4, %s5253_s12), 1  ;;  %5071 = vmatpush3.bf16.msra.mxu1 %v5105_v0  ;;  %4596 = vmatpush3.bf16.msra.mxu0 %v5105_v0  ;;  %v5111_v26 = vld [vmem:[%s6806_s1 + $0x48] sm:$0xff]   ;;  %v5112_v32 = vld [vmem:[%s6806_s1 + $0x40] sm:$0xff]   ;;  %v5116_v41 = vld [vmem:[%s6806_s1 + $0x38] sm:$0xff]   ;;  %vm1843_vm3 = vsmask.f32 6400 }
   0xf   : > { %5064 = vmatprep.subr.bf16.mxu1 %v5106_v1  ;;  %4597 = vmatprep.subr.bf16.mxu0 %v5106_v1  ;;  %s5079_s22 = smul.u32 172, %s6895_s12  ;;  %v5121_v47 = vld [vmem:[%s6806_s1 + $0xb8] sm:$0xff]   ;;  %v5120_v52 = vld [vmem:[%s6806_s1 + $0x30] sm:$0xff]   ;;  %vm3115_vm5 = vsmask.f32 5376 }
  0x10   : > { %v5124_v62 = vld [vmem:[%s6806_s1 + $0xb0] sm:$0xff]  }
  0x11   : > { %s5316_s25 = scalar_lea.vmem %s6805_s0, %s5079_s22 }
  0x12   : > { %5072 = vmatpush3.bf16.msra.mxu1 %v5106_v1  ;;  %4598 = vmatpush3.bf16.msra.mxu0 %v5106_v1  ;;  %v5322_v4 = vld [vmem:[%s5316_s25 + $0x40] sm:$0xff]   ;;  %v5325_v5 = vld [vmem:[%s5316_s25 + $0x48] sm:$0xff]   ;;  %v5354_v22 = vld [vmem:[%s5316_s25 + $0x50] sm:$0xff]  }
  0x13   : > { %5065 = vmatprep.subr.bf16.mxu1 %v5107_v2  ;;  %4599 = vmatprep.subr.bf16.mxu0 %v5107_v2  ;;  %v451_v7 = vshll.u32 %v5322_v4, 16  ;;  %v455_v8 = vshrl.u32 %v5322_v4, 16  ;;  %v459_v9 = vshll.u32 %v5325_v5, 16  ;;  %v223_v10 = vld [vmem:[%s5316_s25] sm:$0xf]  ;;  %v5343_v15 = vld [vmem:[%s5316_s25 + $0x8] sm:$0xff]  }
  0x14   : > { %v5337_v13 = vld [vmem:[%s5316_s25 + $0x4] sm:$0xf]  ;;  %v395_v20 = vshll.u32 %v5343_v15, 16  ;;  %v5357_v25 = vld [vmem:[%s5316_s25 + $0x10] sm:$0xff]   ;;  %v467_v28 = vshll.u32 %v5354_v22, 16  ;;  %v5364_v29 = vld [vmem:[%s5316_s25 + $0x58] sm:$0xff]  }
  0x15   : > { %v5334_v11 = vrot.slane %v451_v7, 1  ;;  %v461_v12 = vrot.slane %v459_v9, 1  ;;  %v5340_v14 = vcombine.low %v223_v10, %v5337_v13  ;;  %v463_v30 = vshrl.u32 %v5325_v5, 16  ;;  %v5374_v35 = vld [vmem:[%s5316_s25 + $0x18] sm:$0xff]   ;;  %v5379_v39 = vld [vmem:[%s5316_s25 + $0x60] sm:$0xff]   ;;  %v5393_v50 = vld [vmem:[%s5316_s25 + $0x68] sm:$0xff]  }
  0x16   : > { %5073 = vmatpush3.bf16.msra.mxu1 %v5107_v2  ;;  %4600 = vmatpush3.bf16.msra.mxu0 %v5107_v2  ;;  %v397_v24 = vrot.slane %v395_v20, 1  ;;  %v399_v33 = vshrl.u32 %v5343_v15, 16  ;;  %v403_v34 = vshll.u32 %v5357_v25, 16  ;;  %v469_v36 = vrot.slane %v467_v28, 1  ;;  %v5387_v46 = vld [vmem:[%s5316_s25 + $0x20] sm:$0xff]   ;;  %v5405_v60 = vld [vmem:[%s5316_s25 + $0x28] sm:$0xff]  }
  0x17   : > { %5066 = vmatprep.subr.bf16.mxu1 %v5108_v3  ;;  %4601 = vmatprep.subr.bf16.mxu0 %v5108_v3  ;;  %v457_v16 = vor.u32 %v455_v8, %v5334_v11  ;;  %v388_v18 = vshrl.u32 %v5340_v14, 16  ;;  %v390_v19 = vshll.u32 %v5340_v14, 16  ;;  %v471_v37 = vshrl.u32 %v5354_v22, 16  ;;  %v5414_v1 = vld [vmem:[%s5316_s25 + $0x70] sm:$0xff]   ;;  %v5125_v2 = vld [vmem:[%s6806_s1 + $0x28] sm:$0xff]  }
  0x18   : > { %v475_v38 = vshll.u32 %v5364_v29, 16  ;;  %v465_v40 = vor.u32 %v463_v30, %v461_v12  ;;  %v407_v42 = vshrl.u32 %v5357_v25, 16  ;;  %v411_v43 = vshll.u32 %v5374_v35, 16 }
  0x19   : > { %v462_v21 = vsel %vm386_vm0, %v457_v16, %v461_v12  ;;  %v392_v23 = vrot.slane %v390_v19, 1  ;;  %v401_v44 = vor.u32 %v399_v33, %v397_v24  ;;  %v405_v45 = vrot.slane %v403_v34, 1  ;;  %v5128_v16 = vld [vmem:[%s6806_s1 + $0xa8] sm:$0xff]   ;;  %v5441_v33 = vld [vmem:[%s5316_s25 + $0x38] sm:$0xff]   ;;  %v5132_v34 = vld [vmem:[%s6806_s1 + $0xa0] sm:$0xff]  }
  0x1a   : > { %5074 = vmatpush3.bf16.msra.mxu1 %v5108_v3  ;;  %4602 = vmatpush3.bf16.msra.mxu0 %v5108_v3  ;;  %v473_v48 = vor.u32 %v471_v37, %v469_v36  ;;  %v477_v49 = vrot.slane %v475_v38, 1  ;;  %v470_v51 = vsel %vm386_vm0, %v465_v40, %v469_v36  ;;  %v479_v53 = vshrl.u32 %v5364_v29, 16  ;;  %v5450_v40 = vld [vmem:[%s5316_s25 + $0x80] sm:$0xff]  }
  0x1b   : > { %5067 = vmatprep.subr.bf16.mxu1 %v5109_v6  ;;  %4603 = vmatprep.subr.bf16.mxu0 %v5109_v6  ;;  %v393_v27 = vor.u32 %v392_v23, %v388_v18  ;;  %v409_v54 = vor.u32 %v407_v42, %v405_v45  ;;  %v413_v55 = vrot.slane %v411_v43, 1  ;;  %v406_v56 = vsel %vm386_vm0, %v401_v44, %v405_v45  ;;  %v5431_v23 = vld [vmem:[%s5316_s25 + $0x78] sm:$0xff]  }
  0x1c   : > { %4627 = vmatprep.mubr.bf16.mxu1 %v462_v21  ;;  %v483_v57 = vshll.u32 %v5379_v39, 16  ;;  %v415_v58 = vshrl.u32 %v5374_v35, 16  ;;  %v419_v59 = vshll.u32 %v5387_v46, 16  ;;  %v478_v61 = vsel %vm386_vm0, %v473_v48, %v477_v49 }
  0x1d   : > { %v398_v31 = vsel %vm386_vm0, %v393_v27, %v397_v24  ;;  %v487_v63 = vshrl.u32 %v5379_v39, 16  ;;  %v491_v0 = vshll.u32 %v5393_v50, 16  ;;  %v414_v3 = vsel %vm386_vm0, %v409_v54, %v413_v55  ;;  %v5130_v24 = vld [vmem:[%s6806_s1 + $0x20] sm:$0xff]  }
  0x1e   : > { %5075 = vmatpush3.bf16.msra.mxu1 %v5109_v6  ;;  %4604 = vmatpush3.bf16.msra.mxu0 %v5109_v6  ;;  %v423_v6 = vshrl.u32 %v5387_v46, 16  ;;  %v427_v7 = vshll.u32 %v5405_v60, 16  ;;  %v481_v8 = vor.u32 %v479_v53, %v477_v49  ;;  %v485_v9 = vrot.slane %v483_v57, 1  ;;  %v5139_v57 = vld [vmem:[%s6806_s1 + $0x10] sm:$0xff]  }
  0x1f   : > { %5068 = vmatprep.subr.bf16.mxu1 %v5110_v17  ;;  %4605 = vmatprep.subr.bf16.mxu0 %v5110_v17  ;;  %v417_v10 = vor.u32 %v415_v58, %v413_v55  ;;  %v421_v12 = vrot.slane %v419_v59, 1  ;;  %v493_v19 = vrot.slane %v491_v0, 1  ;;  %v495_v20 = vshrl.u32 %v5393_v50, 16  ;;  %v1021_v0 = vld [vmem:[%s5316_s25] sm:$0xe] }
  0x20   : > { %4611 = vmatprep.mubr.bf16.mxu0 %v398_v31  ;;  %v489_v18 = vor.u32 %v487_v63, %v485_v9  ;;  %v499_v21 = vshll.u32 %v5414_v1, 16  ;;  %v429_v27 = vrot.slane %v427_v7, 1  ;;  %v431_v28 = vshrl.u32 %v5405_v60, 16  ;;  %v5140_v7 = vld [vmem:[%s6806_s1 + $0x90] sm:$0xff]  }
  0x21   : > { %v486_v30 = vsel %vm386_vm0, %v481_v8, %v485_v9  ;;  %v422_v31 = vsel %vm386_vm0, %v417_v10, %v421_v12  ;;  %v503_v36 = vshrl.u32 %v5414_v1, 16  ;;  %v507_v38 = vshll.u32 %v5431_v23, 16  ;;  %v5145_v8 = vld [vmem:[%s5316_s25 + $0x90] ss:$0 sps:$4 sm:$0x11]  }
  0x22   : > { %5076 = vmatpush3.bf16.msra.mxu1 %v5110_v17  ;;  %4606 = vmatpush3.bf16.msra.mxu0 %v5110_v17  ;;  %v5426_v17 = vld [vmem:[%s5316_s25 + $0x30] sm:$0xff]   ;;  %v494_v37 = vsel %vm386_vm0, %v489_v18, %v493_v19  ;;  %v443_v42 = vshll.u32 %v5441_v33, 16  ;;  %v497_v44 = vor.u32 %v495_v20, %v493_v19  ;;  %v501_v45 = vrot.slane %v499_v21, 1  ;;  %v5142_v19 = vld [vmem:[%s6806_s1 + $0x88] sm:$0xff]  }
  0x23   : > { %5069 = vmatprep.subr.bf16.mxu1 %v5111_v26  ;;  %4607 = vmatprep.subr.bf16.mxu0 %v5111_v26  ;;  %v433_v48 = vor.u32 %v431_v28, %v429_v27  ;;  %v509_v54 = vrot.slane %v507_v38, 1  ;;  %v511_v55 = vshrl.u32 %v5431_v23, 16  ;;  %v5143_v20 = vld [vmem:[%s6806_s1 + $0x8] sm:$0xff]  }
  0x24   : > { %v505_v53 = vor.u32 %v503_v36, %v501_v45  ;;  %v445_v59 = vrot.slane %v443_v42, 1  ;;  %v5147_v36 = vld [vmem:[%s6806_s1] sm:$0xff]   ;;  %v5149_v42 = vld [vmem:[%s6806_s1 + $0xf8] sm:$0xff]  }
  0x26   : > { %5077 = vmatpush3.bf16.msra.mxu1 %v5111_v26  ;;  %4608 = vmatpush3.bf16.msra.mxu0 %v5111_v26  ;;  %v425_v26 = vor.u32 %v423_v6, %v421_v12  ;;  %v510_v6 = vsel %vm386_vm0, %v505_v53, %v509_v54  ;;  %v4163_v12 = vcombine.low %v1021_v0, %v5337_v13  ;;  %v5152_v53 = vld [vmem:[%s6806_s1 + $0x130] sm:$0xff]   ;;  %v1056_v0 = vrot.slane %v5441_v33, 1 }
  0x27   : > { %5070 = vmatprep.subr.bf16.mxu1 %v5112_v32  ;;  %4609 = vmatprep.subr.bf16.mxu0 %v5112_v32 }
  0x28   : > { %v430_v43 = vsel %vm386_vm0, %v425_v26, %v429_v27  ;;  %v1043_v13 = vrot.slane %v4163_v12, 1  ;;  %v1044_v26 = vrot.slane %v5343_v15, 1  ;;  %v5162_v12 = vld [vmem:[%s6806_s1 + $0x108] sm:$0xff]  }
  0x2a   : > { %5078 = vmatpush3.bf16.msra.mxu1 %v5112_v32  ;;  %4610 = vmatpush3.bf16.msra.mxu0 %v5112_v32  ;;  %v435_v32 = vshll.u32 %v5426_v17, 16 }
  0x2b   : > { %4647 = vmatprep.subr.bf16.mxu1 %v5116_v41  ;;  %4699 = vmatprep.subr.bf16.mxu0 %v5121_v47 }
  0x2c   : > { %v437_v49 = vrot.slane %v435_v32, 1 }
  0x2d   : > { %4628 = vmatmul.mubr.bf16.vlgmr.msra.gmra.mxu1 %v470_v51  ;;  %4612 = vmatmul.mubr.bf16.vlgmr.msra.gmra.mxu0 %v406_v56  ;;  %v5136_v51 = vld [vmem:[%s6806_s1 + $0x98] sm:$0xff]   ;;  %v515_v56 = vshll.u32 %v5450_v40, 16 }
  0x2e   : > { %4648 = vmatpush3.bf16.msra.mxu1 %v5116_v41  ;;  %4700 = vmatpush3.bf16.msra.mxu0 %v5121_v47  ;;  %v439_v41 = vshrl.u32 %v5426_v17, 16  ;;  %v5134_v47 = vld [vmem:[%s6806_s1 + $0x18] sm:$0xff]   ;;  %v438_v63 = vsel %vm386_vm0, %v433_v48, %v437_v49 }
  0x2f   : > { %4649 = vmatprep.subr.bf16.mxu1 %v5120_v52  ;;  %4631 = vmatprep.mubr.bf16.mxu1 %v478_v61  ;;  %v447_v61 = vshrl.u32 %v5441_v33, 16  ;;  %v517_v9 = vrot.slane %v515_v56, 1  ;;  %v5154_v56 = vld [vmem:[%s6806_s1 + $0x128] sm:$0xff]  }
  0x30   : > { %4701 = vmatprep.subr.bf16.mxu0 %v5124_v62  ;;  %4615 = vmatprep.mubr.bf16.mxu0 %v414_v3  ;;  %v441_v58 = vor.u32 %v439_v41, %v437_v49  ;;  %v1046_v41 = vrot.slane %v5357_v25, 1 }
  0x31   : > { %v449_v18 = vor.u32 %v447_v61, %v445_v59  ;;  %v5156_v61 = vld [vmem:[%s6806_s1 + $0x120] sm:$0xff]  }
  0x32   : > { %4650 = vmatpush3.bf16.msra.mxu1 %v5120_v52  ;;  %4702 = vmatpush3.bf16.msra.mxu0 %v5124_v62  ;;  %v5462_v52 = vld [vmem:[%s5316_s25 + $0x88] sm:$0xff]   ;;  %v502_v62 = vsel %vm386_vm0, %v497_v44, %v501_v45  ;;  %v446_v10 = vsel %vm386_vm0, %v441_v58, %v445_v59  ;;  %v1048_v45 = vrot.slane %v5374_v35, 1  ;;  %v1047_v49 = vsel %vm1042_vm1, %v1044_v26, %v1046_v41  ;;  %v5151_v59 = vld [vmem:[%s6806_s1 + $0xf0] sm:$0xff]  }
  0x33   : > { %4651 = vmatprep.subr.bf16.mxu1 %v5125_v2  ;;  %4703 = vmatprep.subr.bf16.mxu0 %v5128_v16  ;;  %v523_v3 = vshll.u32 %v5462_v52, 16  ;;  %v454_v28 = vsel %vm386_vm0, %v449_v18, %v5334_v11  ;;  %v1076_v44 = vrot.slane %v5462_v52, 1  ;;  %v1064_v18 = vrot.slane %v5364_v29, 1 }
  0x35   : > { %4632 = vmatmul.mubr.bf16.gmra.mxu1 %v486_v30  ;;  %4616 = vmatmul.mubr.bf16.gmra.mxu0 %v422_v31  ;;  %v527_v30 = vshrl.u32 %v5462_v52, 16  ;;  %v531_v31 = vshll.u32 %v5145_v8, 16 }
  0x36   : > { %4652 = vmatpush3.bf16.msra.mxu1 %v5125_v2  ;;  %4704 = vmatpush3.bf16.msra.mxu0 %v5128_v16  ;;  %v519_v2 = vshrl.u32 %v5450_v40, 16  ;;  %v513_v16 = vor.u32 %v511_v55, %v509_v54  ;;  %v1049_v54 = vsel %vm1042_vm1, %v1046_v41, %v1048_v45  ;;  %v1050_v55 = vrot.slane %v5387_v46, 1 }
  0x37   : > { %4635 = vmatprep.mubr.bf16.mxu1 %v494_v37  ;;  %4653 = vmatprep.subr.bf16.mxu1 %v5130_v24  ;;  %v1045_v37 = vsel %vm1042_vm1, %v1043_v13, %v1044_v26  ;;  %v533_v38 = vrot.slane %v531_v31, 1  ;;  %v1359_v13 = vld [vmem:[%s5316_s25 + $0x8] sm:$0xe]  ;;  %v1360_v26 = vld [vmem:[%s5316_s25 + $0xc] sm:$0xf]  ;;  %v1068_v31 = vrot.slane %v5393_v50, 1 }
  0x38   : > { %4705 = vmatprep.subr.bf16.mxu0 %v5132_v34  ;;  %4619 = vmatprep.mubr.bf16.mxu0 %v430_v43  ;;  %v521_v21 = vor.u32 %v519_v2, %v517_v9  ;;  %v518_v27 = vsel %vm386_vm0, %v513_v16, %v517_v9  ;;  %v5150_v43 = vld [vmem:[%s6806_s1 + $0x138] sm:$0xff]   ;;  %v1051_v58 = vsel %vm1042_vm1, %v1048_v45, %v1050_v55  ;;  %v1062_v16 = vrot.slane %v5354_v22, 1 }
  0x39   : > { %v5157_v9 = vld [vmem:[%s6806_s1 + $0xd8] sm:$0xff]   ;;  %v1072_v45 = vrot.slane %v5431_v23, 1 }
  0x3a   : > { %4654 = vmatpush3.bf16.msra.mxu1 %v5130_v24  ;;  %4706 = vmatpush3.bf16.msra.mxu0 %v5132_v34  ;;  %v525_v24 = vrot.slane %v523_v3, 1  ;;  %v5146_v34 = vld [vmem:[%s6806_s1 + $0x80] sm:$0xff]   ;;  %v5158_v3 = vld [vmem:[%s6806_s1 + $0x118] sm:$0xff]  }
  0x3b   : > { %4655 = vmatprep.subr.bf16.mxu1 %v5134_v47  ;;  %4707 = vmatprep.subr.bf16.mxu0 %v5136_v51 }
  0x3c   : > { %v526_v32 = vsel %vm386_vm0, %v521_v21, %v525_v24  ;;  %v529_v11 = vor.u32 %v527_v30, %v525_v24  ;;  %v5163_v21 = vld [vmem:[%s6806_s1 + $0xc0] sm:$0xff]   ;;  %v5586_v24 = vld [vmem:[%s6806_s1 + $0x1b8] sm:$0xff]  }
  0x3d   : > { %4636 = vmatmul.mubr.bf16.gmra.mxu1 %v502_v62  ;;  %4620 = vmatmul.mubr.bf16.gmra.mxu0 %v438_v63  ;;  %v1054_v62 = vrot.slane %v5426_v17, 1  ;;  %v5153_v63 = vld [vmem:[%s6806_s1 + $0xe8] sm:$0xff]   ;;  %v5597_v30 = vld [vmem:[%s5316_s25 + $0x18] sm:$0xff]  }
  0x3e   : > { %4656 = vmatpush3.bf16.msra.mxu1 %v5134_v47  ;;  %4708 = vmatpush3.bf16.msra.mxu0 %v5136_v51  ;;  %v1078_v47 = vrot.slane %v5145_v8, 1  ;;  %v534_v48 = vsel %vm386_vm0, %v529_v11, %v533_v38  ;;  %v1060_v8 = vrot.slane %v5325_v5, 1  ;;  %v1070_v38 = vrot.slane %v5414_v1, 1 }
  0x3f   : > { %4639 = vmatprep.mubr.bf16.mxu1 %v510_v6  ;;  %4657 = vmatprep.subr.bf16.mxu1 %v5139_v57  ;;  %v1057_v2 = vsel %vm1042_vm1, %v1054_v62, %v1056_v0  ;;  %v1058_v6 = vrot.slane %v5322_v4, 1 }
  0x40   : > { %4709 = vmatprep.subr.bf16.mxu0 %v5140_v7  ;;  %4623 = vmatprep.mubr.bf16.mxu0 %v446_v10  ;;  %v5515_v51 = vsel %vm1042_vm1, %v1076_v44, %v1078_v47  ;;  %v5159_v10 = vld [vmem:[%s6806_s1 + $0xd0] sm:$0xff]   ;;  %v1071_v47 = vsel %vm1042_vm1, %v1068_v31, %v1070_v38 }
  0x42   : > { %4658 = vmatpush3.bf16.msra.mxu1 %v5139_v57  ;;  %4710 = vmatpush3.bf16.msra.mxu0 %v5140_v7  ;;  %v1052_v57 = vrot.slane %v5405_v60, 1  ;;  %v5160_v7 = vld [vmem:[%s6806_s1 + $0x110] sm:$0xff]  }
  0x43   : > { %4711 = vmatprep.subr.bf16.mxu0 %v5142_v19  ;;  %4659 = vmatprep.subr.bf16.mxu1 %v5143_v20 }
  0x45   : > { %4640 = vmatmul.mubr.bf16.gmra.mxu1 %v518_v27  ;;  %4624 = vmatmul.mubr.bf16.gmra.mxu0 %v454_v28  ;;  %v5592_v27 = vld [vmem:[%s5316_s25 + $0x10] sm:$0xff]   ;;  %v1066_v28 = vrot.slane %v5379_v39, 1 }
  0x46   : > { %4712 = vmatpush3.bf16.msra.mxu0 %v5142_v19  ;;  %4643 = vmatprep.mubr.bf16.mxu1 %v526_v32  ;;  %v5161_v19 = vld [vmem:[%s6806_s1 + $0xc8] sm:$0xff]   ;;  %v2316_v32 = vrot.slane %v5592_v27, 2 }
  0x47   : > { %4660 = vmatpush3.bf16.msra.mxu1 %v5143_v20  ;;  %4713 = vmatprep.subr.bf16.mxu0 %v5146_v34  ;;  %v1065_v20 = vsel %vm1042_vm1, %v1062_v16, %v1064_v18 }
  0x48   : > { %4661 = vmatprep.subr.bf16.mxu1 %v5147_v36  ;;  %4715 = vmatprep.mubr.bf16.mxu0 %v1045_v37  ;;  %v1069_v37 = vsel %vm1042_vm1, %v1066_v28, %v1068_v31 }
  0x4a   : > { %4714 = vmatpush3.bf16.msra.mxu0 %v5146_v34  ;;  %v1067_v34 = vsel %vm1042_vm1, %v1064_v18, %v1066_v28 }
  0x4b   : > { %4662 = vmatpush3.bf16.msra.mxu1 %v5147_v36  ;;  %4803 = vmatprep.subr.bf16.mxu0 %v5150_v43  ;;  %v5609_v36 = vcombine.low %v1359_v13, %v1360_v26 }
  0x4c   : > { %4751 = vmatprep.subr.bf16.mxu1 %v5149_v42 }
  0x4d   : > { %4644 = vmatmul.mubr.bf16.gmra.mxu1 %v534_v48  ;;  %4716 = vmatmul.mubr.bf16.vlgmr.msra.gmra.mxu0 %v1047_v49  ;;  %v1845_v41 = vshrl.u32 %v5609_v36, 16  ;;  %v1856_v48 = vshll.u32 %v5592_v27, 16  ;;  %v1865_v49 = vshll.u32 %v5597_v30, 16 }
  0x4e   : > { %4663 = vmatprep.mubr.bf16.mxu1 %v5340_v14  ;;  %4804 = vmatpush3.bf16.msra.mxu0 %v5150_v43  ;;  %v1053_v14 = vsel %vm1042_vm1, %v1050_v55, %v1052_v57  ;;  %v1853_v43 = vshrl.u32 %v5592_v27, 16 }
  0x4f   : > { %4719 = vmatprep.mubr.bf16.mxu0 %v1049_v54  ;;  %4805 = vmatprep.subr.bf16.mxu0 %v5152_v53  ;;  %v1847_v54 = vrot.slane %v1845_v41, 1 }
  0x52   : > { %4806 = vmatpush3.bf16.msra.mxu0 %v5152_v53  ;;  %v1506_v53 = vrot.slane %v5609_v36, 1 }
  0x53   : > { %4807 = vmatprep.subr.bf16.mxu0 %v5154_v56 }
  0x55   : > { %4664 = vmatmul.mubr.bf16.vlgmr.msra.gmra.mxu1 %v5343_v15  ;;  %4720 = vmatmul.mubr.bf16.gmra.mxu0 %v1051_v58  ;;  %v1055_v15 = vsel %vm1042_vm1, %v1052_v57, %v1054_v62  ;;  %v1507_v57 = vrot.slane %v5592_v27, 1  ;;  %v1073_v58 = vsel %vm1042_vm1, %v1070_v38, %v1072_v45  ;;  %v5693_v38 = vld [vmem:[%s5316_s25 + $0x58] sm:$0xff]  }
  0x56   : > { %4752 = vmatpush3.bf16.msra.mxu1 %v5149_v42  ;;  %4667 = vmatprep.mubr.bf16.mxu1 %v5357_v25  ;;  %v5155_v25 = vld [vmem:[%s6806_s1 + $0xe0] sm:$0xff]   ;;  %v1848_v42 = vshll.u32 %v5609_v36, 16  ;;  %v5178_v36 = vld [vmem:[%s6806_s1 + $0x1a8] sm:$0xff]  }
  0x57   : > { %4753 = vmatprep.subr.bf16.mxu1 %v5151_v59  ;;  %4723 = vmatprep.mubr.bf16.mxu0 %v1053_v14  ;;  %v5632_v14 = vld [vmem:[%s5316_s25 + $0x20] sm:$0xff]  }
  0x58   : > { %4808 = vmatpush3.bf16.msra.mxu0 %v5154_v56  ;;  %v1850_v55 = vrot.slane %v1848_v42, 2  ;;  %v1855_v56 = vrot.slane %v1853_v43, 1 }
  0x59   : > { %4809 = vmatprep.subr.bf16.mxu0 %v5156_v61 }
  0x5a   : > { %4754 = vmatpush3.bf16.msra.mxu1 %v5151_v59  ;;  %v1858_v59 = vrot.slane %v1856_v48, 2  ;;  %v1851_v31 = vor.u32 %v1850_v55, %v1847_v54  ;;  %v5707_v54 = vld [vmem:[%s5316_s25 + $0x60] sm:$0xff]  }
  0x5b   : > { %4755 = vmatprep.subr.bf16.mxu1 %v5153_v63 }
  0x5c   : > { %4810 = vmatpush3.bf16.msra.mxu0 %v5156_v61  ;;  %v2293_v61 = vld [vmem:[%s5316_s25 + $0x8] sm:$0xc] }
  0x5d   : > { %4668 = vmatmul.mubr.bf16.gmra.mxu1 %v5374_v35  ;;  %4724 = vmatmul.mubr.bf16.gmra.mxu0 %v1055_v15  ;;  %v1059_v35 = vsel %vm1042_vm1, %v1056_v0, %v1058_v6  ;;  %v4256_v0 = vcombine.low %v2293_v61, %v1360_v26  ;;  %v1867_v15 = vrot.slane %v1865_v49, 2  ;;  %v5718_v61 = vld [vmem:[%s5316_s25 + $0x68] sm:$0xff]  }
  0x5e   : > { %4671 = vmatprep.mubr.bf16.mxu1 %v5387_v46  ;;  %4756 = vmatpush3.bf16.msra.mxu1 %v5153_v63  ;;  %v1061_v46 = vsel %vm1042_vm1, %v1058_v6, %v1060_v8  ;;  %v5637_v63 = vld [vmem:[%s5316_s25 + $0x28] sm:$0xff]   ;;  %v2320_v6 = vrot.slane %v5632_v14, 2 }
  0x5f   : > { %4727 = vmatprep.mubr.bf16.mxu0 %v1057_v2  ;;  %4757 = vmatprep.subr.bf16.mxu1 %v5155_v25  ;;  %v1871_v2 = vshrl.u32 %v5632_v14, 16  ;;  %v1880_v13 = vshrl.u32 %v5637_v63, 16 }
  0x60   : > { %4811 = vmatprep.subr.bf16.mxu0 %v5158_v3 }
  0x61   : > { %4812 = vmatpush3.bf16.msra.mxu0 %v5158_v3  ;;  %v5642_v3 = vld [vmem:[%s5316_s25 + $0x30] sm:$0xff]   ;;  %v1873_v18 = vrot.slane %v1871_v2, 1  ;;  %v1882_v43 = vrot.slane %v1880_v13, 1 }
  0x62   : > { %4758 = vmatpush3.bf16.msra.mxu1 %v5155_v25  ;;  %4813 = vmatprep.subr.bf16.mxu0 %v5160_v7  ;;  %v2315_v25 = vrot.slane %v4256_v0, 2  ;;  %v1892_v48 = vshll.u32 %v5642_v3, 16  ;;  %v2336_v0 = vrot.slane %v5707_v54, 2  ;;  %v5724_v2 = vld [vmem:[%s5316_s25 + $0x70] sm:$0xff]  }
  0x63   : > { %4759 = vmatprep.subr.bf16.mxu1 %v5157_v9 }
  0x65   : > { %4672 = vmatmul.mubr.bf16.gmra.mxu1 %v5405_v60  ;;  %4728 = vmatmul.mubr.bf16.gmra.mxu0 %v1059_v35  ;;  %v5164_v60 = vld [vmem:[%s6806_s1 + $0x100] sm:$0xff]   ;;  %v1874_v35 = vshll.u32 %v5632_v14, 16 }
  0x66   : > { %4675 = vmatprep.mubr.bf16.mxu1 %v5426_v17  ;;  %4731 = vmatprep.mubr.bf16.mxu0 %v1061_v46  ;;  %v1063_v17 = vsel %vm1042_vm1, %v1060_v8, %v1062_v16  ;;  %v5648_v8 = vld [vmem:[%s5316_s25 + $0x38] sm:$0xff]   ;;  %v5656_v46 = vld [vmem:[%s5316_s25 + $0x40] sm:$0xff]  }
  0x67   : > { %4760 = vmatpush3.bf16.msra.mxu1 %v5157_v9  ;;  %4814 = vmatpush3.bf16.msra.mxu0 %v5160_v7  ;;  %v1509_v7 = vrot.slane %v5597_v30, 1  ;;  %v5651_v9 = vsel %vm2314_vm2, %v2315_v25, %v2316_v32  ;;  %v1898_v55 = vshrl.u32 %v5648_v8, 16 }
  0x68   : > { %4761 = vmatprep.subr.bf16.mxu1 %v5159_v10  ;;  %4815 = vmatprep.subr.bf16.mxu0 %v5162_v12 }
  0x6b   : > { %4762 = vmatpush3.bf16.msra.mxu1 %v5159_v10  ;;  %4816 = vmatpush3.bf16.msra.mxu0 %v5162_v12 }
  0x6c   : > { %4763 = vmatprep.subr.bf16.mxu1 %v5161_v19  ;;  %4817 = vmatprep.subr.bf16.mxu0 %v5164_v60 }
  0x6d   : > { %4676 = vmatmul.mubr.bf16.gmra.mxu1 %v5441_v33  ;;  %4732 = vmatmul.mubr.bf16.gmra.mxu0 %v1063_v17  ;;  %v5604_v33 = vld [vmem:[%s6806_s1 + $0x178] sm:$0xff]   ;;  %v2326_v17 = vrot.slane %v5648_v8, 2 }
  0x6e   : > { %4679 = vmatprep.mubr.bf16.mxu1 %v5322_v4  ;;  %4735 = vmatprep.mubr.bf16.mxu0 %v1065_v20  ;;  %v2318_v4 = vrot.slane %v5597_v30, 2  ;;  %v5672_v20 = vld [vmem:[%s5316_s25 + $0x48] sm:$0xff]  }
  0x6f   : > { %4764 = vmatpush3.bf16.msra.mxu1 %v5161_v19  ;;  %4818 = vmatpush3.bf16.msra.mxu0 %v5164_v60  ;;  %v1511_v19 = vrot.slane %v5632_v14, 1  ;;  %v2324_v60 = vrot.slane %v5642_v3, 2 }
  0x70   : > { %4765 = vmatprep.subr.bf16.mxu1 %v5163_v21  ;;  %4907 = vmatprep.subr.bf16.mxu0 %v5586_v24  ;;  %v5613_v11 = vsel %vm2314_vm2, %v2316_v32, %v2318_v4  ;;  %v5659_v10 = vsel %vm2314_vm2, %v2318_v4, %v2320_v6  ;;  %v5684_v32 = vld [vmem:[%s5316_s25 + $0x50] sm:$0xff]  }
  0x71   : > { %v5681_v28 = vsel %vm2314_vm2, %v2324_v60, %v2326_v17  ;;  %v2332_v42 = vrot.slane %v5684_v32, 2 }
  0x73   : > { %4766 = vmatpush3.bf16.msra.mxu1 %v5163_v21  ;;  %v2328_v21 = vrot.slane %v5656_v46, 2 }
  0x74   : > { %4855 = vmatprep.subr.bf16.mxu1 %v5604_v33 }
  0x75   : > { %4680 = vmatmul.mubr.bf16.gmra.mxu1 %v5325_v5  ;;  %4736 = vmatmul.mubr.bf16.gmra.mxu0 %v1067_v34  ;;  %v1074_v5 = vrot.slane %v5450_v40, 1  ;;  %v5687_v4 = vsel %vm2314_vm2, %v2326_v17, %v2328_v21  ;;  %v1883_v34 = vshll.u32 %v5637_v63, 16 }
  0x76   : > { %4683 = vmatprep.mubr.bf16.mxu1 %v5354_v22  ;;  %4739 = vmatprep.mubr.bf16.mxu0 %v1069_v37  ;;  %v1862_v22 = vshrl.u32 %v5597_v30, 16  ;;  %v1513_v37 = vrot.slane %v5637_v63, 1 }
  0x77   : > { %v1077_v16 = vsel %vm1042_vm1, %v1074_v5, %v1076_v44  ;;  %v1876_v44 = vrot.slane %v1874_v35, 2  ;;  %v1885_v49 = vrot.slane %v1883_v34, 2  ;;  %v5735_v35 = vld [vmem:[%s5316_s25 + $0x78] sm:$0xff]   ;;  %v1916_v34 = vshrl.u32 %v5672_v20, 16 }
  0x78   : > { %v1864_v62 = vrot.slane %v1862_v22, 1  ;;  %v2334_v22 = vrot.slane %v5693_v38, 2 }
  0x79   : > { %v1877_v25 = vor.u32 %v1876_v44, %v1873_v18  ;;  %v2340_v18 = vrot.slane %v5724_v2, 2 }
  0x7d   : > { %4684 = vmatmul.mubr.bf16.gmra.mxu1 %v5364_v29  ;;  %4740 = vmatmul.mubr.bf16.gmra.mxu0 %v1071_v47  ;;  %v2322_v29 = vrot.slane %v5637_v63, 2 }
  0x7e   : > { %4687 = vmatprep.mubr.bf16.mxu1 %v5379_v39  ;;  %4743 = vmatprep.mubr.bf16.mxu0 %v1073_v58  ;;  %v1075_v39 = vsel %vm1042_vm1, %v1072_v45, %v1074_v5  ;;  %v1889_v45 = vshrl.u32 %v5642_v3, 16  ;;  %v5714_v58 = vsel %vm2314_vm2, %v2332_v42, %v2334_v22 }
  0x7f   : > { %v5662_v12 = vsel %vm2314_vm2, %v2320_v6, %v2322_v29  ;;  %v5678_v26 = vsel %vm2314_vm2, %v2322_v29, %v2324_v60  ;;  %v5727_v6 = vsel %vm2314_vm2, %v2334_v22, %v2336_v0  ;;  %v2338_v29 = vrot.slane %v5718_v61, 2  ;;  %v5172_v22 = vld [vmem:[%s6806_s1 + $0x170] sm:$0xff]  }
  0x80   : > { %v1508_v60 = vsel %vm1042_vm1, %v1506_v53, %v1507_v57  ;;  %v1886_v53 = vor.u32 %v1885_v49, %v1882_v43  ;;  %v1510_v49 = vsel %vm1042_vm1, %v1507_v57, %v1509_v7 }
  0x85   : > { %4688 = vmatmul.mubr.bf16.gmra.mxu1 %v5393_v50  ;;  %4744 = vmatmul.mubr.bf16.gmra.mxu0 %v1075_v39  ;;  %v1859_v50 = vor.u32 %v1858_v59, %v1855_v56  ;;  %v1901_v56 = vshll.u32 %v5648_v8, 16  ;;  %v1868_v59 = vor.u32 %v1867_v15, %v1864_v62  ;;  %v1891_v62 = vrot.slane %v1889_v45, 1 }
  0x86   : > { %4691 = vmatprep.mubr.bf16.mxu1 %v5414_v1  ;;  %4747 = vmatprep.mubr.bf16.mxu0 %v1077_v16  ;;  %v2330_v1 = vrot.slane %v5672_v20, 2  ;;  %v1894_v15 = vrot.slane %v1892_v48, 2  ;;  %v5738_v16 = vsel %vm2314_vm2, %v2336_v0, %v2338_v29  ;;  %v5765_v48 = vld [vmem:[%s5316_s25 + $0x88] sm:$0xff]   ;;  %v1512_v0 = vsel %vm1042_vm1, %v1509_v7, %v1511_v19 }
  0x87   : > { %v1860_v47 = vsel %vm1843_vm3, %v1851_v31, %v1859_v50  ;;  %v1869_v39 = vsel %vm1843_vm3, %v1859_v50, %v1868_v59  ;;  %v1878_v17 = vsel %vm1843_vm3, %v1868_v59, %v1877_v25  ;;  %v1903_v44 = vrot.slane %v1901_v56, 2 }
  0x88   : > { %v5696_v41 = vsel %vm2314_vm2, %v2328_v21, %v2330_v1  ;;  %v5703_v5 = vsel %vm2314_vm2, %v2330_v1, %v2332_v42  ;;  %v1900_v21 = vrot.slane %v1898_v55, 1  ;;  %v5748_v50 = vsel %vm2314_vm2, %v2338_v29, %v2340_v18  ;;  %v5758_v42 = vld [vmem:[%s5316_s25 + $0x80] sm:$0xff]  }
  0x89   : > { %v2342_v1 = vrot.slane %v5735_v35, 2  ;;  %v2344_v43 = vrot.slane %v5758_v42, 2  ;;  %v1887_v55 = vsel %vm1843_vm3, %v1877_v25, %v1886_v53  ;;  %v1928_v56 = vshll.u32 %v5684_v32, 16 }
  0x8a   : > { %v2346_v59 = vrot.slane %v5765_v48, 2  ;;  %v1904_v25 = vor.u32 %v1903_v44, %v1900_v21  ;;  %v6809_v29 = vrot.slane %v5656_v46, 1  ;;  %v5815_v21 = vld [vmem:[%s5316_s25 + $0x98] ss:$0 sps:$4 sm:$0x33]  }
  0x8b   : > { %v5761_v45 = vsel %vm2314_vm2, %v2340_v18, %v2342_v1  ;;  %v5788_v27 = vsel %vm2314_vm2, %v2342_v1, %v2344_v43  ;;  %v1937_v18 = vshll.u32 %v5693_v38, 16  ;;  %v2632_v1 = vld [vmem:[%s5316_s25 + $0x14] sm:$0xf] }
  0x8d   : > { %4692 = vmatmul.mubr.bf16.gmra.mxu1 %v5431_v23  ;;  %4748 = vmatmul.mubr.bf16.gmra.mxu0 %v5515_v51  ;;  %v1907_v23 = vshrl.u32 %v5656_v46, 16  ;;  %v1910_v51 = vshll.u32 %v5656_v46, 16 }
  0x8e   : > { %4695 = vmatprep.mubr.bf16.mxu1 %v5450_v40  ;;  %4819 = vmatprep.mubr.bf16.mxu0 %v1860_v47  ;;  %v5173_v40 = vld [vmem:[%s6806_s1 + $0x1b0] sm:$0xff]   ;;  %v1895_v47 = vor.u32 %v1894_v15, %v1891_v62  ;;  %v1930_v15 = vrot.slane %v1928_v56, 2 }
  0x8f   : > { %v1909_v13 = vrot.slane %v1907_v23, 1  ;;  %v1912_v31 = vrot.slane %v1910_v51, 2  ;;  %v1515_v23 = vrot.slane %v5642_v3, 1  ;;  %v1517_v51 = vrot.slane %v5648_v8, 1  ;;  %v5183_v8 = vld [vmem:[%s6806_s1 + $0x1a0] sm:$0xff]  }
  0x90   : > { %v1896_v57 = vsel %vm1843_vm3, %v1886_v53, %v1895_v47  ;;  %v1918_v3 = vrot.slane %v1916_v34, 1  ;;  %v1905_v44 = vsel %vm1843_vm3, %v1895_v47, %v1904_v25 }
  0x91   : > { %v5795_v30 = vor.u32 %v1912_v31, %v1909_v13  ;;  %v1516_v13 = vsel %vm1042_vm1, %v1513_v37, %v1515_v23  ;;  %v5822_v14 = vsel %vm1042_vm1, %v1515_v23, %v1517_v51  ;;  %v2631_v31 = vld [vmem:[%s5316_s25 + $0x10] sm:$0xc] }
  0x92   : > { %v5843_v56 = vcombine.low %v2631_v31, %v2632_v1 }
  0x93   : > { %v1914_v53 = vsel %vm1843_vm3, %v1904_v25, %v5795_v30  ;;  %v1955_v25 = vshll.u32 %v5718_v61, 16 }
  0x95   : > { %4696 = vmatmul.mubr.bf16.gmra.mxu1 %v5462_v52  ;;  %4820 = vmatmul.mubr.bf16.vlgmr.msra.gmra.mxu0 %v1869_v39  ;;  %v1919_v52 = vshll.u32 %v5672_v20, 16  ;;  %v1934_v39 = vshrl.u32 %v5693_v38, 16 }
  0x96   : > { %4767 = vmatprep.mubr.bf16.mxu1 %v1508_v60  ;;  %4908 = vmatpush3.bf16.msra.mxu0 %v5586_v24  ;;  %v1925_v24 = vshrl.u32 %v5684_v32, 16  ;;  %v1514_v60 = vsel %vm1042_vm1, %v1511_v19, %v1513_v37  ;;  %v5827_v19 = vsel %vm1042_vm1, %v1517_v51, %v6809_v29  ;;  %v1946_v51 = vshll.u32 %v5707_v54, 16 }
  0x97   : > { %4823 = vmatprep.mubr.bf16.mxu0 %v1878_v17  ;;  %4909 = vmatprep.subr.bf16.mxu0 %v5173_v40  ;;  %v1921_v7 = vrot.slane %v1919_v52, 2  ;;  %v5812_v17 = vld [vmem:[%s5316_s25 + $0x90] sm:$0xff]   ;;  %v1939_v52 = vrot.slane %v1937_v18, 2 }
  0x98   : > { %v1927_v62 = vrot.slane %v1925_v24, 1  ;;  %v2348_v37 = vrot.slane %v5812_v17, 2  ;;  %v2350_v24 = vrot.slane %v5815_v21, 2  ;;  %v5191_v18 = vld [vmem:[%s6806_s1 + $0x190] sm:$0xff]  }
  0x99   : > { %v1922_v34 = vor.u32 %v1921_v7, %v1918_v3  ;;  %v5187_v3 = vld [vmem:[%s6806_s1 + $0x198] sm:$0xff]   ;;  %v5858_v7 = vld [vmem:[%s5316_s25 + $0x20] sm:$0xff]  }
  0x9a   : > { %4910 = vmatpush3.bf16.msra.mxu0 %v5173_v40  ;;  %v5793_v40 = vsel %vm2314_vm2, %v2344_v43, %v2346_v59  ;;  %v5835_v47 = vor.u32 %v1930_v15, %v1927_v62  ;;  %v3565_v43 = vld [vmem:[%s5316_s25 + $0x10] sm:$0x8]  ;;  %v5861_v62 = vsel %vm2314_vm2, %v2348_v37, %v2350_v24  ;;  %v3117_v15 = vshrl.u32 %v5843_v56, 16 }
  0x9b   : > { %4911 = vmatprep.subr.bf16.mxu0 %v5178_v36  ;;  %v4349_v23 = vcombine.low %v3565_v43, %v2632_v1  ;;  %6819 = vst [vmem:[#allocation3_spill] sm:$0xff] %v5861_v62  ;;  %v3590_v31 = vrot.slane %v5858_v7, 3  ;;  %v3134_v24 = vshrl.u32 %v5858_v7, 16  ;;  %v1923_v63 = vsel %vm1843_vm3, %v5795_v30, %v1922_v34 }
  0x9c   : > { %v1957_v62 = vrot.slane %v1955_v25, 2 }
  0x9d   : > { %4768 = vmatmul.mubr.bf16.vlgmr.msra.gmra.mxu1 %v1510_v49  ;;  %4824 = vmatmul.mubr.bf16.gmra.mxu0 %v1887_v55  ;;  %v5180_v49 = vld [vmem:[%s6806_s1 + $0x160] sm:$0xff]   ;;  %v1943_v55 = vshrl.u32 %v5707_v54, 16 }
  0x9e   : > { %4856 = vmatpush3.bf16.msra.mxu1 %v5604_v33  ;;  %4771 = vmatprep.mubr.bf16.mxu1 %v1512_v0  ;;  %v5176_v33 = vld [vmem:[%s6806_s1 + $0x168] sm:$0xff]   ;;  %v5846_v0 = vld [vmem:[%s5316_s25 + $0x18] sm:$0xff]  }
  0x9f   : > { %4857 = vmatprep.subr.bf16.mxu1 %v5172_v22  ;;  %4827 = vmatprep.mubr.bf16.mxu0 %v1896_v57  ;;  %v1952_v57 = vshrl.u32 %v5718_v61, 16  ;;  %v3125_v1 = vshrl.u32 %v5846_v0, 16 }
  0xa0   : > { %4912 = vmatpush3.bf16.msra.mxu0 %v5178_v36  ;;  %v1936_v36 = vrot.slane %v1934_v39, 1  ;;  %v3120_v39 = vshll.u32 %v5843_v56, 16 }
  0xa1   : > { %4913 = vmatprep.subr.bf16.mxu0 %v5183_v8  ;;  %v1954_v30 = vrot.slane %v1952_v57, 1 }
  0xa2   : > { %4858 = vmatpush3.bf16.msra.mxu1 %v5172_v22  ;;  %v5849_v22 = vsel %vm2314_vm2, %v2346_v59, %v2348_v37  ;;  %v3587_v59 = vrot.slane %v4349_v23, 3  ;;  %v3122_v37 = vrot.slane %v3120_v39, 3  ;;  %v3127_v23 = vrot.slane %v3125_v1, 2 }
  0xa3   : > { %4859 = vmatprep.subr.bf16.mxu1 %v5176_v33  ;;  %6818 = vst [vmem:[#allocation2_spill] sm:$0xff] %v5849_v22  ;;  %v1940_v39 = vor.u32 %v1939_v52, %v1936_v36  ;;  %v1932_v1 = vsel %vm1843_vm3, %v1922_v34, %v5835_v47  ;;  %v5889_v22 = vld [vmem:[%s5316_s25 + $0x28] sm:$0xff]   ;;  %v5190_v36 = vld [vmem:[%s6806_s1 + $0x150] sm:$0xff]  }
  0xa4   : > { %4914 = vmatpush3.bf16.msra.mxu0 %v5183_v8  ;;  %v3588_v8 = vrot.slane %v5846_v0, 3  ;;  %v5899_v52 = vld [vmem:[%s5316_s25 + $0x30] sm:$0xff]   ;;  %v3143_v57 = vshrl.u32 %v5889_v22, 16  ;;  %v3146_v25 = vshll.u32 %v5889_v22, 16 }
  0xa5   : > { %4772 = vmatmul.mubr.bf16.gmra.mxu1 %v1514_v60  ;;  %4828 = vmatmul.mubr.bf16.gmra.mxu0 %v1905_v44  ;;  %v3128_v60 = vshll.u32 %v5846_v0, 16  ;;  %v5185_v44 = vld [vmem:[%s6806_s1 + $0x158] sm:$0xff]  }
  0xa6   : > { %4775 = vmatprep.mubr.bf16.mxu1 %v1516_v13  ;;  %4860 = vmatpush3.bf16.msra.mxu1 %v5176_v33  ;;  %v5876_v13 = vsel %vm3586_vm4, %v3587_v59, %v3588_v8  ;;  %v3119_v33 = vrot.slane %v3117_v15, 2  ;;  %v5880_v43 = vsel %vm3586_vm4, %v3588_v8, %v3590_v31  ;;  %v3136_v15 = vrot.slane %v3134_v24, 2 }
  0xa7   : > { %4831 = vmatprep.mubr.bf16.mxu0 %v1914_v53  ;;  %4861 = vmatprep.subr.bf16.mxu1 %v5180_v49  ;;  %6820 = vst [vmem:[#allocation4_spill] sm:$0xff] %v5876_v13  ;;  %6821 = vst [vmem:[#allocation5_spill] sm:$0xff] %v5880_v43  ;;  %v3130_v29 = vrot.slane %v3128_v60, 3  ;;  %v3137_v53 = vshll.u32 %v5858_v7, 16  ;;  %v1945_v60 = vrot.slane %v1943_v55, 1  ;;  %v1948_v13 = vrot.slane %v1946_v51, 2 }
  0xa8   : > { %4915 = vmatprep.subr.bf16.mxu0 %v5187_v3  ;;  %v3123_v59 = vor.u32 %v3122_v37, %v3119_v33  ;;  %v1964_v55 = vshll.u32 %v5724_v2, 16  ;;  %v3592_v51 = vrot.slane %v5889_v22, 3  ;;  %v3594_v37 = vrot.slane %v5899_v52, 3 }
  0xa9   : > { %4916 = vmatpush3.bf16.msra.mxu0 %v5187_v3  ;;  %v3131_v8 = vor.u32 %v3130_v29, %v3127_v23  ;;  %v3139_v43 = vrot.slane %v3137_v53, 3  ;;  %v1961_v3 = vshrl.u32 %v5724_v2, 16  ;;  %v5195_v29 = vld [vmem:[%s6806_s1 + $0x188] sm:$0xff]   ;;  %v3152_v24 = vshrl.u32 %v5899_v52, 16 }
  0xaa   : > { %4862 = vmatpush3.bf16.msra.mxu1 %v5180_v49  ;;  %4917 = vmatprep.subr.bf16.mxu0 %v5191_v18  ;;  %v3145_v23 = vrot.slane %v3143_v57, 2  ;;  %v3148_v53 = vrot.slane %v3146_v25, 3 }
  0xab   : > { %4863 = vmatprep.subr.bf16.mxu1 %v5185_v44  ;;  %v5902_v34 = vsel %vm3115_vm5, %v3123_v59, %v3131_v8  ;;  %v3140_v49 = vor.u32 %v3139_v43, %v3136_v15  ;;  %v5919_v43 = vsel %vm3586_vm4, %v3590_v31, %v3592_v51  ;;  %v5194_v59 = vld [vmem:[%s6806_s1 + $0x148] sm:$0xff]   ;;  %v6825_v15 = vrot.slane %v5672_v20, 1  ;;  %v5949_v20 = vld [vmem:[%s5316_s25 + $0x38] sm:$0xff]  }
  0xac   : > { %6823 = vst [vmem:[#allocation7_spill] sm:$0xff] %v5919_v43  ;;  %v3149_v43 = vor.u32 %v3148_v53, %v3145_v23  ;;  %v1958_v23 = vor.u32 %v1957_v62, %v1954_v30  ;;  %v1982_v62 = vshll.u32 %v5758_v42, 16  ;;  %v3596_v30 = vrot.slane %v5949_v20, 3 }
  0xad   : > { %4776 = vmatmul.mubr.bf16.gmra.mxu1 %v5822_v14  ;;  %4832 = vmatmul.mubr.bf16.gmra.mxu0 %v1923_v63  ;;  %v5911_v33 = vsel %vm3115_vm5, %v3131_v8, %v3140_v49  ;;  %v3155_v14 = vshll.u32 %v5899_v52, 16  ;;  %v5916_v63 = vor.u32 %v1948_v13, %v1945_v60  ;;  %v5200_v13 = vld [vmem:[%s6806_s1 + $0x180] sm:$0xff]   ;;  %v6826_v8 = vrot.slane %v5656_v46, 1 }
  0xae   : > { %4779 = vmatprep.mubr.bf16.mxu1 %v5827_v19  ;;  %4835 = vmatprep.mubr.bf16.mxu0 %v1932_v1  ;;  %6822 = vst [vmem:[#allocation6_spill] sm:$0xff] %v5911_v33  ;;  %v1970_v19 = vshrl.u32 %v5735_v35, 16  ;;  %v6827_v60 = vrot.slane %v5684_v32, 1  ;;  %v6828_v57 = vmov %v6825_v15  ;;  %v1525_v33 = vrot.slane %v5693_v38, 1 }
  0xaf   : > { %4864 = vmatpush3.bf16.msra.mxu1 %v5185_v44  ;;  %4918 = vmatpush3.bf16.msra.mxu0 %v5191_v18  ;;  %v5929_v44 = vsel %vm3586_vm4, %v3592_v51, %v3594_v37  ;;  %v3154_v18 = vrot.slane %v3152_v24, 2  ;;  %v3157_v31 = vrot.slane %v3155_v14, 3  ;;  %v1522_v1 = vsel %vm1042_vm1, %v6826_v8, %v6825_v15 }
  0xb0   : > { %4865 = vmatprep.subr.bf16.mxu1 %v5190_v36  ;;  %4919 = vmatprep.subr.bf16.mxu0 %v5195_v29  ;;  %6824 = vst [vmem:[#allocation8_spill] sm:$0xff] %v5929_v44  ;;  %v1524_v25 = vsel %vm1042_vm1, %v6828_v57, %v6827_v60  ;;  %v1941_v51 = vsel %vm1843_vm3, %v5835_v47, %v1940_v39  ;;  %v1963_v24 = vrot.slane %v1961_v3, 1  ;;  %v1966_v14 = vrot.slane %v1964_v55, 2 }
  0xb1   : > { %v3158_v44 = vor.u32 %v3157_v31, %v3154_v18  ;;  %v1950_v46 = vsel %vm1843_vm3, %v1940_v39, %v5916_v63  ;;  %v1973_v8 = vshll.u32 %v5735_v35, 16  ;;  %v5952_v38 = vsel %vm3115_vm5, %v3140_v49, %v3149_v43  ;;  %v5198_v39 = vld [vmem:[%s6806_s1 + $0x140] sm:$0xff]  }
  0xb2   : > { %6829 = vst [vmem:[#allocation9_spill] sm:$0xff] %v5952_v38  ;;  %v1972_v47 = vrot.slane %v1970_v19, 1  ;;  %v1979_v3 = vshrl.u32 %v5758_v42, 16  ;;  %v3161_v55 = vshrl.u32 %v5949_v20, 16  ;;  %v3164_v53 = vshll.u32 %v5949_v20, 16 }
  0xb3   : > { %4866 = vmatpush3.bf16.msra.mxu1 %v5190_v36  ;;  %4920 = vmatpush3.bf16.msra.mxu0 %v5195_v29  ;;  %v5961_v36 = vld [vmem:[%s6806_s1 + $0x238] sm:$0xff]   ;;  %v5964_v29 = vld [vmem:[%s5316_s25 + $0x40] sm:$0xff]   ;;  %v5967_v49 = vsel %vm3115_vm5, %v3149_v43, %v3158_v44  ;;  %v1967_v19 = vor.u32 %v1966_v14, %v1963_v24  ;;  %v1975_v60 = vrot.slane %v1973_v8, 2  ;;  %v1988_v15 = vshrl.u32 %v5765_v48, 16 }
  0xb4   : > { %4867 = vmatprep.subr.bf16.mxu1 %v5194_v59  ;;  %4921 = vmatprep.subr.bf16.mxu0 %v5200_v13  ;;  %6830 = vst [vmem:[#allocation10_spill] sm:$0xff] %v5967_v49  ;;  %v3598_v18 = vrot.slane %v5964_v29, 3  ;;  %v3170_v31 = vshrl.u32 %v5964_v29, 16  ;;  %v3173_v43 = vshll.u32 %v5964_v29, 16  ;;  %v3163_v57 = vrot.slane %v3161_v55, 2 }
  0xb5   : > { %4780 = vmatmul.mubr.bf16.gmra.mxu1 %v1522_v1  ;;  %4836 = vmatmul.mubr.bf16.gmra.mxu0 %v1941_v51  ;;  %v5977_v1 = vsel %vm3586_vm4, %v3594_v37, %v3596_v30  ;;  %v3166_v51 = vrot.slane %v3164_v53, 3  ;;  %v1981_v37 = vrot.slane %v1979_v3, 1  ;;  %v1984_v14 = vrot.slane %v1982_v62, 2  ;;  %v6001_v62 = vld [vmem:[%s5316_s25 + $0x48] sm:$0xff]  }
  0xb6   : > { %4783 = vmatprep.mubr.bf16.mxu1 %v1524_v25  ;;  %4839 = vmatprep.mubr.bf16.mxu0 %v1950_v46  ;;  %6831 = vst [vmem:[#allocation11_spill] sm:$0xff] %v5977_v1  ;;  %v5983_v25 = vld [vmem:[%s6806_s1 + $0x1f8] sm:$0xff]   ;;  %v5987_v24 = vsel %vm3586_vm4, %v3596_v30, %v3598_v18  ;;  %v6832_v8 = vrot.slane %v5684_v32, 1  ;;  %v1959_v53 = vsel %vm1843_vm3, %v5916_v63, %v1958_v23  ;;  %v1529_v49 = vrot.slane %v5718_v61, 1  ;;  %v6009_v61 = vld [vmem:[%s5316_s25 + $0x50] sm:$0xff]  }
  0xb7   : > { %4868 = vmatpush3.bf16.msra.mxu1 %v5194_v59  ;;  %4922 = vmatpush3.bf16.msra.mxu0 %v5200_v13  ;;  %v3172_v59 = vrot.slane %v3170_v31, 2  ;;  %v3175_v13 = vrot.slane %v3173_v43, 3  ;;  %v3167_v46 = vor.u32 %v3166_v51, %v3163_v57  ;;  %v6833_v38 = vrot.slane %v5707_v54, 1 }
  0xb8   : > { %4869 = vmatprep.subr.bf16.mxu1 %v5198_v39  ;;  %5011 = vmatprep.subr.bf16.mxu0 %v5961_v36  ;;  %v1526_v55 = vsel %vm1042_vm1, %v6832_v8, %v1525_v33  ;;  %v1968_v31 = vsel %vm1843_vm3, %v1958_v23, %v1967_v19  ;;  %v1976_v43 = vor.u32 %v1975_v60, %v1972_v47  ;;  %v1990_v57 = vrot.slane %v1988_v15, 1 }
  0xb9   : > { %v3176_v1 = vor.u32 %v3175_v13, %v3172_v59  ;;  %v1528_v30 = vsel %vm1042_vm1, %v1525_v33, %v6833_v38  ;;  %v6004_v32 = vsel %vm3115_vm5, %v3158_v44, %v3167_v46  ;;  %v1991_v63 = vshll.u32 %v5765_v48, 16 }
  0xba   : > { %6834 = vst [vmem:[#allocation12_spill] sm:$0xff] %v6004_v32  ;;  %v1985_v38 = vor.u32 %v1984_v14, %v1981_v37  ;;  %v3600_v23 = vrot.slane %v6001_v62, 3  ;;  %v3182_v44 = vshll.u32 %v6001_v62, 16  ;;  %v1997_v15 = vshrl.u32 %v5812_v17, 16 }
  0xbb   : > { %4870 = vmatpush3.bf16.msra.mxu1 %v5198_v39  ;;  %v6012_v33 = vsel %vm3115_vm5, %v3167_v46, %v3176_v1  ;;  %v3179_v39 = vshrl.u32 %v6001_v62, 16  ;;  %v3602_v47 = vrot.slane %v6009_v61, 3  ;;  %v3188_v60 = vshrl.u32 %v6009_v61, 16 }
  0xbc   : > { %4959 = vmatprep.subr.bf16.mxu1 %v5983_v25  ;;  %6835 = vst [vmem:[#allocation13_spill] sm:$0xff] %v6012_v33  ;;  %v3191_v51 = vshll.u32 %v6009_v61, 16  ;;  %v2000_v59 = vshll.u32 %v5812_v17, 16  ;;  %v6023_v13 = vsel %vm3586_vm4, %v3598_v18, %v3600_v23  ;;  %v3184_v14 = vrot.slane %v3182_v44, 3 }
  0xbd   : > { %4784 = vmatmul.mubr.bf16.gmra.mxu1 %v1526_v55  ;;  %4840 = vmatmul.mubr.bf16.gmra.mxu0 %v1959_v53  ;;  %v3181_v37 = vrot.slane %v3179_v39, 2  ;;  %v1993_v46 = vrot.slane %v1991_v63, 2  ;;  %v6026_v8 = vsel %vm3586_vm4, %v3600_v23, %v3602_v47  ;;  %v3190_v55 = vrot.slane %v3188_v60, 2 }
  0xbe   : > { %4787 = vmatprep.mubr.bf16.mxu1 %v1528_v30  ;;  %4843 = vmatprep.mubr.bf16.mxu0 %v1968_v31  ;;  %6836 = vst [vmem:[#allocation14_spill] sm:$0xff] %v6026_v8  ;;  %v3193_v53 = vrot.slane %v3191_v51, 3  ;;  %v6837_v31 = vrot.slane %v5707_v54, 1  ;;  %v1977_v33 = vsel %vm1843_vm3, %v1967_v19, %v1976_v43  ;;  %v6838_v32 = vrot.slane %v5724_v2, 1  ;;  %v6037_v8 = vld [vmem:[%s5316_s25 + $0x58] sm:$0xff]   ;;  %v6045_v19 = vld [vmem:[%s5316_s25 + $0x60] sm:$0xff]  }
  0xbf   : > { %v3185_v30 = vor.u32 %v3184_v14, %v3181_v37  ;;  %v1986_v63 = vsel %vm1843_vm3, %v1976_v43, %v1985_v38  ;;  %v1999_v44 = vrot.slane %v1997_v15, 1  ;;  %v2002_v23 = vrot.slane %v2000_v59, 2 }
  0xc0   : > { %v1530_v3 = vsel %vm1042_vm1, %v6837_v31, %v1529_v49  ;;  %v1532_v18 = vsel %vm1042_vm1, %v1529_v49, %v6838_v32  ;;  %v3194_v39 = vor.u32 %v3193_v53, %v3190_v55  ;;  %v1533_v54 = vrot.slane %v5735_v35, 1 }
  0xc1   : > { %v6040_v60 = vsel %vm3115_vm5, %v3176_v1, %v3185_v30  ;;  %v1994_v51 = vor.u32 %v1993_v46, %v1990_v57  ;;  %v1535_v37 = vrot.slane %v5758_v42, 1  ;;  %v2006_v49 = vshrl.u32 %v5815_v21, 16 }
  0xc2   : > { %v6048_v14 = vsel %vm3115_vm5, %v3185_v30, %v3194_v39  ;;  %v3604_v32 = vrot.slane %v6037_v8, 3  ;;  %v3197_v43 = vshrl.u32 %v6037_v8, 16  ;;  %v3200_v1 = vshll.u32 %v6037_v8, 16 }
  0xc3   : > { %6839 = vst [vmem:[#allocation15_spill] sm:$0xff] %v6048_v14  ;;  %v2009_v35 = vshll.u32 %v5815_v21, 16  ;;  %v3606_v42 = vrot.slane %v6045_v19, 3  ;;  %v3206_v57 = vshrl.u32 %v6045_v19, 16  ;;  %v3209_v15 = vshll.u32 %v6045_v19, 16 }
  0xc4   : > { %v3199_v59 = vrot.slane %v3197_v43, 2  ;;  %v3202_v46 = vrot.slane %v3200_v1, 3  ;;  %v6840_v21 = vrot.slane %v5724_v2, 1  ;;  %v2008_v14 = vrot.slane %v2006_v49, 1  ;;  %v6071_v1 = vld [vmem:[%s5316_s25 + $0x68] sm:$0xff]  }
  0xc5   : > { %4788 = vmatmul.mubr.bf16.gmra.mxu1 %v1530_v3  ;;  %4844 = vmatmul.mubr.bf16.gmra.mxu0 %v1977_v33  ;;  %v2003_v3 = vor.u32 %v2002_v23, %v1999_v44  ;;  %v6059_v33 = vsel %vm3586_vm4, %v3602_v47, %v3604_v32  ;;  %v6062_v55 = vsel %vm3586_vm4, %v3604_v32, %v3606_v42  ;;  %v3208_v53 = vrot.slane %v3206_v57, 2 }
  0xc6   : > { %4791 = vmatprep.mubr.bf16.mxu1 %v1532_v18  ;;  %4847 = vmatprep.mubr.bf16.mxu0 %v1986_v63  ;;  %v3211_v30 = vrot.slane %v3209_v15, 3  ;;  %v1534_v31 = vsel %vm1042_vm1, %v6840_v21, %v1533_v54  ;;  %v3203_v18 = vor.u32 %v3202_v46, %v3199_v59  ;;  %v1995_v63 = vsel %vm1843_vm3, %v1985_v38, %v1994_v51  ;;  %v6079_v15 = vld [vmem:[%s5316_s25 + $0x70] sm:$0xff]  }
  0xc7   : > { %v2011_v44 = vrot.slane %v2009_v35, 2  ;;  %v1536_v47 = vsel %vm1042_vm1, %v1533_v54, %v1535_v37  ;;  %v2004_v43 = vsel %vm1843_vm3, %v1994_v51, %v2003_v3  ;;  %v1537_v57 = vrot.slane %v5765_v48, 1 }
  0xc8   : > { %v3212_v23 = vor.u32 %v3211_v30, %v3208_v53  ;;  %v6074_v32 = vsel %vm3115_vm5, %v3194_v39, %v3203_v18  ;;  %v1539_v2 = vrot.slane %v5812_v17, 1  ;;  %v2779_v54 = vrot.slane %v5846_v0, 2 }
  0xc9   : > { %v3608_v51 = vrot.slane %v6071_v1, 3  ;;  %v3215_v49 = vshrl.u32 %v6071_v1, 16  ;;  %v3218_v39 = vshll.u32 %v6071_v1, 16  ;;  %v2012_v48 = vor.u32 %v2011_v44, %v2008_v14 }
  0xca   : > { %v6082_v38 = vsel %vm3115_vm5, %v3203_v18, %v3212_v23  ;;  %v6810_v17 = vrot.slane %v6079_v15, 3  ;;  %v3224_v35 = vshrl.u32 %v6079_v15, 16  ;;  %v3227_v59 = vshll.u32 %v6079_v15, 16 }
  0xcb   : > { %v2778_v46 = vrot.slane %v5843_v56, 2  ;;  %v6093_v0 = vsel %vm3586_vm4, %v3606_v42, %v3608_v51  ;;  %v3217_v53 = vrot.slane %v3215_v49, 2  ;;  %v3220_v30 = vrot.slane %v3218_v39, 3 }
  0xcc   : > { %v6098_v21 = vsel %vm3586_vm4, %v3608_v51, %v6810_v17  ;;  %v3229_v14 = vrot.slane %v3227_v59, 3  ;;  %v2013_v44 = vsel %vm1843_vm3, %v2003_v3, %v2012_v48  ;;  %v1540_v56 = vsel %vm1042_vm1, %v1537_v57, %v1539_v2  ;;  %v5209_v59 = vld [vmem:[%s6806_s1 + $0x1f0] sm:$0xff]  }
  0xcd   : > { %4792 = vmatmul.mubr.bf16.gmra.mxu1 %v1534_v31  ;;  %4848 = vmatmul.mubr.bf16.gmra.mxu0 %v1995_v63  ;;  %v3226_v31 = vrot.slane %v3224_v35, 2  ;;  %v3221_v18 = vor.u32 %v3220_v30, %v3217_v53  ;;  %v1538_v63 = vsel %vm1042_vm1, %v1535_v37, %v1537_v57  ;;  %v2780_v42 = vsel %vm2314_vm2, %v2778_v46, %v2779_v54 }
  0xce   : > { %4795 = vmatprep.mubr.bf16.mxu1 %v1536_v47  ;;  %4851 = vmatprep.mubr.bf16.mxu0 %v2004_v43  ;;  %v5199_v47 = vld [vmem:[%s5316_s25 + $0x98] ss:$0 sps:$4 sm:$0x11]   ;;  %v2781_v3 = vrot.slane %v5858_v7, 2  ;;  %v2783_v39 = vrot.slane %v5889_v22, 2  ;;  %v2785_v7 = vrot.slane %v5899_v52, 2 }
  0xcf   : > { %v6103_v43 = vor.u32 %v3229_v14, %v3226_v31  ;;  %v6108_v49 = vsel %vm3115_vm5, %v3212_v23, %v3221_v18  ;;  %v1541_v37 = vrot.slane %v5199_v47, 1  ;;  %v5210_v23 = vld [vmem:[%s6806_s1 + $0x230] sm:$0xff]   ;;  %v5215_v22 = vld [vmem:[%s6806_s1 + $0x228] sm:$0xff]   ;;  %v5220_v52 = vld [vmem:[%s6806_s1 + $0x220] sm:$0xff]   ;;  %v2791_v46 = vrot.slane %v6001_v62, 2 }
  0xd0   : > { %6842 = vst [vmem:[#allocation17_spill] sm:$0xff] %v6108_v49  ;;  %v2782_v48 = vsel %vm2314_vm2, %v2779_v54, %v2781_v3  ;;  %v2784_v35 = vsel %vm2314_vm2, %v2781_v3, %v2783_v39  ;;  %v2786_v54 = vsel %vm2314_vm2, %v2783_v39, %v2785_v7  ;;  %v2793_v30 = vrot.slane %v6009_v61, 2  ;;  %v5228_v31 = vld [vmem:[%s6806_s1 + $0x210] sm:$0xff]  }
  0xd1   : > { %6841 = vst [vmem:[#allocation16_spill] sm:$0xff] %v6103_v43  ;;  %v6112_v51 = vsel %vm3115_vm5, %v3221_v18, %v6103_v43  ;;  %v1542_v57 = vsel %vm1042_vm1, %v1539_v2, %v1541_v37  ;;  %v2787_v2 = vrot.slane %v5949_v20, 2  ;;  %v2789_v20 = vrot.slane %v5964_v29, 2  ;;  %v5232_v37 = vld [vmem:[%s6806_s1 + $0x208] sm:$0xff]  }
  0xd2   : > { %6843 = vst [vmem:[#allocation18_spill] sm:$0xff] %v6112_v51 }
  0xd3   : > { %v2792_v29 = vsel %vm2314_vm2, %v2789_v20, %v2791_v46 }
  0xd5   : > { %4796 = vmatmul.mubr.bf16.gmra.mxu1 %v1538_v63  ;;  %4852 = vmatmul.mubr.bf16.gmra.mxu0 %v2013_v44  ;;  %v5222_v63 = vld [vmem:[%s6806_s1 + $0x1d8] sm:$0xff]   ;;  %v2794_v44 = vsel %vm2314_vm2, %v2791_v46, %v2793_v30 }
  0xd6   : > { %4799 = vmatprep.mubr.bf16.mxu1 %v1540_v56  ;;  %4923 = vmatprep.mubr.bf16.mxu0 %v2780_v42  ;;  %v5227_v42 = vld [vmem:[%s6806_s1 + $0x1d0] sm:$0xff]  }
  0xdd   : > { %4800 = vmatmul.mubr.bf16.gmra.mxu1 %v1542_v57  ;;  %4924 = vmatmul.mubr.bf16.vlgmr.msra.gmra.mxu0 %v2782_v48  ;;  %v2797_v57 = vrot.slane %v6045_v19, 2 }
  0xde   : > { %4871 = vmatprep.mubr.bf16.mxu1 %v5651_v9  ;;  %5012 = vmatpush3.bf16.msra.mxu0 %v5961_v36  ;;  %v2788_v9 = vsel %vm2314_vm2, %v2785_v7, %v2787_v2  ;;  %v5213_v36 = vld [vmem:[%s6806_s1 + $0x1e8] sm:$0xff]  }
  0xdf   : > { %4927 = vmatprep.mubr.bf16.mxu0 %v2784_v35  ;;  %5013 = vmatprep.subr.bf16.mxu0 %v5210_v23  ;;  %v2799_v35 = vrot.slane %v6071_v1, 2 }
  0xe2   : > { %5014 = vmatpush3.bf16.msra.mxu0 %v5210_v23 }
  0xe3   : > { %5015 = vmatprep.subr.bf16.mxu0 %v5215_v22 }
  0xe5   : > { %4872 = vmatmul.mubr.bf16.vlgmr.msra.gmra.mxu1 %v5613_v11  ;;  %4928 = vmatmul.mubr.bf16.gmra.mxu0 %v2786_v54  ;;  %v2790_v11 = vsel %vm2314_vm2, %v2787_v2, %v2789_v20  ;;  %v2800_v54 = vsel %vm2314_vm2, %v2797_v57, %v2799_v35 }
  0xe6   : > { %4960 = vmatpush3.bf16.msra.mxu1 %v5983_v25  ;;  %4875 = vmatprep.mubr.bf16.mxu1 %v5659_v10  ;;  %v5217_v10 = vld [vmem:[%s6806_s1 + $0x1e0] sm:$0xff]   ;;  %v5224_v25 = vld [vmem:[%s6806_s1 + $0x218] sm:$0xff]  }
  0xe7   : > { %4961 = vmatprep.subr.bf16.mxu1 %v5209_v59  ;;  %4931 = vmatprep.mubr.bf16.mxu0 %v2788_v9  ;;  %v5235_v9 = vld [vmem:[%s6806_s1 + $0x1c0] sm:$0xff]  }
  0xe8   : > { %5016 = vmatpush3.bf16.msra.mxu0 %v5215_v22 }
  0xe9   : > { %5017 = vmatprep.subr.bf16.mxu0 %v5220_v52 }
  0xea   : > { %4962 = vmatpush3.bf16.msra.mxu1 %v5209_v59  ;;  %v6216_v59 = vld [vmem:[%s5316_s25 + $0x78] sm:$0xff]  }
  0xeb   : > { %4963 = vmatprep.subr.bf16.mxu1 %v5213_v36 }
  0xec   : > { %5018 = vmatpush3.bf16.msra.mxu0 %v5220_v52 }
  0xed   : > { %v6153_v53 = vpop.f32.mrf.mxu1  ;;  %4876 = vmatmul.mubr.bf16.gmra.mxu1 %v5662_v12  ;;  %v6156_v62 = vpop.f32.mrf.mxu0  ;;  %4932 = vmatmul.mubr.bf16.gmra.mxu0 %v2790_v11  ;;  %v2795_v12 = vrot.slane %v6037_v8, 2 }
  0xee   : > { %4879 = vmatprep.mubr.bf16.mxu1 %v5678_v26  ;;  %4964 = vmatpush3.bf16.msra.mxu1 %v5213_v36  ;;  %v2801_v36 = vrot.slane %v6079_v15, 2 }
  0xef   : > { %v6163_v14 = vpop.f32.mrf.mxu1  ;;  %v6165_v18 = vpop.f32.mrf.mxu0  ;;  %4935 = vmatprep.mubr.bf16.mxu0 %v2792_v29  ;;  %4965 = vmatprep.subr.bf16.mxu1 %v5217_v10  ;;  %v2796_v8 = vsel %vm2314_vm2, %v2793_v30, %v2795_v12  ;;  %v2798_v22 = vsel %vm2314_vm2, %v2795_v12, %v2797_v57 }
  0xf0   : > { %5019 = vmatprep.subr.bf16.mxu0 %v5224_v25 }
  0xf1   : > { %v6171_v26 = vpop.f32.mrf.mxu1  ;;  %v6173_v61 = vpop.f32.mrf.mxu0  ;;  %5020 = vmatpush3.bf16.msra.mxu0 %v5224_v25  ;;  %v2802_v25 = vsel %vm2314_vm2, %v2799_v35, %v2801_v36 }
  0xf2   : > { %4966 = vmatpush3.bf16.msra.mxu1 %v5217_v10  ;;  %5021 = vmatprep.subr.bf16.mxu0 %v5228_v31  ;;  %v2803_v10 = vrot.slane %v6216_v59, 2 }
  0xf3   : > { %v6176_v47 = vpop.f32.mrf.mxu1  ;;  %v6178_v56 = vpop.f32.mrf.mxu0  ;;  %4967 = vmatprep.subr.bf16.mxu1 %v5222_v63 }
  0xf4   : > { %v2804_v12 = vsel %vm2314_vm2, %v2801_v36, %v2803_v10  ;;  %v6275_v36 = vld [vmem:[%s5316_s25 + $0x98] sm:$0xff]  }
  0xf5   : > { %v6187_v3 = vpop.f32.mrf.mxu1  ;;  %4880 = vmatmul.mubr.bf16.gmra.mxu1 %v5681_v28  ;;  %v6190_v39 = vpop.f32.mrf.mxu0  ;;  %4936 = vmatmul.mubr.bf16.gmra.mxu0 %v2794_v44  ;;  %v5231_v28 = vld [vmem:[%s6806_s1 + $0x1c8] sm:$0xff]   ;;  %6850 = vst [vmem:[#allocation25_spill] sm:$0xff] %v6275_v36 }
  0xf6   : > { %4883 = vmatprep.mubr.bf16.mxu1 %v5687_v4  ;;  %4939 = vmatprep.mubr.bf16.mxu0 %v2796_v8  ;;  %v5236_v4 = vld [vmem:[%s6806_s1 + $0x200] sm:$0xff]  }
  0xf7   : > { %v6194_v48 = vpop.f32.mrf.mxu1  ;;  %v6196_v23 = vpop.f32.mrf.mxu0  ;;  %4968 = vmatpush3.bf16.msra.mxu1 %v5222_v63  ;;  %5022 = vmatpush3.bf16.msra.mxu0 %v5228_v31  ;;  %v6247_v63 = vld [vmem:[%s5316_s25 + $0x88] sm:$0xff]  }
  0xf8   : > { %4969 = vmatprep.subr.bf16.mxu1 %v5227_v42  ;;  %5023 = vmatprep.subr.bf16.mxu0 %v5232_v37  ;;  %6844 = vst [vmem:[#allocation19_spill] sm:$0xff] %v6247_v63  ;;  %v2807_v35 = vrot.slane %v6247_v63, 2 }
  0xf9   : > { %v6205_v19 = vpop.f32.mrf.mxu1  ;;  %v6207_v7 = vpop.f32.mrf.mxu0 }
  0xfb   : > { %v6210_v2 = vpop.f32.mrf.mxu1  ;;  %v6212_v1 = vpop.f32.mrf.mxu0  ;;  %4970 = vmatpush3.bf16.msra.mxu1 %v5227_v42  ;;  %5024 = vmatpush3.bf16.msra.mxu0 %v5232_v37 }
  0xfc   : > { %4971 = vmatprep.subr.bf16.mxu1 %v5231_v28  ;;  %5025 = vmatprep.subr.bf16.mxu0 %v5236_v4 }
  0xfd   : > { %v6221_v52 = vpop.f32.mrf.mxu1  ;;  %4884 = vmatmul.mubr.bf16.gmra.mxu1 %v5696_v41  ;;  %v6224_v20 = vpop.f32.mrf.mxu0  ;;  %4940 = vmatmul.mubr.bf16.gmra.mxu0 %v2798_v22  ;;  %v6267_v22 = vld [vmem:[%s5316_s25 + $0x90] sm:$0xff]  }
  0xfe   : > { %4887 = vmatprep.mubr.bf16.mxu1 %v5703_v5  ;;  %4943 = vmatprep.mubr.bf16.mxu0 %v2800_v54  ;;  %v6239_v5 = vld [vmem:[%s5316_s25 + $0x80] sm:$0xff]   ;;  %6848 = vst [vmem:[#allocation23_spill] sm:$0xff] %v6267_v22 }
  0xff   : > { %v6228_v46 = vpop.f32.mrf.mxu1  ;;  %v6230_v11 = vpop.f32.mrf.mxu0  ;;  %4972 = vmatpush3.bf16.msra.mxu1 %v5231_v28  ;;  %5026 = vmatpush3.bf16.msra.mxu0 %v5236_v4  ;;  %v2805_v42 = vrot.slane %v6239_v5, 2 }
 0x100   : > { %4973 = vmatprep.subr.bf16.mxu1 %v5235_v9 }
 0x101   : > { %v6233_v29 = vpop.f32.mrf.mxu1  ;;  %v6235_v41 = vpop.f32.mrf.mxu0 }
 0x103   : > { %v6241_v30 = vpop.f32.mrf.mxu1  ;;  %v6243_v31 = vpop.f32.mrf.mxu0  ;;  %4974 = vmatpush3.bf16.msra.mxu1 %v5235_v9  ;;  %v2808_v9 = vsel %vm2314_vm2, %v2805_v42, %v2807_v35 }
 0x105   : > { %v6249_v44 = vpop.f32.mrf.mxu1  ;;  %4888 = vmatmul.mubr.bf16.gmra.mxu1 %v5714_v58  ;;  %v6252_v8 = vpop.f32.mrf.mxu0  ;;  %4944 = vmatmul.mubr.bf16.gmra.mxu0 %v2802_v25  ;;  %v2806_v58 = vsel %vm2314_vm2, %v2803_v10, %v2805_v42  ;;  %v2809_v10 = vrot.slane %v6267_v22, 2 }
 0x106   : > { %6845 = vst [vmem:[#allocation20_spill] sm:$0xff] %v6249_v44  ;;  %4891 = vmatprep.mubr.bf16.mxu1 %v5727_v6  ;;  %4947 = vmatprep.mubr.bf16.mxu0 %v2804_v12 }
 0x107   : > { %v6256_v37 = vpop.f32.mrf.mxu1  ;;  %v6258_v57 = vpop.f32.mrf.mxu0 }
 0x108   : > { %6846 = vst [vmem:[#allocation21_spill] sm:$0xff] %v6256_v37 }
 0x109   : > { %v6261_v28 = vpop.f32.mrf.mxu1  ;;  %v6263_v4 = vpop.f32.mrf.mxu0 }
 0x10a   : > { %6847 = vst [vmem:[#allocation22_spill] sm:$0xff] %v6261_v28  ;;  %v2810_v28 = vsel %vm2314_vm2, %v2807_v35, %v2809_v10 }
 0x10b   : > { %v6269_v54 = vpop.f32.mrf.mxu1  ;;  %v6271_v6 = vpop.f32.mrf.mxu0 }
 0x10c   : > { %6849 = vst [vmem:[#allocation24_spill] sm:$0xff] %v6269_v54  ;;  %v2811_v54 = vrot.slane %v6275_v36, 2 }
 0x10d   : > { %v6277_v25 = vpop.f32.mrf.mxu1  ;;  %4892 = vmatmul.mubr.bf16.gmra.mxu1 %v5738_v16  ;;  %v4717_v12 = vpop.f32.mrf.mxu0  ;;  %4948 = vmatmul.mubr.bf16.gmra.mxu0 %v2806_v58 }
 0x10e   : > { %6851 = vst [vmem:[#allocation26_spill] sm:$0xff] %v6277_v25  ;;  %4895 = vmatprep.mubr.bf16.mxu1 %v5748_v50  ;;  %4951 = vmatprep.mubr.bf16.mxu0 %v2808_v9  ;;  %v5234_v25 = vld [vmem:[%s5316_s25 + $0xa0] ss:$0 sps:$4 sm:$0x33]   ;;  %v2812_v58 = vsel %vm2314_vm2, %v2809_v10, %v2811_v54 }
 0x10f   : > { %v6282_v17 = vpop.f32.mrf.mxu1  ;;  %v1180_v51 = vpop.f32.mrf.mxu0 }
 0x110   : > { %6852 = vst [vmem:[#allocation27_spill] sm:$0xff] %v6282_v17 }
 0x111   : > { %v6285_v43 = vpop.f32.mrf.mxu1  ;;  %v4718_v42 = vpop.f32.mrf.mxu0 }
 0x112   : > { %6853 = vst [vmem:[#allocation28_spill] sm:$0xff] %v6285_v43  ;;  %v2813_v43 = vrot.slane %v5234_v25, 2 }
 0x113   : > { %v6289_v37 = vpop.f32.mrf.mxu1  ;;  %v1183_v16 = vpop.f32.mrf.mxu0 }
 0x114   : > { %6854 = vst [vmem:[#allocation29_spill] sm:$0xff] %v6289_v37 }
 0x115   : > { %v4665_v50 = vpop.f32.mrf.mxu1  ;;  %4896 = vmatmul.mubr.bf16.gmra.mxu1 %v5761_v45  ;;  %v4721_v9 = vpop.f32.mrf.mxu0  ;;  %4952 = vmatmul.mubr.bf16.gmra.mxu0 %v2810_v28  ;;  %v2814_v45 = vsel %vm2314_vm2, %v2811_v54, %v2813_v43 }
 0x116   : > { %v887_v17 = vadd.f32 %v4665_v50, %v6156_v62  ;;  %4899 = vmatprep.mubr.bf16.mxu1 %v5788_v27  ;;  %4955 = vmatprep.mubr.bf16.mxu0 %v2812_v58 }
 0x117   : > { %v878_v36 = vpop.f32.mrf.mxu1  ;;  %v1196_v22 = vpop.f32.mrf.mxu0 }
 0x118   : > { %v879_v35 = vadd.f32 %v878_v36, %v6165_v18  ;;  %v6296_v63 = vadd.f32 %v4717_v12, %v887_v17  ;;  %v6855_v36 = vld [vmem:[#allocation2_spill] sm:$0xff] }
 0x119   : > { %v4666_v37 = vpop.f32.mrf.mxu1  ;;  %v4722_v49 = vpop.f32.mrf.mxu0 }
 0x11a   : > { %v890_v10 = vadd.f32 %v4666_v37, %v6173_v61  ;;  %v6300_v44 = vadd.f32 %v1180_v51, %v879_v35  ;;  %v6856_v61 = vld [vmem:[#allocation4_spill] sm:$0xff] }
 0x11b   : > { %v881_v28 = vpop.f32.mrf.mxu1  ;;  %v1199_v62 = vpop.f32.mrf.mxu0 }
 0x11c   : > { %v882_v27 = vadd.f32 %v881_v28, %v6178_v56  ;;  %v6303_v58 = vadd.f32 %v4718_v42, %v890_v10  ;;  %v6857_v28 = vld [vmem:[#allocation3_spill] sm:$0xff] }
 0x11d   : > { %v4669_v25 = vpop.f32.mrf.mxu1  ;;  %4900 = vmatmul.mubr.bf16.gmra.mxu1 %v5793_v40  ;;  %v4725_v18 = vpop.f32.mrf.mxu0  ;;  %4956 = vmatmul.mubr.bf16.gmra.mxu0 %v2814_v45 }
 0x11e   : > { %v903_v17 = vadd.f32 %v4669_v25, %v6190_v39  ;;  %4903 = vmatprep.mubr.bf16.mxu1 %v6855_v36  ;;  %5027 = vmatprep.mubr.bf16.mxu0 %v6856_v61  ;;  %v6309_v43 = vadd.f32 %v1183_v16, %v882_v27  ;;  %v6858_v25 = vld [vmem:[#allocation5_spill] sm:$0xff] }
 0x11f   : > { %v894_v51 = vpop.f32.mrf.mxu1  ;;  %v1212_v37 = vpop.f32.mrf.mxu0 }
 0x120   : > { %v895_v54 = vadd.f32 %v894_v51, %v6196_v23  ;;  %v6312_v56 = vadd.f32 %v4721_v9, %v903_v17  ;;  %v6859_v9 = vld [vmem:[#allocation7_spill] sm:$0xff] }
 0x121   : > { %v4670_v12 = vpop.f32.mrf.mxu1  ;;  %v4726_v42 = vpop.f32.mrf.mxu0 }
 0x122   : > { %v906_v40 = vadd.f32 %v4670_v12, %v6207_v7  ;;  %v6315_v50 = vadd.f32 %v1196_v22, %v895_v54 }
 0x123   : > { %v897_v35 = vpop.f32.mrf.mxu1  ;;  %v1215_v39 = vpop.f32.mrf.mxu0 }
 0x124   : > { %v898_v10 = vadd.f32 %v897_v35, %v6212_v1  ;;  %v6318_v45 = vadd.f32 %v4722_v49, %v906_v40  ;;  %v6860_v35 = vld [vmem:[#allocation6_spill] sm:$0xff] }
 0x125   : > { %v4673_v16 = vpop.f32.mrf.mxu1  ;;  %4904 = vmatmul.mubr.bf16.gmra.mxu1 %v6857_v28  ;;  %v4729_v27 = vpop.f32.mrf.mxu0  ;;  %5028 = vmatmul.mubr.bf16.vlgmr.msra.gmra.mxu0 %v6858_v25  ;;  %v6863_v28 = vld [vmem:[#allocation11_spill] sm:$0xff] }
 0x126   : > { %v919_v23 = vadd.f32 %v4673_v16, %v6224_v20  ;;  %4975 = vmatprep.mubr.bf16.mxu1 %v5902_v34  ;;  %5031 = vmatprep.mubr.bf16.mxu0 %v6859_v9  ;;  %v6325_v7 = vadd.f32 %v1199_v62, %v898_v10  ;;  %v6861_v16 = vld [vmem:[#allocation8_spill] sm:$0xff] }
 0x127   : > { %v910_v22 = vpop.f32.mrf.mxu1  ;;  %v1228_v17 = vpop.f32.mrf.mxu0 }
 0x128   : > { %v911_v1 = vadd.f32 %v910_v22, %v6230_v11  ;;  %v6328_v49 = vadd.f32 %v4725_v18, %v919_v23  ;;  %v6862_v18 = vld [vmem:[#allocation9_spill] sm:$0xff] }
 0x129   : > { %v4674_v36 = vpop.f32.mrf.mxu1  ;;  %v4730_v61 = vpop.f32.mrf.mxu0 }
 0x12a   : > { %v922_v51 = vadd.f32 %v4674_v36, %v6235_v41  ;;  %v6331_v54 = vadd.f32 %v1212_v37, %v911_v1 }
 0x12b   : > { %v913_v12 = vpop.f32.mrf.mxu1  ;;  %v1231_v20 = vpop.f32.mrf.mxu0 }
 0x12c   : > { %v914_v34 = vadd.f32 %v913_v12, %v6243_v31  ;;  %v6334_v40 = vadd.f32 %v4726_v42, %v922_v51 }
 0x12d   : > { %v4677_v62 = vpop.f32.mrf.mxu1  ;;  %4976 = vmatmul.mubr.bf16.vlgmr.msra.gmra.mxu1 %v6860_v35  ;;  %v4733_v10 = vpop.f32.mrf.mxu0  ;;  %5032 = vmatmul.mubr.bf16.gmra.mxu0 %v6861_v16 }
 0x12e   : > { %v935_v11 = vadd.f32 %v4677_v62, %v6252_v8  ;;  %4979 = vmatprep.mubr.bf16.mxu1 %v6862_v18  ;;  %5035 = vmatprep.mubr.bf16.mxu0 %v6863_v28  ;;  %v6341_v41 = vadd.f32 %v1215_v39, %v914_v34  ;;  %v6864_v34 = vld [vmem:[#allocation10_spill] sm:$0xff] }
 0x12f   : > { %v926_v37 = vpop.f32.mrf.mxu1  ;;  %v1244_v25 = vpop.f32.mrf.mxu0 }
 0x130   : > { %v927_v31 = vadd.f32 %v926_v37, %v6258_v57  ;;  %v6344_v42 = vadd.f32 %v4729_v27, %v935_v11  ;;  %v6865_v27 = vld [vmem:[#allocation12_spill] sm:$0xff] }
 0x131   : > { %v4678_v23 = vpop.f32.mrf.mxu1  ;;  %v4734_v9 = vpop.f32.mrf.mxu0 }
 0x132   : > { %v938_v22 = vadd.f32 %v4678_v23, %v6263_v4  ;;  %v6347_v1 = vadd.f32 %v1228_v17, %v927_v31 }
 0x133   : > { %v929_v36 = vpop.f32.mrf.mxu1  ;;  %v1247_v8 = vpop.f32.mrf.mxu0 }
 0x134   : > { %v930_v51 = vadd.f32 %v929_v36, %v6271_v6  ;;  %v6350_v12 = vadd.f32 %v4730_v61, %v938_v22  ;;  %v6867_v22 = vld [vmem:[#allocation14_spill] sm:$0xff] }
 0x135   : > { %v4681_v39 = vpop.f32.mrf.mxu1  ;;  %4980 = vmatmul.mubr.bf16.gmra.mxu1 %v6864_v34  ;;  %v4737_v62 = vpop.f32.mrf.mxu0  ;;  %5036 = vmatmul.mubr.bf16.gmra.mxu0 %v5987_v24 }
 0x136   : > { %v951_v57 = vadd.f32 %v4681_v39, %v6153_v53  ;;  %4983 = vmatprep.mubr.bf16.mxu1 %v6865_v27  ;;  %5039 = vmatprep.mubr.bf16.mxu0 %v6023_v13  ;;  %v6357_v4 = vadd.f32 %v1231_v20, %v930_v51  ;;  %v6866_v20 = vld [vmem:[#allocation13_spill] sm:$0xff] }
 0x137   : > { %v942_v17 = vpop.f32.mrf.mxu1  ;;  %v1260_v35 = vpop.f32.mrf.mxu0 }
 0x138   : > { %v943_v6 = vadd.f32 %v942_v17, %v6163_v14  ;;  %v6360_v61 = vadd.f32 %v4733_v10, %v951_v57 }
 0x139   : > { %v4682_v16 = vpop.f32.mrf.mxu1  ;;  %v4738_v11 = vpop.f32.mrf.mxu0 }
 0x13a   : > { %v954_v18 = vadd.f32 %v4682_v16, %v6171_v26  ;;  %v6363_v28 = vadd.f32 %v1244_v25, %v943_v6  ;;  %v3233_v6 = vshrl.u32 %v6216_v59, 16  ;;  %v3236_v16 = vshll.u32 %v6216_v59, 16 }
 0x13b   : > { %v945_v24 = vpop.f32.mrf.mxu1  ;;  %v1263_v53 = vpop.f32.mrf.mxu0 }
 0x13c   : > { %v946_v37 = vadd.f32 %v945_v24, %v6176_v47  ;;  %v6366_v31 = vadd.f32 %v4734_v9, %v954_v18 }
 0x13d   : > { %v4685_v13 = vpop.f32.mrf.mxu1  ;;  %4984 = vmatmul.mubr.bf16.gmra.mxu1 %v6866_v20  ;;  %v4741_v23 = vpop.f32.mrf.mxu0  ;;  %5040 = vmatmul.mubr.bf16.gmra.mxu0 %v6867_v22  ;;  %v3235_v20 = vrot.slane %v3233_v6, 2  ;;  %v3238_v22 = vrot.slane %v3236_v16, 3 }
 0x13e   : > { %v967_v14 = vadd.f32 %v4685_v13, %v6187_v3  ;;  %4987 = vmatprep.mubr.bf16.mxu1 %v6040_v60  ;;  %5043 = vmatprep.mubr.bf16.mxu0 %v6059_v33  ;;  %v6373_v26 = vadd.f32 %v1247_v8, %v946_v37  ;;  %v6868_v8 = vld [vmem:[#allocation15_spill] sm:$0xff]  ;;  %v6869_v37 = vrot.slane %v6079_v15, 3  ;;  %v3242_v15 = vshrl.u32 %v6239_v5, 16 }
 0x13f   : > { %v958_v10 = vpop.f32.mrf.mxu1  ;;  %v1276_v25 = vpop.f32.mrf.mxu0 }
 0x140   : > { %v959_v47 = vadd.f32 %v958_v10, %v6194_v48  ;;  %v6376_v9 = vadd.f32 %v4737_v62, %v967_v14  ;;  %v6870_v10 = vld [vmem:[#allocation20_spill] sm:$0xff] }
 0x141   : > { %v4686_v36 = vpop.f32.mrf.mxu1  ;;  %v4742_v51 = vpop.f32.mrf.mxu0 }
 0x142   : > { %v970_v39 = vadd.f32 %v4686_v36, %v6205_v19  ;;  %v6379_v34 = vadd.f32 %v1260_v35, %v959_v47  ;;  %v6871_v47 = vld [vmem:[#allocation17_spill] sm:$0xff]  ;;  %v3245_v36 = vshll.u32 %v6239_v5, 16 }
 0x143   : > { %v961_v57 = vpop.f32.mrf.mxu1  ;;  %v1279_v3 = vpop.f32.mrf.mxu0 }
 0x144   : > { %v962_v60 = vadd.f32 %v961_v57, %v6210_v2  ;;  %v6382_v27 = vadd.f32 %v4738_v11, %v970_v39  ;;  %v3612_v2 = vrot.slane %v6216_v59, 3  ;;  %v3239_v57 = vor.u32 %v3238_v22, %v3235_v20  ;;  %v6875_v20 = vld [vmem:[#allocation16_spill] sm:$0xff] }
 0x145   : > { %v4689_v33 = vpop.f32.mrf.mxu1  ;;  %4988 = vmatmul.mubr.bf16.gmra.mxu1 %v6868_v8  ;;  %v4745_v17 = vpop.f32.mrf.mxu0  ;;  %5044 = vmatmul.mubr.bf16.gmra.mxu0 %v6062_v55  ;;  %v6873_v8 = vld [vmem:[#allocation21_spill] sm:$0xff] }
 0x146   : > { %v983_v48 = vadd.f32 %v4689_v33, %v6221_v52  ;;  %4991 = vmatprep.mubr.bf16.mxu1 %v6074_v32  ;;  %5047 = vmatprep.mubr.bf16.mxu0 %v6093_v0  ;;  %v6389_v19 = vadd.f32 %v1263_v53, %v962_v60  ;;  %v3613_v13 = vsel %vm3586_vm4, %v6869_v37, %v3612_v2 }
 0x147   : > { %v974_v62 = vpop.f32.mrf.mxu1  ;;  %v1292_v35 = vpop.f32.mrf.mxu0  ;;  %v3240_v22 = vsel %vm3115_vm5, %v6875_v20, %v3239_v57 }
 0x148   : > { %v975_v11 = vadd.f32 %v974_v62, %v6228_v46  ;;  %v6395_v18 = vadd.f32 %v4741_v23, %v983_v48 }
 0x149   : > { %v4690_v55 = vpop.f32.mrf.mxu1  ;;  %v4746_v52 = vpop.f32.mrf.mxu0 }
 0x14a   : > { %v986_v32 = vadd.f32 %v4690_v55, %v6233_v29  ;;  %v6398_v24 = vadd.f32 %v1276_v25, %v975_v11  ;;  %v3614_v29 = vrot.slane %v6239_v5, 3  ;;  %v6874_v5 = vld [vmem:[#allocation22_spill] sm:$0xff]  ;;  %v3244_v55 = vrot.slane %v3242_v15, 2 }
 0x14b   : > { %v977_v0 = vpop.f32.mrf.mxu1  ;;  %v1295_v53 = vpop.f32.mrf.mxu0 }
 0x14c   : > { %v978_v59 = vadd.f32 %v977_v0, %v6241_v30  ;;  %v6404_v14 = vadd.f32 %v4742_v51, %v986_v32  ;;  %v3615_v11 = vsel %vm3586_vm4, %v3612_v2, %v3614_v29  ;;  %v3247_v32 = vrot.slane %v3245_v36, 3 }
 0x14d   : > { %v4693_v46 = vpop.f32.mrf.mxu1  ;;  %4992 = vmatmul.mubr.bf16.gmra.mxu1 %v6082_v38  ;;  %v4749_v23 = vpop.f32.mrf.mxu0  ;;  %5048 = vmatmul.mubr.bf16.gmra.mxu0 %v6098_v21  ;;  %v6872_v38 = vld [vmem:[#allocation19_spill] sm:$0xff] }
 0x14e   : > { %v999_v25 = vadd.f32 %v4693_v46, %v6870_v10  ;;  %4995 = vmatprep.mubr.bf16.mxu1 %v6871_v47  ;;  %5051 = vmatprep.mubr.bf16.mxu0 %v3613_v13  ;;  %v6413_v30 = vadd.f32 %v1279_v3, %v978_v59  ;;  %v3616_v60 = vrot.slane %v6872_v38, 3  ;;  %v3251_v21 = vshrl.u32 %v6872_v38, 16  ;;  %v6876_v10 = vld [vmem:[#allocation24_spill] sm:$0xff] }
 0x14f   : > { %v990_v51 = vpop.f32.mrf.mxu1  ;;  %v1308_v39 = vpop.f32.mrf.mxu0  ;;  %v3254_v33 = vshll.u32 %v6872_v38, 16 }
 0x150   : > { %v991_v48 = vadd.f32 %v990_v51, %v6873_v8  ;;  %v6419_v62 = vadd.f32 %v4745_v17, %v999_v25  ;;  %v3617_v59 = vsel %vm3586_vm4, %v3614_v29, %v3616_v60  ;;  %v3253_v46 = vrot.slane %v3251_v21, 2  ;;  %v6878_v51 = vld [vmem:[#allocation18_spill] sm:$0xff] }
 0x151   : > { %v4694_v6 = vpop.f32.mrf.mxu1  ;;  %v4750_v16 = vpop.f32.mrf.mxu0  ;;  %v3256_v17 = vrot.slane %v3254_v33, 3  ;;  %v6880_v8 = vld [vmem:[#allocation26_spill] sm:$0xff] }
 0x152   : > { %v1002_v3 = vadd.f32 %v4694_v6, %v6874_v5  ;;  %v6423_v0 = vadd.f32 %v1292_v35, %v991_v48  ;;  %v6879_v35 = vld [vmem:[#allocation23_spill] sm:$0xff]  ;;  %v3248_v6 = vor.u32 %v3247_v32, %v3244_v55 }
 0x153   : > { %v993_v37 = vpop.f32.mrf.mxu1  ;;  %v1311_v13 = vpop.f32.mrf.mxu0  ;;  %v3260_v36 = vshrl.u32 %v6879_v35, 16  ;;  %v3263_v38 = vshll.u32 %v6879_v35, 16  ;;  %v3618_v29 = vrot.slane %v6879_v35, 3  ;;  %v3257_v5 = vor.u32 %v3256_v17, %v3253_v46  ;;  %v5238_v35 = vld [vmem:[%s5316_s25 + $0xa0] ss:$0 sps:$4 sm:$0x77]  }
 0x154   : > { %v994_v25 = vadd.f32 %v993_v37, %v6876_v10  ;;  %v6429_v47 = vadd.f32 %v4746_v52, %v1002_v3  ;;  %v6882_v3 = vld [vmem:[#allocation25_spill] sm:$0xff]  ;;  %v6883_v10 = vld [vmem:[#allocation27_spill] sm:$0xff]  ;;  %s5080_s25 = smul.u32 288, %s6895_s12 }
 0x155   : > { %v4697_v2 = vpop.f32.mrf.mxu1  ;;  %4996 = vmatmul.mubr.bf16.gmra.mxu1 %v6878_v51  ;;  %v4821_v15 = vpop.f32.mrf.mxu0  ;;  %5052 = vmatmul.mubr.bf16.gmra.mxu0 %v3615_v11  ;;  %v3620_v37 = vrot.slane %v6882_v3, 3  ;;  %v3269_v11 = vshrl.u32 %v6882_v3, 16  ;;  %v3272_v20 = vshll.u32 %v6882_v3, 16  ;;  %v3619_v46 = vsel %vm3586_vm4, %v3616_v60, %v3618_v29 }
 0x156   : > { %6877 = vst [vmem:[#allocation2_spill] sm:$0xff] %v6429_v47  ;;  %v1015_v48 = vadd.f32 %v4697_v2, %v6880_v8  ;;  %4999 = vmatprep.mubr.bf16.mxu1 %v3240_v22  ;;  %5055 = vmatprep.mubr.bf16.mxu0 %v3617_v59  ;;  %v6436_v21 = vadd.f32 %v1295_v53, %v994_v25  ;;  %v3262_v22 = vrot.slane %v3260_v36, 2  ;;  %v3265_v59 = vrot.slane %v3263_v38, 3  ;;  %v6885_v53 = vld [vmem:[#allocation28_spill] sm:$0xff]  ;;  %s6688_s12 = scalar_lea.vmem %s6808_s3, %s5080_s25 }
 0x157   : > { %v1006_v52 = vpop.f32.mrf.mxu1  ;;  %v2114_v33 = vpop.f32.mrf.mxu0  ;;  %v3249_v8 = vsel %vm3115_vm5, %v3239_v57, %v3248_v6  ;;  %v3258_v3 = vsel %vm3115_vm5, %v3248_v6, %v3257_v5  ;;  %v3622_v60 = vrot.slane %v5238_v35, 3  ;;  %v3281_v6 = vshll.u32 %v5238_v35, 16 }
 0x158   : > { %6881 = vst [vmem:[#allocation4_spill] sm:$0xff] %v6436_v21  ;;  %v1007_v51 = vadd.f32 %v1006_v52, %v6883_v10  ;;  %v6442_v2 = vadd.f32 %v4749_v23, %v1015_v48  ;;  %v3621_v23 = vsel %vm3586_vm4, %v3618_v29, %v3620_v37  ;;  %v3271_v48 = vrot.slane %v3269_v11, 2  ;;  %v6886_v10 = vld [vmem:[#allocation29_spill] sm:$0xff] }
 0x159   : > { %v4698_v55 = vpop.f32.mrf.mxu1  ;;  %v4822_v32 = vpop.f32.mrf.mxu0  ;;  %v3274_v52 = vrot.slane %v3272_v20, 3  ;;  %v3266_v57 = vor.u32 %v3265_v59, %v3262_v22  ;;  %v3623_v59 = vsel %vm3586_vm4, %v3620_v37, %v3622_v60 }
 0x15a   : > { %6884 = vst [vmem:[#allocation3_spill] sm:$0xff] %v6442_v2  ;;  %v1018_v25 = vadd.f32 %v4698_v55, %v6885_v53  ;;  %v6448_v17 = vadd.f32 %v1308_v39, %v1007_v51  ;;  %v3278_v51 = vshrl.u32 %v5238_v35, 16 }
 0x15b   : > { %v1009_v21 = vpop.f32.mrf.mxu1  ;;  %v2117_v47 = vpop.f32.mrf.mxu0  ;;  %v3275_v20 = vor.u32 %v3274_v52, %v3271_v48 }
 0x15c   : > { %v1010_v36 = vadd.f32 %v1009_v21, %v6886_v10  ;;  %v6453_v38 = vadd.f32 %v4750_v16, %v1018_v25 }
 0x15d   : > { %v4769_v2 = vpop.f32.mrf.mxu1  ;;  %5000 = vmatmul.mubr.bf16.gmra.mxu1 %v3249_v8  ;;  %v4825_v55 = vpop.f32.mrf.mxu0  ;;  %5056 = vmatmul.mubr.bf16.gmra.mxu0 %v3619_v46  ;;  %v3267_v8 = vsel %vm3115_vm5, %v3257_v5, %v3266_v57  ;;  %v3283_v46 = vrot.slane %v3281_v6, 3 }
 0x15e   : > { %v1788_v39 = vadd.f32 %v4769_v2, %v6296_v63  ;;  %5003 = vmatprep.mubr.bf16.mxu1 %v3258_v3  ;;  %5059 = vmatprep.mubr.bf16.mxu0 %v3621_v23  ;;  %v6456_v53 = vadd.f32 %v1311_v13, %v1010_v36  ;;  %v3280_v2 = vrot.slane %v3278_v51, 2  ;;  %v3276_v23 = vsel %vm3115_vm5, %v3266_v57, %v3275_v20 }
 0x15f   : > { %v1643_v29 = vpop.f32.mrf.mxu1  ;;  %v2130_v11 = vpop.f32.mrf.mxu0 }
 0x160   : > { %v1786_v16 = vadd.f32 %v1643_v29, %v6300_v44  ;;  %v6459_v21 = vadd.f32 %v4821_v15, %v1788_v39 }
 0x161   : > { %v4770_v25 = vpop.f32.mrf.mxu1  ;;  %v4826_v22 = vpop.f32.mrf.mxu0 }
 0x162   : > { %v1789_v63 = vadd.f32 %v4770_v25, %v6303_v58  ;;  %v6464_v35 = vadd.f32 %v2114_v33, %v1786_v16  ;;  %v3284_v58 = vor.u32 %v3283_v46, %v3280_v2 }
 0x163   : > { %v1646_v13 = vpop.f32.mrf.mxu1  ;;  %v2133_v3 = vpop.f32.mrf.mxu0 }
 0x164   : > { %v1787_v44 = vadd.f32 %v1646_v13, %v6309_v43  ;;  %v6468_v15 = vadd.f32 %v4822_v32, %v1789_v63  ;;  %v3285_v39 = vsel %vm3115_vm5, %v3275_v20, %v3284_v58 }
 0x165   : > { %v4773_v48 = vpop.f32.mrf.mxu1  ;;  %5004 = vmatmul.mubr.bf16.gmra.mxu1 %v3267_v8  ;;  %v4829_v5 = vpop.f32.mrf.mxu0  ;;  %5060 = vmatmul.mubr.bf16.gmra.mxu0 %v3623_v59 }
 0x166   : > { %v1792_v37 = vadd.f32 %v4773_v48, %v6312_v56  ;;  %5007 = vmatprep.mubr.bf16.mxu1 %v3276_v23  ;;  %v6471_v52 = vadd.f32 %v2117_v47, %v1787_v44 }
 0x167   : > { %v1659_v33 = vpop.f32.mrf.mxu1  ;;  %v2146_v10 = vpop.f32.mrf.mxu0 }
 0x168   : > { %v1790_v36 = vadd.f32 %v1659_v33, %v6315_v50  ;;  %v6474_v60 = vadd.f32 %v4825_v55, %v1792_v37 }
 0x169   : > { %v4774_v57 = vpop.f32.mrf.mxu1  ;;  %v4830_v43 = vpop.f32.mrf.mxu0 }
 0x16a   : > { %v1793_v32 = vadd.f32 %v4774_v57, %v6318_v45  ;;  %v6478_v51 = vadd.f32 %v2130_v11, %v1790_v36 }
 0x16b   : > { %v1662_v6 = vpop.f32.mrf.mxu1  ;;  %v2149_v56 = vpop.f32.mrf.mxu0 }
 0x16c   : > { %v1791_v29 = vadd.f32 %v1662_v6, %v6325_v7  ;;  %v6481_v47 = vadd.f32 %v4826_v22, %v1793_v32 }
 0x16d   : > { %v4777_v16 = vpop.f32.mrf.mxu1  ;;  %5008 = vmatmul.mubr.bf16.gmra.mxu1 %v3285_v39  ;;  %v4833_v25 = vpop.f32.mrf.mxu0 }
 0x16e   : > { %v1796_v50 = vadd.f32 %v4777_v16, %v6328_v49  ;;  %v6484_v55 = vadd.f32 %v2133_v3, %v1791_v29 }
 0x16f   : > { %v1675_v8 = vpop.f32.mrf.mxu1  ;;  %v2162_v59 = vpop.f32.mrf.mxu0 }
 0x170   : > { %v1794_v45 = vadd.f32 %v1675_v8, %v6331_v54  ;;  %v6487_v20 = vadd.f32 %v4829_v5, %v1796_v50 }
 0x171   : > { %v4778_v11 = vpop.f32.mrf.mxu1  ;;  %v4834_v63 = vpop.f32.mrf.mxu0 }
 0x172   : > { %v1797_v2 = vadd.f32 %v4778_v11, %v6334_v40  ;;  %v6490_v7 = vadd.f32 %v2146_v10, %v1794_v45 }
 0x173   : > { %v1678_v22 = vpop.f32.mrf.mxu1  ;;  %v2165_v46 = vpop.f32.mrf.mxu0 }
 0x174   : > { %v1795_v13 = vadd.f32 %v1678_v22, %v6341_v41  ;;  %v6493_v23 = vadd.f32 %v4830_v43, %v1797_v2 }
 0x175   : > { %v4781_v49 = vpop.f32.mrf.mxu1  ;;  %v4837_v3 = vpop.f32.mrf.mxu0 }
 0x176   : > { %v1800_v44 = vadd.f32 %v4781_v49, %v6344_v42  ;;  %v6496_v48 = vadd.f32 %v2149_v56, %v1795_v13 }
 0x177   : > { %v1691_v54 = vpop.f32.mrf.mxu1  ;;  %v2178_v5 = vpop.f32.mrf.mxu0 }
 0x178   : > { %v1798_v37 = vadd.f32 %v1691_v54, %v6347_v1  ;;  %v6499_v58 = vadd.f32 %v4833_v25, %v1800_v44 }
 0x179   : > { %v4782_v40 = vpop.f32.mrf.mxu1  ;;  %v4838_v33 = vpop.f32.mrf.mxu0 }
 0x17a   : > { %v1801_v10 = vadd.f32 %v4782_v40, %v6350_v12  ;;  %v6502_v36 = vadd.f32 %v2162_v59, %v1798_v37 }
 0x17b   : > { %v1694_v41 = vpop.f32.mrf.mxu1  ;;  %v2181_v57 = vpop.f32.mrf.mxu0 }
 0x17c   : > { %v1799_v43 = vadd.f32 %v1694_v41, %v6357_v4  ;;  %v6505_v32 = vadd.f32 %v4834_v63, %v1801_v10 }
 0x17d   : > { %v4785_v42 = vpop.f32.mrf.mxu1  ;;  %v4841_v39 = vpop.f32.mrf.mxu0 }
 0x17e   : > { %v1804_v6 = vadd.f32 %v4785_v42, %v6360_v61  ;;  %v6508_v56 = vadd.f32 %v2165_v46, %v1799_v43 }
 0x17f   : > { %v1707_v1 = vpop.f32.mrf.mxu1  ;;  %v2194_v29 = vpop.f32.mrf.mxu0 }
 0x180   : > { %v1802_v16 = vadd.f32 %v1707_v1, %v6363_v28  ;;  %v6511_v25 = vadd.f32 %v4837_v3, %v1804_v6 }
 0x181   : > { %v4786_v12 = vpop.f32.mrf.mxu1  ;;  %v4842_v50 = vpop.f32.mrf.mxu0 }
 0x182   : > { %v1805_v8 = vadd.f32 %v4786_v12, %v6366_v31  ;;  %v6514_v59 = vadd.f32 %v2178_v5, %v1802_v16 }
 0x183   : > { %v1710_v4 = vpop.f32.mrf.mxu1  ;;  %v2197_v45 = vpop.f32.mrf.mxu0 }
 0x184   : > { %v1803_v11 = vadd.f32 %v1710_v4, %v6373_v26  ;;  %v6517_v63 = vadd.f32 %v4838_v33, %v1805_v8 }
 0x185   : > { %v4789_v61 = vpop.f32.mrf.mxu1  ;;  %v4845_v2 = vpop.f32.mrf.mxu0 }
 0x186   : > { %v1808_v22 = vadd.f32 %v4789_v61, %v6376_v9  ;;  %v6520_v46 = vadd.f32 %v2181_v57, %v1803_v11 }
 0x187   : > { %v1723_v28 = vpop.f32.mrf.mxu1  ;;  %v2210_v13 = vpop.f32.mrf.mxu0 }
 0x188   : > { %v1806_v49 = vadd.f32 %v1723_v28, %v6379_v34  ;;  %v6523_v3 = vadd.f32 %v4841_v39, %v1808_v22  ;;  %v6887_v28 = vld [vmem:[#allocation2_spill] sm:$0xff] }
 0x189   : > { %v4790_v31 = vpop.f32.mrf.mxu1  ;;  %v4846_v44 = vpop.f32.mrf.mxu0 }
 0x18a   : > { %v1809_v54 = vadd.f32 %v4790_v31, %v6382_v27  ;;  %v6526_v5 = vadd.f32 %v2194_v29, %v1806_v49 }
 0x18b   : > { %v1726_v26 = vpop.f32.mrf.mxu1  ;;  %v2213_v37 = vpop.f32.mrf.mxu0 }
 0x18c   : > { %v1807_v40 = vadd.f32 %v1726_v26, %v6389_v19  ;;  %v6529_v33 = vadd.f32 %v4842_v50, %v1809_v54 }
 0x18d   : > { %v4793_v9 = vpop.f32.mrf.mxu1  ;;  %v4849_v10 = vpop.f32.mrf.mxu0 }
 0x18e   : > { %v1812_v41 = vadd.f32 %v4793_v9, %v6395_v18  ;;  %v6532_v57 = vadd.f32 %v2197_v45, %v1807_v40  ;;  %v6889_v40 = vld [vmem:[#allocation3_spill] sm:$0xff] }
 0x18f   : > { %v1739_v34 = vpop.f32.mrf.mxu1  ;;  %v2226_v43 = vpop.f32.mrf.mxu0 }
 0x190   : > { %v1810_v42 = vadd.f32 %v1739_v34, %v6398_v24  ;;  %v6535_v39 = vadd.f32 %v4845_v2, %v1812_v41 }
 0x191   : > { %v4794_v27 = vpop.f32.mrf.mxu1  ;;  %v4850_v6 = vpop.f32.mrf.mxu0 }
 0x192   : > { %v1813_v1 = vadd.f32 %v4794_v27, %v6404_v14  ;;  %v6538_v29 = vadd.f32 %v2210_v13, %v1810_v42 }
 0x193   : > { %v1742_v19 = vpop.f32.mrf.mxu1  ;;  %v2229_v16 = vpop.f32.mrf.mxu0 }
 0x194   : > { %v1811_v12 = vadd.f32 %v1742_v19, %v6413_v30  ;;  %v6541_v50 = vadd.f32 %v4846_v44, %v1813_v1  ;;  %v6888_v44 = vld [vmem:[#allocation4_spill] sm:$0xff] }
 0x195   : > { %v4797_v18 = vpop.f32.mrf.mxu1  ;;  %v4853_v8 = vpop.f32.mrf.mxu0 }
 0x196   : > { %v1816_v4 = vadd.f32 %v4797_v18, %v6419_v62  ;;  %v6544_v45 = vadd.f32 %v2213_v37, %v1811_v12 }
 0x197   : > { %v1755_v24 = vpop.f32.mrf.mxu1  ;;  %v2242_v11 = vpop.f32.mrf.mxu0 }
 0x198   : > { %v1814_v61 = vadd.f32 %v1755_v24, %v6423_v0  ;;  %v6547_v2 = vadd.f32 %v4849_v10, %v1816_v4 }
 0x199   : > { %v4798_v14 = vpop.f32.mrf.mxu1  ;;  %v4854_v22 = vpop.f32.mrf.mxu0 }
 0x19a   : > { %v1817_v13 = vadd.f32 %v4798_v14, %v6887_v28  ;;  %v6550_v49 = vadd.f32 %v2226_v43, %v1814_v61 }
 0x19b   : > { %v1758_v30 = vpop.f32.mrf.mxu1  ;;  %v2245_v31 = vpop.f32.mrf.mxu0 }
 0x19c   : > { %v1815_v54 = vadd.f32 %v1758_v30, %v6888_v44  ;;  %v6553_v26 = vadd.f32 %v4850_v6, %v1817_v13 }
 0x19d   : > { %v4801_v62 = vpop.f32.mrf.mxu1  ;;  %v4925_v37 = vpop.f32.mrf.mxu0 }
 0x19e   : > { %v1820_v9 = vadd.f32 %v4801_v62, %v6889_v40  ;;  %v6556_v41 = vadd.f32 %v2229_v16, %v1815_v54 }
 0x19f   : > { %v1771_v0 = vpop.f32.mrf.mxu1  ;;  %v2915_v10 = vpop.f32.mrf.mxu0 }
 0x1a0   : > { %v1818_v34 = vadd.f32 %v1771_v0, %v6448_v17  ;;  %v6559_v42 = vadd.f32 %v4853_v8, %v1820_v9 }
 0x1a1   : > { %v4802_v43 = vpop.f32.mrf.mxu1  ;;  %v4926_v27 = vpop.f32.mrf.mxu0 }
 0x1a2   : > { %v1821_v1 = vadd.f32 %v4802_v43, %v6453_v38  ;;  %v6562_v19 = vadd.f32 %v2242_v11, %v1818_v34 }
 0x1a3   : > { %v1774_v6 = vpop.f32.mrf.mxu1  ;;  %v2918_v12 = vpop.f32.mrf.mxu0 }
 0x1a4   : > { %v1819_v18 = vadd.f32 %v1774_v6, %v6456_v53  ;;  %v6565_v4 = vadd.f32 %v4854_v22, %v1821_v1 }
 0x1a5   : > { %v4873_v16 = vpop.f32.mrf.mxu1  ;;  %v4929_v24 = vpop.f32.mrf.mxu0 }
 0x1a6   : > { %v2597_v61 = vadd.f32 %v4873_v16, %v6459_v21  ;;  %v6568_v14 = vadd.f32 %v2245_v31, %v1819_v18 }
 0x1a7   : > { %v2452_v17 = vpop.f32.mrf.mxu1  ;;  %v2931_v8 = vpop.f32.mrf.mxu0 }
 0x1a8   : > { %v2595_v28 = vadd.f32 %v2452_v17, %v6464_v35  ;;  %v6571_v13 = vadd.f32 %v4925_v37, %v2597_v61 }
 0x1a9   : > { %v4874_v38 = vpop.f32.mrf.mxu1  ;;  %v4930_v11 = vpop.f32.mrf.mxu0 }
 0x1aa   : > { %v2598_v30 = vadd.f32 %v4874_v38, %v6468_v15  ;;  %v6574_v44 = vadd.f32 %v2915_v10, %v2595_v28 }
 0x1ab   : > { %v2455_v53 = vpop.f32.mrf.mxu1  ;;  %v2934_v22 = vpop.f32.mrf.mxu0 }
 0x1ac   : > { %v2596_v54 = vadd.f32 %v2455_v53, %v6471_v52  ;;  %v6577_v62 = vadd.f32 %v4926_v27, %v2598_v30 }
 0x1ad   : > { %v4877_v21 = vpop.f32.mrf.mxu1  ;;  %v4933_v31 = vpop.f32.mrf.mxu0 }
 0x1ae   : > { %v2601_v40 = vadd.f32 %v4877_v21, %v6474_v60  ;;  %v6580_v9 = vadd.f32 %v2918_v12, %v2596_v54 }
 0x1af   : > { %v2468_v35 = vpop.f32.mrf.mxu1  ;;  %v2947_v37 = vpop.f32.mrf.mxu0 }
 0x1b0   : > { %v2599_v0 = vadd.f32 %v2468_v35, %v6478_v51  ;;  %v6583_v34 = vadd.f32 %v4929_v24, %v2601_v40 }
 0x1b1   : > { %v4878_v15 = vpop.f32.mrf.mxu1  ;;  %v4934_v10 = vpop.f32.mrf.mxu0 }
 0x1b2   : > { %v2602_v43 = vadd.f32 %v4878_v15, %v6481_v47  ;;  %v6586_v1 = vadd.f32 %v2931_v8, %v2599_v0 }
 0x1b3   : > { %v2471_v52 = vpop.f32.mrf.mxu1  ;;  %v2950_v27 = vpop.f32.mrf.mxu0 }
 0x1b4   : > { %v2600_v6 = vadd.f32 %v2471_v52, %v6484_v55  ;;  %v6589_v18 = vadd.f32 %v4930_v11, %v2602_v43 }
 0x1b5   : > { %v4881_v60 = vpop.f32.mrf.mxu1  ;;  %v4937_v12 = vpop.f32.mrf.mxu0 }
 0x1b6   : > { %v2605_v16 = vadd.f32 %v4881_v60, %v6487_v20  ;;  %v6592_v61 = vadd.f32 %v2934_v22, %v2600_v6 }
 0x1b7   : > { %v2484_v51 = vpop.f32.mrf.mxu1  ;;  %v2963_v24 = vpop.f32.mrf.mxu0 }
 0x1b8   : > { %v2603_v17 = vadd.f32 %v2484_v51, %v6490_v7  ;;  %v6595_v28 = vadd.f32 %v4933_v31, %v2605_v16 }
 0x1b9   : > { %v4882_v47 = vpop.f32.mrf.mxu1  ;;  %v4938_v8 = vpop.f32.mrf.mxu0 }
 0x1ba   : > { %v2606_v38 = vadd.f32 %v4882_v47, %v6493_v23  ;;  %v6598_v30 = vadd.f32 %v2947_v37, %v2603_v17 }
 0x1bb   : > { %v2487_v55 = vpop.f32.mrf.mxu1  ;;  %v2966_v11 = vpop.f32.mrf.mxu0 }
 0x1bc   : > { %v2604_v53 = vadd.f32 %v2487_v55, %v6496_v48  ;;  %v6601_v54 = vadd.f32 %v4934_v10, %v2606_v38 }
 0x1bd   : > { %v4885_v20 = vpop.f32.mrf.mxu1  ;;  %v4941_v22 = vpop.f32.mrf.mxu0 }
 0x1be   : > { %v2609_v21 = vadd.f32 %v4885_v20, %v6499_v58  ;;  %v6604_v40 = vadd.f32 %v2950_v27, %v2604_v53 }
 0x1bf   : > { %v2500_v7 = vpop.f32.mrf.mxu1  ;;  %v2979_v31 = vpop.f32.mrf.mxu0 }
 0x1c0   : > { %v2607_v35 = vadd.f32 %v2500_v7, %v6502_v36  ;;  %v6607_v0 = vadd.f32 %v4937_v12, %v2609_v21 }
 0x1c1   : > { %v4886_v23 = vpop.f32.mrf.mxu1  ;;  %v4942_v37 = vpop.f32.mrf.mxu0 }
 0x1c2   : > { %v2610_v15 = vadd.f32 %v4886_v23, %v6505_v32  ;;  %v6610_v43 = vadd.f32 %v2963_v24, %v2607_v35 }
 0x1c3   : > { %v2503_v48 = vpop.f32.mrf.mxu1  ;;  %v2982_v10 = vpop.f32.mrf.mxu0 }
 0x1c4   : > { %v2608_v52 = vadd.f32 %v2503_v48, %v6508_v56  ;;  %v6613_v6 = vadd.f32 %v4938_v8, %v2610_v15 }
 0x1c5   : > { %v4889_v58 = vpop.f32.mrf.mxu1  ;;  %v4945_v27 = vpop.f32.mrf.mxu0 }
 0x1c6   : > { %v2613_v60 = vadd.f32 %v4889_v58, %v6511_v25  ;;  %v6616_v16 = vadd.f32 %v2966_v11, %v2608_v52 }
 0x1c7   : > { %v2516_v36 = vpop.f32.mrf.mxu1  ;;  %v2995_v12 = vpop.f32.mrf.mxu0 }
 0x1c8   : > { %v2611_v51 = vadd.f32 %v2516_v36, %v6514_v59  ;;  %v6619_v17 = vadd.f32 %v4941_v22, %v2613_v60 }
 0x1c9   : > { %v4890_v32 = vpop.f32.mrf.mxu1  ;;  %v4946_v24 = vpop.f32.mrf.mxu0 }
 0x1ca   : > { %v2614_v47 = vadd.f32 %v4890_v32, %v6517_v63  ;;  %v6622_v38 = vadd.f32 %v2979_v31, %v2611_v51 }
 0x1cb   : > { %v2519_v56 = vpop.f32.mrf.mxu1  ;;  %v2998_v8 = vpop.f32.mrf.mxu0 }
 0x1cc   : > { %v2612_v55 = vadd.f32 %v2519_v56, %v6520_v46  ;;  %v6625_v53 = vadd.f32 %v4942_v37, %v2614_v47 }
 0x1cd   : > { %v4893_v25 = vpop.f32.mrf.mxu1  ;;  %v4949_v11 = vpop.f32.mrf.mxu0 }
 0x1ce   : > { %v2617_v20 = vadd.f32 %v4893_v25, %v6523_v3  ;;  %v6628_v21 = vadd.f32 %v2982_v10, %v2612_v55 }
 0x1cf   : > { %v2532_v59 = vpop.f32.mrf.mxu1  ;;  %v3011_v22 = vpop.f32.mrf.mxu0 }
 0x1d0   : > { %v2615_v7 = vadd.f32 %v2532_v59, %v6526_v5  ;;  %v6631_v35 = vadd.f32 %v4945_v27, %v2617_v20 }
 0x1d1   : > { %v4894_v63 = vpop.f32.mrf.mxu1  ;;  %v4950_v31 = vpop.f32.mrf.mxu0 }
 0x1d2   : > { %v2618_v23 = vadd.f32 %v4894_v63, %v6529_v33  ;;  %v6634_v15 = vadd.f32 %v2995_v12, %v2615_v7 }
 0x1d3   : > { %v2535_v46 = vpop.f32.mrf.mxu1  ;;  %v3014_v37 = vpop.f32.mrf.mxu0 }
 0x1d4   : > { %v2616_v48 = vadd.f32 %v2535_v46, %v6532_v57  ;;  %v6637_v52 = vadd.f32 %v4946_v24, %v2618_v23 }
 0x1d5   : > { %v4897_v3 = vpop.f32.mrf.mxu1  ;;  %v4953_v10 = vpop.f32.mrf.mxu0 }
 0x1d6   : > { %v2621_v58 = vadd.f32 %v4897_v3, %v6535_v39  ;;  %v6640_v60 = vadd.f32 %v2998_v8, %v2616_v48 }
 0x1d7   : > { %v2548_v5 = vpop.f32.mrf.mxu1  ;;  %v3027_v27 = vpop.f32.mrf.mxu0 }
 0x1d8   : > { %v2619_v36 = vadd.f32 %v2548_v5, %v6538_v29  ;;  %v6643_v51 = vadd.f32 %v4949_v11, %v2621_v58 }
 0x1d9   : > { %v4898_v33 = vpop.f32.mrf.mxu1  ;;  %v4954_v12 = vpop.f32.mrf.mxu0 }
 0x1da   : > { %v2622_v32 = vadd.f32 %v4898_v33, %v6541_v50  ;;  %v6646_v47 = vadd.f32 %v3011_v22, %v2619_v36 }
 0x1db   : > { %v2551_v57 = vpop.f32.mrf.mxu1  ;;  %v3030_v24 = vpop.f32.mrf.mxu0 }
 0x1dc   : > { %v2620_v56 = vadd.f32 %v2551_v57, %v6544_v45  ;;  %v6649_v55 = vadd.f32 %v4950_v31, %v2622_v32 }
 0x1dd   : > { %v4901_v39 = vpop.f32.mrf.mxu1  ;;  %v4957_v8 = vpop.f32.mrf.mxu0 }
 0x1de   : > { %v2625_v25 = vadd.f32 %v4901_v39, %v6547_v2  ;;  %v6652_v20 = vadd.f32 %v3014_v37, %v2620_v56 }
 0x1df   : > { %v2564_v29 = vpop.f32.mrf.mxu1  ;;  %v3043_v11 = vpop.f32.mrf.mxu0 }
 0x1e0   : > { %v2623_v59 = vadd.f32 %v2564_v29, %v6550_v49  ;;  %v6655_v7 = vadd.f32 %v4953_v10, %v2625_v25 }
 0x1e1   : > { %v4902_v50 = vpop.f32.mrf.mxu1  ;;  %v4958_v22 = vpop.f32.mrf.mxu0 }
 0x1e2   : > { %v2626_v63 = vadd.f32 %v4902_v50, %v6553_v26  ;;  %v6658_v23 = vadd.f32 %v3027_v27, %v2623_v59 }
 0x1e3   : > { %v2567_v45 = vpop.f32.mrf.mxu1  ;;  %v3046_v31 = vpop.f32.mrf.mxu0 }
 0x1e4   : > { %v2624_v46 = vadd.f32 %v2567_v45, %v6556_v41  ;;  %v6661_v48 = vadd.f32 %v4954_v12, %v2626_v63 }
 0x1e5   : > { %v4905_v2 = vpop.f32.mrf.mxu1  ;;  %v5029_v37 = vpop.f32.mrf.mxu0 }
 0x1e6   : > { %v2629_v3 = vadd.f32 %v4905_v2, %v6559_v42  ;;  %v6664_v49 = vadd.f32 %v3030_v24, %v2624_v46 }
 0x1e7   : > { %v2580_v10 = vpop.f32.mrf.mxu1  ;;  %v3724_v58 = vpop.f32.mrf.mxu0 }
 0x1e8   : > { %v2627_v5 = vadd.f32 %v2580_v10, %v6562_v19  ;;  %v6667_v26 = vadd.f32 %v4957_v8, %v2629_v3  ;;  %v6682_v8 = vld [vmem:[%s6807_s2] ss:$0 sm:$0xff] }
 0x1e9   : > { %v4906_v27 = vpop.f32.mrf.mxu1  ;;  %v5030_v36 = vpop.f32.mrf.mxu0 }
 0x1ea   : > { %v2630_v33 = vadd.f32 %v4906_v27, %v6565_v4  ;;  %v6670_v41 = vadd.f32 %v3043_v11, %v2627_v5 }
 0x1eb   : > { %v2583_v12 = vpop.f32.mrf.mxu1  ;;  %v3727_v32 = vpop.f32.mrf.mxu0 }
 0x1ec   : > { %v2628_v57 = vadd.f32 %v2583_v12, %v6568_v14  ;;  %v6673_v56 = vadd.f32 %v4958_v22, %v2630_v33 }
 0x1ed   : > { %v4977_v42 = vpop.f32.mrf.mxu1  ;;  %v5033_v24 = vpop.f32.mrf.mxu0 }
 0x1ee   : > { %v3531_v39 = vadd.f32 %v4977_v42, %v6571_v13  ;;  %v6677_v19 = vadd.f32 %v3046_v31, %v2628_v57 }
 0x1ef   : > { %v3386_v4 = vpop.f32.mrf.mxu1  ;;  %v3740_v25 = vpop.f32.mrf.mxu0 }
 0x1f0   : > { %v3869_v29 = vadd.f32 %v5029_v37, %v3531_v39  ;;  %v3529_v11 = vadd.f32 %v3386_v4, %v6574_v44 }
 0x1f1   : > { %v4978_v14 = vpop.f32.mrf.mxu1  ;;  %v5034_v13 = vpop.f32.mrf.mxu0 }
 0x1f2   : > { %v3912_v59 = vadd.f32 %v6682_v8, %v3869_v29  ;;  %v3867_v50 = vadd.f32 %v3724_v58, %v3529_v11  ;;  %v3532_v22 = vadd.f32 %v4978_v14, %v6577_v62 }
 0x1f3   : > { %v3389_v63 = vpop.f32.mrf.mxu1  ;;  %v3743_v45 = vpop.f32.mrf.mxu0 }
 0x1f4   : > { %3948 = vst [vmem:[%s6688_s12 + $0x10] sm:$0xff] %v3912_v59  ;;  %v3910_v44 = vadd.f32 %v6682_v8, %v3867_v50  ;;  %v3870_v31 = vadd.f32 %v5030_v36, %v3532_v22  ;;  %v3530_v46 = vadd.f32 %v3389_v63, %v6580_v9 }
 0x1f5   : > { %v4981_v2 = vpop.f32.mrf.mxu1  ;;  %v5037_v37 = vpop.f32.mrf.mxu0 }
 0x1f6   : > { %3946 = vst [vmem:[%s6688_s12] sm:$0xff] %v3910_v44  ;;  %v3913_v3 = vadd.f32 %v6682_v8, %v3870_v31  ;;  %v3868_v10 = vadd.f32 %v3727_v32, %v3530_v46  ;;  %v3535_v58 = vadd.f32 %v4981_v2, %v6583_v34 }
 0x1f7   : > { %v3402_v5 = vpop.f32.mrf.mxu1  ;;  %v3756_v62 = vpop.f32.mrf.mxu0 }
 0x1f8   : > { %3949 = vst [vmem:[%s6688_s12 + $0x18] sm:$0xff] %v3913_v3  ;;  %v3911_v27 = vadd.f32 %v6682_v8, %v3868_v10  ;;  %v3873_v33 = vadd.f32 %v5033_v24, %v3535_v58  ;;  %v3533_v36 = vadd.f32 %v3402_v5, %v6586_v1 }
 0x1f9   : > { %v4982_v12 = vpop.f32.mrf.mxu1  ;;  %v5038_v9 = vpop.f32.mrf.mxu0 }
 0x1fa   : > { %3947 = vst [vmem:[%s6688_s12 + $0x8] sm:$0xff] %v3911_v27  ;;  %v3916_v57 = vadd.f32 %v6682_v8, %v3873_v33  ;;  %v3871_v42 = vadd.f32 %v3740_v25, %v3533_v36  ;;  %v3536_v32 = vadd.f32 %v4982_v12, %v6589_v18 }
 0x1fb   : > { %v3405_v39 = vpop.f32.mrf.mxu1  ;;  %v3759_v34 = vpop.f32.mrf.mxu0 }
 0x1fc   : > { %3952 = vst [vmem:[%s6688_s12 + $0x30] sm:$0xff] %v3916_v57  ;;  %v3914_v4 = vadd.f32 %v6682_v8, %v3871_v42  ;;  %v3874_v29 = vadd.f32 %v5034_v13, %v3536_v32  ;;  %v3534_v24 = vadd.f32 %v3405_v39, %v6592_v61 }
 0x1fd   : > { %v4985_v11 = vpop.f32.mrf.mxu1  ;;  %v5041_v1 = vpop.f32.mrf.mxu0 }
 0x1fe   : > { %3950 = vst [vmem:[%s6688_s12 + $0x20] sm:$0xff] %v3914_v4  ;;  %v3917_v14 = vadd.f32 %v6682_v8, %v3874_v29  ;;  %v3872_v59 = vadd.f32 %v3743_v45, %v3534_v24  ;;  %v3539_v25 = vadd.f32 %v4985_v11, %v6595_v28 }
 0x1ff   : > { %v3418_v50 = vpop.f32.mrf.mxu1  ;;  %v3772_v18 = vpop.f32.mrf.mxu0 }
 0x200   : > { %3953 = vst [vmem:[%s6688_s12 + $0x38] sm:$0xff] %v3917_v14  ;;  %v3915_v22 = vadd.f32 %v6682_v8, %v3872_v59  ;;  %v3877_v63 = vadd.f32 %v5037_v37, %v3539_v25  ;;  %v3537_v13 = vadd.f32 %v3418_v50, %v6598_v30 }
 0x201   : > { %v4986_v44 = vpop.f32.mrf.mxu1  ;;  %v5042_v61 = vpop.f32.mrf.mxu0 }
 0x202   : > { %3951 = vst [vmem:[%s6688_s12 + $0x28] sm:$0xff] %v3915_v22  ;;  %v3920_v31 = vadd.f32 %v6682_v8, %v3877_v63  ;;  %v3875_v46 = vadd.f32 %v3756_v62, %v3537_v13  ;;  %v3540_v45 = vadd.f32 %v4986_v44, %v6601_v54 }
 0x203   : > { %v3421_v2 = vpop.f32.mrf.mxu1  ;;  %v3775_v28 = vpop.f32.mrf.mxu0 }
 0x204   : > { %3956 = vst [vmem:[%s6688_s12 + $0x50] sm:$0xff] %v3920_v31  ;;  %v3918_v3 = vadd.f32 %v6682_v8, %v3875_v46  ;;  %v3878_v10 = vadd.f32 %v5038_v9, %v3540_v45  ;;  %v3538_v37 = vadd.f32 %v3421_v2, %v6604_v40 }
 0x205   : > { %v4989_v58 = vpop.f32.mrf.mxu1  ;;  %v5045_v30 = vpop.f32.mrf.mxu0 }
 0x206   : > { %3954 = vst [vmem:[%s6688_s12 + $0x40] sm:$0xff] %v3918_v3  ;;  %v3921_v5 = vadd.f32 %v6682_v8, %v3878_v10  ;;  %v3876_v27 = vadd.f32 %v3759_v34, %v3538_v37  ;;  %v3543_v62 = vadd.f32 %v4989_v58, %v6607_v0 }
 0x207   : > { %v3434_v33 = vpop.f32.mrf.mxu1  ;;  %v3788_v54 = vpop.f32.mrf.mxu0 }
 0x208   : > { %3957 = vst [vmem:[%s6688_s12 + $0x58] sm:$0xff] %v3921_v5  ;;  %v3919_v36 = vadd.f32 %v6682_v8, %v3876_v27  ;;  %v3881_v12 = vadd.f32 %v5041_v1, %v3543_v62  ;;  %v3541_v9 = vadd.f32 %v3434_v33, %v6610_v43 }
 0x209   : > { %v4990_v57 = vpop.f32.mrf.mxu1  ;;  %v5046_v40 = vpop.f32.mrf.mxu0 }
 0x20a   : > { %3955 = vst [vmem:[%s6688_s12 + $0x48] sm:$0xff] %v3919_v36  ;;  %v3924_v42 = vadd.f32 %v6682_v8, %v3881_v12  ;;  %v3879_v32 = vadd.f32 %v3772_v18, %v3541_v9  ;;  %v3544_v39 = vadd.f32 %v4990_v57, %v6613_v6 }
 0x20b   : > { %v3437_v34 = vpop.f32.mrf.mxu1  ;;  %v3791_v0 = vpop.f32.mrf.mxu0 }
 0x20c   : > { %3960 = vst [vmem:[%s6688_s12 + $0x70] sm:$0xff] %v3924_v42  ;;  %v3922_v4 = vadd.f32 %v6682_v8, %v3879_v32  ;;  %v3882_v29 = vadd.f32 %v5042_v61, %v3544_v39  ;;  %v3542_v24 = vadd.f32 %v3437_v34, %v6616_v16 }
 0x20d   : > { %v4993_v11 = vpop.f32.mrf.mxu1  ;;  %v5049_v43 = vpop.f32.mrf.mxu0 }
 0x20e   : > { %3958 = vst [vmem:[%s6688_s12 + $0x60] sm:$0xff] %v3922_v4  ;;  %v3925_v1 = vadd.f32 %v6682_v8, %v3882_v29  ;;  %v3880_v14 = vadd.f32 %v3775_v28, %v3542_v24  ;;  %v3547_v59 = vadd.f32 %v4993_v11, %v6619_v17 }
 0x20f   : > { %v3450_v25 = vpop.f32.mrf.mxu1  ;;  %v3804_v6 = vpop.f32.mrf.mxu0 }
 0x210   : > { %3961 = vst [vmem:[%s6688_s12 + $0x78] sm:$0xff] %v3925_v1  ;;  %v3923_v50 = vadd.f32 %v6682_v8, %v3880_v14  ;;  %v3885_v18 = vadd.f32 %v5045_v30, %v3547_v59  ;;  %v3545_v22 = vadd.f32 %v3450_v25, %v6622_v38 }
 0x211   : > { %v4994_v63 = vpop.f32.mrf.mxu1  ;;  %v5050_v16 = vpop.f32.mrf.mxu0 }
 0x212   : > { %3959 = vst [vmem:[%s6688_s12 + $0x68] sm:$0xff] %v3923_v50  ;;  %v3928_v13 = vadd.f32 %v6682_v8, %v3885_v18  ;;  %v3883_v44 = vadd.f32 %v3788_v54, %v3545_v22  ;;  %v3548_v61 = vadd.f32 %v4994_v63, %v6625_v53 }
 0x213   : > { %v3453_v31 = vpop.f32.mrf.mxu1  ;;  %v3807_v17 = vpop.f32.mrf.mxu0 }
 0x214   : > { %3964 = vst [vmem:[%s6688_s12 + $0x90] sm:$0xff] %v3928_v13  ;;  %v3926_v46 = vadd.f32 %v6682_v8, %v3883_v44  ;;  %v3886_v45 = vadd.f32 %v5046_v40, %v3548_v61  ;;  %v3546_v2 = vadd.f32 %v3453_v31, %v6628_v21 }
 0x215   : > { %v4997_v28 = vpop.f32.mrf.mxu1  ;;  %v5053_v38 = vpop.f32.mrf.mxu0 }
 0x216   : > { %3962 = vst [vmem:[%s6688_s12 + $0x80] sm:$0xff] %v3926_v46  ;;  %v3929_v3 = vadd.f32 %v6682_v8, %v3886_v45  ;;  %v3884_v10 = vadd.f32 %v3791_v0, %v3546_v2  ;;  %v3551_v37 = vadd.f32 %v4997_v28, %v6631_v35 }
 0x217   : > { %v3466_v58 = vpop.f32.mrf.mxu1  ;;  %v3820_v53 = vpop.f32.mrf.mxu0 }
 0x218   : > { %3965 = vst [vmem:[%s6688_s12 + $0x98] sm:$0xff] %v3929_v3  ;;  %v3927_v30 = vadd.f32 %v6682_v8, %v3884_v10  ;;  %v3889_v5 = vadd.f32 %v5049_v43, %v3551_v37  ;;  %v3549_v27 = vadd.f32 %v3466_v58, %v6634_v15 }
 0x219   : > { %v4998_v62 = vpop.f32.mrf.mxu1  ;;  %v5054_v21 = vpop.f32.mrf.mxu0 }
 0x21a   : > { %3963 = vst [vmem:[%s6688_s12 + $0x88] sm:$0xff] %v3927_v30  ;;  %v3932_v33 = vadd.f32 %v6682_v8, %v3889_v5  ;;  %v3887_v54 = vadd.f32 %v3804_v6, %v3549_v27  ;;  %v3552_v36 = vadd.f32 %v4998_v62, %v6637_v52 }
 0x21b   : > { %v3469_v12 = vpop.f32.mrf.mxu1  ;;  %v3823_v35 = vpop.f32.mrf.mxu0 }
 0x21c   : > { %3968 = vst [vmem:[%s6688_s12 + $0xb0] sm:$0xff] %v3932_v33  ;;  %v3930_v9 = vadd.f32 %v6682_v8, %v3887_v54  ;;  %v3890_v57 = vadd.f32 %v5050_v16, %v3552_v36  ;;  %v3550_v40 = vadd.f32 %v3469_v12, %v6640_v60 }
 0x21d   : > { %v5001_v42 = vpop.f32.mrf.mxu1  ;;  %v5057_v15 = vpop.f32.mrf.mxu0 }
 0x21e   : > { %3966 = vst [vmem:[%s6688_s12 + $0xa0] sm:$0xff] %v3930_v9  ;;  %v3933_v32 = vadd.f32 %v6682_v8, %v3890_v57  ;;  %v3888_v39 = vadd.f32 %v3807_v17, %v3550_v40  ;;  %v3555_v34 = vadd.f32 %v5001_v42, %v6643_v51 }
 0x21f   : > { %v3482_v0 = vpop.f32.mrf.mxu1  ;;  %v3836_v52 = vpop.f32.mrf.mxu0 }
 0x220   : > { %3969 = vst [vmem:[%s6688_s12 + $0xb8] sm:$0xff] %v3933_v32  ;;  %v3931_v4 = vadd.f32 %v6682_v8, %v3888_v39  ;;  %v3893_v29 = vadd.f32 %v5053_v38, %v3555_v34  ;;  %v3553_v24 = vadd.f32 %v3482_v0, %v6646_v47 }
 0x221   : > { %v5002_v11 = vpop.f32.mrf.mxu1  ;;  %v5058_v60 = vpop.f32.mrf.mxu0 }
 0x222   : > { %3967 = vst [vmem:[%s6688_s12 + $0xa8] sm:$0xff] %v3931_v4  ;;  %v3936_v43 = vadd.f32 %v6682_v8, %v3893_v29  ;;  %v3891_v1 = vadd.f32 %v3820_v53, %v3553_v24  ;;  %v3556_v14 = vadd.f32 %v5002_v11, %v6649_v55 }
 0x223   : > { %v3485_v59 = vpop.f32.mrf.mxu1  ;;  %v3839_v18 = vpop.f32.mrf.mxu0 }
 0x224   : > { %3972 = vst [vmem:[%s6688_s12 + $0xd0] sm:$0xff] %v3936_v43  ;;  %v3934_v51 = vadd.f32 %v6682_v8, %v3891_v1  ;;  %v3894_v25 = vadd.f32 %v5054_v21, %v3556_v14  ;;  %v3554_v6 = vadd.f32 %v3485_v59, %v6652_v20 }
 0x225   : > { %v5005_v50 = vpop.f32.mrf.mxu1  ;;  %v5061_v31 = vpop.f32.mrf.mxu0 }
 0x226   : > { %3970 = vst [vmem:[%s6688_s12 + $0xc0] sm:$0xff] %v3934_v51  ;;  %v3937_v47 = vadd.f32 %v6682_v8, %v3894_v25  ;;  %v3892_v22 = vadd.f32 %v3823_v35, %v3554_v6  ;;  %v3559_v63 = vadd.f32 %v5005_v50, %v6655_v7 }
 0x227   : > { %v3498_v16 = vpop.f32.mrf.mxu1  ;;  %v3852_v38 = vpop.f32.mrf.mxu0 }
 0x228   : > { %3973 = vst [vmem:[%s6688_s12 + $0xd8] sm:$0xff] %v3937_v47  ;;  %v3935_v55 = vadd.f32 %v6682_v8, %v3892_v22  ;;  %v3897_v13 = vadd.f32 %v5057_v15, %v3559_v63  ;;  %v3557_v44 = vadd.f32 %v3498_v16, %v6658_v23 }
 0x229   : > { %v5006_v61 = vpop.f32.mrf.mxu1  ;;  %v5062_v5 = vpop.f32.mrf.mxu0 }
 0x22a   : > { %3971 = vst [vmem:[%s6688_s12 + $0xc8] sm:$0xff] %v3935_v55  ;;  %v3940_v20 = vadd.f32 %v6682_v8, %v3897_v13  ;;  %v3895_v17 = vadd.f32 %v3836_v52, %v3557_v44  ;;  %v3560_v46 = vadd.f32 %v5006_v61, %v6661_v48 }
 0x22b   : > { %v3501_v45 = vpop.f32.mrf.mxu1  ;;  %v3855_v12 = vpop.f32.mrf.mxu0 }
 0x22c   : > { %3976 = vst [vmem:[%s6688_s12 + $0xf0] sm:$0xff] %v3940_v20  ;;  %v3938_v7 = vadd.f32 %v6682_v8, %v3895_v17  ;;  %v3898_v2 = vadd.f32 %v5058_v60, %v3560_v46  ;;  %v3558_v28 = vadd.f32 %v3501_v45, %v6664_v49 }
 0x22d   : > { %v5009_v3 = vpop.f32.mrf.mxu1 }
 0x22e   : > { %3974 = vst [vmem:[%s6688_s12 + $0xe0] sm:$0xff] %v3938_v7  ;;  %v3941_v23 = vadd.f32 %v6682_v8, %v3898_v2  ;;  %v3896_v10 = vadd.f32 %v3839_v18, %v3558_v28  ;;  %v3563_v37 = vadd.f32 %v5009_v3, %v6667_v26 }
 0x22f   : > { %v3514_v58 = vpop.f32.mrf.mxu1 }
 0x230   : > { %3977 = vst [vmem:[%s6688_s12 + $0xf8] sm:$0xff] %v3941_v23  ;;  %v3939_v48 = vadd.f32 %v6682_v8, %v3896_v10  ;;  %v3901_v53 = vadd.f32 %v5061_v31, %v3563_v37  ;;  %v3561_v30 = vadd.f32 %v3514_v58, %v6670_v41 }
 0x231   : > { %v5010_v49 = vpop.f32.mrf.mxu1 }
 0x232   : > { %3975 = vst [vmem:[%s6688_s12 + $0xe8] sm:$0xff] %v3939_v48  ;;  %v3944_v27 = vadd.f32 %v6682_v8, %v3901_v53  ;;  %v3899_v62 = vadd.f32 %v3852_v38, %v3561_v30  ;;  %v3564_v21 = vadd.f32 %v5010_v49, %v6673_v56 }
 0x233   : > { %v3517_v33 = vpop.f32.mrf.mxu1 }
 0x234   : > { %3980 = vst [vmem:[%s6688_s12 + $0x110] sm:$0xff] %v3944_v27  ;;  %v3942_v26 = vadd.f32 %v6682_v8, %v3899_v62  ;;  %v3902_v54 = vadd.f32 %v5062_v5, %v3564_v21  ;;  %v3562_v36 = vadd.f32 %v3517_v33, %v6677_v19 }
 0x236   : > { %3978 = vst [vmem:[%s6688_s12 + $0x100] sm:$0xff] %v3942_v26  ;;  %v3945_v41 = vadd.f32 %v6682_v8, %v3902_v54  ;;  %v3900_v35 = vadd.f32 %v3855_v12, %v3562_v36 }
 0x238   : > { %3981 = vst [vmem:[%s6688_s12 + $0x118] sm:$0xff] %v3945_v41  ;;  %v3943_v9 = vadd.f32 %v6682_v8, %v3900_v35 }
 0x23a   : > { %3979 = vst [vmem:[%s6688_s12 + $0x108] sm:$0xff] %v3943_v9 }
 0x23b PF: > { %s13_s14 = sadd.s32 1, %s5261_s14   ;;  %s6890_s12 = smov %s5257_s13 }
 0x23c   : > { %p10_p5 = scmp.ge.s32.totalorder %s13_s14, 4   ;;  %s6891_s13 = smov %s6893_s15 }
 0x23e   :  { %12 = sbr.rel (!%p10_p5) target bundleno = 2 (0x2), region = 76 }

</bundles_post_ra>
